<compile_context>
chip_gen: v7x
topology: tpu7x:2x2x1
jax: 0.10.0
libtpu: 0.0.40
codegen_flags: <defaults>
</compile_context>

<pallas_src>
import functools

import jax
import jax.numpy as jnp
from jax.experimental import pallas as pl
from jax.experimental.pallas import tpu as pltpu


_NEG_SLOPE = 0.01          # torch.nn.LeakyReLU() default
_HIDDEN = (2048, 1024, 512)
_MIB = 1 << 20


def _round_up(x: int, m: int) -> int:
    return (x + m - 1) // m * m


def _leaky(x, slope):
    return jnp.where(x > 0, x, slope * x)


def _s3_mlp_kernel(x_ref,
                   w1_ref, b1_ref, w2_ref, b2_ref,
                   w3_ref, b3_ref, w4_ref, b4_ref,
                   o_ref, acc_ref, *, negative_slope: float):
    """Fused 4-layer MLP.  grid = (row tiles, K chunks of layer 1)."""
    k = pl.program_id(1)

    @pl.when(k == 0)
    def _():
        acc_ref[...] = jnp.zeros_like(acc_ref)

    # Layer-1 partial product for this K chunk (bf16 operands, f32 MXU accum).
    acc_ref[...] += jnp.dot(x_ref[...].astype(jnp.bfloat16), w1_ref[...],
                            preferred_element_type=jnp.float32)

    @pl.when(k == pl.num_programs(1) - 1)
    def _():
        def layer(h_bf16, w_ref, b_ref, act):
            y = jnp.dot(h_bf16, w_ref[...], preferred_element_type=jnp.float32)
            y = y + b_ref[...]                      # (1, N) f32 bias broadcast
            return _leaky(y, negative_slope) if act else y

        h = _leaky(acc_ref[...] + b1_ref[...], negative_slope).astype(jnp.bfloat16)
        h = layer(h, w2_ref, b2_ref, True).astype(jnp.bfloat16)
        h = layer(h, w3_ref, b3_ref, True).astype(jnp.bfloat16)
        o_ref[...] = layer(h, w4_ref, b4_ref, False).astype(o_ref.dtype)


def s3_encoder_forward(expr, params, negative_slope: float = _NEG_SLOPE,
                       *, stream_tile_k: int | None = None):
    """Pallas implementation of S3_encoder.forward.

    expr: (batch, n_genes) f32.  params: 4 tuples (W, b), W stored as
    (in_features, out_features) == PyTorch weight.T.  Returns (batch, dim_code).
    stream_tile_k: optional override to force the K-streamed W1 path (testing /
    tuning); normally the mode is picked from the VMEM budget.
    """
    (w1, b1), (w2, b2), (w3, b3), (w4, b4) = params
    M, n_genes = expr.shape
    dim_code = w4.shape[1]
    h1, h2, h3 = _HIDDEN

    # ---- per-generation hardware budget (trace-time query) -----------------
    try:
        vmem_cap = int(getattr(pltpu.get_tpu_info(), "vmem_capacity_bytes",
                               64 * _MIB))
    except Exception:
        vmem_cap = 64 * _MIB                      # conservative (v7x per-TC)
    num_tc = 2 if vmem_cap <= 96 * _MIB else 1    # v7x: 64 MiB/TC, 2 TCs/chip
    budget = vmem_cap - 8 * _MIB                  # head-room for compiler scratch

    # ---- lane-dense padded sizes -------------------------------------------
    n_out = _round_up(dim_code, 128)              # output width -> full lanes
    kp_res = _round_up(max(n_genes, 256), 256)    # layer-1 K -> MXU-friendly

    # ---- row tile: one big tile on 1-TC chips; split only for big batch v7x -
    if M >= 512:
        tm = 256 if num_tc == 2 else 512
    else:
        tm = min(512, max(16, _round_up(M, 16)))  # multiple of 16 (bf16 packing)
        if tm > 128:
            tm = _round_up(tm, 128)

    # ---- explicit VMEM accounting ------------------------------------------
    other_resident = ((h1 * h2 + h2 * h3 + h3 * n_out) * 2      # bf16 W2/W3/W4
                      + (h1 + h2 + h3 + n_out) * 4)             # f32 biases

    def _slack(tm_):          # in-kernel activation / spill head-room
        return 4 * _MIB + tm_ * (h1 + h2) * 4

    def resident_cost(tm_):
        return (other_resident
                + kp_res * h1 * 2                 # resident bf16 W1
                + 2 * tm_ * kp_res * 4            # double-buffered x tile
                + 2 * tm_ * n_out * 4             # double-buffered output tile
                + tm_ * h1 * 4                    # layer-1 f32 accumulator
                + _slack(tm_))

    def streamed_cost(tm_, tk_):
        return (other_resident
                + 2 * tk_ * h1 * 2                # double-buffered W1 K-chunk
                + 2 * tm_ * tk_ * 4               # double-buffered x tile
                + 2 * tm_ * n_out * 4
                + tm_ * h1 * 4
                + _slack(tm_))

    resident_w1 = stream_tile_k is None and resident_cost(tm) <= budget
    if resident_w1:
        kp, tk, grid_k = kp_res, kp_res, 1
        used = resident_cost(tm)
    else:
        if stream_tile_k is not None:
            tk = max(256, _round_up(stream_tile_k, 256))
        else:
            tk = min(2048, kp_res)
            while tk > 256 and streamed_cost(tm, tk) > budget:
                tk //= 2
        while tm > 64 and streamed_cost(tm, tk) > budget:
            tm = max(16, _round_up(tm // 2, 16))  # last resort: shrink row tile
        kp = _round_up(n_genes, tk)
        grid_k = kp // tk
        used = streamed_cost(tm, tk)

    m_pad = _round_up(M, tm)
    grid_m = m_pad // tm
    vmem_limit = int(min(vmem_cap, max(32 * _MIB, used + 2 * _MIB)))

    # ---- zero-padding (numerically exact) -----------------------------------
    x = expr
    if m_pad != M or kp != n_genes:
        x = jnp.pad(expr, ((0, m_pad - M), (0, kp - n_genes)))
    w1p = w1 if kp == n_genes else jnp.pad(w1, ((0, kp - n_genes), (0, 0)))
    if n_out != dim_code:
        w4p = jnp.pad(w4, ((0, 0), (0, n_out - dim_code)))
        b4p = jnp.pad(b4, ((0, n_out - dim_code),))
    else:
        w4p, b4p = w4, b4

    # bf16 weights (f32 accumulation in-kernel), f32 (1, N) biases.
    w1b, w2b, w3b, w4b = (w.astype(jnp.bfloat16) for w in (w1p, w2, w3, w4p))
    b1r, b2r, b3r, b4r = (b.reshape(1, -1).astype(jnp.float32)
                          for b in (b1, b2, b3, b4p))
    # TODO(synk): accept bf16 expr / fp8 W2-W3 when the producer can supply them
    # (halves x HBM stream / resident weight VMEM on v7x); kept f32/bf16 here.

    vmem_whole = pl.BlockSpec(memory_space=pltpu.MemorySpace.VMEM)  # resident, 1-buffered
    if resident_w1:
        x_spec = pl.BlockSpec((tm, kp), lambda i, k: (i, 0))
        w1_spec = vmem_whole
    else:
        x_spec = pl.BlockSpec((tm, tk), lambda i, k: (i, k))
        w1_spec = pl.BlockSpec((tk, h1), lambda i, k: (k, 0))   # streamed K chunk

    out = pl.pallas_call(
        functools.partial(_s3_mlp_kernel, negative_slope=negative_slope),
        out_shape=jax.ShapeDtypeStruct((m_pad, n_out), jnp.float32),
        grid_spec=pltpu.PrefetchScalarGridSpec(
            num_scalar_prefetch=0,
            grid=(grid_m, grid_k),
            in_specs=[
                x_spec,
                w1_spec, vmem_whole,          # W1, b1
                vmem_whole, vmem_whole,       # W2, b2
                vmem_whole, vmem_whole,       # W3, b3
                vmem_whole, vmem_whole,       # W4, b4
            ],
            out_specs=pl.BlockSpec((tm, n_out), lambda i, k: (i, 0)),
            scratch_shapes=[pltpu.VMEM((tm, h1), jnp.float32)],  # layer-1 acc
        ),
        compiler_params=pltpu.CompilerParams(
            dimension_semantics=("parallel", "arbitrary"),
            vmem_limit_bytes=vmem_limit,
        ),
    )(x, w1b, b1r, w2b, b2r, w3b, b3r, w4b, b4r)

    return out[:M, :dim_code]


def init_s3_encoder_params(key, n_genes: int, dim_code: int):
    """Deterministic init matching the nn.Linear shapes of S3_encoder.

    Weights stored as (in_features, out_features) == PyTorch weight.T, f32,
    torch-default uniform(-1/sqrt(fan_in), 1/sqrt(fan_in)).
    """
    dims = [n_genes, *_HIDDEN, dim_code]
    params = []
    for i in range(len(dims) - 1):
        fan_in, fan_out = dims[i], dims[i + 1]
        key, kw, kb = jax.random.split(key, 3)
        bound = 1.0 / jnp.sqrt(jnp.float32(fan_in))
        w = jax.random.uniform(kw, (fan_in, fan_out), jnp.float32, -bound, bound)
        b = jax.random.uniform(kb, (fan_out,), jnp.float32, -bound, bound)
        params.append((w, b))
    return params


def s3_encoder_reference(expr, params, negative_slope: float = _NEG_SLOPE):
    """Pure-JAX reference matching the kernel's bf16-compute / f32-accumulate math."""
    h = expr
    n_layers = len(params)
    for idx, (w, b) in enumerate(params):
        h = jnp.dot(h.astype(jnp.bfloat16), w.astype(jnp.bfloat16),
                    preferred_element_type=jnp.float32) + b.astype(jnp.float32)
        if idx < n_layers - 1:
            h = jnp.where(h > 0, h, negative_slope * h)
    return h


if __name__ == "__main__":
    # --- test 1: resident-W1 path, small shapes ------------------------------
    batch, n_genes, dim_code = 8, 256, 32
    key = jax.random.PRNGKey(0)
    key, k_x = jax.random.split(key)
    expr = jax.random.normal(k_x, (batch, n_genes), jnp.float32)
    params = init_s3_encoder_params(key, n_genes, dim_code)

    fwd = jax.jit(s3_encoder_forward)
    code = jax.block_until_ready(fwd(expr, params))
    ref = jax.block_until_ready(s3_encoder_reference(expr, params))
    assert code.shape == (batch, dim_code), code.shape
    assert jnp.allclose(code, ref, atol=1e-2, rtol=1e-2), (
        float(jnp.max(jnp.abs(code - ref))))

    # --- test 2: K-streamed W1 path (used for large n_genes), small shapes ---
    batch2, n_genes2 = 32, 512
    key, k_x2 = jax.random.split(key)
    expr2 = jax.random.normal(k_x2, (batch2, n_genes2), jnp.float32)
    params2 = init_s3_encoder_params(key, n_genes2, dim_code)
    fwd_stream = jax.jit(functools.partial(s3_encoder_forward, stream_tile_k=256))
    code2 = jax.block_until_ready(fwd_stream(expr2, params2))
    ref2 = jax.block_until_ready(s3_encoder_reference(expr2, params2))
    assert code2.shape == (batch2, dim_code), code2.shape
    assert jnp.allclose(code2, ref2, atol=1e-2, rtol=1e-2), (
        float(jnp.max(jnp.abs(code2 - ref2))))

    print("KERNEL_OK")
</pallas_src>

<mosaic_0001>
module attributes {stable_mosaic.version = 11 : i64} {
  func.func @_s3_mlp_kernel(%arg0: i32, %arg1: i32, %arg2: memref<16x256xf32, #tpu.memory_space<vmem>>, %arg3: memref<256x2048xbf16, #tpu.memory_space<vmem>>, %arg4: memref<1x2048xf32, #tpu.memory_space<vmem>>, %arg5: memref<2048x1024xbf16, #tpu.memory_space<vmem>>, %arg6: memref<1x1024xf32, #tpu.memory_space<vmem>>, %arg7: memref<1024x512xbf16, #tpu.memory_space<vmem>>, %arg8: memref<1x512xf32, #tpu.memory_space<vmem>>, %arg9: memref<512x128xbf16, #tpu.memory_space<vmem>>, %arg10: memref<1x128xf32, #tpu.memory_space<vmem>>, %arg11: memref<16x128xf32, #tpu.memory_space<vmem>>, %arg12: memref<16x2048xf32, #tpu.memory_space<vmem>>) attributes {dimension_semantics = [#tpu.dimension_semantics<parallel>, #tpu.dimension_semantics<arbitrary>], iteration_bounds = array<i64: 1, 1>, scalar_prefetch = 0 : i64, scratch_operands = 1 : i64, tpu.core_type = #tpu.core_type<tc>, window_params = [{transform_indices = @transform_0, window_bounds = array<i64: 16, 256>}, {pipeline_mode = #tpu.pipeline_mode<synchronous>, transform_indices = @transform_1, window_bounds = array<i64: 256, 2048>}, {pipeline_mode = #tpu.pipeline_mode<synchronous>, transform_indices = @transform_2, window_bounds = array<i64: 1, 2048>}, {pipeline_mode = #tpu.pipeline_mode<synchronous>, transform_indices = @transform_3, window_bounds = array<i64: 2048, 1024>}, {pipeline_mode = #tpu.pipeline_mode<synchronous>, transform_indices = @transform_4, window_bounds = array<i64: 1, 1024>}, {pipeline_mode = #tpu.pipeline_mode<synchronous>, transform_indices = @transform_5, window_bounds = array<i64: 1024, 512>}, {pipeline_mode = #tpu.pipeline_mode<synchronous>, transform_indices = @transform_6, window_bounds = array<i64: 1, 512>}, {pipeline_mode = #tpu.pipeline_mode<synchronous>, transform_indices = @transform_7, window_bounds = array<i64: 512, 128>}, {pipeline_mode = #tpu.pipeline_mode<synchronous>, transform_indices = @transform_8, window_bounds = array<i64: 1, 128>}, {transform_indices = @transform_9, window_bounds = array<i64: 16, 128>}]} {
    %c0_i32 = arith.constant 0 : i32
    %0 = arith.cmpi eq, %arg1, %c0_i32 : i32
    %1 = arith.extui %0 : i1 to i32
    %c0_i32_0 = arith.constant 0 : i32
    %2 = arith.cmpi ne, %1, %c0_i32_0 : i32
    scf.if %2 {
      %cst_10 = arith.constant 0.000000e+00 : f32
      %13 = vector.broadcast %cst_10 : f32 to vector<16x2048xf32>
      %c0_11 = arith.constant 0 : index
      %c0_12 = arith.constant 0 : index
      %14 = vector.load %arg12[%c0_11, %c0_12] : memref<16x2048xf32, #tpu.memory_space<vmem>>, vector<16x2048xf32>
      tpu.vector_store %arg12[%c0_11, %c0_12], %13 {strides = array<i32>} : memref<16x2048xf32, #tpu.memory_space<vmem>>, vector<16x2048xf32>,
    } else {
    }
    %c0 = arith.constant 0 : index
    %c0_1 = arith.constant 0 : index
    %3 = vector.load %arg12[%c0, %c0_1] : memref<16x2048xf32, #tpu.memory_space<vmem>>, vector<16x2048xf32>
    %c0_2 = arith.constant 0 : index
    %c0_3 = arith.constant 0 : index
    %4 = vector.load %arg2[%c0_2, %c0_3] : memref<16x256xf32, #tpu.memory_space<vmem>>, vector<16x256xf32>
    %5 = arith.truncf %4 : vector<16x256xf32> to vector<16x256xbf16>
    %c0_4 = arith.constant 0 : index
    %c0_5 = arith.constant 0 : index
    %6 = vector.load %arg3[%c0_4, %c0_5] : memref<256x2048xbf16, #tpu.memory_space<vmem>>, vector<256x2048xbf16>
    %cst = arith.constant dense<0.000000e+00> : vector<16x2048xf32>
    %7 = tpu.matmul %5, %6, %cst {dimension_numbers = #tpu.dot_dimension_numbers<[1], [0], [0], [1], [0, 0, 1, 1], [], []>} : vector<16x256xbf16>, vector<256x2048xbf16>, vector<16x2048xf32> -> vector<16x2048xf32>
    %8 = arith.addf %3, %7 : vector<16x2048xf32>
    %c0_6 = arith.constant 0 : index
    %c0_7 = arith.constant 0 : index
    %9 = vector.load %arg12[%c0_6, %c0_7] : memref<16x2048xf32, #tpu.memory_space<vmem>>, vector<16x2048xf32>
    tpu.vector_store %arg12[%c0_6, %c0_7], %8 {strides = array<i32>} : memref<16x2048xf32, #tpu.memory_space<vmem>>, vector<16x2048xf32>,
    %c0_i32_8 = arith.constant 0 : i32
    %10 = arith.cmpi eq, %arg1, %c0_i32_8 : i32
    %11 = arith.extui %10 : i1 to i32
    %c0_i32_9 = arith.constant 0 : i32
    %12 = arith.cmpi ne, %11, %c0_i32_9 : i32
    scf.if %12 {
      %c0_10 = arith.constant 0 : index
      %c0_11 = arith.constant 0 : index
      %13 = vector.load %arg12[%c0_10, %c0_11] : memref<16x2048xf32, #tpu.memory_space<vmem>>, vector<16x2048xf32>
      %c0_12 = arith.constant 0 : index
      %c0_13 = arith.constant 0 : index
      %14 = vector.load %arg4[%c0_12, %c0_13] : memref<1x2048xf32, #tpu.memory_space<vmem>>, vector<1x2048xf32>
      %15 = vector.broadcast %14 : vector<1x2048xf32> to vector<16x2048xf32>
      %16 = arith.addf %13, %15 : vector<16x2048xf32>
      %cst_14 = arith.constant 0.000000e+00 : f32
      %17 = vector.broadcast %cst_14 : f32 to vector<16x2048xf32>
      %18 = arith.cmpf ogt, %16, %17 : vector<16x2048xf32>
      %cst_15 = arith.constant 0.00999999977 : f32
      %19 = vector.broadcast %cst_15 : f32 to vector<16x2048xf32>
      %20 = arith.mulf %19, %16 : vector<16x2048xf32>
      %21 = arith.select %18, %16, %20 : vector<16x2048xi1>, vector<16x2048xf32>
      %22 = arith.truncf %21 : vector<16x2048xf32> to vector<16x2048xbf16>
      %c0_16 = arith.constant 0 : index
      %c0_17 = arith.constant 0 : index
      %23 = vector.load %arg5[%c0_16, %c0_17] : memref<2048x1024xbf16, #tpu.memory_space<vmem>>, vector<2048x1024xbf16>
      %cst_18 = arith.constant dense<0.000000e+00> : vector<16x1024xf32>
      %24 = tpu.matmul %22, %23, %cst_18 {dimension_numbers = #tpu.dot_dimension_numbers<[1], [0], [0], [1], [0, 0, 1, 1], [], []>} : vector<16x2048xbf16>, vector<2048x1024xbf16>, vector<16x1024xf32> -> vector<16x1024xf32>
      %c0_19 = arith.constant 0 : index
      %c0_20 = arith.constant 0 : index
      %25 = vector.load %arg6[%c0_19, %c0_20] : memref<1x1024xf32, #tpu.memory_space<vmem>>, vector<1x1024xf32>
      %26 = vector.broadcast %25 : vector<1x1024xf32> to vector<16x1024xf32>
      %27 = arith.addf %24, %26 : vector<16x1024xf32>
      %cst_21 = arith.constant 0.000000e+00 : f32
      %28 = vector.broadcast %cst_21 : f32 to vector<16x1024xf32>
      %29 = arith.cmpf ogt, %27, %28 : vector<16x1024xf32>
      %cst_22 = arith.constant 0.00999999977 : f32
      %30 = vector.broadcast %cst_22 : f32 to vector<16x1024xf32>
      %31 = arith.mulf %30, %27 : vector<16x1024xf32>
      %32 = arith.select %29, %27, %31 : vector<16x1024xi1>, vector<16x1024xf32>
      %33 = arith.truncf %32 : vector<16x1024xf32> to vector<16x1024xbf16>
      %c0_23 = arith.constant 0 : index
      %c0_24 = arith.constant 0 : index
      %34 = vector.load %arg7[%c0_23, %c0_24] : memref<1024x512xbf16, #tpu.memory_space<vmem>>, vector<1024x512xbf16>
      %cst_25 = arith.constant dense<0.000000e+00> : vector<16x512xf32>
      %35 = tpu.matmul %33, %34, %cst_25 {dimension_numbers = #tpu.dot_dimension_numbers<[1], [0], [0], [1], [0, 0, 1, 1], [], []>} : vector<16x1024xbf16>, vector<1024x512xbf16>, vector<16x512xf32> -> vector<16x512xf32>
      %c0_26 = arith.constant 0 : index
      %c0_27 = arith.constant 0 : index
      %36 = vector.load %arg8[%c0_26, %c0_27] : memref<1x512xf32, #tpu.memory_space<vmem>>, vector<1x512xf32>
      %37 = vector.broadcast %36 : vector<1x512xf32> to vector<16x512xf32>
      %38 = arith.addf %35, %37 : vector<16x512xf32>
      %cst_28 = arith.constant 0.000000e+00 : f32
      %39 = vector.broadcast %cst_28 : f32 to vector<16x512xf32>
      %40 = arith.cmpf ogt, %38, %39 : vector<16x512xf32>
      %cst_29 = arith.constant 0.00999999977 : f32
      %41 = vector.broadcast %cst_29 : f32 to vector<16x512xf32>
      %42 = arith.mulf %41, %38 : vector<16x512xf32>
      %43 = arith.select %40, %38, %42 : vector<16x512xi1>, vector<16x512xf32>
      %44 = arith.truncf %43 : vector<16x512xf32> to vector<16x512xbf16>
      %c0_30 = arith.constant 0 : index
      %c0_31 = arith.constant 0 : index
      %45 = vector.load %arg9[%c0_30, %c0_31] : memref<512x128xbf16, #tpu.memory_space<vmem>>, vector<512x128xbf16>
      %cst_32 = arith.constant dense<0.000000e+00> : vector<16x128xf32>
      %46 = tpu.matmul %44, %45, %cst_32 {dimension_numbers = #tpu.dot_dimension_numbers<[1], [0], [0], [1], [0, 0, 1, 1], [], []>} : vector<16x512xbf16>, vector<512x128xbf16>, vector<16x128xf32> -> vector<16x128xf32>
      %c0_33 = arith.constant 0 : index
      %c0_34 = arith.constant 0 : index
      %47 = vector.load %arg10[%c0_33, %c0_34] : memref<1x128xf32, #tpu.memory_space<vmem>>, vector<1x128xf32>
      %48 = vector.broadcast %47 : vector<1x128xf32> to vector<16x128xf32>
      %49 = arith.addf %46, %48 : vector<16x128xf32>
      %c0_35 = arith.constant 0 : index
      %c0_36 = arith.constant 0 : index
      %50 = vector.load %arg11[%c0_35, %c0_36] : memref<16x128xf32, #tpu.memory_space<vmem>>, vector<16x128xf32>
      tpu.vector_store %arg11[%c0_35, %c0_36], %49 {strides = array<i32>} : memref<16x128xf32, #tpu.memory_space<vmem>>, vector<16x128xf32>,
    } else {
    }
    return
  }
  func.func @transform_0(%arg0: i32, %arg1: i32) -> (i32, i32) {
    %c0_i32 = arith.constant 0 : i32
    %c0_i32_0 = arith.constant 0 : i32
    return %arg0, %c0_i32 : i32, i32
  }
  func.func @transform_1(%arg0: i32, %arg1: i32) -> (i32, i32) {
    %c0_i32 = arith.constant 0 : i32
    %c0_i32_0 = arith.constant 0 : i32
    %c0_i32_1 = arith.constant 0 : i32
    return %c0_i32, %c0_i32_0 : i32, i32
  }
  func.func @transform_2(%arg0: i32, %arg1: i32) -> (i32, i32) {
    %c0_i32 = arith.constant 0 : i32
    %c0_i32_0 = arith.constant 0 : i32
    %c0_i32_1 = arith.constant 0 : i32
    return %c0_i32, %c0_i32_0 : i32, i32
  }
  func.func @transform_3(%arg0: i32, %arg1: i32) -> (i32, i32) {
    %c0_i32 = arith.constant 0 : i32
    %c0_i32_0 = arith.constant 0 : i32
    %c0_i32_1 = arith.constant 0 : i32
    return %c0_i32, %c0_i32_0 : i32, i32
  }
  func.func @transform_4(%arg0: i32, %arg1: i32) -> (i32, i32) {
    %c0_i32 = arith.constant 0 : i32
    %c0_i32_0 = arith.constant 0 : i32
    %c0_i32_1 = arith.constant 0 : i32
    return %c0_i32, %c0_i32_0 : i32, i32
  }
  func.func @transform_5(%arg0: i32, %arg1: i32) -> (i32, i32) {
    %c0_i32 = arith.constant 0 : i32
    %c0_i32_0 = arith.constant 0 : i32
    %c0_i32_1 = arith.constant 0 : i32
    return %c0_i32, %c0_i32_0 : i32, i32
  }
  func.func @transform_6(%arg0: i32, %arg1: i32) -> (i32, i32) {
    %c0_i32 = arith.constant 0 : i32
    %c0_i32_0 = arith.constant 0 : i32
    %c0_i32_1 = arith.constant 0 : i32
    return %c0_i32, %c0_i32_0 : i32, i32
  }
  func.func @transform_7(%arg0: i32, %arg1: i32) -> (i32, i32) {
    %c0_i32 = arith.constant 0 : i32
    %c0_i32_0 = arith.constant 0 : i32
    %c0_i32_1 = arith.constant 0 : i32
    return %c0_i32, %c0_i32_0 : i32, i32
  }
  func.func @transform_8(%arg0: i32, %arg1: i32) -> (i32, i32) {
    %c0_i32 = arith.constant 0 : i32
    %c0_i32_0 = arith.constant 0 : i32
    %c0_i32_1 = arith.constant 0 : i32
    return %c0_i32, %c0_i32_0 : i32, i32
  }
  func.func @transform_9(%arg0: i32, %arg1: i32) -> (i32, i32) {
    %c0_i32 = arith.constant 0 : i32
    %c0_i32_0 = arith.constant 0 : i32
    return %arg0, %c0_i32 : i32, i32
  }
}

</mosaic_0001>

<bundles_post_ra>
// kernel: s3_encoder_forward.1
= control target key start
LH: loop header
LB: loop body
LE: loop exit
PB: predicated region body
PF: predicated region fallthrough
CT: control target
= control target key end

     0   :  { %s19587_s1 = inlined_call_operand.vmem [shape: bf16[256,2048], index: 1, kind: input, shape index: {}]   ;;  %s19588_s0 = inlined_call_operand.vmem [shape: f32[16,256], index: 0, kind: input, shape index: {}]   ;;  %s19589_s3 = inlined_call_operand.vmem [shape: bf16[2048,1024], index: 3, kind: input, shape index: {}]   ;;  %s19590_s2 = inlined_call_operand.vmem [shape: f32[1,2048], index: 2, kind: input, shape index: {}]   ;;  %s19591_s4 = inlined_call_operand.vmem [shape: f32[1,1024], index: 4, kind: input, shape index: {}]   ;;  %s19592_s5 = inlined_call_operand.vmem [shape: bf16[1024,512], index: 5, kind: input, shape index: {}]   ;;  %s19593_s7 = inlined_call_operand.vmem [shape: bf16[512,128], index: 7, kind: input, shape index: {}]   ;;  %s19594_s6 = inlined_call_operand.vmem [shape: f32[1,512], index: 6, kind: input, shape index: {}]   ;;  %s19595_s8 = inlined_call_operand.vmem [shape: f32[1,128], index: 8, kind: input, shape index: {}]   ;;  %s19596_s9 = inlined_call_operand.vmem [shape: f32[16,128], index: 9, kind: output, shape index: {}]  }
   0x1   :  { %v107_v0 = vld [vmem:[%s19587_s1] sm:$0xff]  ;;  %v108_v2 = vld [vmem:[%s19587_s1 + $0x8] sm:$0xff]  ;;  %v104_v54 = vld [vmem:[%s19588_s0 + $0x18] sm:$0xff] }
   0x2   :  { %v115_v1 = vld [vmem:[%s19587_s1 + $0x40] sm:$0xff]  ;;  %v116_v4 = vld [vmem:[%s19587_s1 + $0x48] sm:$0xff] }
   0x3   :  { %v12214_v3 = vcombine.high %v107_v0, %v115_v1  ;;  %v12213_v5 = vcombine.low %v107_v0, %v115_v1  ;;  %v123_v6 = vld [vmem:[%s19587_s1 + $0x80] sm:$0xff]  ;;  %v12216_v8 = vcombine.high %v108_v2, %v116_v4  ;;  %v12215_v9 = vcombine.low %v108_v2, %v116_v4  ;;  %v124_v11 = vld [vmem:[%s19587_s1 + $0x88] sm:$0xff] }
   0x4   :  { %v131_v7 = vld [vmem:[%s19587_s1 + $0xc0] sm:$0xff]  ;;  %v132_v12 = vld [vmem:[%s19587_s1 + $0xc8] sm:$0xff] }
   0x5   :  { %v12230_v10 = vcombine.high %v123_v6, %v131_v7  ;;  %v139_v13 = vld [vmem:[%s19587_s1 + $0x100] sm:$0xff]  ;;  %1643 = vmatprep.subr.bf16.mxu0 %v12214_v3  ;;  %v12232_v14 = vcombine.high %v124_v11, %v132_v12  ;;  %v140_v16 = vld [vmem:[%s19587_s1 + $0x108] sm:$0xff]  ;;  %1686 = vmatprep.subr.bf16.mxu1 %v12216_v8  ;;  %v12229_v18 = vcombine.low %v123_v6, %v131_v7 }
   0x6   :  { %v147_v15 = vld [vmem:[%s19587_s1 + $0x140] sm:$0xff]  ;;  %v148_v17 = vld [vmem:[%s19587_s1 + $0x148] sm:$0xff]  ;;  %1644 = vmatpush1.bf16.msra.mxu0 %v12213_v5  ;;  %1687 = vmatpush1.bf16.msra.mxu1 %v12215_v9  ;;  %v12231_v19 = vcombine.low %v124_v11, %v132_v12 }
   0x7   :  { %1645 = vmatprep.subr.bf16.mxu0 %v12230_v10  ;;  %v12246_v20 = vcombine.high %v139_v13, %v147_v15  ;;  %1688 = vmatprep.subr.bf16.mxu1 %v12232_v14  ;;  %v12248_v21 = vcombine.high %v140_v16, %v148_v17  ;;  %v155_v22 = vld [vmem:[%s19587_s1 + $0x180] sm:$0xff]  ;;  %v156_v24 = vld [vmem:[%s19587_s1 + $0x188] sm:$0xff]  ;;  %v12245_v26 = vcombine.low %v139_v13, %v147_v15 }
   0x8   :  { %v163_v23 = vld [vmem:[%s19587_s1 + $0x1c0] sm:$0xff]  ;;  %v164_v25 = vld [vmem:[%s19587_s1 + $0x1c8] sm:$0xff]  ;;  %v12247_v27 = vcombine.low %v140_v16, %v148_v17 }
   0x9   :  { %v12262_v28 = vcombine.high %v155_v22, %v163_v23  ;;  %v12264_v29 = vcombine.high %v156_v24, %v164_v25  ;;  %v171_v30 = vld [vmem:[%s19587_s1 + $0x200] sm:$0xff]  ;;  %v172_v32 = vld [vmem:[%s19587_s1 + $0x208] sm:$0xff]  ;;  %v12261_v34 = vcombine.low %v155_v22, %v163_v23  ;;  %v12263_v35 = vcombine.low %v156_v24, %v164_v25 }
   0xa   :  { %1646 = vmatpush1.bf16.msra.mxu0 %v12229_v18  ;;  %1689 = vmatpush1.bf16.msra.mxu1 %v12231_v19  ;;  %v179_v31 = vld [vmem:[%s19587_s1 + $0x240] sm:$0xff]  ;;  %v180_v33 = vld [vmem:[%s19587_s1 + $0x248] sm:$0xff] }
   0xb   :  { %1647 = vmatprep.subr.bf16.mxu0 %v12246_v20  ;;  %1690 = vmatprep.subr.bf16.mxu1 %v12248_v21  ;;  %v12278_v36 = vcombine.high %v171_v30, %v179_v31  ;;  %v12280_v37 = vcombine.high %v172_v32, %v180_v33  ;;  %v187_v38 = vld [vmem:[%s19587_s1 + $0x280] sm:$0xff]  ;;  %v188_v40 = vld [vmem:[%s19587_s1 + $0x288] sm:$0xff]  ;;  %v12277_v42 = vcombine.low %v171_v30, %v179_v31 }
   0xc   :  { %v195_v39 = vld [vmem:[%s19587_s1 + $0x2c0] sm:$0xff]  ;;  %v196_v41 = vld [vmem:[%s19587_s1 + $0x2c8] sm:$0xff]  ;;  %v12279_v43 = vcombine.low %v172_v32, %v180_v33 }
   0xd   :  { %v12294_v44 = vcombine.high %v187_v38, %v195_v39  ;;  %v12296_v45 = vcombine.high %v188_v40, %v196_v41  ;;  %v203_v46 = vld [vmem:[%s19587_s1 + $0x300] sm:$0xff]  ;;  %v204_v48 = vld [vmem:[%s19587_s1 + $0x308] sm:$0xff]  ;;  %v12293_v50 = vcombine.low %v187_v38, %v195_v39  ;;  %v12295_v51 = vcombine.low %v188_v40, %v196_v41 }
   0xe   :  { %1648 = vmatpush1.bf16.msra.mxu0 %v12245_v26  ;;  %1691 = vmatpush1.bf16.msra.mxu1 %v12247_v27  ;;  %v211_v47 = vld [vmem:[%s19587_s1 + $0x340] sm:$0xff]  ;;  %v212_v49 = vld [vmem:[%s19587_s1 + $0x348] sm:$0xff] }
   0xf   :  { %1649 = vmatprep.subr.bf16.mxu0 %v12262_v28  ;;  %1692 = vmatprep.subr.bf16.mxu1 %v12264_v29  ;;  %v12310_v52 = vcombine.high %v203_v46, %v211_v47  ;;  %v102_v53 = vld [vmem:[%s19588_s0 + $0x8] sm:$0xff]  ;;  %v12312_v55 = vcombine.high %v204_v48, %v212_v49  ;;  %v219_v56 = vld [vmem:[%s19587_s1 + $0x380] sm:$0xff]  ;;  %v12309_v61 = vcombine.low %v203_v46, %v211_v47 }
  0x10   :  { %v227_v57 = vld [vmem:[%s19587_s1 + $0x3c0] sm:$0xff]  ;;  %v14549_v58 = vpack.c.bf16 %v104_v54, %v102_v53  ;;  %v220_v59 = vld [vmem:[%s19587_s1 + $0x388] sm:$0xff]  ;;  %v12311_v62 = vcombine.low %v204_v48, %v212_v49 }
  0x11   :  { %v228_v60 = vld [vmem:[%s19587_s1 + $0x3c8] sm:$0xff]  ;;  %v12326_v63 = vcombine.high %v219_v56, %v227_v57  ;;  %v235_v1 = vld [vmem:[%s19587_s1 + $0x400] sm:$0xff]  ;;  %v12325_v5 = vcombine.low %v219_v56, %v227_v57 }
  0x12   :  { %1650 = vmatpush1.bf16.msra.mxu0 %v12261_v34  ;;  %1693 = vmatpush1.bf16.msra.mxu1 %v12263_v35  ;;  %v12328_v0 = vcombine.high %v220_v59, %v228_v60  ;;  %v243_v2 = vld [vmem:[%s19587_s1 + $0x440] sm:$0xff]  ;;  %v236_v3 = vld [vmem:[%s19587_s1 + $0x408] sm:$0xff]  ;;  %v12327_v6 = vcombine.low %v220_v59, %v228_v60 }
  0x13   :  { %1651 = vmatprep.subr.bf16.mxu0 %v12278_v36  ;;  %1694 = vmatprep.subr.bf16.mxu1 %v12280_v37  ;;  %v244_v4 = vld [vmem:[%s19587_s1 + $0x448] sm:$0xff]  ;;  %v12342_v7 = vcombine.high %v235_v1, %v243_v2  ;;  %v251_v9 = vld [vmem:[%s19587_s1 + $0x480] sm:$0xff]  ;;  %v12341_v13 = vcombine.low %v235_v1, %v243_v2  ;;  %v109_v2 = vld [vmem:[%s19587_s1 + $0x10] sm:$0xff] }
  0x14   :  { %1675 = vmatprep.mubr.bf16.mxu0 %v14549_v58  ;;  %1718 = vmatprep.mubr.bf16.mxu1 %v14549_v58  ;;  %v12344_v8 = vcombine.high %v236_v3, %v244_v4  ;;  %v259_v10 = vld [vmem:[%s19587_s1 + $0x4c0] sm:$0xff]  ;;  %v252_v11 = vld [vmem:[%s19587_s1 + $0x488] sm:$0xff]  ;;  %v12343_v14 = vcombine.low %v236_v3, %v244_v4  ;;  %v117_v3 = vld [vmem:[%s19587_s1 + $0x50] sm:$0xff] }
  0x15   :  { %v260_v12 = vld [vmem:[%s19587_s1 + $0x4c8] sm:$0xff]  ;;  %v12358_v15 = vcombine.high %v251_v9, %v259_v10  ;;  %v267_v17 = vld [vmem:[%s19587_s1 + $0x500] sm:$0xff]  ;;  %v12357_v21 = vcombine.low %v251_v9, %v259_v10  ;;  %v110_v4 = vld [vmem:[%s19587_s1 + $0x18] sm:$0xff]  ;;  %v12218_v10 = vcombine.high %v109_v2, %v117_v3 }
  0x16   :  { %1652 = vmatpush1.bf16.msra.mxu0 %v12277_v42  ;;  %1695 = vmatpush1.bf16.msra.mxu1 %v12279_v43  ;;  %v12360_v16 = vcombine.high %v252_v11, %v260_v12  ;;  %v275_v18 = vld [vmem:[%s19587_s1 + $0x540] sm:$0xff]  ;;  %v268_v19 = vld [vmem:[%s19587_s1 + $0x508] sm:$0xff]  ;;  %v12359_v22 = vcombine.low %v252_v11, %v260_v12  ;;  %v125_v12 = vld [vmem:[%s19587_s1 + $0x90] sm:$0xff] }
  0x17   :  { %1653 = vmatprep.subr.bf16.mxu0 %v12294_v44  ;;  %1696 = vmatprep.subr.bf16.mxu1 %v12296_v45  ;;  %v276_v20 = vld [vmem:[%s19587_s1 + $0x548] sm:$0xff]  ;;  %v12374_v23 = vcombine.high %v267_v17, %v275_v18  ;;  %v283_v25 = vld [vmem:[%s19587_s1 + $0x580] sm:$0xff]  ;;  %v12373_v29 = vcombine.low %v267_v17, %v275_v18  ;;  %v12217_v17 = vcombine.low %v109_v2, %v117_v3 }
  0x18   :  { %v12376_v24 = vcombine.high %v268_v19, %v276_v20  ;;  %v291_v26 = vld [vmem:[%s19587_s1 + $0x5c0] sm:$0xff]  ;;  %v284_v27 = vld [vmem:[%s19587_s1 + $0x588] sm:$0xff]  ;;  %v12375_v30 = vcombine.low %v268_v19, %v276_v20 }
  0x19   :  { %v292_v28 = vld [vmem:[%s19587_s1 + $0x5c8] sm:$0xff]  ;;  %v12390_v31 = vcombine.high %v283_v25, %v291_v26  ;;  %v299_v33 = vld [vmem:[%s19587_s1 + $0x600] sm:$0xff]  ;;  %v12389_v37 = vcombine.low %v283_v25, %v291_v26 }
  0x1a   :  { %1654 = vmatpush1.bf16.msra.mxu0 %v12293_v50  ;;  %1697 = vmatpush1.bf16.msra.mxu1 %v12295_v51  ;;  %v12392_v32 = vcombine.high %v284_v27, %v292_v28  ;;  %v307_v34 = vld [vmem:[%s19587_s1 + $0x640] sm:$0xff]  ;;  %v300_v35 = vld [vmem:[%s19587_s1 + $0x608] sm:$0xff]  ;;  %v12391_v38 = vcombine.low %v284_v27, %v292_v28 }
  0x1b   :  { %1655 = vmatprep.subr.bf16.mxu0 %v12310_v52  ;;  %1698 = vmatprep.subr.bf16.mxu1 %v12312_v55  ;;  %v308_v36 = vld [vmem:[%s19587_s1 + $0x648] sm:$0xff]  ;;  %v12406_v39 = vcombine.high %v299_v33, %v307_v34  ;;  %v315_v41 = vld [vmem:[%s19587_s1 + $0x680] sm:$0xff]  ;;  %v12405_v45 = vcombine.low %v299_v33, %v307_v34 }
  0x1c   :  { %v12408_v40 = vcombine.high %v300_v35, %v308_v36  ;;  %v323_v42 = vld [vmem:[%s19587_s1 + $0x6c0] sm:$0xff]  ;;  %v316_v43 = vld [vmem:[%s19587_s1 + $0x688] sm:$0xff]  ;;  %v12407_v46 = vcombine.low %v300_v35, %v308_v36 }
  0x1d   :  { %v324_v44 = vld [vmem:[%s19587_s1 + $0x6c8] sm:$0xff]  ;;  %v12422_v47 = vcombine.high %v315_v41, %v323_v42  ;;  %v331_v49 = vld [vmem:[%s19587_s1 + $0x700] sm:$0xff]  ;;  %v12421_v53 = vcombine.low %v315_v41, %v323_v42 }
  0x1e   :  { %1656 = vmatpush1.bf16.msra.mxu0 %v12309_v61  ;;  %1699 = vmatpush1.bf16.msra.mxu1 %v12311_v62  ;;  %v12424_v48 = vcombine.high %v316_v43, %v324_v44  ;;  %v339_v50 = vld [vmem:[%s19587_s1 + $0x740] sm:$0xff]  ;;  %v332_v51 = vld [vmem:[%s19587_s1 + $0x708] sm:$0xff]  ;;  %v12423_v54 = vcombine.low %v316_v43, %v324_v44 }
  0x1f   :  { %1657 = vmatprep.subr.bf16.mxu0 %v12326_v63  ;;  %1700 = vmatprep.subr.bf16.mxu1 %v12328_v0  ;;  %v340_v52 = vld [vmem:[%s19587_s1 + $0x748] sm:$0xff]  ;;  %v12438_v55 = vcombine.high %v331_v49, %v339_v50  ;;  %v347_v57 = vld [vmem:[%s19587_s1 + $0x780] sm:$0xff]  ;;  %v12437_v62 = vcombine.low %v331_v49, %v339_v50 }
  0x20   :  { %v12440_v56 = vcombine.high %v332_v51, %v340_v52  ;;  %v355_v59 = vld [vmem:[%s19587_s1 + $0x7c0] sm:$0xff]  ;;  %v348_v60 = vld [vmem:[%s19587_s1 + $0x788] sm:$0xff]  ;;  %v12439_v63 = vcombine.low %v332_v51, %v340_v52 }
  0x21   :  { %v356_v61 = vld [vmem:[%s19587_s1 + $0x7c8] sm:$0xff]  ;;  %v12454_v0 = vcombine.high %v347_v57, %v355_v59 }
  0x22   :  { %1658 = vmatpush1.bf16.msra.mxu0 %v12325_v5  ;;  %1701 = vmatpush1.bf16.msra.mxu1 %v12327_v6  ;;  %v12456_v1 = vcombine.high %v348_v60, %v356_v61  ;;  %v118_v5 = vld [vmem:[%s19587_s1 + $0x58] sm:$0xff]  ;;  %v12453_v6 = vcombine.low %v347_v57, %v355_v59  ;;  %v12455_v9 = vcombine.low %v348_v60, %v356_v61 }
  0x23   :  { %1659 = vmatprep.subr.bf16.mxu0 %v12342_v7  ;;  %1702 = vmatprep.subr.bf16.mxu1 %v12344_v8  ;;  %v101_v7 = vld [vmem:[%s19588_s0] sm:$0xff]  ;;  %v103_v8 = vld [vmem:[%s19588_s0 + $0x10] sm:$0xff]  ;;  %v12220_v11 = vcombine.high %v110_v4, %v118_v5  ;;  %v12219_v18 = vcombine.low %v110_v4, %v118_v5 }
  0x26   :  { %1660 = vmatpush1.bf16.msra.mxu0 %v12341_v13  ;;  %1703 = vmatpush1.bf16.msra.mxu1 %v12343_v14  ;;  %v133_v13 = vld [vmem:[%s19587_s1 + $0xd0] sm:$0xff]  ;;  %v14679_v14 = vpack.c.bf16 %v103_v8, %v101_v7  ;;  %v238_v8 = vld [vmem:[%s19587_s1 + $0x418] sm:$0xff] }
  0x27   :  { %1661 = vmatprep.subr.bf16.mxu0 %v12358_v15  ;;  %1704 = vmatprep.subr.bf16.mxu1 %v12360_v16  ;;  %v126_v15 = vld [vmem:[%s19587_s1 + $0x98] sm:$0xff]  ;;  %v12234_v19 = vcombine.high %v125_v12, %v133_v13  ;;  %v12233_v25 = vcombine.low %v125_v12, %v133_v13  ;;  %v245_v7 = vld [vmem:[%s19587_s1 + $0x450] sm:$0xff] }
  0x28   :  { %v134_v16 = vld [vmem:[%s19587_s1 + $0xd8] sm:$0xff] }
  0x29   :  { %v12236_v20 = vcombine.high %v126_v15, %v134_v16  ;;  %v12235_v26 = vcombine.low %v126_v15, %v134_v16  ;;  %v253_v15 = vld [vmem:[%s19587_s1 + $0x490] sm:$0xff] }
  0x2a   :  { %1662 = vmatpush1.bf16.msra.mxu0 %v12357_v21  ;;  %1705 = vmatpush1.bf16.msra.mxu1 %v12359_v22  ;;  %v141_v21 = vld [vmem:[%s19587_s1 + $0x110] sm:$0xff] }
  0x2b   :  { %1663 = vmatprep.subr.bf16.mxu0 %v12374_v23  ;;  %1706 = vmatprep.subr.bf16.mxu1 %v12376_v24  ;;  %v149_v22 = vld [vmem:[%s19587_s1 + $0x150] sm:$0xff]  ;;  %v142_v23 = vld [vmem:[%s19587_s1 + $0x118] sm:$0xff] }
  0x2c   :  { %v150_v24 = vld [vmem:[%s19587_s1 + $0x158] sm:$0xff]  ;;  %v12250_v27 = vcombine.high %v141_v21, %v149_v22  ;;  %v12249_v33 = vcombine.low %v141_v21, %v149_v22  ;;  %v261_v16 = vld [vmem:[%s19587_s1 + $0x4d0] sm:$0xff] }
  0x2d   :  { %v12252_v28 = vcombine.high %v142_v23, %v150_v24  ;;  %v12251_v34 = vcombine.low %v142_v23, %v150_v24  ;;  %v12362_v21 = vcombine.high %v253_v15, %v261_v16  ;;  %v269_v23 = vld [vmem:[%s19587_s1 + $0x510] sm:$0xff] }
  0x2e   :  { %1664 = vmatpush1.bf16.msra.mxu0 %v12373_v29  ;;  %1707 = vmatpush1.bf16.msra.mxu1 %v12375_v30  ;;  %v157_v29 = vld [vmem:[%s19587_s1 + $0x190] sm:$0xff] }
  0x2f   :  { %1665 = vmatprep.subr.bf16.mxu0 %v12390_v31  ;;  %1708 = vmatprep.subr.bf16.mxu1 %v12392_v32  ;;  %v165_v30 = vld [vmem:[%s19587_s1 + $0x1d0] sm:$0xff]  ;;  %v158_v31 = vld [vmem:[%s19587_s1 + $0x198] sm:$0xff] }
  0x30   :  { %v166_v32 = vld [vmem:[%s19587_s1 + $0x1d8] sm:$0xff]  ;;  %v12266_v35 = vcombine.high %v157_v29, %v165_v30  ;;  %v12265_v41 = vcombine.low %v157_v29, %v165_v30  ;;  %v277_v24 = vld [vmem:[%s19587_s1 + $0x550] sm:$0xff] }
  0x31   :  { %v12268_v36 = vcombine.high %v158_v31, %v166_v32  ;;  %v12267_v42 = vcombine.low %v158_v31, %v166_v32  ;;  %v12378_v29 = vcombine.high %v269_v23, %v277_v24  ;;  %v285_v31 = vld [vmem:[%s19587_s1 + $0x590] sm:$0xff] }
  0x32   :  { %1666 = vmatpush1.bf16.msra.mxu0 %v12389_v37  ;;  %1709 = vmatpush1.bf16.msra.mxu1 %v12391_v38  ;;  %v173_v37 = vld [vmem:[%s19587_s1 + $0x210] sm:$0xff] }
  0x33   :  { %1667 = vmatprep.subr.bf16.mxu0 %v12406_v39  ;;  %1710 = vmatprep.subr.bf16.mxu1 %v12408_v40  ;;  %v181_v38 = vld [vmem:[%s19587_s1 + $0x250] sm:$0xff]  ;;  %v174_v39 = vld [vmem:[%s19587_s1 + $0x218] sm:$0xff] }
  0x34   :  { %v182_v40 = vld [vmem:[%s19587_s1 + $0x258] sm:$0xff]  ;;  %v12282_v43 = vcombine.high %v173_v37, %v181_v38  ;;  %v12281_v49 = vcombine.low %v173_v37, %v181_v38  ;;  %v293_v32 = vld [vmem:[%s19587_s1 + $0x5d0] sm:$0xff] }
  0x35   :  { %v12284_v44 = vcombine.high %v174_v39, %v182_v40  ;;  %v12283_v50 = vcombine.low %v174_v39, %v182_v40  ;;  %v12394_v37 = vcombine.high %v285_v31, %v293_v32  ;;  %v301_v39 = vld [vmem:[%s19587_s1 + $0x610] sm:$0xff] }
  0x36   :  { %1668 = vmatpush1.bf16.msra.mxu0 %v12405_v45  ;;  %1711 = vmatpush1.bf16.msra.mxu1 %v12407_v46  ;;  %v189_v45 = vld [vmem:[%s19587_s1 + $0x290] sm:$0xff] }
  0x37   :  { %1669 = vmatprep.subr.bf16.mxu0 %v12422_v47  ;;  %1712 = vmatprep.subr.bf16.mxu1 %v12424_v48  ;;  %v197_v46 = vld [vmem:[%s19587_s1 + $0x2d0] sm:$0xff]  ;;  %v190_v47 = vld [vmem:[%s19587_s1 + $0x298] sm:$0xff] }
  0x38   :  { %v198_v48 = vld [vmem:[%s19587_s1 + $0x2d8] sm:$0xff]  ;;  %v12298_v51 = vcombine.high %v189_v45, %v197_v46  ;;  %v12297_v57 = vcombine.low %v189_v45, %v197_v46  ;;  %v309_v40 = vld [vmem:[%s19587_s1 + $0x650] sm:$0xff] }
  0x39   :  { %v12300_v52 = vcombine.high %v190_v47, %v198_v48  ;;  %v12299_v59 = vcombine.low %v190_v47, %v198_v48  ;;  %v12410_v45 = vcombine.high %v301_v39, %v309_v40  ;;  %v317_v47 = vld [vmem:[%s19587_s1 + $0x690] sm:$0xff] }
  0x3a   :  { %1670 = vmatpush1.bf16.msra.mxu0 %v12421_v53  ;;  %1713 = vmatpush1.bf16.msra.mxu1 %v12423_v54  ;;  %v205_v53 = vld [vmem:[%s19587_s1 + $0x310] sm:$0xff] }
  0x3b   :  { %1671 = vmatprep.subr.bf16.mxu0 %v12438_v55  ;;  %1714 = vmatprep.subr.bf16.mxu1 %v12440_v56  ;;  %v213_v54 = vld [vmem:[%s19587_s1 + $0x350] sm:$0xff]  ;;  %v206_v55 = vld [vmem:[%s19587_s1 + $0x318] sm:$0xff] }
  0x3c   :  { %v214_v56 = vld [vmem:[%s19587_s1 + $0x358] sm:$0xff]  ;;  %v12314_v60 = vcombine.high %v205_v53, %v213_v54  ;;  %v12313_v2 = vcombine.low %v205_v53, %v213_v54  ;;  %v325_v48 = vld [vmem:[%s19587_s1 + $0x6d0] sm:$0xff] }
  0x3d   :  { %v12316_v61 = vcombine.high %v206_v55, %v214_v56  ;;  %v12315_v3 = vcombine.low %v206_v55, %v214_v56  ;;  %v12426_v53 = vcombine.high %v317_v47, %v325_v48  ;;  %v333_v55 = vld [vmem:[%s19587_s1 + $0x710] sm:$0xff] }
  0x3e   :  { %1672 = vmatpush1.bf16.msra.mxu0 %v12437_v62  ;;  %1715 = vmatpush1.bf16.msra.mxu1 %v12439_v63  ;;  %v221_v62 = vld [vmem:[%s19587_s1 + $0x390] sm:$0xff] }
  0x3f   :  { %1673 = vmatprep.subr.bf16.mxu0 %v12454_v0  ;;  %1716 = vmatprep.subr.bf16.mxu1 %v12456_v1  ;;  %v229_v63 = vld [vmem:[%s19587_s1 + $0x3d0] sm:$0xff]  ;;  %v222_v0 = vld [vmem:[%s19587_s1 + $0x398] sm:$0xff] }
  0x40   :  { %v230_v1 = vld [vmem:[%s19587_s1 + $0x3d8] sm:$0xff]  ;;  %v12330_v4 = vcombine.high %v221_v62, %v229_v63  ;;  %v341_v56 = vld [vmem:[%s19587_s1 + $0x750] sm:$0xff] }
  0x41   :  { %v12332_v5 = vcombine.high %v222_v0, %v230_v1 }
  0x42   :  { %1674 = vmatpush1.bf16.msra.mxu0 %v12453_v6  ;;  %1717 = vmatpush1.bf16.msra.mxu1 %v12455_v9  ;;  %v237_v6 = vld [vmem:[%s19587_s1 + $0x410] sm:$0xff]  ;;  %v246_v9 = vld [vmem:[%s19587_s1 + $0x458] sm:$0xff] }
  0x43   :  { %1729 = vmatprep.subr.bf16.mxu0 %v12218_v10  ;;  %1772 = vmatprep.subr.bf16.mxu1 %v12220_v11  ;;  %v12329_v10 = vcombine.low %v221_v62, %v229_v63  ;;  %v12331_v11 = vcombine.low %v222_v0, %v230_v1  ;;  %v12346_v12 = vcombine.high %v237_v6, %v245_v7  ;;  %v349_v0 = vld [vmem:[%s19587_s1 + $0x790] sm:$0xff] }
  0x44   :  { %v12348_v13 = vcombine.high %v238_v8, %v246_v9  ;;  %v12442_v62 = vcombine.high %v333_v55, %v341_v56  ;;  %v357_v1 = vld [vmem:[%s19587_s1 + $0x7d0] sm:$0xff] }
  0x45   :  { %1676 = vmatmul.mubr.bf16.vlgmr.msra.gmra.mrb[0].mxu0 %v14679_v14  ;;  %1719 = vmatmul.mubr.bf16.vlgmr.msra.gmra.mrb[0].mxu1 %v14679_v14 }
  0x46   :  { %1730 = vmatpush1.bf16.msra.mxu0 %v12217_v17  ;;  %1773 = vmatpush1.bf16.msra.mxu1 %v12219_v18  ;;  %v254_v17 = vld [vmem:[%s19587_s1 + $0x498] sm:$0xff] }
  0x47   :  { %1731 = vmatprep.subr.bf16.mxu0 %v12234_v19  ;;  %1774 = vmatprep.subr.bf16.mxu1 %v12236_v20  ;;  %v262_v18 = vld [vmem:[%s19587_s1 + $0x4d8] sm:$0xff]  ;;  %v12345_v19 = vcombine.low %v237_v6, %v245_v7  ;;  %v12347_v20 = vcombine.low %v238_v8, %v246_v9  ;;  %v12458_v6 = vcombine.high %v349_v0, %v357_v1  ;;  %v111_v8 = vld [vmem:[%s19587_s1 + $0x20] sm:$0xff] }
  0x48   :  { %1761 = vmatprep.mubr.bf16.mxu0 %v14549_v58  ;;  %1804 = vmatprep.mubr.bf16.mxu1 %v14549_v58  ;;  %v12364_v22 = vcombine.high %v254_v17, %v262_v18  ;;  %v119_v9 = vld [vmem:[%s19587_s1 + $0x60] sm:$0xff] }
  0x4a   :  { %1732 = vmatpush1.bf16.msra.mxu0 %v12233_v25  ;;  %1775 = vmatpush1.bf16.msra.mxu1 %v12235_v26  ;;  %v270_v25 = vld [vmem:[%s19587_s1 + $0x518] sm:$0xff] }
  0x4b   :  { %1733 = vmatprep.subr.bf16.mxu0 %v12250_v27  ;;  %1776 = vmatprep.subr.bf16.mxu1 %v12252_v28  ;;  %v278_v26 = vld [vmem:[%s19587_s1 + $0x558] sm:$0xff]  ;;  %v12361_v27 = vcombine.low %v253_v15, %v261_v16  ;;  %v12363_v28 = vcombine.low %v254_v17, %v262_v18  ;;  %v12222_v15 = vcombine.high %v111_v8, %v119_v9  ;;  %v127_v17 = vld [vmem:[%s19587_s1 + $0xa0] sm:$0xff] }
  0x4c   :  { %v12380_v30 = vcombine.high %v270_v25, %v278_v26  ;;  %v135_v18 = vld [vmem:[%s19587_s1 + $0xe0] sm:$0xff] }
  0x4e   :  { %1734 = vmatpush1.bf16.msra.mxu0 %v12249_v33  ;;  %1777 = vmatpush1.bf16.msra.mxu1 %v12251_v34  ;;  %v286_v33 = vld [vmem:[%s19587_s1 + $0x598] sm:$0xff] }
  0x4f   :  { %1735 = vmatprep.subr.bf16.mxu0 %v12266_v35  ;;  %1778 = vmatprep.subr.bf16.mxu1 %v12268_v36  ;;  %v294_v34 = vld [vmem:[%s19587_s1 + $0x5d8] sm:$0xff]  ;;  %v12377_v35 = vcombine.low %v269_v23, %v277_v24  ;;  %v12379_v36 = vcombine.low %v270_v25, %v278_v26  ;;  %v12238_v23 = vcombine.high %v127_v17, %v135_v18  ;;  %v143_v25 = vld [vmem:[%s19587_s1 + $0x120] sm:$0xff] }
  0x50   :  { %v12396_v38 = vcombine.high %v286_v33, %v294_v34  ;;  %v151_v26 = vld [vmem:[%s19587_s1 + $0x160] sm:$0xff] }
  0x52   :  { %1736 = vmatpush1.bf16.msra.mxu0 %v12265_v41  ;;  %1779 = vmatpush1.bf16.msra.mxu1 %v12267_v42  ;;  %v302_v41 = vld [vmem:[%s19587_s1 + $0x618] sm:$0xff] }
  0x53   :  { %1737 = vmatprep.subr.bf16.mxu0 %v12282_v43  ;;  %1780 = vmatprep.subr.bf16.mxu1 %v12284_v44  ;;  %v310_v42 = vld [vmem:[%s19587_s1 + $0x658] sm:$0xff]  ;;  %v12393_v43 = vcombine.low %v285_v31, %v293_v32  ;;  %v12395_v44 = vcombine.low %v286_v33, %v294_v34  ;;  %v12254_v31 = vcombine.high %v143_v25, %v151_v26  ;;  %v159_v33 = vld [vmem:[%s19587_s1 + $0x1a0] sm:$0xff] }
  0x54   :  { %v12412_v46 = vcombine.high %v302_v41, %v310_v42  ;;  %v167_v34 = vld [vmem:[%s19587_s1 + $0x1e0] sm:$0xff] }
  0x56   :  { %1738 = vmatpush1.bf16.msra.mxu0 %v12281_v49  ;;  %1781 = vmatpush1.bf16.msra.mxu1 %v12283_v50  ;;  %v318_v49 = vld [vmem:[%s19587_s1 + $0x698] sm:$0xff] }
  0x57   :  { %1739 = vmatprep.subr.bf16.mxu0 %v12298_v51  ;;  %1782 = vmatprep.subr.bf16.mxu1 %v12300_v52  ;;  %v326_v50 = vld [vmem:[%s19587_s1 + $0x6d8] sm:$0xff]  ;;  %v12409_v51 = vcombine.low %v301_v39, %v309_v40  ;;  %v12411_v52 = vcombine.low %v302_v41, %v310_v42  ;;  %v12270_v39 = vcombine.high %v159_v33, %v167_v34  ;;  %v175_v41 = vld [vmem:[%s19587_s1 + $0x220] sm:$0xff] }
  0x58   :  { %v12428_v54 = vcombine.high %v318_v49, %v326_v50  ;;  %v183_v42 = vld [vmem:[%s19587_s1 + $0x260] sm:$0xff] }
  0x5a   :  { %1740 = vmatpush1.bf16.msra.mxu0 %v12297_v57  ;;  %1783 = vmatpush1.bf16.msra.mxu1 %v12299_v59  ;;  %v334_v57 = vld [vmem:[%s19587_s1 + $0x718] sm:$0xff] }
  0x5b   :  { %1741 = vmatprep.subr.bf16.mxu0 %v12314_v60  ;;  %1784 = vmatprep.subr.bf16.mxu1 %v12316_v61  ;;  %v342_v59 = vld [vmem:[%s19587_s1 + $0x758] sm:$0xff]  ;;  %v12425_v60 = vcombine.low %v317_v47, %v325_v48  ;;  %v12427_v61 = vcombine.low %v318_v49, %v326_v50  ;;  %v12286_v47 = vcombine.high %v175_v41, %v183_v42  ;;  %v191_v49 = vld [vmem:[%s19587_s1 + $0x2a0] sm:$0xff] }
  0x5c   :  { %v12444_v63 = vcombine.high %v334_v57, %v342_v59  ;;  %v199_v50 = vld [vmem:[%s19587_s1 + $0x2e0] sm:$0xff] }
  0x5e   :  { %1742 = vmatpush1.bf16.msra.mxu0 %v12313_v2  ;;  %1785 = vmatpush1.bf16.msra.mxu1 %v12315_v3  ;;  %v350_v2 = vld [vmem:[%s19587_s1 + $0x798] sm:$0xff] }
  0x5f   :  { %1743 = vmatprep.subr.bf16.mxu0 %v12330_v4  ;;  %1786 = vmatprep.subr.bf16.mxu1 %v12332_v5  ;;  %v358_v3 = vld [vmem:[%s19587_s1 + $0x7d8] sm:$0xff]  ;;  %v12441_v4 = vcombine.low %v333_v55, %v341_v56  ;;  %v12443_v5 = vcombine.low %v334_v57, %v342_v59  ;;  %v12302_v55 = vcombine.high %v191_v49, %v199_v50  ;;  %v207_v57 = vld [vmem:[%s19587_s1 + $0x320] sm:$0xff] }
  0x60   :  { %v12460_v7 = vcombine.high %v350_v2, %v358_v3  ;;  %v215_v59 = vld [vmem:[%s19587_s1 + $0x360] sm:$0xff] }
  0x62   :  { %1744 = vmatpush1.bf16.msra.mxu0 %v12329_v10  ;;  %1787 = vmatpush1.bf16.msra.mxu1 %v12331_v11  ;;  %v112_v10 = vld [vmem:[%s19587_s1 + $0x28] sm:$0xff] }
  0x63   :  { %1745 = vmatprep.subr.bf16.mxu0 %v12346_v12  ;;  %1788 = vmatprep.subr.bf16.mxu1 %v12348_v13  ;;  %v120_v11 = vld [vmem:[%s19587_s1 + $0x68] sm:$0xff]  ;;  %v12457_v12 = vcombine.low %v349_v0, %v357_v1  ;;  %v12459_v13 = vcombine.low %v350_v2, %v358_v3  ;;  %v12318_v0 = vcombine.high %v207_v57, %v215_v59  ;;  %v223_v2 = vld [vmem:[%s19587_s1 + $0x3a0] sm:$0xff] }
  0x64   :  { %v12224_v16 = vcombine.high %v112_v10, %v120_v11  ;;  %v231_v3 = vld [vmem:[%s19587_s1 + $0x3e0] sm:$0xff] }
  0x66   :  { %1746 = vmatpush1.bf16.msra.mxu0 %v12345_v19  ;;  %1789 = vmatpush1.bf16.msra.mxu1 %v12347_v20  ;;  %v128_v19 = vld [vmem:[%s19587_s1 + $0xa8] sm:$0xff] }
  0x67   :  { %1747 = vmatprep.subr.bf16.mxu0 %v12362_v21  ;;  %1790 = vmatprep.subr.bf16.mxu1 %v12364_v22  ;;  %v136_v20 = vld [vmem:[%s19587_s1 + $0xe8] sm:$0xff]  ;;  %v12221_v21 = vcombine.low %v111_v8, %v119_v9  ;;  %v12223_v22 = vcombine.low %v112_v10, %v120_v11  ;;  %v12334_v8 = vcombine.high %v223_v2, %v231_v3  ;;  %v239_v10 = vld [vmem:[%s19587_s1 + $0x420] sm:$0xff] }
  0x68   :  { %v12240_v24 = vcombine.high %v128_v19, %v136_v20  ;;  %v247_v11 = vld [vmem:[%s19587_s1 + $0x460] sm:$0xff] }
  0x6a   :  { %1748 = vmatpush1.bf16.msra.mxu0 %v12361_v27  ;;  %1791 = vmatpush1.bf16.msra.mxu1 %v12363_v28  ;;  %v144_v27 = vld [vmem:[%s19587_s1 + $0x128] sm:$0xff] }
  0x6b   :  { %1749 = vmatprep.subr.bf16.mxu0 %v12378_v29  ;;  %1792 = vmatprep.subr.bf16.mxu1 %v12380_v30  ;;  %v152_v28 = vld [vmem:[%s19587_s1 + $0x168] sm:$0xff]  ;;  %v12237_v29 = vcombine.low %v127_v17, %v135_v18  ;;  %v12239_v30 = vcombine.low %v128_v19, %v136_v20  ;;  %v12350_v17 = vcombine.high %v239_v10, %v247_v11  ;;  %v255_v19 = vld [vmem:[%s19587_s1 + $0x4a0] sm:$0xff] }
  0x6c   :  { %v12256_v32 = vcombine.high %v144_v27, %v152_v28  ;;  %v263_v20 = vld [vmem:[%s19587_s1 + $0x4e0] sm:$0xff] }
  0x6e   :  { %1750 = vmatpush1.bf16.msra.mxu0 %v12377_v35  ;;  %1793 = vmatpush1.bf16.msra.mxu1 %v12379_v36  ;;  %v160_v35 = vld [vmem:[%s19587_s1 + $0x1a8] sm:$0xff] }
  0x6f   :  { %1751 = vmatprep.subr.bf16.mxu0 %v12394_v37  ;;  %1794 = vmatprep.subr.bf16.mxu1 %v12396_v38  ;;  %v168_v36 = vld [vmem:[%s19587_s1 + $0x1e8] sm:$0xff]  ;;  %v12253_v37 = vcombine.low %v143_v25, %v151_v26  ;;  %v12255_v38 = vcombine.low %v144_v27, %v152_v28  ;;  %v12366_v25 = vcombine.high %v255_v19, %v263_v20  ;;  %v271_v27 = vld [vmem:[%s19587_s1 + $0x520] sm:$0xff] }
  0x70   :  { %v12272_v40 = vcombine.high %v160_v35, %v168_v36  ;;  %v279_v28 = vld [vmem:[%s19587_s1 + $0x560] sm:$0xff] }
  0x72   :  { %1752 = vmatpush1.bf16.msra.mxu0 %v12393_v43  ;;  %1795 = vmatpush1.bf16.msra.mxu1 %v12395_v44  ;;  %v176_v43 = vld [vmem:[%s19587_s1 + $0x228] sm:$0xff] }
  0x73   :  { %1753 = vmatprep.subr.bf16.mxu0 %v12410_v45  ;;  %1796 = vmatprep.subr.bf16.mxu1 %v12412_v46  ;;  %v184_v44 = vld [vmem:[%s19587_s1 + $0x268] sm:$0xff]  ;;  %v12269_v45 = vcombine.low %v159_v33, %v167_v34  ;;  %v12271_v46 = vcombine.low %v160_v35, %v168_v36  ;;  %v12382_v33 = vcombine.high %v271_v27, %v279_v28  ;;  %v287_v35 = vld [vmem:[%s19587_s1 + $0x5a0] sm:$0xff] }
  0x74   :  { %v12288_v48 = vcombine.high %v176_v43, %v184_v44  ;;  %v295_v36 = vld [vmem:[%s19587_s1 + $0x5e0] sm:$0xff] }
  0x76   :  { %1754 = vmatpush1.bf16.msra.mxu0 %v12409_v51  ;;  %1797 = vmatpush1.bf16.msra.mxu1 %v12411_v52  ;;  %v192_v51 = vld [vmem:[%s19587_s1 + $0x2a8] sm:$0xff] }
  0x77   :  { %1755 = vmatprep.subr.bf16.mxu0 %v12426_v53  ;;  %1798 = vmatprep.subr.bf16.mxu1 %v12428_v54  ;;  %v200_v52 = vld [vmem:[%s19587_s1 + $0x2e8] sm:$0xff]  ;;  %v12285_v53 = vcombine.low %v175_v41, %v183_v42  ;;  %v12287_v54 = vcombine.low %v176_v43, %v184_v44  ;;  %v12398_v41 = vcombine.high %v287_v35, %v295_v36  ;;  %v303_v43 = vld [vmem:[%s19587_s1 + $0x620] sm:$0xff] }
  0x78   :  { %v12304_v56 = vcombine.high %v192_v51, %v200_v52  ;;  %v311_v44 = vld [vmem:[%s19587_s1 + $0x660] sm:$0xff] }
  0x7a   :  { %1756 = vmatpush1.bf16.msra.mxu0 %v12425_v60  ;;  %1799 = vmatpush1.bf16.msra.mxu1 %v12427_v61  ;;  %v208_v60 = vld [vmem:[%s19587_s1 + $0x328] sm:$0xff] }
  0x7b   :  { %1757 = vmatprep.subr.bf16.mxu0 %v12442_v62  ;;  %1800 = vmatprep.subr.bf16.mxu1 %v12444_v63  ;;  %v216_v61 = vld [vmem:[%s19587_s1 + $0x368] sm:$0xff]  ;;  %v12301_v62 = vcombine.low %v191_v49, %v199_v50  ;;  %v12303_v63 = vcombine.low %v192_v51, %v200_v52  ;;  %v12414_v49 = vcombine.high %v303_v43, %v311_v44  ;;  %v319_v51 = vld [vmem:[%s19587_s1 + $0x6a0] sm:$0xff] }
  0x7c   :  { %v12320_v1 = vcombine.high %v208_v60, %v216_v61  ;;  %v327_v52 = vld [vmem:[%s19587_s1 + $0x6e0] sm:$0xff] }
  0x7e   :  { %1758 = vmatpush1.bf16.msra.mxu0 %v12441_v4  ;;  %1801 = vmatpush1.bf16.msra.mxu1 %v12443_v5  ;;  %v224_v4 = vld [vmem:[%s19587_s1 + $0x3a8] sm:$0xff] }
  0x7f   :  { %1759 = vmatprep.subr.bf16.mxu0 %v12458_v6  ;;  %1802 = vmatprep.subr.bf16.mxu1 %v12460_v7  ;;  %v232_v5 = vld [vmem:[%s19587_s1 + $0x3e8] sm:$0xff]  ;;  %v12317_v6 = vcombine.low %v207_v57, %v215_v59  ;;  %v12319_v7 = vcombine.low %v208_v60, %v216_v61  ;;  %v12430_v57 = vcombine.high %v319_v51, %v327_v52  ;;  %v335_v60 = vld [vmem:[%s19587_s1 + $0x720] sm:$0xff] }
  0x80   :  { %v12336_v9 = vcombine.high %v224_v4, %v232_v5  ;;  %v343_v61 = vld [vmem:[%s19587_s1 + $0x760] sm:$0xff] }
  0x82   :  { %1760 = vmatpush1.bf16.msra.mxu0 %v12457_v12  ;;  %1803 = vmatpush1.bf16.msra.mxu1 %v12459_v13  ;;  %v240_v12 = vld [vmem:[%s19587_s1 + $0x428] sm:$0xff] }
  0x83   :  { %1815 = vmatprep.subr.bf16.mxu0 %v12222_v15  ;;  %1858 = vmatprep.subr.bf16.mxu1 %v12224_v16  ;;  %v248_v13 = vld [vmem:[%s19587_s1 + $0x468] sm:$0xff]  ;;  %v12333_v15 = vcombine.low %v223_v2, %v231_v3  ;;  %v12335_v16 = vcombine.low %v224_v4, %v232_v5  ;;  %v12446_v2 = vcombine.high %v335_v60, %v343_v61  ;;  %v351_v4 = vld [vmem:[%s19587_s1 + $0x7a0] sm:$0xff] }
  0x84   :  { %v12352_v18 = vcombine.high %v240_v12, %v248_v13  ;;  %v359_v5 = vld [vmem:[%s19587_s1 + $0x7e0] sm:$0xff] }
  0x85   :  { %1762 = vmatmul.mubr.bf16.vlgmr.msra.gmra.mrb[4].mxu0 %v14679_v14  ;;  %1805 = vmatmul.mubr.bf16.vlgmr.msra.gmra.mrb[4].mxu1 %v14679_v14 }
  0x86   :  { %1816 = vmatpush1.bf16.msra.mxu0 %v12221_v21  ;;  %1859 = vmatpush1.bf16.msra.mxu1 %v12223_v22  ;;  %v256_v21 = vld [vmem:[%s19587_s1 + $0x4a8] sm:$0xff] }
  0x87   :  { %1817 = vmatprep.subr.bf16.mxu0 %v12238_v23  ;;  %1860 = vmatprep.subr.bf16.mxu1 %v12240_v24  ;;  %v264_v22 = vld [vmem:[%s19587_s1 + $0x4e8] sm:$0xff]  ;;  %v12349_v23 = vcombine.low %v239_v10, %v247_v11  ;;  %v12351_v24 = vcombine.low %v240_v12, %v248_v13  ;;  %v12462_v10 = vcombine.high %v351_v4, %v359_v5  ;;  %v113_v12 = vld [vmem:[%s19587_s1 + $0x30] sm:$0xff] }
  0x88   :  { %1847 = vmatprep.mubr.bf16.mxu0 %v14549_v58  ;;  %1890 = vmatprep.mubr.bf16.mxu1 %v14549_v58  ;;  %v12368_v26 = vcombine.high %v256_v21, %v264_v22  ;;  %v121_v13 = vld [vmem:[%s19587_s1 + $0x70] sm:$0xff] }
  0x8a   :  { %1818 = vmatpush1.bf16.msra.mxu0 %v12237_v29  ;;  %1861 = vmatpush1.bf16.msra.mxu1 %v12239_v30  ;;  %v272_v29 = vld [vmem:[%s19587_s1 + $0x528] sm:$0xff] }
  0x8b   :  { %1819 = vmatprep.subr.bf16.mxu0 %v12254_v31  ;;  %1862 = vmatprep.subr.bf16.mxu1 %v12256_v32  ;;  %v280_v30 = vld [vmem:[%s19587_s1 + $0x568] sm:$0xff]  ;;  %v12365_v31 = vcombine.low %v255_v19, %v263_v20  ;;  %v12367_v32 = vcombine.low %v256_v21, %v264_v22  ;;  %v12226_v19 = vcombine.high %v113_v12, %v121_v13  ;;  %v129_v21 = vld [vmem:[%s19587_s1 + $0xb0] sm:$0xff] }
  0x8c   :  { %v12384_v34 = vcombine.high %v272_v29, %v280_v30  ;;  %v137_v22 = vld [vmem:[%s19587_s1 + $0xf0] sm:$0xff] }
  0x8e   :  { %1820 = vmatpush1.bf16.msra.mxu0 %v12253_v37  ;;  %1863 = vmatpush1.bf16.msra.mxu1 %v12255_v38  ;;  %v288_v37 = vld [vmem:[%s19587_s1 + $0x5a8] sm:$0xff] }
  0x8f   :  { %1821 = vmatprep.subr.bf16.mxu0 %v12270_v39  ;;  %1864 = vmatprep.subr.bf16.mxu1 %v12272_v40  ;;  %v296_v38 = vld [vmem:[%s19587_s1 + $0x5e8] sm:$0xff]  ;;  %v12381_v39 = vcombine.low %v271_v27, %v279_v28  ;;  %v12383_v40 = vcombine.low %v272_v29, %v280_v30  ;;  %v12242_v27 = vcombine.high %v129_v21, %v137_v22  ;;  %v145_v29 = vld [vmem:[%s19587_s1 + $0x130] sm:$0xff] }
  0x90   :  { %v12400_v42 = vcombine.high %v288_v37, %v296_v38  ;;  %v153_v30 = vld [vmem:[%s19587_s1 + $0x170] sm:$0xff] }
  0x92   :  { %1822 = vmatpush1.bf16.msra.mxu0 %v12269_v45  ;;  %1865 = vmatpush1.bf16.msra.mxu1 %v12271_v46  ;;  %v304_v45 = vld [vmem:[%s19587_s1 + $0x628] sm:$0xff] }
  0x93   :  { %1823 = vmatprep.subr.bf16.mxu0 %v12286_v47  ;;  %1866 = vmatprep.subr.bf16.mxu1 %v12288_v48  ;;  %v312_v46 = vld [vmem:[%s19587_s1 + $0x668] sm:$0xff]  ;;  %v12397_v47 = vcombine.low %v287_v35, %v295_v36  ;;  %v12399_v48 = vcombine.low %v288_v37, %v296_v38  ;;  %v12258_v35 = vcombine.high %v145_v29, %v153_v30  ;;  %v161_v37 = vld [vmem:[%s19587_s1 + $0x1b0] sm:$0xff] }
  0x94   :  { %v12416_v50 = vcombine.high %v304_v45, %v312_v46  ;;  %v169_v38 = vld [vmem:[%s19587_s1 + $0x1f0] sm:$0xff] }
  0x96   :  { %1824 = vmatpush1.bf16.msra.mxu0 %v12285_v53  ;;  %1867 = vmatpush1.bf16.msra.mxu1 %v12287_v54  ;;  %v320_v53 = vld [vmem:[%s19587_s1 + $0x6a8] sm:$0xff] }
  0x97   :  { %1825 = vmatprep.subr.bf16.mxu0 %v12302_v55  ;;  %1868 = vmatprep.subr.bf16.mxu1 %v12304_v56  ;;  %v328_v54 = vld [vmem:[%s19587_s1 + $0x6e8] sm:$0xff]  ;;  %v12413_v55 = vcombine.low %v303_v43, %v311_v44  ;;  %v12415_v56 = vcombine.low %v304_v45, %v312_v46  ;;  %v12274_v43 = vcombine.high %v161_v37, %v169_v38  ;;  %v177_v45 = vld [vmem:[%s19587_s1 + $0x230] sm:$0xff] }
  0x98   :  { %v12432_v59 = vcombine.high %v320_v53, %v328_v54  ;;  %v185_v46 = vld [vmem:[%s19587_s1 + $0x270] sm:$0xff] }
  0x9a   :  { %1826 = vmatpush1.bf16.msra.mxu0 %v12301_v62  ;;  %1869 = vmatpush1.bf16.msra.mxu1 %v12303_v63  ;;  %v336_v62 = vld [vmem:[%s19587_s1 + $0x728] sm:$0xff] }
  0x9b   :  { %1827 = vmatprep.subr.bf16.mxu0 %v12318_v0  ;;  %1870 = vmatprep.subr.bf16.mxu1 %v12320_v1  ;;  %v344_v63 = vld [vmem:[%s19587_s1 + $0x768] sm:$0xff]  ;;  %v12429_v0 = vcombine.low %v319_v51, %v327_v52  ;;  %v12431_v1 = vcombine.low %v320_v53, %v328_v54  ;;  %v193_v52 = vld [vmem:[%s19587_s1 + $0x2b0] sm:$0xff]  ;;  %v194_v54 = vld [vmem:[%s19587_s1 + $0x2b8] sm:$0xff] }
  0x9c   :  { %v12448_v3 = vcombine.high %v336_v62, %v344_v63  ;;  %v201_v53 = vld [vmem:[%s19587_s1 + $0x2f0] sm:$0xff] }
  0x9e   :  { %1828 = vmatpush1.bf16.msra.mxu0 %v12317_v6  ;;  %1871 = vmatpush1.bf16.msra.mxu1 %v12319_v7  ;;  %v352_v6 = vld [vmem:[%s19587_s1 + $0x7a8] sm:$0xff] }
  0x9f   :  { %1829 = vmatprep.subr.bf16.mxu0 %v12334_v8  ;;  %1872 = vmatprep.subr.bf16.mxu1 %v12336_v9  ;;  %v360_v7 = vld [vmem:[%s19587_s1 + $0x7e8] sm:$0xff]  ;;  %v12445_v8 = vcombine.low %v335_v60, %v343_v61  ;;  %v12447_v9 = vcombine.low %v336_v62, %v344_v63  ;;  %v209_v61 = vld [vmem:[%s19587_s1 + $0x330] sm:$0xff]  ;;  %v210_v63 = vld [vmem:[%s19587_s1 + $0x338] sm:$0xff] }
  0xa0   :  { %v12464_v11 = vcombine.high %v352_v6, %v360_v7  ;;  %v217_v62 = vld [vmem:[%s19587_s1 + $0x370] sm:$0xff] }
  0xa2   :  { %1830 = vmatpush1.bf16.msra.mxu0 %v12333_v15  ;;  %1873 = vmatpush1.bf16.msra.mxu1 %v12335_v16  ;;  %v114_v15 = vld [vmem:[%s19587_s1 + $0x38] sm:$0xff] }
  0xa3   :  { %1831 = vmatprep.subr.bf16.mxu0 %v12350_v17  ;;  %1874 = vmatprep.subr.bf16.mxu1 %v12352_v18  ;;  %v122_v16 = vld [vmem:[%s19587_s1 + $0x78] sm:$0xff]  ;;  %v12461_v17 = vcombine.low %v351_v4, %v359_v5  ;;  %v12463_v18 = vcombine.low %v352_v6, %v360_v7  ;;  %v225_v5 = vld [vmem:[%s19587_s1 + $0x3b0] sm:$0xff] }
  0xa4   :  { %v12228_v20 = vcombine.high %v114_v15, %v122_v16  ;;  %v233_v6 = vld [vmem:[%s19587_s1 + $0x3f0] sm:$0xff]  ;;  %v226_v7 = vld [vmem:[%s19587_s1 + $0x3b8] sm:$0xff] }
  0xa6   :  { %1832 = vmatpush1.bf16.msra.mxu0 %v12349_v23  ;;  %1875 = vmatpush1.bf16.msra.mxu1 %v12351_v24  ;;  %v130_v23 = vld [vmem:[%s19587_s1 + $0xb8] sm:$0xff] }
  0xa7   :  { %1833 = vmatprep.subr.bf16.mxu0 %v12366_v25  ;;  %1876 = vmatprep.subr.bf16.mxu1 %v12368_v26  ;;  %v138_v24 = vld [vmem:[%s19587_s1 + $0xf8] sm:$0xff]  ;;  %v12225_v25 = vcombine.low %v113_v12, %v121_v13  ;;  %v12227_v26 = vcombine.low %v114_v15, %v122_v16  ;;  %v241_v13 = vld [vmem:[%s19587_s1 + $0x430] sm:$0xff] }
  0xa8   :  { %v12244_v28 = vcombine.high %v130_v23, %v138_v24  ;;  %v249_v15 = vld [vmem:[%s19587_s1 + $0x470] sm:$0xff]  ;;  %v242_v16 = vld [vmem:[%s19587_s1 + $0x438] sm:$0xff] }
  0xaa   :  { %1834 = vmatpush1.bf16.msra.mxu0 %v12365_v31  ;;  %1877 = vmatpush1.bf16.msra.mxu1 %v12367_v32  ;;  %v146_v31 = vld [vmem:[%s19587_s1 + $0x138] sm:$0xff] }
  0xab   :  { %1835 = vmatprep.subr.bf16.mxu0 %v12382_v33  ;;  %1878 = vmatprep.subr.bf16.mxu1 %v12384_v34  ;;  %v154_v32 = vld [vmem:[%s19587_s1 + $0x178] sm:$0xff]  ;;  %v12241_v33 = vcombine.low %v129_v21, %v137_v22  ;;  %v12243_v34 = vcombine.low %v130_v23, %v138_v24  ;;  %v257_v22 = vld [vmem:[%s19587_s1 + $0x4b0] sm:$0xff] }
  0xac   :  { %v12260_v36 = vcombine.high %v146_v31, %v154_v32  ;;  %v265_v23 = vld [vmem:[%s19587_s1 + $0x4f0] sm:$0xff]  ;;  %v258_v24 = vld [vmem:[%s19587_s1 + $0x4b8] sm:$0xff] }
  0xae   :  { %1836 = vmatpush1.bf16.msra.mxu0 %v12381_v39  ;;  %1879 = vmatpush1.bf16.msra.mxu1 %v12383_v40  ;;  %v162_v39 = vld [vmem:[%s19587_s1 + $0x1b8] sm:$0xff] }
  0xaf   :  { %1837 = vmatprep.subr.bf16.mxu0 %v12398_v41  ;;  %1880 = vmatprep.subr.bf16.mxu1 %v12400_v42  ;;  %v170_v40 = vld [vmem:[%s19587_s1 + $0x1f8] sm:$0xff]  ;;  %v12257_v41 = vcombine.low %v145_v29, %v153_v30  ;;  %v12259_v42 = vcombine.low %v146_v31, %v154_v32  ;;  %v273_v30 = vld [vmem:[%s19587_s1 + $0x530] sm:$0xff] }
  0xb0   :  { %v12276_v44 = vcombine.high %v162_v39, %v170_v40  ;;  %v281_v31 = vld [vmem:[%s19587_s1 + $0x570] sm:$0xff]  ;;  %v274_v32 = vld [vmem:[%s19587_s1 + $0x538] sm:$0xff] }
  0xb2   :  { %1838 = vmatpush1.bf16.msra.mxu0 %v12397_v47  ;;  %1881 = vmatpush1.bf16.msra.mxu1 %v12399_v48  ;;  %v186_v47 = vld [vmem:[%s19587_s1 + $0x278] sm:$0xff]  ;;  %v12273_v48 = vcombine.low %v161_v37, %v169_v38  ;;  %v289_v38 = vld [vmem:[%s19587_s1 + $0x5b0] sm:$0xff] }
  0xb3   :  { %1839 = vmatprep.subr.bf16.mxu0 %v12414_v49  ;;  %1882 = vmatprep.subr.bf16.mxu1 %v12416_v50  ;;  %v12275_v49 = vcombine.low %v162_v39, %v170_v40  ;;  %v12290_v50 = vcombine.high %v177_v45, %v185_v46  ;;  %v297_v39 = vld [vmem:[%s19587_s1 + $0x5f0] sm:$0xff]  ;;  %v290_v40 = vld [vmem:[%s19587_s1 + $0x5b8] sm:$0xff] }
  0xb6   :  { %1840 = vmatpush1.bf16.msra.mxu0 %v12413_v55  ;;  %1883 = vmatpush1.bf16.msra.mxu1 %v12415_v56  ;;  %v202_v55 = vld [vmem:[%s19587_s1 + $0x2f8] sm:$0xff]  ;;  %v12289_v56 = vcombine.low %v177_v45, %v185_v46  ;;  %v305_v46 = vld [vmem:[%s19587_s1 + $0x630] sm:$0xff] }
  0xb7   :  { %1841 = vmatprep.subr.bf16.mxu0 %v12430_v57  ;;  %1884 = vmatprep.subr.bf16.mxu1 %v12432_v59  ;;  %v12306_v59 = vcombine.high %v193_v52, %v201_v53  ;;  %v12308_v60 = vcombine.high %v194_v54, %v202_v55 }
  0xba   :  { %1842 = vmatpush1.bf16.msra.mxu0 %v12429_v0  ;;  %1885 = vmatpush1.bf16.msra.mxu1 %v12431_v1  ;;  %v218_v0 = vld [vmem:[%s19587_s1 + $0x378] sm:$0xff]  ;;  %v12305_v1 = vcombine.low %v193_v52, %v201_v53  ;;  %v321_v53 = vld [vmem:[%s19587_s1 + $0x6b0] sm:$0xff] }
  0xbb   :  { %1843 = vmatprep.subr.bf16.mxu0 %v12446_v2  ;;  %1886 = vmatprep.subr.bf16.mxu1 %v12448_v3  ;;  %v12307_v2 = vcombine.low %v194_v54, %v202_v55  ;;  %v12322_v3 = vcombine.high %v209_v61, %v217_v62  ;;  %v12324_v4 = vcombine.high %v210_v63, %v218_v0  ;;  %v329_v54 = vld [vmem:[%s19587_s1 + $0x6f0] sm:$0xff]  ;;  %v322_v55 = vld [vmem:[%s19587_s1 + $0x6b8] sm:$0xff] }
  0xbe   :  { %1844 = vmatpush1.bf16.msra.mxu0 %v12445_v8  ;;  %1887 = vmatpush1.bf16.msra.mxu1 %v12447_v9  ;;  %v234_v8 = vld [vmem:[%s19587_s1 + $0x3f8] sm:$0xff]  ;;  %v12321_v9 = vcombine.low %v209_v61, %v217_v62  ;;  %v337_v62 = vld [vmem:[%s19587_s1 + $0x730] sm:$0xff] }
  0xbf   :  { %1845 = vmatprep.subr.bf16.mxu0 %v12462_v10  ;;  %1888 = vmatprep.subr.bf16.mxu1 %v12464_v11  ;;  %v12323_v10 = vcombine.low %v210_v63, %v218_v0  ;;  %v12338_v11 = vcombine.high %v225_v5, %v233_v6  ;;  %v12340_v12 = vcombine.high %v226_v7, %v234_v8  ;;  %v345_v63 = vld [vmem:[%s19587_s1 + $0x770] sm:$0xff]  ;;  %v338_v0 = vld [vmem:[%s19587_s1 + $0x738] sm:$0xff] }
  0xc2   :  { %1846 = vmatpush1.bf16.msra.mxu0 %v12461_v17  ;;  %1889 = vmatpush1.bf16.msra.mxu1 %v12463_v18  ;;  %v250_v17 = vld [vmem:[%s19587_s1 + $0x478] sm:$0xff]  ;;  %v12337_v18 = vcombine.low %v225_v5, %v233_v6  ;;  %v353_v6 = vld [vmem:[%s19587_s1 + $0x7b0] sm:$0xff] }
  0xc3   :  { %1901 = vmatprep.subr.bf16.mxu0 %v12226_v19  ;;  %1944 = vmatprep.subr.bf16.mxu1 %v12228_v20  ;;  %v12339_v19 = vcombine.low %v226_v7, %v234_v8  ;;  %v12354_v20 = vcombine.high %v241_v13, %v249_v15  ;;  %v12356_v21 = vcombine.high %v242_v16, %v250_v17  ;;  %v361_v7 = vld [vmem:[%s19587_s1 + $0x7f0] sm:$0xff]  ;;  %v354_v8 = vld [vmem:[%s19587_s1 + $0x7b8] sm:$0xff] }
  0xc5   :  { %1848 = vmatmul.mubr.bf16.vlgmr.msra.gmra.mrb[8].mxu0 %v14679_v14  ;;  %1891 = vmatmul.mubr.bf16.vlgmr.msra.gmra.mrb[8].mxu1 %v14679_v14 }
  0xc6   :  { %1902 = vmatpush1.bf16.msra.mxu0 %v12225_v25  ;;  %1945 = vmatpush1.bf16.msra.mxu1 %v12227_v26  ;;  %v266_v25 = vld [vmem:[%s19587_s1 + $0x4f8] sm:$0xff]  ;;  %v12353_v26 = vcombine.low %v241_v13, %v249_v15  ;;  %v2314_v15 = vld [vmem:[%s19589_s3] sm:$0xff] }
  0xc7   :  { %1903 = vmatprep.subr.bf16.mxu0 %v12242_v27  ;;  %1946 = vmatprep.subr.bf16.mxu1 %v12244_v28  ;;  %v12355_v27 = vcombine.low %v242_v16, %v250_v17  ;;  %v12370_v28 = vcombine.high %v257_v22, %v265_v23  ;;  %v12372_v29 = vcombine.high %v258_v24, %v266_v25  ;;  %v2318_v16 = vld [vmem:[%s19589_s3 + $0x20] sm:$0xff]  ;;  %v2315_v17 = vld [vmem:[%s19589_s3 + $0x8] sm:$0xff] }
  0xc8   :  { %1933 = vmatprep.mubr.bf16.mxu0 %v14549_v58  ;;  %1976 = vmatprep.mubr.bf16.mxu1 %v14549_v58  ;;  %v178_v58 = vld [vmem:[%s19587_s1 + $0x238] sm:$0xff] }
  0xc9   :  { %v12292_v51 = vcombine.high %v178_v58, %v186_v47  ;;  %v12291_v57 = vcombine.low %v178_v58, %v186_v47  ;;  %v313_v58 = vld [vmem:[%s19587_s1 + $0x670] sm:$0xff]  ;;  %v306_v47 = vld [vmem:[%s19587_s1 + $0x638] sm:$0xff] }
  0xca   :  { %1904 = vmatpush1.bf16.msra.mxu0 %v12241_v33  ;;  %1947 = vmatpush1.bf16.msra.mxu1 %v12243_v34  ;;  %v282_v33 = vld [vmem:[%s19587_s1 + $0x578] sm:$0xff]  ;;  %v12369_v34 = vcombine.low %v257_v22, %v265_v23  ;;  %v2322_v23 = vld [vmem:[%s19589_s3 + $0x40] sm:$0xff] }
  0xcb   :  { %1905 = vmatprep.subr.bf16.mxu0 %v12258_v35  ;;  %1948 = vmatprep.subr.bf16.mxu1 %v12260_v36  ;;  %v12371_v35 = vcombine.low %v258_v24, %v266_v25  ;;  %v12386_v36 = vcombine.high %v273_v30, %v281_v31  ;;  %v12388_v37 = vcombine.high %v274_v32, %v282_v33  ;;  %v2326_v24 = vld [vmem:[%s19589_s3 + $0x60] sm:$0xff]  ;;  %v2323_v25 = vld [vmem:[%s19589_s3 + $0x48] sm:$0xff] }
  0xce   :  { %1906 = vmatpush1.bf16.msra.mxu0 %v12257_v41  ;;  %1949 = vmatpush1.bf16.msra.mxu1 %v12259_v42  ;;  %v298_v41 = vld [vmem:[%s19587_s1 + $0x5f8] sm:$0xff]  ;;  %v12385_v42 = vcombine.low %v273_v30, %v281_v31  ;;  %v2330_v31 = vld [vmem:[%s19589_s3 + $0x80] sm:$0xff] }
  0xcf   :  { %1907 = vmatprep.subr.bf16.mxu0 %v12274_v43  ;;  %1950 = vmatprep.subr.bf16.mxu1 %v12276_v44  ;;  %v12387_v43 = vcombine.low %v274_v32, %v282_v33  ;;  %v12402_v44 = vcombine.high %v289_v38, %v297_v39  ;;  %v12404_v45 = vcombine.high %v290_v40, %v298_v41  ;;  %v2334_v32 = vld [vmem:[%s19589_s3 + $0xa0] sm:$0xff]  ;;  %v2331_v33 = vld [vmem:[%s19589_s3 + $0x88] sm:$0xff] }
  0xd2   :  { %1908 = vmatpush1.bf16.msra.mxu0 %v12273_v48  ;;  %1951 = vmatpush1.bf16.msra.mxu1 %v12275_v49  ;;  %v314_v48 = vld [vmem:[%s19587_s1 + $0x678] sm:$0xff]  ;;  %v12401_v49 = vcombine.low %v289_v38, %v297_v39  ;;  %v2338_v39 = vld [vmem:[%s19589_s3 + $0xc0] sm:$0xff] }
  0xd3   :  { %1909 = vmatprep.subr.bf16.mxu0 %v12290_v50  ;;  %1952 = vmatprep.subr.bf16.mxu1 %v12292_v51  ;;  %v12403_v50 = vcombine.low %v290_v40, %v298_v41  ;;  %v12418_v51 = vcombine.high %v305_v46, %v313_v58  ;;  %v12420_v52 = vcombine.high %v306_v47, %v314_v48  ;;  %v2342_v40 = vld [vmem:[%s19589_s3 + $0xe0] sm:$0xff]  ;;  %v2343_v41 = vld [vmem:[%s19589_s3 + $0xe8] sm:$0xff] }
  0xd6   :  { %1910 = vmatpush1.bf16.msra.mxu0 %v12289_v56  ;;  %1953 = vmatpush1.bf16.msra.mxu1 %v12291_v57  ;;  %v330_v56 = vld [vmem:[%s19587_s1 + $0x6f8] sm:$0xff]  ;;  %v12417_v57 = vcombine.low %v305_v46, %v313_v58  ;;  %v2346_v58 = vld [vmem:[%s19589_s3 + $0x100] sm:$0xff] }
  0xd7   :  { %1911 = vmatprep.subr.bf16.mxu0 %v12306_v59  ;;  %1954 = vmatprep.subr.bf16.mxu1 %v12308_v60  ;;  %v12419_v59 = vcombine.low %v306_v47, %v314_v48  ;;  %v12434_v60 = vcombine.high %v321_v53, %v329_v54  ;;  %v12436_v61 = vcombine.high %v322_v55, %v330_v56  ;;  %v2350_v47 = vld [vmem:[%s19589_s3 + $0x120] sm:$0xff]  ;;  %v2347_v48 = vld [vmem:[%s19589_s3 + $0x108] sm:$0xff] }
  0xda   :  { %1912 = vmatpush1.bf16.msra.mxu0 %v12305_v1  ;;  %1955 = vmatpush1.bf16.msra.mxu1 %v12307_v2  ;;  %v346_v1 = vld [vmem:[%s19587_s1 + $0x778] sm:$0xff]  ;;  %v12433_v2 = vcombine.low %v321_v53, %v329_v54  ;;  %v12502_v53 = vcombine.high %v2346_v58, %v2350_v47 }
  0xdb   :  { %1913 = vmatprep.subr.bf16.mxu0 %v12322_v3  ;;  %1956 = vmatprep.subr.bf16.mxu1 %v12324_v4  ;;  %v12435_v3 = vcombine.low %v322_v55, %v330_v56  ;;  %v12450_v4 = vcombine.high %v337_v62, %v345_v63  ;;  %v12452_v5 = vcombine.high %v338_v0, %v346_v1  ;;  %v2354_v55 = vld [vmem:[%s19589_s3 + $0x140] sm:$0xff] }
  0xdc   :  { %v2358_v56 = vld [vmem:[%s19589_s3 + $0x160] sm:$0xff] }
  0xde   :  { %1914 = vmatpush1.bf16.msra.mxu0 %v12321_v9  ;;  %1957 = vmatpush1.bf16.msra.mxu1 %v12323_v10  ;;  %v362_v9 = vld [vmem:[%s19587_s1 + $0x7f8] sm:$0xff]  ;;  %v12449_v10 = vcombine.low %v337_v62, %v345_v63  ;;  %v15333_v62 = vld [vmem:[%s19590_s2] sm:$0xff] }
  0xdf   :  { %1915 = vmatprep.subr.bf16.mxu0 %v12338_v11  ;;  %1958 = vmatprep.subr.bf16.mxu1 %v12340_v12  ;;  %v12451_v11 = vcombine.low %v338_v0, %v346_v1  ;;  %v12466_v12 = vcombine.high %v353_v6, %v361_v7  ;;  %v12468_v13 = vcombine.high %v354_v8, %v362_v9 }
  0xe2   :  { %1916 = vmatpush1.bf16.msra.mxu0 %v12337_v18  ;;  %1959 = vmatpush1.bf16.msra.mxu1 %v12339_v19  ;;  %v2319_v18 = vld [vmem:[%s19589_s3 + $0x28] sm:$0xff]  ;;  %v12465_v19 = vcombine.low %v353_v6, %v361_v7  ;;  %v2366_v6 = vld [vmem:[%s19589_s3 + $0x1a0] sm:$0xff] }
  0xe3   :  { %1917 = vmatprep.subr.bf16.mxu0 %v12354_v20  ;;  %1960 = vmatprep.subr.bf16.mxu1 %v12356_v21  ;;  %v12467_v20 = vcombine.low %v354_v8, %v362_v9  ;;  %v12470_v21 = vcombine.high %v2314_v15, %v2318_v16  ;;  %v12472_v22 = vcombine.high %v2315_v17, %v2319_v18  ;;  %v2363_v8 = vld [vmem:[%s19589_s3 + $0x188] sm:$0xff] }
  0xe4   :  { %v2367_v9 = vld [vmem:[%s19589_s3 + $0x1a8] sm:$0xff] }
  0xe6   :  { %1918 = vmatpush1.bf16.msra.mxu0 %v12353_v26  ;;  %1961 = vmatpush1.bf16.msra.mxu1 %v12355_v27  ;;  %v2327_v26 = vld [vmem:[%s19589_s3 + $0x68] sm:$0xff]  ;;  %v12469_v27 = vcombine.low %v2314_v15, %v2318_v16 }
  0xe7   :  { %1919 = vmatprep.subr.bf16.mxu0 %v12370_v28  ;;  %1962 = vmatprep.subr.bf16.mxu1 %v12372_v29  ;;  %v12471_v28 = vcombine.low %v2315_v17, %v2319_v18  ;;  %v12478_v29 = vcombine.high %v2322_v23, %v2326_v24  ;;  %v12480_v30 = vcombine.high %v2323_v25, %v2327_v26  ;;  %v15375_v18 = vld [vmem:[%s19589_s3 + $0x1c8] sm:$0xff] }
  0xea   :  { %1920 = vmatpush1.bf16.msra.mxu0 %v12369_v34  ;;  %1963 = vmatpush1.bf16.msra.mxu1 %v12371_v35  ;;  %v2335_v34 = vld [vmem:[%s19589_s3 + $0xa8] sm:$0xff]  ;;  %v12477_v35 = vcombine.low %v2322_v23, %v2326_v24  ;;  %v12520_v23 = vcombine.high %v2363_v8, %v2367_v9  ;;  %v15387_v24 = vld [vmem:[%s19589_s3 + $0x200] sm:$0xff] }
  0xeb   :  { %1921 = vmatprep.subr.bf16.mxu0 %v12386_v36  ;;  %1964 = vmatprep.subr.bf16.mxu1 %v12388_v37  ;;  %v12479_v36 = vcombine.low %v2323_v25, %v2327_v26  ;;  %v12486_v37 = vcombine.high %v2330_v31, %v2334_v32  ;;  %v12488_v38 = vcombine.high %v2331_v33, %v2335_v34 }
  0xee   :  { %1922 = vmatpush1.bf16.msra.mxu0 %v12385_v42  ;;  %1965 = vmatpush1.bf16.msra.mxu1 %v12387_v43  ;;  %v2090_v42 = vlaneseq  ;;  %v12485_v43 = vcombine.low %v2330_v31, %v2334_v32  ;;  %v15401_v31 = vld [vmem:[%s19589_s3 + $0x208] sm:$0xff] }
  0xef   :  { %1923 = vmatprep.subr.bf16.mxu0 %v12402_v44  ;;  %1966 = vmatprep.subr.bf16.mxu1 %v12404_v45  ;;  %v12487_v44 = vcombine.low %v2331_v33, %v2335_v34  ;;  %v12494_v45 = vcombine.high %v2338_v39, %v2342_v40  ;;  %v15406_v32 = vld [vmem:[%s19589_s3 + $0x228] sm:$0xff] }
  0xf2   :  { %1924 = vmatpush1.bf16.msra.mxu0 %v12401_v49  ;;  %1967 = vmatpush1.bf16.msra.mxu1 %v12403_v50  ;;  %v2351_v49 = vld [vmem:[%s19589_s3 + $0x128] sm:$0xff]  ;;  %v15313_v50 = vshrl.u32 %v2090_v42, 7 }
  0xf3   :  { %1925 = vmatprep.subr.bf16.mxu0 %v12418_v51  ;;  %1968 = vmatprep.subr.bf16.mxu1 %v12420_v52  ;;  %v12493_v51 = vcombine.low %v2338_v39, %v2342_v40  ;;  %v12504_v54 = vcombine.high %v2347_v48, %v2351_v49  ;;  %v12503_v1 = vcombine.low %v2347_v48, %v2351_v49 }
  0xf4   :  { %v15336_v63 = vsub.s32 1, %v15313_v50  ;;  %v15339_v0 = vsub.s32 2, %v15313_v50 }
  0xf6   :  { %1926 = vmatpush1.bf16.msra.mxu0 %v12417_v57  ;;  %1969 = vmatpush1.bf16.msra.mxu1 %v12419_v59  ;;  %v15322_v57 = vsub.s32 0, %v15313_v50  ;;  %v2355_v59 = vld [vmem:[%s19589_s3 + $0x148] sm:$0xff]  ;;  %v2101_v15 = vrot.slane %v15333_v62, %v15339_v0 }
  0xf7   :  { %1927 = vmatprep.subr.bf16.mxu0 %v12434_v60  ;;  %1970 = vmatprep.subr.bf16.mxu1 %v12436_v61  ;;  %v2359_v60 = vld [vmem:[%s19589_s3 + $0x168] sm:$0xff]  ;;  %v12501_v61 = vcombine.low %v2346_v58, %v2350_v47  ;;  %v12536_v58 = vcombine.high %v15401_v31, %v15406_v32 }
  0xf8   :  { %v2093_v7 = vrot.slane %v15333_v62, %v15322_v57  ;;  %v12511_v16 = vcombine.low %v2355_v59, %v2359_v60 }
  0xfa   :  { %1928 = vmatpush1.bf16.msra.mxu0 %v12433_v2  ;;  %1971 = vmatpush1.bf16.msra.mxu1 %v12435_v3  ;;  %v12510_v2 = vcombine.high %v2354_v55, %v2358_v56  ;;  %v15342_v3 = vsub.s32 3, %v15313_v50 }
  0xfb   :  { %1929 = vmatprep.subr.bf16.mxu0 %v12450_v4  ;;  %1972 = vmatprep.subr.bf16.mxu1 %v12452_v5  ;;  %v12512_v4 = vcombine.high %v2355_v59, %v2359_v60  ;;  %v2362_v5 = vld [vmem:[%s19589_s3 + $0x180] sm:$0xff] }
  0xfc   :  { %v12518_v17 = vcombine.high %v2362_v5, %v2366_v6 }
  0xfe   :  { %1930 = vmatpush1.bf16.msra.mxu0 %v12449_v10  ;;  %1973 = vmatpush1.bf16.msra.mxu1 %v12451_v11  ;;  %v2097_v10 = vrot.slane %v15333_v62, %v15336_v63  ;;  %v12509_v11 = vcombine.low %v2354_v55, %v2358_v56 }
  0xff   :  { %1931 = vmatprep.subr.bf16.mxu0 %v12466_v12  ;;  %1974 = vmatprep.subr.bf16.mxu1 %v12468_v13  ;;  %v15363_v12 = vld [vmem:[%s19589_s3 + $0x1c0] sm:$0xff] }
 0x100   :  { %v15368_v13 = vld [vmem:[%s19589_s3 + $0x1e0] sm:$0xff] }
 0x102   :  { %1932 = vmatpush1.bf16.msra.mxu0 %v12465_v19  ;;  %1975 = vmatpush1.bf16.msra.mxu1 %v12467_v20  ;;  %v15380_v19 = vld [vmem:[%s19589_s3 + $0x1e8] sm:$0xff]  ;;  %v2105_v20 = vrot.slane %v15333_v62, %v15342_v3 }
 0x103   :  { %8500 = vmatprep.subr.bf16.mxu0 %v12470_v21  ;;  %8844 = vmatprep.subr.bf16.mxu1 %v12472_v22  ;;  %v12517_v22 = vcombine.low %v2362_v5, %v2366_v6  ;;  %v2387_v5 = vld [vmem:[%s19589_s3 + $0x248] sm:$0xff] }
 0x104   :  { %v2391_v6 = vld [vmem:[%s19589_s3 + $0x268] sm:$0xff] }
 0x105   :  { %1934 = vmatmul.mubr.bf16.vlgmr.msra.gmra.mrb[12].mxu0 %v14679_v14  ;;  %1977 = vmatmul.mubr.bf16.vlgmr.msra.gmra.mrb[12].mxu1 %v14679_v14  ;;  %v2339_v14 = vld [vmem:[%s19589_s3 + $0xc8] sm:$0xff] }
 0x106   :  { %8501 = vmatpush1.bf16.msra.mxu0 %v12469_v27  ;;  %8845 = vmatpush1.bf16.msra.mxu1 %v12471_v28  ;;  %v12496_v46 = vcombine.high %v2339_v14, %v2343_v41  ;;  %v12495_v52 = vcombine.low %v2339_v14, %v2343_v41  ;;  %v12519_v27 = vcombine.low %v2363_v8, %v2367_v9 }
 0x107   :  { %8502 = vmatprep.subr.bf16.mxu0 %v12478_v29  ;;  %8846 = vmatprep.subr.bf16.mxu1 %v12480_v30  ;;  %v12525_v28 = vcombine.low %v15363_v12, %v15368_v13  ;;  %v12526_v29 = vcombine.high %v15363_v12, %v15368_v13  ;;  %v15396_v30 = vld [vmem:[%s19589_s3 + $0x220] sm:$0xff]  ;;  %v12535_v12 = vcombine.low %v15401_v31, %v15406_v32  ;;  %v2407_v31 = vld [vmem:[%s19589_s3 + $0x2e8] sm:$0xff] }
 0x108   :  { %v12533_v9 = vcombine.low %v15387_v24, %v15396_v30 }
 0x10a   :  { %8503 = vmatpush1.bf16.msra.mxu0 %v12477_v35  ;;  %8847 = vmatpush1.bf16.msra.mxu1 %v12479_v36  ;;  %v12527_v36 = vcombine.low %v15375_v18, %v15380_v19 }
 0x10b   :  { %8504 = vmatprep.subr.bf16.mxu0 %v12486_v37  ;;  %8848 = vmatprep.subr.bf16.mxu1 %v12488_v38  ;;  %v12528_v37 = vcombine.high %v15375_v18, %v15380_v19  ;;  %v2398_v18 = vld [vmem:[%s19589_s3 + $0x2a0] sm:$0xff] }
 0x10e   :  { %8505 = vmatpush1.bf16.msra.mxu0 %v12485_v43  ;;  %8849 = vmatpush1.bf16.msra.mxu1 %v12487_v44 }
 0x10f   :  { %8506 = vmatprep.subr.bf16.mxu0 %v12494_v45  ;;  %8850 = vmatprep.subr.bf16.mxu1 %v12496_v46  ;;  %v12534_v46 = vcombine.high %v15387_v24, %v15396_v30  ;;  %v2403_v30 = vld [vmem:[%s19589_s3 + $0x2c8] sm:$0xff] }
 0x112   :  { %8507 = vmatpush1.bf16.msra.mxu0 %v12493_v51  ;;  %8851 = vmatpush1.bf16.msra.mxu1 %v12495_v52 }
 0x113   :  { %8508 = vmatprep.subr.bf16.mxu0 %v12502_v53  ;;  %8852 = vmatprep.subr.bf16.mxu1 %v12504_v54 }
 0x116   :  { %8509 = vmatpush1.bf16.msra.mxu0 %v12501_v61  ;;  %8853 = vmatpush1.bf16.msra.mxu1 %v12503_v1  ;;  %v2386_v61 = vld [vmem:[%s19589_s3 + $0x240] sm:$0xff] }
 0x117   :  { %8510 = vmatprep.subr.bf16.mxu0 %v12510_v2  ;;  %8854 = vmatprep.subr.bf16.mxu1 %v12512_v4  ;;  %v2390_v1 = vld [vmem:[%s19589_s3 + $0x260] sm:$0xff] }
 0x118   :  { %v1677_v21 = vpop.f32.mrb[0].mxu0  ;;  %v1720_v33 = vpop.f32.mrb[0].mxu1  ;;  %v12542_v13 = vcombine.high %v2386_v61, %v2390_v1  ;;  %v12541_v24 = vcombine.low %v2386_v61, %v2390_v1  ;;  %v2434_v1 = vld [vmem:[%s19589_s3 + $0x3c0] sm:$0xff] }
 0x119   :  { %v2170_v25 = vadd.f32 %v2093_v7, %v1677_v21  ;;  %v1679_v26 = vpop.f32.mrb[1].mxu0  ;;  %v2172_v38 = vadd.f32 %v2101_v15, %v1720_v33  ;;  %v1722_v39 = vpop.f32.mrb[1].mxu1  ;;  %v2395_v21 = vld [vmem:[%s19589_s3 + $0x288] sm:$0xff] }
 0x11a   :  { %v2171_v34 = vadd.f32 %v2097_v10, %v1679_v26  ;;  %v1681_v35 = vpop.f32.mrb[2].mxu0  ;;  %8511 = vmatpush1.bf16.msra.mxu0 %v12509_v11  ;;  %8855 = vmatpush1.bf16.msra.mxu1 %v12511_v16  ;;  %v2173_v42 = vadd.f32 %v2105_v20, %v1722_v39  ;;  %v1724_v43 = vpop.f32.mrb[2].mxu1  ;;  %v12544_v16 = vcombine.high %v2387_v5, %v2391_v6  ;;  %v2415_v39 = vld [vmem:[%s19589_s3 + $0x328] sm:$0xff] }
 0x11b   :  { %vm2202_vm0 = vcmp.gt.f32.partialorder %v2170_v25, 0.0  ;;  %v2234_v40 = vmul.f32 0.01, %v2170_v25  ;;  %v2186_v14 = vadd.f32 %v2093_v7, %v1681_v35  ;;  %v1683_v41 = vpop.f32.mrb[3].mxu0  ;;  %8512 = vmatprep.subr.bf16.mxu0 %v12518_v17  ;;  %8856 = vmatprep.subr.bf16.mxu1 %v12520_v23  ;;  %v1726_v47 = vpop.f32.mrb[3].mxu1  ;;  %vm2204_vm4 = vcmp.gt.f32.partialorder %v2172_v38, 0.0 }
 0x11c   :  { %v2235_v44 = vmul.f32 0.01, %v2171_v34  ;;  %v2187_v45 = vadd.f32 %v2097_v10, %v1683_v41  ;;  %vm2203_vm1 = vcmp.gt.f32.partialorder %v2171_v34, 0.0  ;;  %v2236_v49 = vmul.f32 0.01, %v2172_v38  ;;  %v2394_v17 = vld [vmem:[%s19589_s3 + $0x280] sm:$0xff] }
 0x11d   :  { %vm2218_vm2 = vcmp.gt.f32.partialorder %v2186_v14, 0.0  ;;  %v2250_v48 = vmul.f32 0.01, %v2186_v14  ;;  %v2266_v51 = vsel %vm2202_vm0, %v2170_v25, %v2234_v40  ;;  %vm2205_vm5 = vcmp.gt.f32.partialorder %v2173_v42, 0.0 }
 0x11e   :  { %vm2219_vm3 = vcmp.gt.f32.partialorder %v2187_v45, 0.0  ;;  %v2251_v52 = vmul.f32 0.01, %v2187_v45  ;;  %8513 = vmatpush1.bf16.msra.mxu0 %v12517_v22  ;;  %8857 = vmatpush1.bf16.msra.mxu1 %v12519_v27  ;;  %v2237_v54 = vmul.f32 0.01, %v2173_v42  ;;  %v2188_v55 = vadd.f32 %v2101_v15, %v1724_v43  ;;  %v2399_v22 = vld [vmem:[%s19589_s3 + $0x2a8] sm:$0xff] }
 0x11f   :  { %v2282_v53 = vsel %vm2218_vm2, %v2186_v14, %v2250_v48  ;;  %8514 = vmatprep.subr.bf16.mxu0 %v12526_v29  ;;  %v2267_v56 = vsel %vm2203_vm1, %v2171_v34, %v2235_v44  ;;  %8858 = vmatprep.subr.bf16.mxu1 %v12528_v37  ;;  %v2189_v2 = vadd.f32 %v2105_v20, %v1726_v47  ;;  %v2406_v29 = vld [vmem:[%s19589_s3 + $0x2e0] sm:$0xff] }
 0x120   :  { %v15417_v59 = vpack.c.bf16 %v2282_v53, %v2266_v51  ;;  %v2283_v60 = vsel %vm2219_vm3, %v2187_v45, %v2251_v52  ;;  %v2268_v7 = vsel %vm2204_vm4, %v2172_v38, %v2236_v49  ;;  %vm2220_vm6 = vcmp.gt.f32.partialorder %v2188_v55, 0.0  ;;  %v2414_v37 = vld [vmem:[%s19589_s3 + $0x320] sm:$0xff]  ;;  %v2411_v38 = vld [vmem:[%s19589_s3 + $0x308] sm:$0xff] }
 0x121   :  { %v15425_v4 = vpack.c.bf16 %v2283_v60, %v2267_v56  ;;  %v2252_v8 = vmul.f32 0.01, %v2188_v55  ;;  %v2269_v10 = vsel %vm2205_vm5, %v2173_v42, %v2237_v54  ;;  %vm2221_vm7 = vcmp.gt.f32.partialorder %v2189_v2, 0.0  ;;  %v2418_v43 = vld [vmem:[%s19589_s3 + $0x340] sm:$0xff]  ;;  %v2419_v45 = vld [vmem:[%s19589_s3 + $0x348] sm:$0xff] }
 0x122   :  { %8515 = vmatpush1.bf16.msra.mxu0 %v12525_v28  ;;  %v2253_v11 = vmul.f32 0.01, %v2189_v2  ;;  %8859 = vmatpush1.bf16.msra.mxu1 %v12527_v36  ;;  %v12543_v25 = vcombine.low %v2387_v5, %v2391_v6  ;;  %v12550_v26 = vcombine.high %v2394_v17, %v2398_v18  ;;  %v12552_v27 = vcombine.high %v2395_v21, %v2399_v22  ;;  %v2402_v28 = vld [vmem:[%s19589_s3 + $0x2c0] sm:$0xff]  ;;  %v2427_v53 = vld [vmem:[%s19589_s3 + $0x388] sm:$0xff] }
 0x123   :  { %8532 = vmatprep.mubr.bf16.mxu0 %v15425_v4  ;;  %v2284_v15 = vsel %vm2220_vm6, %v2188_v55, %v2252_v8  ;;  %8876 = vmatprep.mubr.bf16.mxu1 %v15425_v4  ;;  %v12549_v32 = vcombine.low %v2394_v17, %v2398_v18  ;;  %v12551_v33 = vcombine.low %v2395_v21, %v2399_v22  ;;  %v2410_v36 = vld [vmem:[%s19589_s3 + $0x300] sm:$0xff]  ;;  %v2431_v54 = vld [vmem:[%s19589_s3 + $0x3a8] sm:$0xff] }
 0x124   :  { %8516 = vmatprep.subr.bf16.mxu0 %v12534_v46  ;;  %v15447_v19 = vpack.c.bf16 %v2284_v15, %v2268_v7  ;;  %v2285_v20 = vsel %vm2221_vm7, %v2189_v2, %v2253_v11  ;;  %8860 = vmatprep.subr.bf16.mxu1 %v12536_v58  ;;  %v12558_v34 = vcombine.high %v2402_v28, %v2406_v29  ;;  %v2422_v44 = vld [vmem:[%s19589_s3 + $0x360] sm:$0xff]  ;;  %v2423_v46 = vld [vmem:[%s19589_s3 + $0x368] sm:$0xff] }
 0x125   :  { %v15455_v23 = vpack.c.bf16 %v2285_v20, %v2269_v10  ;;  %v12560_v35 = vcombine.high %v2403_v30, %v2407_v31  ;;  %v12557_v40 = vcombine.low %v2402_v28, %v2406_v29  ;;  %v12559_v14 = vcombine.low %v2403_v30, %v2407_v31  ;;  %v2426_v51 = vld [vmem:[%s19589_s3 + $0x380] sm:$0xff]  ;;  %v2435_v5 = vld [vmem:[%s19589_s3 + $0x3c8] sm:$0xff] }
 0x126   :  { %8517 = vmatpush1.bf16.msra.mxu0 %v12533_v9  ;;  %8861 = vmatpush1.bf16.msra.mxu1 %v12535_v12  ;;  %v12566_v41 = vcombine.high %v2410_v36, %v2414_v37  ;;  %v12568_v42 = vcombine.high %v2411_v38, %v2415_v39  ;;  %v12565_v58 = vcombine.low %v2410_v36, %v2414_v37  ;;  %v2430_v52 = vld [vmem:[%s19589_s3 + $0x3a0] sm:$0xff]  ;;  %v2439_v6 = vld [vmem:[%s19589_s3 + $0x3e8] sm:$0xff] }
 0x127   :  { %8518 = vmatprep.subr.bf16.mxu0 %v12542_v13  ;;  %8862 = vmatprep.subr.bf16.mxu1 %v12544_v16  ;;  %v12567_v47 = vcombine.low %v2411_v38, %v2415_v39  ;;  %v12574_v48 = vcombine.high %v2418_v43, %v2422_v44  ;;  %v12576_v49 = vcombine.high %v2419_v45, %v2423_v46  ;;  %v2438_v2 = vld [vmem:[%s19589_s3 + $0x3e0] sm:$0xff]  ;;  %v2443_v13 = vld [vmem:[%s19589_s3 + $0x408] sm:$0xff] }
 0x128   :  { %v12573_v55 = vcombine.low %v2418_v43, %v2422_v44  ;;  %v12575_v56 = vcombine.low %v2419_v45, %v2423_v46  ;;  %v12582_v60 = vcombine.high %v2426_v51, %v2430_v52  ;;  %v12584_v61 = vcombine.high %v2427_v53, %v2431_v54  ;;  %v2442_v11 = vld [vmem:[%s19589_s3 + $0x400] sm:$0xff]  ;;  %v2447_v15 = vld [vmem:[%s19589_s3 + $0x428] sm:$0xff] }
 0x129   :  { %v12581_v7 = vcombine.low %v2426_v51, %v2430_v52  ;;  %v12583_v8 = vcombine.low %v2427_v53, %v2431_v54  ;;  %v12590_v9 = vcombine.high %v2434_v1, %v2438_v2  ;;  %v12592_v10 = vcombine.high %v2435_v5, %v2439_v6  ;;  %v2446_v12 = vld [vmem:[%s19589_s3 + $0x420] sm:$0xff] }
 0x12a   :  { %8519 = vmatpush1.bf16.msra.mxu0 %v12541_v24  ;;  %8863 = vmatpush1.bf16.msra.mxu1 %v12543_v25  ;;  %v12589_v16 = vcombine.low %v2434_v1, %v2438_v2  ;;  %v12591_v17 = vcombine.low %v2435_v5, %v2439_v6  ;;  %v12598_v18 = vcombine.high %v2442_v11, %v2446_v12  ;;  %v2450_v21 = vld [vmem:[%s19589_s3 + $0x440] sm:$0xff]  ;;  %v2451_v25 = vld [vmem:[%s19589_s3 + $0x448] sm:$0xff]  ;;  %v15597_v1 = vsub.s32 5, %v15313_v50 }
 0x12b   :  { %8520 = vmatprep.subr.bf16.mxu0 %v12550_v26  ;;  %8864 = vmatprep.subr.bf16.mxu1 %v12552_v27  ;;  %v12600_v20 = vcombine.high %v2443_v13, %v2447_v15  ;;  %v2454_v22 = vld [vmem:[%s19589_s3 + $0x460] sm:$0xff]  ;;  %v12597_v24 = vcombine.low %v2442_v11, %v2446_v12  ;;  %v2455_v26 = vld [vmem:[%s19589_s3 + $0x468] sm:$0xff]  ;;  %v12599_v27 = vcombine.low %v2443_v13, %v2447_v15  ;;  %v15600_v2 = vsub.s32 6, %v15313_v50 }
 0x12c   :  { %v12606_v28 = vcombine.high %v2450_v21, %v2454_v22  ;;  %v2458_v29 = vld [vmem:[%s19589_s3 + $0x480] sm:$0xff]  ;;  %v12608_v31 = vcombine.high %v2451_v25, %v2455_v26  ;;  %v2491_v12 = vld [vmem:[%s19589_s3 + $0x588] sm:$0xff]  ;;  %v2113_v13 = vrot.slane %v15333_v62, %v15597_v1 }
 0x12d   :  { %v2462_v30 = vld [vmem:[%s19589_s3 + $0x4a0] sm:$0xff] }
 0x12e   :  { %8521 = vmatpush1.bf16.msra.mxu0 %v12549_v32  ;;  %8865 = vmatpush1.bf16.msra.mxu1 %v12551_v33  ;;  %v2459_v32 = vld [vmem:[%s19589_s3 + $0x488] sm:$0xff]  ;;  %v12614_v36 = vcombine.high %v2458_v29, %v2462_v30  ;;  %v2466_v38 = vld [vmem:[%s19589_s3 + $0x4c0] sm:$0xff] }
 0x12f   :  { %8522 = vmatprep.subr.bf16.mxu0 %v12558_v34  ;;  %8866 = vmatprep.subr.bf16.mxu1 %v12560_v35  ;;  %v2463_v33 = vld [vmem:[%s19589_s3 + $0x4a8] sm:$0xff]  ;;  %v12605_v34 = vcombine.low %v2450_v21, %v2454_v22  ;;  %v12607_v35 = vcombine.low %v2451_v25, %v2455_v26  ;;  %v2470_v39 = vld [vmem:[%s19589_s3 + $0x4e0] sm:$0xff] }
 0x130   :  { %v12616_v37 = vcombine.high %v2459_v32, %v2463_v33  ;;  %v12622_v43 = vcombine.high %v2466_v38, %v2470_v39  ;;  %v2474_v45 = vld [vmem:[%s19589_s3 + $0x500] sm:$0xff]  ;;  %v15636_v22 = vld [vmem:[%s19589_s3 + $0x5c8] sm:$0xff] }
 0x131   :  { %v2478_v46 = vld [vmem:[%s19589_s3 + $0x520] sm:$0xff] }
 0x132   :  { %8523 = vmatpush1.bf16.msra.mxu0 %v12557_v40  ;;  %8867 = vmatpush1.bf16.msra.mxu1 %v12559_v14  ;;  %v2467_v40 = vld [vmem:[%s19589_s3 + $0x4c8] sm:$0xff]  ;;  %v12630_v51 = vcombine.high %v2474_v45, %v2478_v46  ;;  %v2482_v53 = vld [vmem:[%s19589_s3 + $0x540] sm:$0xff] }
 0x133   :  { %8524 = vmatprep.subr.bf16.mxu0 %v12566_v41  ;;  %8868 = vmatprep.subr.bf16.mxu1 %v12568_v42  ;;  %v2471_v14 = vld [vmem:[%s19589_s3 + $0x4e8] sm:$0xff]  ;;  %v12613_v41 = vcombine.low %v2458_v29, %v2462_v30  ;;  %v12615_v42 = vcombine.low %v2459_v32, %v2463_v33  ;;  %v2486_v54 = vld [vmem:[%s19589_s3 + $0x560] sm:$0xff] }
 0x134   :  { %v12624_v44 = vcombine.high %v2467_v40, %v2471_v14  ;;  %v12638_v6 = vcombine.high %v2482_v53, %v2486_v54  ;;  %v12637_v15 = vcombine.low %v2482_v53, %v2486_v54  ;;  %v15648_v29 = vld [vmem:[%s19589_s3 + $0x600] sm:$0xff] }
 0x136   :  { %8525 = vmatpush1.bf16.msra.mxu0 %v12565_v58  ;;  %8869 = vmatpush1.bf16.msra.mxu1 %v12567_v47  ;;  %v2475_v58 = vld [vmem:[%s19589_s3 + $0x508] sm:$0xff] }
 0x137   :  { %8526 = vmatprep.subr.bf16.mxu0 %v12574_v48  ;;  %8870 = vmatprep.subr.bf16.mxu1 %v12576_v49  ;;  %v2479_v47 = vld [vmem:[%s19589_s3 + $0x528] sm:$0xff]  ;;  %v12621_v48 = vcombine.low %v2466_v38, %v2470_v39  ;;  %v12623_v49 = vcombine.low %v2467_v40, %v2471_v14 }
 0x138   :  { %v12632_v52 = vcombine.high %v2475_v58, %v2479_v47  ;;  %v12631_v5 = vcombine.low %v2475_v58, %v2479_v47 }
 0x13a   :  { %8527 = vmatpush1.bf16.msra.mxu0 %v12573_v55  ;;  %8871 = vmatpush1.bf16.msra.mxu1 %v12575_v56  ;;  %v15588_v55 = vsub.s32 4, %v15313_v50  ;;  %v2483_v56 = vld [vmem:[%s19589_s3 + $0x548] sm:$0xff] }
 0x13b   :  { %8528 = vmatprep.subr.bf16.mxu0 %v12582_v60  ;;  %8872 = vmatprep.subr.bf16.mxu1 %v12584_v61  ;;  %v2487_v60 = vld [vmem:[%s19589_s3 + $0x568] sm:$0xff]  ;;  %v12629_v61 = vcombine.low %v2474_v45, %v2478_v46 }
 0x13c   :  { %v2109_v11 = vrot.slane %v15333_v62, %v15588_v55 }
 0x13e   :  { %8529 = vmatpush1.bf16.msra.mxu0 %v12581_v7  ;;  %8873 = vmatpush1.bf16.msra.mxu1 %v12583_v8  ;;  %v15603_v7 = vsub.s32 7, %v15313_v50  ;;  %v12640_v8 = vcombine.high %v2483_v56, %v2487_v60  ;;  %v2495_v50 = vld [vmem:[%s19589_s3 + $0x5a8] sm:$0xff] }
 0x13f   :  { %8530 = vmatprep.subr.bf16.mxu0 %v12590_v9  ;;  %8874 = vmatprep.subr.bf16.mxu1 %v12592_v10  ;;  %v2490_v9 = vld [vmem:[%s19589_s3 + $0x580] sm:$0xff]  ;;  %v12647_v32 = vcombine.low %v2491_v12, %v2495_v50 }
 0x140   :  { %v2494_v10 = vld [vmem:[%s19589_s3 + $0x5a0] sm:$0xff]  ;;  %v2121_v25 = vrot.slane %v15333_v62, %v15603_v7 }
 0x141   :  { %v12646_v21 = vcombine.high %v2490_v9, %v2494_v10 }
 0x142   :  { %8531 = vmatpush1.bf16.msra.mxu0 %v12589_v16  ;;  %8875 = vmatpush1.bf16.msra.mxu1 %v12591_v17  ;;  %v15624_v16 = vld [vmem:[%s19589_s3 + $0x5c0] sm:$0xff] }
 0x143   :  { %8543 = vmatprep.subr.bf16.mxu0 %v12598_v18  ;;  %8887 = vmatprep.subr.bf16.mxu1 %v12600_v20  ;;  %v15629_v17 = vld [vmem:[%s19589_s3 + $0x5e0] sm:$0xff]  ;;  %v2117_v18 = vrot.slane %v15333_v62, %v15600_v2  ;;  %v12639_v20 = vcombine.low %v2483_v56, %v2487_v60 }
 0x144   :  { %v12653_v33 = vcombine.low %v15624_v16, %v15629_v17  ;;  %v15657_v62 = vld [vmem:[%s19589_s3 + $0x620] sm:$0xff] }
 0x145   :  { %8533 = vmatmul.mubr.bf16.vlgmr.msra.gmra.mrb[16].mxu0 %v15417_v59  ;;  %8877 = vmatmul.mubr.bf16.vlgmr.msra.gmra.mrb[16].mxu1 %v15417_v59 }
 0x146   :  { %8544 = vmatpush1.bf16.msra.mxu0 %v12597_v24  ;;  %8575 = vmatprep.mubr.bf16.mxu0 %v15455_v23  ;;  %v15641_v24 = vld [vmem:[%s19589_s3 + $0x5e8] sm:$0xff] }
 0x147   :  { %8888 = vmatpush1.bf16.msra.mxu1 %v12599_v27  ;;  %8919 = vmatprep.mubr.bf16.mxu1 %v15455_v23  ;;  %v12645_v27 = vcombine.low %v2490_v9, %v2494_v10  ;;  %v12655_v40 = vcombine.low %v15636_v22, %v15641_v24  ;;  %v12656_v14 = vcombine.high %v15636_v22, %v15641_v24 }
 0x148   :  { %8545 = vmatprep.subr.bf16.mxu0 %v12606_v28  ;;  %8889 = vmatprep.subr.bf16.mxu1 %v12608_v31  ;;  %v12648_v28 = vcombine.high %v2491_v12, %v2495_v50  ;;  %v2518_v12 = vld [vmem:[%s19589_s3 + $0x660] sm:$0xff] }
 0x14a   :  { %8546 = vmatpush1.bf16.msra.mxu0 %v12605_v34  ;;  %v12654_v34 = vcombine.high %v15624_v16, %v15629_v17  ;;  %v2519_v16 = vld [vmem:[%s19589_s3 + $0x668] sm:$0xff] }
 0x14b   :  { %8890 = vmatpush1.bf16.msra.mxu1 %v12607_v35  ;;  %8547 = vmatprep.subr.bf16.mxu0 %v12614_v36  ;;  %v15662_v35 = vld [vmem:[%s19589_s3 + $0x608] sm:$0xff] }
 0x14c   :  { %8891 = vmatprep.subr.bf16.mxu1 %v12616_v37  ;;  %v15667_v36 = vld [vmem:[%s19589_s3 + $0x628] sm:$0xff] }
 0x14d   :  { %v12663_v24 = vcombine.low %v15662_v35, %v15667_v36 }
 0x14e   :  { %8548 = vmatpush1.bf16.msra.mxu0 %v12613_v41 }
 0x14f   :  { %8892 = vmatpush1.bf16.msra.mxu1 %v12615_v42  ;;  %8549 = vmatprep.subr.bf16.mxu0 %v12622_v43 }
 0x150   :  { %8893 = vmatprep.subr.bf16.mxu1 %v12624_v44 }
 0x152   :  { %8550 = vmatpush1.bf16.msra.mxu0 %v12621_v48 }
 0x153   :  { %8894 = vmatpush1.bf16.msra.mxu1 %v12623_v49  ;;  %8551 = vmatprep.subr.bf16.mxu0 %v12630_v51  ;;  %v12662_v49 = vcombine.high %v15648_v29, %v15657_v62  ;;  %v12664_v51 = vcombine.high %v15662_v35, %v15667_v36 }
 0x154   :  { %8895 = vmatprep.subr.bf16.mxu1 %v12632_v52 }
 0x156   :  { %8552 = vmatpush1.bf16.msra.mxu0 %v12629_v61 }
 0x157   :  { %8896 = vmatpush1.bf16.msra.mxu1 %v12631_v5  ;;  %8553 = vmatprep.subr.bf16.mxu0 %v12638_v6 }
 0x158   :  { %v1763_v26 = vpop.f32.mrb[4].mxu0  ;;  %8897 = vmatprep.subr.bf16.mxu1 %v12640_v8  ;;  %v1806_v37 = vpop.f32.mrb[4].mxu1 }
 0x159   :  { %v2174_v30 = vadd.f32 %v2109_v11, %v1763_v26  ;;  %v1765_v31 = vpop.f32.mrb[5].mxu0  ;;  %v2176_v41 = vadd.f32 %v2117_v18, %v1806_v37  ;;  %v1808_v42 = vpop.f32.mrb[5].mxu1 }
 0x15a   :  { %v2175_v38 = vadd.f32 %v2113_v13, %v1765_v31  ;;  %v1767_v39 = vpop.f32.mrb[6].mxu0  ;;  %8554 = vmatpush1.bf16.msra.mxu0 %v12637_v15  ;;  %v2177_v46 = vadd.f32 %v2121_v25, %v1808_v42  ;;  %v1810_v58 = vpop.f32.mrb[6].mxu1  ;;  %v2515_v15 = vld [vmem:[%s19589_s3 + $0x648] sm:$0xff] }
 0x15b   :  { %vm2206_vm8 = vcmp.gt.f32.partialorder %v2174_v30, 0.0  ;;  %v2238_v43 = vmul.f32 0.01, %v2174_v30  ;;  %v2190_v44 = vadd.f32 %v2109_v11, %v1767_v39  ;;  %8898 = vmatpush1.bf16.msra.mxu1 %v12639_v20  ;;  %v1769_v45 = vpop.f32.mrb[7].mxu0  ;;  %8555 = vmatprep.subr.bf16.mxu0 %v12646_v21  ;;  %v1812_v52 = vpop.f32.mrb[7].mxu1  ;;  %vm2208_vm12 = vcmp.gt.f32.partialorder %v2176_v41, 0.0 }
 0x15c   :  { %v2239_v47 = vmul.f32 0.01, %v2175_v38  ;;  %v2191_v48 = vadd.f32 %v2113_v13, %v1769_v45  ;;  %8899 = vmatprep.subr.bf16.mxu1 %v12648_v28  ;;  %vm2207_vm9 = vcmp.gt.f32.partialorder %v2175_v38, 0.0  ;;  %v2240_v54 = vmul.f32 0.01, %v2176_v41  ;;  %v2514_v11 = vld [vmem:[%s19589_s3 + $0x640] sm:$0xff] }
 0x15d   :  { %vm2222_vm10 = vcmp.gt.f32.partialorder %v2190_v44, 0.0  ;;  %v2254_v53 = vmul.f32 0.01, %v2190_v44  ;;  %v2270_v56 = vsel %vm2206_vm8, %v2174_v30, %v2238_v43  ;;  %vm2209_vm13 = vcmp.gt.f32.partialorder %v2177_v46, 0.0  ;;  %v2522_v28 = vld [vmem:[%s19589_s3 + $0x680] sm:$0xff] }
 0x15e   :  { %vm2223_vm11 = vcmp.gt.f32.partialorder %v2191_v48, 0.0  ;;  %v2255_v60 = vmul.f32 0.01, %v2191_v48  ;;  %8556 = vmatpush1.bf16.msra.mxu0 %v12645_v27  ;;  %v2241_v5 = vmul.f32 0.01, %v2177_v46  ;;  %v2192_v6 = vadd.f32 %v2117_v18, %v1810_v58  ;;  %v2534_v39 = vld [vmem:[%s19589_s3 + $0x6e0] sm:$0xff] }
 0x15f   :  { %v2286_v61 = vsel %vm2222_vm10, %v2190_v44, %v2254_v53  ;;  %8900 = vmatpush1.bf16.msra.mxu1 %v12647_v32  ;;  %8557 = vmatprep.subr.bf16.mxu0 %v12654_v34  ;;  %v2271_v8 = vsel %vm2207_vm9, %v2175_v38, %v2239_v47  ;;  %v2193_v50 = vadd.f32 %v2121_v25, %v1812_v52  ;;  %v2523_v32 = vld [vmem:[%s19589_s3 + $0x688] sm:$0xff]  ;;  %v2530_v38 = vld [vmem:[%s19589_s3 + $0x6c0] sm:$0xff] }
 0x160   :  { %v15678_v9 = vpack.c.bf16 %v2286_v61, %v2270_v56  ;;  %v2287_v10 = vsel %vm2223_vm11, %v2191_v48, %v2255_v60  ;;  %8901 = vmatprep.subr.bf16.mxu1 %v12656_v14  ;;  %v2272_v17 = vsel %vm2208_vm12, %v2176_v41, %v2240_v54  ;;  %vm2224_vm14 = vcmp.gt.f32.partialorder %v2192_v6, 0.0  ;;  %v2535_v14 = vld [vmem:[%s19589_s3 + $0x6e8] sm:$0xff]  ;;  %v2538_v45 = vld [vmem:[%s19589_s3 + $0x700] sm:$0xff] }
 0x161   :  { %v15686_v13 = vpack.c.bf16 %v2287_v10, %v2271_v8  ;;  %v2256_v18 = vmul.f32 0.01, %v2192_v6  ;;  %v12661_v20 = vcombine.low %v15648_v29, %v15657_v62  ;;  %v2273_v21 = vsel %vm2209_vm13, %v2177_v46, %v2241_v5  ;;  %v2526_v29 = vld [vmem:[%s19589_s3 + $0x6a0] sm:$0xff]  ;;  %v2539_v58 = vld [vmem:[%s19589_s3 + $0x708] sm:$0xff] }
 0x162   :  { %8558 = vmatpush1.bf16.msra.mxu0 %v12653_v33  ;;  %vm2225_vm15 = vcmp.gt.f32.partialorder %v2193_v50, 0.0  ;;  %v2257_v22 = vmul.f32 0.01, %v2193_v50  ;;  %v12670_v25 = vcombine.high %v2514_v11, %v2518_v12  ;;  %v12672_v27 = vcombine.high %v2515_v15, %v2519_v16  ;;  %v2527_v33 = vld [vmem:[%s19589_s3 + $0x6a8] sm:$0xff]  ;;  %v2542_v46 = vld [vmem:[%s19589_s3 + $0x720] sm:$0xff] }
 0x163   :  { %8902 = vmatpush1.bf16.msra.mxu1 %v12655_v40  ;;  %8559 = vmatprep.subr.bf16.mxu0 %v12662_v49  ;;  %v2288_v26 = vsel %vm2224_vm14, %v2192_v6, %v2256_v18  ;;  %v12669_v62 = vcombine.low %v2514_v11, %v2518_v12  ;;  %v12671_v35 = vcombine.low %v2515_v15, %v2519_v16  ;;  %v2531_v40 = vld [vmem:[%s19589_s3 + $0x6c8] sm:$0xff]  ;;  %v2546_v53 = vld [vmem:[%s19589_s3 + $0x740] sm:$0xff] }
 0x164   :  { %8903 = vmatprep.subr.bf16.mxu1 %v12664_v51  ;;  %v15706_v30 = vpack.c.bf16 %v2288_v26, %v2272_v17  ;;  %v2289_v31 = vsel %vm2225_vm15, %v2193_v50, %v2257_v22  ;;  %v12678_v36 = vcombine.high %v2522_v28, %v2526_v29  ;;  %v12680_v37 = vcombine.high %v2523_v32, %v2527_v33  ;;  %v2543_v47 = vld [vmem:[%s19589_s3 + $0x728] sm:$0xff]  ;;  %v2550_v54 = vld [vmem:[%s19589_s3 + $0x760] sm:$0xff] }
 0x165   :  { %v15714_v34 = vpack.c.bf16 %v2289_v31, %v2273_v21  ;;  %v12677_v41 = vcombine.low %v2522_v28, %v2526_v29  ;;  %v12679_v42 = vcombine.low %v2523_v32, %v2527_v33  ;;  %v12686_v43 = vcombine.high %v2530_v38, %v2534_v39  ;;  %v2547_v56 = vld [vmem:[%s19589_s3 + $0x748] sm:$0xff]  ;;  %v2554_v10 = vld [vmem:[%s19589_s3 + $0x780] sm:$0xff] }
 0x166   :  { %8560 = vmatpush1.bf16.msra.mxu0 %v12661_v20  ;;  %v12688_v44 = vcombine.high %v2531_v40, %v2535_v14  ;;  %v12685_v48 = vcombine.low %v2530_v38, %v2534_v39  ;;  %v12687_v49 = vcombine.low %v2531_v40, %v2535_v14  ;;  %v12694_v51 = vcombine.high %v2538_v45, %v2542_v46  ;;  %v2551_v60 = vld [vmem:[%s19589_s3 + $0x768] sm:$0xff]  ;;  %v2558_v11 = vld [vmem:[%s19589_s3 + $0x7a0] sm:$0xff] }
 0x167   :  { %8904 = vmatpush1.bf16.msra.mxu1 %v12663_v24  ;;  %8561 = vmatprep.subr.bf16.mxu0 %v12670_v25  ;;  %v12696_v52 = vcombine.high %v2539_v58, %v2543_v47  ;;  %v12693_v61 = vcombine.low %v2538_v45, %v2542_v46  ;;  %v12695_v5 = vcombine.low %v2539_v58, %v2543_v47  ;;  %v2555_v12 = vld [vmem:[%s19589_s3 + $0x788] sm:$0xff]  ;;  %v2562_v20 = vld [vmem:[%s19589_s3 + $0x7c0] sm:$0xff] }
 0x168   :  { %8905 = vmatprep.subr.bf16.mxu1 %v12672_v27  ;;  %v12702_v6 = vcombine.high %v2546_v53, %v2550_v54  ;;  %v12704_v8 = vcombine.high %v2547_v56, %v2551_v60  ;;  %v2559_v50 = vld [vmem:[%s19589_s3 + $0x7a8] sm:$0xff]  ;;  %v12701_v15 = vcombine.low %v2546_v53, %v2550_v54  ;;  %v12703_v16 = vcombine.low %v2547_v56, %v2551_v60  ;;  %v2566_v21 = vld [vmem:[%s19589_s3 + $0x7e0] sm:$0xff] }
 0x169   :  { %v12710_v17 = vcombine.high %v2554_v10, %v2558_v11  ;;  %v12712_v18 = vcombine.high %v2555_v12, %v2559_v50  ;;  %v2563_v22 = vld [vmem:[%s19589_s3 + $0x7c8] sm:$0xff]  ;;  %v12709_v25 = vcombine.low %v2554_v10, %v2558_v11  ;;  %v12711_v26 = vcombine.low %v2555_v12, %v2559_v50  ;;  %v2570_v29 = vld [vmem:[%s19589_s3 + $0x800] sm:$0xff] }
 0x16a   :  { %8562 = vmatpush1.bf16.msra.mxu0 %v12669_v62  ;;  %v2567_v24 = vld [vmem:[%s19589_s3 + $0x7e8] sm:$0xff]  ;;  %v12718_v27 = vcombine.high %v2562_v20, %v2566_v21  ;;  %v2574_v31 = vld [vmem:[%s19589_s3 + $0x820] sm:$0xff]  ;;  %v12717_v62 = vcombine.low %v2562_v20, %v2566_v21 }
 0x16b   :  { %8906 = vmatpush1.bf16.msra.mxu1 %v12671_v35  ;;  %8563 = vmatprep.subr.bf16.mxu0 %v12678_v36  ;;  %v12720_v28 = vcombine.high %v2563_v22, %v2567_v24  ;;  %v2571_v32 = vld [vmem:[%s19589_s3 + $0x808] sm:$0xff]  ;;  %v12719_v35 = vcombine.low %v2563_v22, %v2567_v24  ;;  %v12726_v36 = vcombine.high %v2570_v29, %v2574_v31  ;;  %v2578_v38 = vld [vmem:[%s19589_s3 + $0x840] sm:$0xff] }
 0x16c   :  { %8907 = vmatprep.subr.bf16.mxu1 %v12680_v37  ;;  %v2575_v33 = vld [vmem:[%s19589_s3 + $0x828] sm:$0xff]  ;;  %v2582_v39 = vld [vmem:[%s19589_s3 + $0x860] sm:$0xff]  ;;  %v12725_v40 = vcombine.low %v2570_v29, %v2574_v31 }
 0x16d   :  { %v12728_v37 = vcombine.high %v2571_v32, %v2575_v33  ;;  %v2579_v14 = vld [vmem:[%s19589_s3 + $0x848] sm:$0xff]  ;;  %v2590_v45 = vld [vmem:[%s19589_s3 + $0x8a0] sm:$0xff] }
 0x16e   :  { %8564 = vmatpush1.bf16.msra.mxu0 %v12677_v41  ;;  %v2583_v41 = vld [vmem:[%s19589_s3 + $0x868] sm:$0xff]  ;;  %v2594_v53 = vld [vmem:[%s19589_s3 + $0x8c0] sm:$0xff] }
 0x16f   :  { %8908 = vmatpush1.bf16.msra.mxu1 %v12679_v42  ;;  %8565 = vmatprep.subr.bf16.mxu0 %v12686_v43  ;;  %v12727_v42 = vcombine.low %v2571_v32, %v2575_v33  ;;  %v12734_v43 = vcombine.high %v2578_v38, %v2582_v39  ;;  %v12736_v46 = vcombine.high %v2579_v14, %v2583_v41  ;;  %v2587_v58 = vld [vmem:[%s19589_s3 + $0x888] sm:$0xff]  ;;  %v2598_v54 = vld [vmem:[%s19589_s3 + $0x8e0] sm:$0xff] }
 0x170   :  { %8909 = vmatprep.subr.bf16.mxu1 %v12688_v44  ;;  %v2586_v44 = vld [vmem:[%s19589_s3 + $0x880] sm:$0xff]  ;;  %v2591_v47 = vld [vmem:[%s19589_s3 + $0x8a8] sm:$0xff] }
 0x171   :  { %v2595_v56 = vld [vmem:[%s19589_s3 + $0x8c8] sm:$0xff]  ;;  %v2602_v10 = vld [vmem:[%s19589_s3 + $0x900] sm:$0xff] }
 0x172   :  { %8566 = vmatpush1.bf16.msra.mxu0 %v12685_v48  ;;  %v12733_v48 = vcombine.low %v2578_v38, %v2582_v39  ;;  %v2599_v60 = vld [vmem:[%s19589_s3 + $0x8e8] sm:$0xff]  ;;  %v2606_v11 = vld [vmem:[%s19589_s3 + $0x920] sm:$0xff] }
 0x173   :  { %8910 = vmatpush1.bf16.msra.mxu1 %v12687_v49  ;;  %8567 = vmatprep.subr.bf16.mxu0 %v12694_v51  ;;  %v12735_v49 = vcombine.low %v2579_v14, %v2583_v41  ;;  %v12742_v51 = vcombine.high %v2586_v44, %v2590_v45  ;;  %v2603_v12 = vld [vmem:[%s19589_s3 + $0x908] sm:$0xff]  ;;  %v2610_v20 = vld [vmem:[%s19589_s3 + $0x940] sm:$0xff] }
 0x174   :  { %8911 = vmatprep.subr.bf16.mxu1 %v12696_v52  ;;  %v12744_v52 = vcombine.high %v2587_v58, %v2591_v47  ;;  %v2607_v50 = vld [vmem:[%s19589_s3 + $0x928] sm:$0xff]  ;;  %v2614_v21 = vld [vmem:[%s19589_s3 + $0x960] sm:$0xff] }
 0x175   :  { %v2611_v22 = vld [vmem:[%s19589_s3 + $0x948] sm:$0xff]  ;;  %v2618_v31 = vld [vmem:[%s19589_s3 + $0x980] sm:$0xff] }
 0x176   :  { %8568 = vmatpush1.bf16.msra.mxu0 %v12693_v61  ;;  %v12741_v61 = vcombine.low %v2586_v44, %v2590_v45  ;;  %v2615_v24 = vld [vmem:[%s19589_s3 + $0x968] sm:$0xff]  ;;  %v2622_v32 = vld [vmem:[%s19589_s3 + $0x9a0] sm:$0xff] }
 0x177   :  { %8912 = vmatpush1.bf16.msra.mxu1 %v12695_v5  ;;  %8569 = vmatprep.subr.bf16.mxu0 %v12702_v6  ;;  %v12743_v5 = vcombine.low %v2587_v58, %v2591_v47  ;;  %v12750_v6 = vcombine.high %v2594_v53, %v2598_v54  ;;  %v12768_v29 = vcombine.high %v2611_v22, %v2615_v24  ;;  %v15876_v38 = vld [vmem:[%s19589_s3 + $0x9c0] sm:$0xff] }
 0x178   :  { %8913 = vmatprep.subr.bf16.mxu1 %v12704_v8  ;;  %v12752_v8 = vcombine.high %v2595_v56, %v2599_v60  ;;  %v15881_v39 = vld [vmem:[%s19589_s3 + $0x9e0] sm:$0xff]  ;;  %v12767_v14 = vcombine.low %v2611_v22, %v2615_v24  ;;  %v12774_v41 = vcombine.high %v2618_v31, %v2622_v32 }
 0x179   :  { %v15900_v47 = vld [vmem:[%s19589_s3 + $0xa00] sm:$0xff] }
 0x17a   :  { %8570 = vmatpush1.bf16.msra.mxu0 %v12701_v15  ;;  %v12749_v15 = vcombine.low %v2594_v53, %v2598_v54  ;;  %v12782_v53 = vcombine.high %v15876_v38, %v15881_v39  ;;  %v15909_v54 = vld [vmem:[%s19589_s3 + $0xa20] sm:$0xff] }
 0x17b   :  { %8914 = vmatpush1.bf16.msra.mxu1 %v12703_v16  ;;  %8571 = vmatprep.subr.bf16.mxu0 %v12710_v17  ;;  %v12751_v16 = vcombine.low %v2595_v56, %v2599_v60  ;;  %v12758_v17 = vcombine.high %v2602_v10, %v2606_v11  ;;  %v15914_v56 = vld [vmem:[%s19589_s3 + $0xa08] sm:$0xff]  ;;  %v12790_v22 = vcombine.high %v15900_v47, %v15909_v54 }
 0x17c   :  { %8915 = vmatprep.subr.bf16.mxu1 %v12712_v18  ;;  %v12760_v18 = vcombine.high %v2603_v12, %v2607_v50  ;;  %v15919_v60 = vld [vmem:[%s19589_s3 + $0xa28] sm:$0xff] }
 0x17d   :  { %v12792_v24 = vcombine.high %v15914_v56, %v15919_v60 }
 0x17e   :  { %8572 = vmatpush1.bf16.msra.mxu0 %v12709_v25  ;;  %v12757_v25 = vcombine.low %v2602_v10, %v2606_v11 }
 0x17f   :  { %8916 = vmatpush1.bf16.msra.mxu1 %v12711_v26  ;;  %8573 = vmatprep.subr.bf16.mxu0 %v12718_v27  ;;  %v15855_v26 = vld [vmem:[%s19590_s2 + $0x8] sm:$0xff]  ;;  %v12759_v27 = vcombine.low %v2603_v12, %v2607_v50 }
 0x180   :  { %8917 = vmatprep.subr.bf16.mxu1 %v12720_v28  ;;  %v12766_v28 = vcombine.high %v2610_v20, %v2614_v21  ;;  %v2125_v33 = vrot.slane %v15855_v26, %v15322_v57  ;;  %v2137_v44 = vrot.slane %v15855_v26, %v15342_v3 }
 0x182   :  { %8574 = vmatpush1.bf16.msra.mxu0 %v12717_v62  ;;  %v2619_v62 = vld [vmem:[%s19589_s3 + $0x988] sm:$0xff] }
 0x183   :  { %8918 = vmatpush1.bf16.msra.mxu1 %v12719_v35  ;;  %8586 = vmatprep.subr.bf16.mxu0 %v12726_v36  ;;  %v2623_v35 = vld [vmem:[%s19589_s3 + $0x9a8] sm:$0xff]  ;;  %v2129_v36 = vrot.slane %v15855_v26, %v15336_v63 }
 0x184   :  { %8930 = vmatprep.subr.bf16.mxu1 %v12728_v37  ;;  %v12765_v37 = vcombine.low %v2610_v20, %v2614_v21  ;;  %v12776_v58 = vcombine.high %v2619_v62, %v2623_v35 }
 0x185   :  { %8576 = vmatmul.mubr.bf16.vlgmr.msra.gmra.mrb[16].mxu0 %v15447_v19 }
 0x186   :  { %8920 = vmatmul.mubr.bf16.vlgmr.msra.gmra.mrb[16].mxu1 %v15447_v19  ;;  %8587 = vmatpush1.bf16.msra.mxu0 %v12725_v40  ;;  %v2133_v40 = vrot.slane %v15855_v26, %v15339_v0 }
 0x187   :  { %8618 = vmatprep.mubr.bf16.mxu0 %v15686_v13  ;;  %8931 = vmatpush1.bf16.msra.mxu1 %v12727_v42  ;;  %v15888_v42 = vld [vmem:[%s19589_s3 + $0x9c8] sm:$0xff] }
 0x188   :  { %8962 = vmatprep.mubr.bf16.mxu1 %v15686_v13  ;;  %8588 = vmatprep.subr.bf16.mxu0 %v12734_v43  ;;  %v15893_v43 = vld [vmem:[%s19589_s3 + $0x9e8] sm:$0xff] }
 0x189   :  { %8932 = vmatprep.subr.bf16.mxu1 %v12736_v46  ;;  %v12773_v46 = vcombine.low %v2618_v31, %v2622_v32  ;;  %v12784_v10 = vcombine.high %v15888_v42, %v15893_v43 }
 0x18a   :  { %8589 = vmatpush1.bf16.msra.mxu0 %v12733_v48 }
 0x18b   :  { %8933 = vmatpush1.bf16.msra.mxu1 %v12735_v49  ;;  %8590 = vmatprep.subr.bf16.mxu0 %v12742_v51  ;;  %v12775_v51 = vcombine.low %v2619_v62, %v2623_v35 }
 0x18c   :  { %8934 = vmatprep.subr.bf16.mxu1 %v12744_v52  ;;  %v12781_v52 = vcombine.low %v15876_v38, %v15881_v39  ;;  %v2642_v38 = vld [vmem:[%s19589_s3 + $0xa40] sm:$0xff] }
 0x18d   :  { %v2646_v39 = vld [vmem:[%s19589_s3 + $0xa60] sm:$0xff] }
 0x18e   :  { %8591 = vmatpush1.bf16.msra.mxu0 %v12741_v61 }
 0x18f   :  { %8935 = vmatpush1.bf16.msra.mxu1 %v12743_v5  ;;  %8592 = vmatprep.subr.bf16.mxu0 %v12750_v6 }
 0x190   :  { %8936 = vmatprep.subr.bf16.mxu1 %v12752_v8  ;;  %v12783_v8 = vcombine.low %v15888_v42, %v15893_v43  ;;  %v2647_v42 = vld [vmem:[%s19589_s3 + $0xa68] sm:$0xff] }
 0x192   :  { %8593 = vmatpush1.bf16.msra.mxu0 %v12749_v15 }
 0x193   :  { %8937 = vmatpush1.bf16.msra.mxu1 %v12751_v16  ;;  %8594 = vmatprep.subr.bf16.mxu0 %v12758_v17 }
 0x194   :  { %8938 = vmatprep.subr.bf16.mxu1 %v12760_v18 }
 0x196   :  { %8595 = vmatpush1.bf16.msra.mxu0 %v12757_v25 }
 0x197   :  { %8939 = vmatpush1.bf16.msra.mxu1 %v12759_v27  ;;  %8596 = vmatprep.subr.bf16.mxu0 %v12766_v28 }
 0x198   :  { %v1849_v45 = vpop.f32.mrb[8].mxu0  ;;  %8940 = vmatprep.subr.bf16.mxu1 %v12768_v29  ;;  %v1892_v61 = vpop.f32.mrb[8].mxu1 }
 0x199   :  { %v2178_v48 = vadd.f32 %v2125_v33, %v1849_v45  ;;  %v1851_v49 = vpop.f32.mrb[9].mxu0  ;;  %v2180_v11 = vadd.f32 %v2133_v40, %v1892_v61  ;;  %v1894_v12 = vpop.f32.mrb[9].mxu1 }
 0x19a   :  { %v2179_v5 = vadd.f32 %v2129_v36, %v1851_v49  ;;  %v1853_v6 = vpop.f32.mrb[10].mxu0  ;;  %8597 = vmatpush1.bf16.msra.mxu0 %v12765_v37  ;;  %v2181_v17 = vadd.f32 %v2137_v44, %v1894_v12  ;;  %v1896_v18 = vpop.f32.mrb[10].mxu1  ;;  %v12798_v49 = vcombine.high %v2642_v38, %v2646_v39  ;;  %v2658_v12 = vld [vmem:[%s19589_s3 + $0xac0] sm:$0xff] }
 0x19b   :  { %vm2210_vm0 = vcmp.gt.f32.partialorder %v2178_v48, 0.0  ;;  %v2242_v50 = vmul.f32 0.01, %v2178_v48  ;;  %v2194_v15 = vadd.f32 %v2125_v33, %v1853_v6  ;;  %8941 = vmatpush1.bf16.msra.mxu1 %v12767_v14  ;;  %v1855_v16 = vpop.f32.mrb[11].mxu0  ;;  %8598 = vmatprep.subr.bf16.mxu0 %v12774_v41  ;;  %v1898_v25 = vpop.f32.mrb[11].mxu1  ;;  %vm2212_vm4 = vcmp.gt.f32.partialorder %v2180_v11, 0.0 }
 0x19c   :  { %v2243_v20 = vmul.f32 0.01, %v2179_v5  ;;  %v2195_v21 = vadd.f32 %v2129_v36, %v1855_v16  ;;  %8942 = vmatprep.subr.bf16.mxu1 %v12776_v58  ;;  %vm2211_vm1 = vcmp.gt.f32.partialorder %v2179_v5, 0.0  ;;  %v2244_v28 = vmul.f32 0.01, %v2180_v11  ;;  %v2663_v16 = vld [vmem:[%s19589_s3 + $0xae8] sm:$0xff] }
 0x19d   :  { %vm2226_vm2 = vcmp.gt.f32.partialorder %v2194_v15, 0.0  ;;  %v2258_v27 = vmul.f32 0.01, %v2194_v15  ;;  %v2274_v29 = vsel %vm2210_vm0, %v2178_v48, %v2242_v50  ;;  %vm2213_vm5 = vcmp.gt.f32.partialorder %v2181_v17, 0.0  ;;  %v2662_v50 = vld [vmem:[%s19589_s3 + $0xae0] sm:$0xff] }
 0x19e   :  { %vm2227_vm3 = vcmp.gt.f32.partialorder %v2195_v21, 0.0  ;;  %v2259_v31 = vmul.f32 0.01, %v2195_v21  ;;  %8599 = vmatpush1.bf16.msra.mxu0 %v12773_v46  ;;  %v2245_v33 = vmul.f32 0.01, %v2181_v17  ;;  %v2196_v62 = vadd.f32 %v2133_v40, %v1896_v18  ;;  %v2643_v40 = vld [vmem:[%s19589_s3 + $0xa48] sm:$0xff] }
 0x19f   :  { %v2290_v32 = vsel %vm2226_vm2, %v2194_v15, %v2258_v27  ;;  %8943 = vmatpush1.bf16.msra.mxu1 %v12775_v51  ;;  %8600 = vmatprep.subr.bf16.mxu0 %v12782_v53  ;;  %v2275_v35 = vsel %vm2211_vm1, %v2179_v5, %v2243_v20  ;;  %v2197_v14 = vadd.f32 %v2137_v44, %v1898_v25  ;;  %v2651_v5 = vld [vmem:[%s19589_s3 + $0xa88] sm:$0xff] }
 0x1a0   :  { %v15930_v36 = vpack.c.bf16 %v2290_v32, %v2274_v29  ;;  %v2291_v37 = vsel %vm2227_vm3, %v2195_v21, %v2259_v31  ;;  %8944 = vmatprep.subr.bf16.mxu1 %v12784_v10  ;;  %v2276_v43 = vsel %vm2212_vm4, %v2180_v11, %v2244_v28  ;;  %vm2228_vm6 = vcmp.gt.f32.partialorder %v2196_v62, 0.0  ;;  %v2659_v15 = vld [vmem:[%s19589_s3 + $0xac8] sm:$0xff] }
 0x1a1   :  { %v15938_v41 = vpack.c.bf16 %v2291_v37, %v2275_v35  ;;  %v2260_v45 = vmul.f32 0.01, %v2196_v62  ;;  %v12789_v46 = vcombine.low %v15900_v47, %v15909_v54  ;;  %v2277_v44 = vsel %vm2213_vm5, %v2181_v17, %v2245_v33  ;;  %v2654_v47 = vld [vmem:[%s19589_s3 + $0xaa0] sm:$0xff]  ;;  %v2667_v25 = vld [vmem:[%s19589_s3 + $0xb08] sm:$0xff] }
 0x1a2   :  { %8601 = vmatpush1.bf16.msra.mxu0 %v12781_v52  ;;  %vm2229_vm7 = vcmp.gt.f32.partialorder %v2197_v14, 0.0  ;;  %v2261_v58 = vmul.f32 0.01, %v2197_v14  ;;  %v12791_v48 = vcombine.low %v15914_v56, %v15919_v60  ;;  %v12800_v53 = vcombine.high %v2643_v40, %v2647_v42  ;;  %v2650_v52 = vld [vmem:[%s19589_s3 + $0xa80] sm:$0xff]  ;;  %v2655_v56 = vld [vmem:[%s19589_s3 + $0xaa8] sm:$0xff] }
 0x1a3   :  { %8945 = vmatpush1.bf16.msra.mxu1 %v12783_v8  ;;  %8602 = vmatprep.subr.bf16.mxu0 %v12790_v22  ;;  %v2292_v51 = vsel %vm2228_vm6, %v2196_v62, %v2260_v45  ;;  %v12797_v6 = vcombine.low %v2642_v38, %v2646_v39  ;;  %v12799_v8 = vcombine.low %v2643_v40, %v2647_v42  ;;  %v2666_v22 = vld [vmem:[%s19589_s3 + $0xb00] sm:$0xff]  ;;  %v2671_v27 = vld [vmem:[%s19589_s3 + $0xb28] sm:$0xff] }
 0x1a4   :  { %8946 = vmatprep.subr.bf16.mxu1 %v12792_v24  ;;  %v15958_v54 = vpack.c.bf16 %v2292_v51, %v2276_v43  ;;  %v2293_v61 = vsel %vm2229_vm7, %v2197_v14, %v2261_v58  ;;  %v12806_v10 = vcombine.high %v2650_v52, %v2654_v47  ;;  %v12808_v11 = vcombine.high %v2651_v5, %v2655_v56  ;;  %v2670_v24 = vld [vmem:[%s19589_s3 + $0xb20] sm:$0xff]  ;;  %v2675_v35 = vld [vmem:[%s19589_s3 + $0xb48] sm:$0xff] }
 0x1a5   :  { %v15966_v60 = vpack.c.bf16 %v2293_v61, %v2277_v44  ;;  %v12805_v17 = vcombine.low %v2650_v52, %v2654_v47  ;;  %v12807_v18 = vcombine.low %v2651_v5, %v2655_v56  ;;  %v12814_v20 = vcombine.high %v2658_v12, %v2662_v50  ;;  %v2674_v33 = vld [vmem:[%s19589_s3 + $0xb40] sm:$0xff]  ;;  %v2679_v37 = vld [vmem:[%s19589_s3 + $0xb68] sm:$0xff] }
 0x1a6   :  { %8603 = vmatpush1.bf16.msra.mxu0 %v12789_v46  ;;  %v12816_v21 = vcombine.high %v2659_v15, %v2663_v16  ;;  %v12813_v28 = vcombine.low %v2658_v12, %v2662_v50  ;;  %v12815_v29 = vcombine.low %v2659_v15, %v2663_v16  ;;  %v12822_v31 = vcombine.high %v2666_v22, %v2670_v24  ;;  %v2678_v62 = vld [vmem:[%s19589_s3 + $0xb60] sm:$0xff]  ;;  %v2683_v45 = vld [vmem:[%s19589_s3 + $0xb88] sm:$0xff] }
 0x1a7   :  { %8947 = vmatpush1.bf16.msra.mxu1 %v12791_v48  ;;  %8604 = vmatprep.subr.bf16.mxu0 %v12798_v49  ;;  %v12824_v32 = vcombine.high %v2667_v25, %v2671_v27  ;;  %v12821_v38 = vcombine.low %v2666_v22, %v2670_v24  ;;  %v12823_v39 = vcombine.low %v2667_v25, %v2671_v27  ;;  %v2682_v42 = vld [vmem:[%s19589_s3 + $0xb80] sm:$0xff]  ;;  %v2687_v46 = vld [vmem:[%s19589_s3 + $0xba8] sm:$0xff] }
 0x1a8   :  { %8948 = vmatprep.subr.bf16.mxu1 %v12800_v53  ;;  %v12830_v14 = vcombine.high %v2674_v33, %v2678_v62  ;;  %v12832_v40 = vcombine.high %v2675_v35, %v2679_v37  ;;  %v2686_v43 = vld [vmem:[%s19589_s3 + $0xba0] sm:$0xff]  ;;  %v12829_v44 = vcombine.low %v2674_v33, %v2678_v62  ;;  %v12831_v58 = vcombine.low %v2675_v35, %v2679_v37  ;;  %v2691_v52 = vld [vmem:[%s19589_s3 + $0xbc8] sm:$0xff] }
 0x1a9   :  { %v12838_v48 = vcombine.high %v2682_v42, %v2686_v43  ;;  %v12840_v49 = vcombine.high %v2683_v45, %v2687_v46  ;;  %v2690_v51 = vld [vmem:[%s19589_s3 + $0xbc0] sm:$0xff]  ;;  %v2695_v47 = vld [vmem:[%s19589_s3 + $0xbe8] sm:$0xff]  ;;  %v12837_v61 = vcombine.low %v2682_v42, %v2686_v43  ;;  %v12839_v5 = vcombine.low %v2683_v45, %v2687_v46 }
 0x1aa   :  { %8605 = vmatpush1.bf16.msra.mxu0 %v12797_v6  ;;  %v2694_v53 = vld [vmem:[%s19589_s3 + $0xbe0] sm:$0xff]  ;;  %v12848_v6 = vcombine.high %v2691_v52, %v2695_v47  ;;  %v2703_v12 = vld [vmem:[%s19589_s3 + $0xc28] sm:$0xff]  ;;  %v12847_v15 = vcombine.low %v2691_v52, %v2695_v47 }
 0x1ab   :  { %8949 = vmatpush1.bf16.msra.mxu1 %v12799_v8  ;;  %8606 = vmatprep.subr.bf16.mxu0 %v12806_v10  ;;  %v12846_v56 = vcombine.high %v2690_v51, %v2694_v53  ;;  %v2698_v8 = vld [vmem:[%s19589_s3 + $0xc00] sm:$0xff]  ;;  %v12845_v50 = vcombine.low %v2690_v51, %v2694_v53  ;;  %v2707_v22 = vld [vmem:[%s19589_s3 + $0xc48] sm:$0xff] }
 0x1ac   :  { %8950 = vmatprep.subr.bf16.mxu1 %v12808_v11  ;;  %v2702_v10 = vld [vmem:[%s19589_s3 + $0xc20] sm:$0xff]  ;;  %v2699_v11 = vld [vmem:[%s19589_s3 + $0xc08] sm:$0xff] }
 0x1ad   :  { %v12854_v16 = vcombine.high %v2698_v8, %v2702_v10  ;;  %v2711_v24 = vld [vmem:[%s19589_s3 + $0xc68] sm:$0xff]  ;;  %v12855_v25 = vcombine.low %v2699_v11, %v2703_v12 }
 0x1ae   :  { %8607 = vmatpush1.bf16.msra.mxu0 %v12805_v17  ;;  %v12856_v17 = vcombine.high %v2699_v11, %v2703_v12  ;;  %v2719_v33 = vld [vmem:[%s19589_s3 + $0xca8] sm:$0xff]  ;;  %v12863_v35 = vcombine.low %v2707_v22, %v2711_v24 }
 0x1af   :  { %8951 = vmatpush1.bf16.msra.mxu1 %v12807_v18  ;;  %8608 = vmatprep.subr.bf16.mxu0 %v12814_v20  ;;  %v2706_v18 = vld [vmem:[%s19589_s3 + $0xc40] sm:$0xff]  ;;  %v2727_v42 = vld [vmem:[%s19589_s3 + $0xce8] sm:$0xff] }
 0x1b0   :  { %8952 = vmatprep.subr.bf16.mxu1 %v12816_v21  ;;  %v2710_v20 = vld [vmem:[%s19589_s3 + $0xc60] sm:$0xff]  ;;  %v12853_v21 = vcombine.low %v2698_v8, %v2702_v10  ;;  %v2735_v51 = vld [vmem:[%s19589_s3 + $0xd28] sm:$0xff] }
 0x1b1   :  { %v12862_v27 = vcombine.high %v2706_v18, %v2710_v20  ;;  %v12861_v62 = vcombine.low %v2706_v18, %v2710_v20  ;;  %v2743_v8 = vld [vmem:[%s19589_s3 + $0xd68] sm:$0xff] }
 0x1b2   :  { %8609 = vmatpush1.bf16.msra.mxu0 %v12813_v28  ;;  %v2714_v28 = vld [vmem:[%s19589_s3 + $0xc80] sm:$0xff]  ;;  %v2747_v18 = vld [vmem:[%s19589_s3 + $0xd88] sm:$0xff] }
 0x1b3   :  { %8953 = vmatpush1.bf16.msra.mxu1 %v12815_v29  ;;  %8610 = vmatprep.subr.bf16.mxu0 %v12822_v31  ;;  %v2718_v29 = vld [vmem:[%s19589_s3 + $0xca0] sm:$0xff]  ;;  %v12864_v31 = vcombine.high %v2707_v22, %v2711_v24  ;;  %v2751_v20 = vld [vmem:[%s19589_s3 + $0xda8] sm:$0xff] }
 0x1b4   :  { %8954 = vmatprep.subr.bf16.mxu1 %v12824_v32  ;;  %v2715_v32 = vld [vmem:[%s19589_s3 + $0xc88] sm:$0xff]  ;;  %v12870_v37 = vcombine.high %v2714_v28, %v2718_v29  ;;  %v12869_v43 = vcombine.low %v2714_v28, %v2718_v29  ;;  %v16123_v24 = vld [vmem:[%s19589_s3 + $0xdc0] sm:$0xff] }
 0x1b5   :  { %v12871_v45 = vcombine.low %v2715_v32, %v2719_v33 }
 0x1b6   :  { %8611 = vmatpush1.bf16.msra.mxu0 %v12821_v38  ;;  %v12872_v38 = vcombine.high %v2715_v32, %v2719_v33  ;;  %v16140_v32 = vld [vmem:[%s19589_s3 + $0xde8] sm:$0xff]  ;;  %v2153_v33 = vrot.slane %v15855_v26, %v15603_v7 }
 0x1b7   :  { %8955 = vmatpush1.bf16.msra.mxu1 %v12823_v39  ;;  %8612 = vmatprep.subr.bf16.mxu0 %v12830_v14  ;;  %v2722_v39 = vld [vmem:[%s19589_s3 + $0xcc0] sm:$0xff] }
 0x1b8   :  { %8956 = vmatprep.subr.bf16.mxu1 %v12832_v40  ;;  %v2726_v14 = vld [vmem:[%s19589_s3 + $0xce0] sm:$0xff]  ;;  %v2723_v40 = vld [vmem:[%s19589_s3 + $0xcc8] sm:$0xff] }
 0x1b9   :  { %v12878_v46 = vcombine.high %v2722_v39, %v2726_v14  ;;  %v12877_v53 = vcombine.low %v2722_v39, %v2726_v14  ;;  %v12879_v52 = vcombine.low %v2723_v40, %v2727_v42 }
 0x1ba   :  { %8613 = vmatpush1.bf16.msra.mxu0 %v12829_v44  ;;  %v12880_v44 = vcombine.high %v2723_v40, %v2727_v42  ;;  %v12903_v40 = vcombine.low %v2747_v18, %v2751_v20 }
 0x1bb   :  { %8957 = vmatpush1.bf16.msra.mxu1 %v12831_v58  ;;  %8614 = vmatprep.subr.bf16.mxu0 %v12838_v48  ;;  %v2730_v58 = vld [vmem:[%s19589_s3 + $0xd00] sm:$0xff] }
 0x1bc   :  { %8958 = vmatprep.subr.bf16.mxu1 %v12840_v49  ;;  %v2734_v48 = vld [vmem:[%s19589_s3 + $0xd20] sm:$0xff]  ;;  %v2731_v49 = vld [vmem:[%s19589_s3 + $0xd08] sm:$0xff] }
 0x1bd   :  { %v12886_v47 = vcombine.high %v2730_v58, %v2734_v48  ;;  %v12885_v10 = vcombine.low %v2730_v58, %v2734_v48  ;;  %v12887_v11 = vcombine.low %v2731_v49, %v2735_v51 }
 0x1be   :  { %8615 = vmatpush1.bf16.msra.mxu0 %v12837_v61  ;;  %v12888_v61 = vcombine.high %v2731_v49, %v2735_v51 }
 0x1bf   :  { %8959 = vmatpush1.bf16.msra.mxu1 %v12839_v5  ;;  %8616 = vmatprep.subr.bf16.mxu0 %v12846_v56  ;;  %v2738_v5 = vld [vmem:[%s19589_s3 + $0xd40] sm:$0xff] }
 0x1c0   :  { %8960 = vmatprep.subr.bf16.mxu1 %v12848_v6  ;;  %v2742_v56 = vld [vmem:[%s19589_s3 + $0xd60] sm:$0xff]  ;;  %v2739_v6 = vld [vmem:[%s19589_s3 + $0xd48] sm:$0xff] }
 0x1c1   :  { %v12894_v12 = vcombine.high %v2738_v5, %v2742_v56  ;;  %v12893_v22 = vcombine.low %v2738_v5, %v2742_v56  ;;  %v12895_v28 = vcombine.low %v2739_v6, %v2743_v8 }
 0x1c2   :  { %8617 = vmatpush1.bf16.msra.mxu0 %v12845_v50  ;;  %v12896_v50 = vcombine.high %v2739_v6, %v2743_v8 }
 0x1c3   :  { %8961 = vmatpush1.bf16.msra.mxu1 %v12847_v15  ;;  %8629 = vmatprep.subr.bf16.mxu0 %v12854_v16  ;;  %v2746_v15 = vld [vmem:[%s19589_s3 + $0xd80] sm:$0xff] }
 0x1c4   :  { %8973 = vmatprep.subr.bf16.mxu1 %v12856_v17  ;;  %v2750_v16 = vld [vmem:[%s19589_s3 + $0xda0] sm:$0xff]  ;;  %v2141_v17 = vrot.slane %v15855_v26, %v15588_v55 }
 0x1c5   :  { %8619 = vmatmul.mubr.bf16.vlgmr.msra.gmra.mrb[16].mxu0 %v15678_v9  ;;  %v12902_v29 = vcombine.high %v2746_v15, %v2750_v16 }
 0x1c6   :  { %8963 = vmatmul.mubr.bf16.vlgmr.msra.gmra.mrb[16].mxu1 %v15678_v9  ;;  %8630 = vmatpush1.bf16.msra.mxu0 %v12853_v21  ;;  %v2145_v21 = vrot.slane %v15855_v26, %v15597_v1 }
 0x1c7   :  { %8661 = vmatprep.mubr.bf16.mxu0 %v15714_v34  ;;  %8974 = vmatpush1.bf16.msra.mxu1 %v12855_v25  ;;  %v16128_v25 = vld [vmem:[%s19589_s3 + $0xde0] sm:$0xff] }
 0x1c8   :  { %9005 = vmatprep.mubr.bf16.mxu1 %v15714_v34  ;;  %8631 = vmatprep.subr.bf16.mxu0 %v12862_v27  ;;  %v2149_v27 = vrot.slane %v15855_v26, %v15600_v2  ;;  %v12909_v42 = vcombine.low %v16123_v24, %v16128_v25  ;;  %v16156_v26 = vld [vmem:[%s19589_s3 + $0xe20] sm:$0xff] }
 0x1c9   :  { %8975 = vmatprep.subr.bf16.mxu1 %v12864_v31  ;;  %v16135_v31 = vld [vmem:[%s19589_s3 + $0xdc8] sm:$0xff] }
 0x1ca   :  { %8632 = vmatpush1.bf16.msra.mxu0 %v12861_v62  ;;  %v12911_v49 = vcombine.low %v16135_v31, %v16140_v32  ;;  %v12912_v51 = vcombine.high %v16135_v31, %v16140_v32  ;;  %v2774_v31 = vld [vmem:[%s19589_s3 + $0xe60] sm:$0xff] }
 0x1cb   :  { %8976 = vmatpush1.bf16.msra.mxu1 %v12863_v35  ;;  %8633 = vmatprep.subr.bf16.mxu0 %v12870_v37  ;;  %v12901_v35 = vcombine.low %v2746_v15, %v2750_v16  ;;  %v12904_v37 = vcombine.high %v2747_v18, %v2751_v20 }
 0x1cc   :  { %8977 = vmatprep.subr.bf16.mxu1 %v12872_v38  ;;  %v16147_v38 = vld [vmem:[%s19589_s3 + $0xe00] sm:$0xff] }
 0x1ce   :  { %8634 = vmatpush1.bf16.msra.mxu0 %v12869_v43  ;;  %v12910_v43 = vcombine.high %v16123_v24, %v16128_v25 }
 0x1cf   :  { %8978 = vmatpush1.bf16.msra.mxu1 %v12871_v45  ;;  %8635 = vmatprep.subr.bf16.mxu0 %v12878_v46  ;;  %v16161_v45 = vld [vmem:[%s19589_s3 + $0xe08] sm:$0xff] }
 0x1d0   :  { %8979 = vmatprep.subr.bf16.mxu1 %v12880_v44  ;;  %v16166_v46 = vld [vmem:[%s19589_s3 + $0xe28] sm:$0xff] }
 0x1d2   :  { %8636 = vmatpush1.bf16.msra.mxu0 %v12877_v53 }
 0x1d3   :  { %8980 = vmatpush1.bf16.msra.mxu1 %v12879_v52  ;;  %8637 = vmatprep.subr.bf16.mxu0 %v12886_v47 }
 0x1d4   :  { %8981 = vmatprep.subr.bf16.mxu1 %v12888_v61 }
 0x1d6   :  { %8638 = vmatpush1.bf16.msra.mxu0 %v12885_v10 }
 0x1d7   :  { %8982 = vmatpush1.bf16.msra.mxu1 %v12887_v11  ;;  %8639 = vmatprep.subr.bf16.mxu0 %v12894_v12  ;;  %v12918_v11 = vcombine.high %v16147_v38, %v16156_v26  ;;  %v12920_v12 = vcombine.high %v16161_v45, %v16166_v46 }
 0x1d8   :  { %v1935_v62 = vpop.f32.mrb[12].mxu0  ;;  %8983 = vmatprep.subr.bf16.mxu1 %v12896_v50  ;;  %v1978_v44 = vpop.f32.mrb[12].mxu1 }
 0x1d9   :  { %v2182_v39 = vadd.f32 %v2141_v17, %v1935_v62  ;;  %v1937_v14 = vpop.f32.mrb[13].mxu0  ;;  %v2184_v53 = vadd.f32 %v2149_v27, %v1978_v44  ;;  %v1980_v52 = vpop.f32.mrb[13].mxu1 }
 0x1da   :  { %v2183_v58 = vadd.f32 %v2145_v21, %v1937_v14  ;;  %v1939_v48 = vpop.f32.mrb[14].mxu0  ;;  %8640 = vmatpush1.bf16.msra.mxu0 %v12893_v22  ;;  %v2185_v56 = vadd.f32 %v2153_v33, %v1980_v52  ;;  %v1982_v6 = vpop.f32.mrb[14].mxu1  ;;  %v12917_v14 = vcombine.low %v16147_v38, %v16156_v26  ;;  %v2782_v38 = vld [vmem:[%s19589_s3 + $0xea0] sm:$0xff] }
 0x1db   :  { %vm2214_vm8 = vcmp.gt.f32.partialorder %v2182_v39, 0.0  ;;  %v2246_v47 = vmul.f32 0.01, %v2182_v39  ;;  %v2198_v61 = vadd.f32 %v2141_v17, %v1939_v48  ;;  %8984 = vmatpush1.bf16.msra.mxu1 %v12895_v28  ;;  %v1941_v5 = vpop.f32.mrb[15].mxu0  ;;  %8641 = vmatprep.subr.bf16.mxu0 %v12902_v29  ;;  %v1984_v50 = vpop.f32.mrb[15].mxu1  ;;  %vm2216_vm12 = vcmp.gt.f32.partialorder %v2184_v53, 0.0 }
 0x1dc   :  { %v2247_v8 = vmul.f32 0.01, %v2183_v58  ;;  %v2199_v10 = vadd.f32 %v2145_v21, %v1941_v5  ;;  %8985 = vmatprep.subr.bf16.mxu1 %v12904_v37  ;;  %vm2215_vm9 = vcmp.gt.f32.partialorder %v2183_v58, 0.0  ;;  %v2248_v16 = vmul.f32 0.01, %v2184_v53  ;;  %v2770_v29 = vld [vmem:[%s19589_s3 + $0xe40] sm:$0xff] }
 0x1dd   :  { %vm2230_vm10 = vcmp.gt.f32.partialorder %v2198_v61, 0.0  ;;  %v2262_v15 = vmul.f32 0.01, %v2198_v61  ;;  %v2278_v17 = vsel %vm2214_vm8, %v2182_v39, %v2246_v47  ;;  %vm2217_vm13 = vcmp.gt.f32.partialorder %v2185_v56, 0.0  ;;  %v2786_v5 = vld [vmem:[%s19589_s3 + $0xec0] sm:$0xff] }
 0x1de   :  { %vm2231_vm11 = vcmp.gt.f32.partialorder %v2199_v10, 0.0  ;;  %v2263_v18 = vmul.f32 0.01, %v2199_v10  ;;  %8642 = vmatpush1.bf16.msra.mxu0 %v12901_v35  ;;  %v2249_v21 = vmul.f32 0.01, %v2185_v56  ;;  %v2200_v22 = vadd.f32 %v2149_v27, %v1982_v6  ;;  %v2771_v27 = vld [vmem:[%s19589_s3 + $0xe48] sm:$0xff] }
 0x1df   :  { %v2294_v20 = vsel %vm2230_vm10, %v2198_v61, %v2262_v15  ;;  %8986 = vmatpush1.bf16.msra.mxu1 %v12903_v40  ;;  %8643 = vmatprep.subr.bf16.mxu0 %v12910_v43  ;;  %v2279_v24 = vsel %vm2215_vm9, %v2183_v58, %v2247_v8  ;;  %v2201_v32 = vadd.f32 %v2153_v33, %v1984_v50  ;;  %v2775_v35 = vld [vmem:[%s19589_s3 + $0xe68] sm:$0xff]  ;;  %v2794_v15 = vld [vmem:[%s19589_s3 + $0xf00] sm:$0xff] }
 0x1e0   :  { %v16177_v25 = vpack.c.bf16 %v2294_v20, %v2278_v17  ;;  %v2295_v28 = vsel %vm2231_vm11, %v2199_v10, %v2263_v18  ;;  %8987 = vmatprep.subr.bf16.mxu1 %v12912_v51  ;;  %v2280_v37 = vsel %vm2216_vm12, %v2184_v53, %v2248_v16  ;;  %vm2232_vm14 = vcmp.gt.f32.partialorder %v2200_v22, 0.0  ;;  %v2787_v6 = vld [vmem:[%s19589_s3 + $0xec8] sm:$0xff]  ;;  %v2798_v16 = vld [vmem:[%s19589_s3 + $0xf20] sm:$0xff] }
 0x1e1   :  { %v16185_v62 = vpack.c.bf16 %v2295_v28, %v2279_v24  ;;  %v2264_v39 = vmul.f32 0.01, %v2200_v22  ;;  %v2281_v33 = vsel %vm2217_vm13, %v2185_v56, %v2249_v21  ;;  %vm2233_vm15 = vcmp.gt.f32.partialorder %v2201_v32, 0.0  ;;  %v2790_v56 = vld [vmem:[%s19589_s3 + $0xee0] sm:$0xff]  ;;  %v2791_v8 = vld [vmem:[%s19589_s3 + $0xee8] sm:$0xff] }
 0x1e2   :  { %8644 = vmatpush1.bf16.msra.mxu0 %v12909_v42  ;;  %v2265_v40 = vmul.f32 0.01, %v2201_v32  ;;  %v12919_v43 = vcombine.low %v16161_v45, %v16166_v46  ;;  %v12926_v44 = vcombine.high %v2770_v29, %v2774_v31  ;;  %v12928_v48 = vcombine.high %v2771_v27, %v2775_v35  ;;  %v2778_v42 = vld [vmem:[%s19589_s3 + $0xe80] sm:$0xff]  ;;  %v2783_v45 = vld [vmem:[%s19589_s3 + $0xea8] sm:$0xff] }
 0x1e3   :  { %8988 = vmatpush1.bf16.msra.mxu1 %v12911_v49  ;;  %8645 = vmatprep.subr.bf16.mxu0 %v12918_v11  ;;  %v2296_v58 = vsel %vm2232_vm14, %v2200_v22, %v2264_v39  ;;  %v2779_v49 = vld [vmem:[%s19589_s3 + $0xe88] sm:$0xff]  ;;  %v12925_v53 = vcombine.low %v2770_v29, %v2774_v31  ;;  %v12927_v52 = vcombine.low %v2771_v27, %v2775_v35  ;;  %v2802_v28 = vld [vmem:[%s19589_s3 + $0xf40] sm:$0xff] }
 0x1e4   :  { %8989 = vmatprep.subr.bf16.mxu1 %v12920_v12  ;;  %v16205_v26 = vpack.c.bf16 %v2296_v58, %v2280_v37  ;;  %v2297_v51 = vsel %vm2233_vm15, %v2201_v32, %v2265_v40  ;;  %v12934_v47 = vcombine.high %v2778_v42, %v2782_v38  ;;  %v12936_v61 = vcombine.high %v2779_v49, %v2783_v45  ;;  %v2795_v17 = vld [vmem:[%s19589_s3 + $0xf08] sm:$0xff]  ;;  %v2806_v29 = vld [vmem:[%s19589_s3 + $0xf60] sm:$0xff] }
 0x1e5   :  { %v16213_v46 = vpack.c.bf16 %v2297_v51, %v2281_v33  ;;  %v12933_v10 = vcombine.low %v2778_v42, %v2782_v38  ;;  %v12935_v11 = vcombine.low %v2779_v49, %v2783_v45  ;;  %v12942_v12 = vcombine.high %v2786_v5, %v2790_v56  ;;  %v2799_v18 = vld [vmem:[%s19589_s3 + $0xf28] sm:$0xff]  ;;  %v2814_v33 = vld [vmem:[%s19589_s3 + $0xfa0] sm:$0xff] }
 0x1e6   :  { %8646 = vmatpush1.bf16.msra.mxu0 %v12917_v14  ;;  %v12944_v50 = vcombine.high %v2787_v6, %v2791_v8  ;;  %v12941_v20 = vcombine.low %v2786_v5, %v2790_v56  ;;  %v12943_v21 = vcombine.low %v2787_v6, %v2791_v8  ;;  %v12950_v22 = vcombine.high %v2794_v15, %v2798_v16  ;;  %v2803_v31 = vld [vmem:[%s19589_s3 + $0xf48] sm:$0xff]  ;;  %v2810_v14 = vld [vmem:[%s19589_s3 + $0xf80] sm:$0xff] }
 0x1e7   :  { %8990 = vmatpush1.bf16.msra.mxu1 %v12919_v43  ;;  %8647 = vmatprep.subr.bf16.mxu0 %v12926_v44  ;;  %v12952_v24 = vcombine.high %v2795_v17, %v2799_v18  ;;  %v2807_v32 = vld [vmem:[%s19589_s3 + $0xf68] sm:$0xff]  ;;  %v12949_v27 = vcombine.low %v2794_v15, %v2798_v16  ;;  %v12951_v35 = vcombine.low %v2795_v17, %v2799_v18  ;;  %v2818_v38 = vld [vmem:[%s19589_s3 + $0xfc0] sm:$0xff] }
 0x1e8   :  { %8991 = vmatprep.subr.bf16.mxu1 %v12928_v48  ;;  %v12958_v37 = vcombine.high %v2802_v28, %v2806_v29  ;;  %v12960_v39 = vcombine.high %v2803_v31, %v2807_v32  ;;  %v2811_v40 = vld [vmem:[%s19589_s3 + $0xf88] sm:$0xff]  ;;  %v12957_v44 = vcombine.low %v2802_v28, %v2806_v29  ;;  %v12959_v58 = vcombine.low %v2803_v31, %v2807_v32  ;;  %v2822_v51 = vld [vmem:[%s19589_s3 + $0xfe0] sm:$0xff] }
 0x1e9   :  { %v2815_v43 = vld [vmem:[%s19589_s3 + $0xfa8] sm:$0xff]  ;;  %v12966_v48 = vcombine.high %v2810_v14, %v2814_v33  ;;  %v2826_v5 = vld [vmem:[%s19589_s3 + $0x1000] sm:$0xff] }
 0x1ea   :  { %8648 = vmatpush1.bf16.msra.mxu0 %v12925_v53  ;;  %v12968_v42 = vcombine.high %v2811_v40, %v2815_v43  ;;  %v2819_v49 = vld [vmem:[%s19589_s3 + $0xfc8] sm:$0xff]  ;;  %v12965_v53 = vcombine.low %v2810_v14, %v2814_v33  ;;  %v2830_v56 = vld [vmem:[%s19589_s3 + $0x1020] sm:$0xff] }
 0x1eb   :  { %8992 = vmatpush1.bf16.msra.mxu1 %v12927_v52  ;;  %8649 = vmatprep.subr.bf16.mxu0 %v12934_v47  ;;  %v2823_v45 = vld [vmem:[%s19589_s3 + $0xfe8] sm:$0xff]  ;;  %v12967_v52 = vcombine.low %v2811_v40, %v2815_v43  ;;  %v12974_v47 = vcombine.high %v2818_v38, %v2822_v51  ;;  %v2834_v15 = vld [vmem:[%s19589_s3 + $0x1040] sm:$0xff]  ;;  %v12981_v17 = vcombine.low %v2826_v5, %v2830_v56 }
 0x1ec   :  { %8993 = vmatprep.subr.bf16.mxu1 %v12936_v61  ;;  %v12976_v61 = vcombine.high %v2819_v49, %v2823_v45  ;;  %v2827_v6 = vld [vmem:[%s19589_s3 + $0x1008] sm:$0xff]  ;;  %v2838_v16 = vld [vmem:[%s19589_s3 + $0x1060] sm:$0xff] }
 0x1ed   :  { %v2831_v8 = vld [vmem:[%s19589_s3 + $0x1028] sm:$0xff]  ;;  %v2846_v28 = vld [vmem:[%s19589_s3 + $0x10a0] sm:$0xff] }
 0x1ee   :  { %8650 = vmatpush1.bf16.msra.mxu0 %v12933_v10  ;;  %v12973_v10 = vcombine.low %v2818_v38, %v2822_v51  ;;  %v2835_v18 = vld [vmem:[%s19589_s3 + $0x1048] sm:$0xff]  ;;  %v2850_v14 = vld [vmem:[%s19589_s3 + $0x10c0] sm:$0xff] }
 0x1ef   :  { %8994 = vmatpush1.bf16.msra.mxu1 %v12935_v11  ;;  %8651 = vmatprep.subr.bf16.mxu0 %v12942_v12  ;;  %v12975_v11 = vcombine.low %v2819_v49, %v2823_v45  ;;  %v12982_v12 = vcombine.high %v2826_v5, %v2830_v56  ;;  %v2843_v31 = vld [vmem:[%s19589_s3 + $0x1088] sm:$0xff]  ;;  %v2854_v33 = vld [vmem:[%s19589_s3 + $0x10e0] sm:$0xff] }
 0x1f0   :  { %8995 = vmatprep.subr.bf16.mxu1 %v12944_v50  ;;  %v12984_v50 = vcombine.high %v2827_v6, %v2831_v8  ;;  %v2847_v32 = vld [vmem:[%s19589_s3 + $0x10a8] sm:$0xff]  ;;  %v2858_v38 = vld [vmem:[%s19589_s3 + $0x1100] sm:$0xff] }
 0x1f1   :  { %v2851_v40 = vld [vmem:[%s19589_s3 + $0x10c8] sm:$0xff]  ;;  %v2862_v51 = vld [vmem:[%s19589_s3 + $0x1120] sm:$0xff] }
 0x1f2   :  { %8652 = vmatpush1.bf16.msra.mxu0 %v12941_v20  ;;  %v2839_v20 = vld [vmem:[%s19589_s3 + $0x1068] sm:$0xff]  ;;  %v2866_v5 = vld [vmem:[%s19589_s3 + $0x1140] sm:$0xff] }
 0x1f3   :  { %8996 = vmatpush1.bf16.msra.mxu1 %v12943_v21  ;;  %8653 = vmatprep.subr.bf16.mxu0 %v12950_v22  ;;  %v12983_v21 = vcombine.low %v2827_v6, %v2831_v8  ;;  %v12990_v22 = vcombine.high %v2834_v15, %v2838_v16  ;;  %v12992_v29 = vcombine.high %v2835_v18, %v2839_v20  ;;  %v2855_v43 = vld [vmem:[%s19589_s3 + $0x10e8] sm:$0xff]  ;;  %v2870_v56 = vld [vmem:[%s19589_s3 + $0x1160] sm:$0xff] }
 0x1f4   :  { %8997 = vmatprep.subr.bf16.mxu1 %v12952_v24  ;;  %v2842_v24 = vld [vmem:[%s19589_s3 + $0x1080] sm:$0xff]  ;;  %v2859_v49 = vld [vmem:[%s19589_s3 + $0x1108] sm:$0xff] }
 0x1f5   :  { %v2863_v45 = vld [vmem:[%s19589_s3 + $0x1128] sm:$0xff] }
 0x1f6   :  { %8654 = vmatpush1.bf16.msra.mxu0 %v12949_v27  ;;  %v12989_v27 = vcombine.low %v2834_v15, %v2838_v16  ;;  %v2867_v6 = vld [vmem:[%s19589_s3 + $0x1148] sm:$0xff]  ;;  %v2874_v15 = vld [vmem:[%s19589_s3 + $0x1180] sm:$0xff] }
 0x1f7   :  { %8998 = vmatpush1.bf16.msra.mxu1 %v12951_v35  ;;  %8655 = vmatprep.subr.bf16.mxu0 %v12958_v37  ;;  %v12991_v35 = vcombine.low %v2835_v18, %v2839_v20  ;;  %v12998_v37 = vcombine.high %v2842_v24, %v2846_v28  ;;  %v2871_v8 = vld [vmem:[%s19589_s3 + $0x1168] sm:$0xff]  ;;  %v2878_v16 = vld [vmem:[%s19589_s3 + $0x11a0] sm:$0xff]  ;;  %v13021_v20 = vcombine.low %v2866_v5, %v2870_v56 }
 0x1f8   :  { %8999 = vmatprep.subr.bf16.mxu1 %v12960_v39  ;;  %v13000_v39 = vcombine.high %v2843_v31, %v2847_v32  ;;  %v2879_v18 = vld [vmem:[%s19589_s3 + $0x11a8] sm:$0xff] }
 0x1fa   :  { %8656 = vmatpush1.bf16.msra.mxu0 %v12957_v44  ;;  %v12997_v44 = vcombine.low %v2842_v24, %v2846_v28  ;;  %v2882_v28 = vld [vmem:[%s19589_s3 + $0x11c0] sm:$0xff] }
 0x1fb   :  { %9000 = vmatpush1.bf16.msra.mxu1 %v12959_v58  ;;  %8657 = vmatprep.subr.bf16.mxu0 %v12966_v48  ;;  %v12999_v58 = vcombine.low %v2843_v31, %v2847_v32  ;;  %v13006_v48 = vcombine.high %v2850_v14, %v2854_v33  ;;  %v2883_v31 = vld [vmem:[%s19589_s3 + $0x11c8] sm:$0xff] }
 0x1fc   :  { %9001 = vmatprep.subr.bf16.mxu1 %v12968_v42  ;;  %v13008_v42 = vcombine.high %v2851_v40, %v2855_v43  ;;  %v2887_v32 = vld [vmem:[%s19589_s3 + $0x11e8] sm:$0xff] }
 0x1fe   :  { %8658 = vmatpush1.bf16.msra.mxu0 %v12965_v53  ;;  %v13005_v53 = vcombine.low %v2850_v14, %v2854_v33  ;;  %v2890_v14 = vld [vmem:[%s19589_s3 + $0x1200] sm:$0xff] }
 0x1ff   :  { %9002 = vmatpush1.bf16.msra.mxu1 %v12967_v52  ;;  %8659 = vmatprep.subr.bf16.mxu0 %v12974_v47  ;;  %v13007_v52 = vcombine.low %v2851_v40, %v2855_v43  ;;  %v13014_v47 = vcombine.high %v2858_v38, %v2862_v51  ;;  %v2894_v33 = vld [vmem:[%s19589_s3 + $0x1220] sm:$0xff]  ;;  %v2891_v40 = vld [vmem:[%s19589_s3 + $0x1208] sm:$0xff] }
 0x200   :  { %9003 = vmatprep.subr.bf16.mxu1 %v12976_v61  ;;  %v13016_v61 = vcombine.high %v2859_v49, %v2863_v45  ;;  %v2895_v43 = vld [vmem:[%s19589_s3 + $0x1228] sm:$0xff] }
 0x202   :  { %8660 = vmatpush1.bf16.msra.mxu0 %v12973_v10  ;;  %v13013_v10 = vcombine.low %v2858_v38, %v2862_v51  ;;  %v2898_v38 = vld [vmem:[%s19589_s3 + $0x1240] sm:$0xff] }
 0x203   :  { %9004 = vmatpush1.bf16.msra.mxu1 %v12975_v11  ;;  %8672 = vmatprep.subr.bf16.mxu0 %v12982_v12  ;;  %v13015_v11 = vcombine.low %v2859_v49, %v2863_v45  ;;  %v13022_v12 = vcombine.high %v2866_v5, %v2870_v56  ;;  %v2902_v51 = vld [vmem:[%s19589_s3 + $0x1260] sm:$0xff]  ;;  %v2899_v49 = vld [vmem:[%s19589_s3 + $0x1248] sm:$0xff] }
 0x204   :  { %9016 = vmatprep.subr.bf16.mxu1 %v12984_v50  ;;  %v13024_v50 = vcombine.high %v2867_v6, %v2871_v8  ;;  %v2903_v45 = vld [vmem:[%s19589_s3 + $0x1268] sm:$0xff]  ;;  %v2906_v5 = vld [vmem:[%s19589_s3 + $0x1280] sm:$0xff] }
 0x205   :  { %8662 = vmatmul.mubr.bf16.vlgmr.msra.gmra.mrb[16].mxu0 %v15706_v30  ;;  %v2910_v56 = vld [vmem:[%s19589_s3 + $0x12a0] sm:$0xff] }
 0x206   :  { %9006 = vmatmul.mubr.bf16.vlgmr.msra.gmra.mrb[16].mxu1 %v15706_v30  ;;  %8673 = vmatpush1.bf16.msra.mxu0 %v12981_v17  ;;  %v2875_v17 = vld [vmem:[%s19589_s3 + $0x1188] sm:$0xff] }
 0x207   :  { %8704 = vmatprep.mubr.bf16.mxu0 %v15938_v41  ;;  %9017 = vmatpush1.bf16.msra.mxu1 %v12983_v21  ;;  %v13023_v21 = vcombine.low %v2867_v6, %v2871_v8  ;;  %v13032_v24 = vcombine.high %v2875_v17, %v2879_v18  ;;  %v2907_v6 = vld [vmem:[%s19589_s3 + $0x1288] sm:$0xff] }
 0x208   :  { %9048 = vmatprep.mubr.bf16.mxu1 %v15938_v41  ;;  %8674 = vmatprep.subr.bf16.mxu0 %v12990_v22  ;;  %v13030_v22 = vcombine.high %v2874_v15, %v2878_v16  ;;  %v2911_v8 = vld [vmem:[%s19589_s3 + $0x12a8] sm:$0xff] }
 0x209   :  { %9018 = vmatprep.subr.bf16.mxu1 %v12992_v29  ;;  %v2886_v29 = vld [vmem:[%s19589_s3 + $0x11e0] sm:$0xff] }
 0x20a   :  { %8675 = vmatpush1.bf16.msra.mxu0 %v12989_v27  ;;  %v13029_v27 = vcombine.low %v2874_v15, %v2878_v16  ;;  %v2914_v15 = vld [vmem:[%s19589_s3 + $0x12c0] sm:$0xff] }
 0x20b   :  { %9019 = vmatpush1.bf16.msra.mxu1 %v12991_v35  ;;  %8676 = vmatprep.subr.bf16.mxu0 %v12998_v37  ;;  %v13031_v35 = vcombine.low %v2875_v17, %v2879_v18  ;;  %v13038_v37 = vcombine.high %v2882_v28, %v2886_v29  ;;  %v2918_v16 = vld [vmem:[%s19589_s3 + $0x12e0] sm:$0xff]  ;;  %v2915_v17 = vld [vmem:[%s19589_s3 + $0x12c8] sm:$0xff] }
 0x20c   :  { %9020 = vmatprep.subr.bf16.mxu1 %v13000_v39  ;;  %v13040_v39 = vcombine.high %v2883_v31, %v2887_v32  ;;  %v2919_v18 = vld [vmem:[%s19589_s3 + $0x12e8] sm:$0xff] }
 0x20e   :  { %8677 = vmatpush1.bf16.msra.mxu0 %v12997_v44  ;;  %v13037_v44 = vcombine.low %v2882_v28, %v2886_v29  ;;  %v2922_v28 = vld [vmem:[%s19589_s3 + $0x1300] sm:$0xff] }
 0x20f   :  { %9021 = vmatpush1.bf16.msra.mxu1 %v12999_v58  ;;  %8678 = vmatprep.subr.bf16.mxu0 %v13006_v48  ;;  %v13039_v58 = vcombine.low %v2883_v31, %v2887_v32  ;;  %v13046_v48 = vcombine.high %v2890_v14, %v2894_v33  ;;  %v2926_v29 = vld [vmem:[%s19589_s3 + $0x1320] sm:$0xff]  ;;  %v2923_v31 = vld [vmem:[%s19589_s3 + $0x1308] sm:$0xff] }
 0x210   :  { %9022 = vmatprep.subr.bf16.mxu1 %v13008_v42  ;;  %v13048_v42 = vcombine.high %v2891_v40, %v2895_v43  ;;  %v2927_v32 = vld [vmem:[%s19589_s3 + $0x1328] sm:$0xff] }
 0x212   :  { %8679 = vmatpush1.bf16.msra.mxu0 %v13005_v53  ;;  %v13045_v53 = vcombine.low %v2890_v14, %v2894_v33  ;;  %v2930_v14 = vld [vmem:[%s19589_s3 + $0x1340] sm:$0xff] }
 0x213   :  { %9023 = vmatpush1.bf16.msra.mxu1 %v13007_v52  ;;  %8680 = vmatprep.subr.bf16.mxu0 %v13014_v47  ;;  %v13047_v52 = vcombine.low %v2891_v40, %v2895_v43  ;;  %v13054_v47 = vcombine.high %v2898_v38, %v2902_v51  ;;  %v2934_v33 = vld [vmem:[%s19589_s3 + $0x1360] sm:$0xff]  ;;  %v2931_v40 = vld [vmem:[%s19589_s3 + $0x1348] sm:$0xff] }
 0x214   :  { %9024 = vmatprep.subr.bf16.mxu1 %v13016_v61  ;;  %v13056_v61 = vcombine.high %v2899_v49, %v2903_v45  ;;  %v2935_v43 = vld [vmem:[%s19589_s3 + $0x1368] sm:$0xff] }
 0x216   :  { %8681 = vmatpush1.bf16.msra.mxu0 %v13013_v10  ;;  %v13053_v10 = vcombine.low %v2898_v38, %v2902_v51  ;;  %v2938_v38 = vld [vmem:[%s19589_s3 + $0x1380] sm:$0xff] }
 0x217   :  { %9025 = vmatpush1.bf16.msra.mxu1 %v13015_v11  ;;  %8682 = vmatprep.subr.bf16.mxu0 %v13022_v12  ;;  %v13055_v11 = vcombine.low %v2899_v49, %v2903_v45  ;;  %v13062_v12 = vcombine.high %v2906_v5, %v2910_v56  ;;  %v2942_v51 = vld [vmem:[%s19589_s3 + $0x13a0] sm:$0xff]  ;;  %v2939_v49 = vld [vmem:[%s19589_s3 + $0x1388] sm:$0xff] }
 0x218   :  { %9026 = vmatprep.subr.bf16.mxu1 %v13024_v50  ;;  %v13064_v50 = vcombine.high %v2907_v6, %v2911_v8  ;;  %v2943_v45 = vld [vmem:[%s19589_s3 + $0x13a8] sm:$0xff] }
 0x21a   :  { %8683 = vmatpush1.bf16.msra.mxu0 %v13021_v20  ;;  %v13061_v20 = vcombine.low %v2906_v5, %v2910_v56  ;;  %v2946_v5 = vld [vmem:[%s19589_s3 + $0x13c0] sm:$0xff] }
 0x21b   :  { %9027 = vmatpush1.bf16.msra.mxu1 %v13023_v21  ;;  %8684 = vmatprep.subr.bf16.mxu0 %v13030_v22  ;;  %v13063_v21 = vcombine.low %v2907_v6, %v2911_v8  ;;  %v13070_v22 = vcombine.high %v2914_v15, %v2918_v16  ;;  %v2950_v56 = vld [vmem:[%s19589_s3 + $0x13e0] sm:$0xff]  ;;  %v2947_v6 = vld [vmem:[%s19589_s3 + $0x13c8] sm:$0xff] }
 0x21c   :  { %9028 = vmatprep.subr.bf16.mxu1 %v13032_v24  ;;  %v13072_v24 = vcombine.high %v2915_v17, %v2919_v18  ;;  %v2951_v8 = vld [vmem:[%s19589_s3 + $0x13e8] sm:$0xff] }
 0x21e   :  { %8685 = vmatpush1.bf16.msra.mxu0 %v13029_v27  ;;  %v13069_v27 = vcombine.low %v2914_v15, %v2918_v16  ;;  %v2954_v15 = vld [vmem:[%s19589_s3 + $0x1400] sm:$0xff] }
 0x21f   :  { %9029 = vmatpush1.bf16.msra.mxu1 %v13031_v35  ;;  %8686 = vmatprep.subr.bf16.mxu0 %v13038_v37  ;;  %v13071_v35 = vcombine.low %v2915_v17, %v2919_v18  ;;  %v13078_v37 = vcombine.high %v2922_v28, %v2926_v29  ;;  %v2958_v16 = vld [vmem:[%s19589_s3 + $0x1420] sm:$0xff]  ;;  %v2955_v17 = vld [vmem:[%s19589_s3 + $0x1408] sm:$0xff] }
 0x220   :  { %9030 = vmatprep.subr.bf16.mxu1 %v13040_v39  ;;  %v13080_v39 = vcombine.high %v2923_v31, %v2927_v32  ;;  %v2959_v18 = vld [vmem:[%s19589_s3 + $0x1428] sm:$0xff] }
 0x222   :  { %8687 = vmatpush1.bf16.msra.mxu0 %v13037_v44  ;;  %v13077_v44 = vcombine.low %v2922_v28, %v2926_v29  ;;  %v2962_v28 = vld [vmem:[%s19589_s3 + $0x1440] sm:$0xff] }
 0x223   :  { %9031 = vmatpush1.bf16.msra.mxu1 %v13039_v58  ;;  %8688 = vmatprep.subr.bf16.mxu0 %v13046_v48  ;;  %v13079_v58 = vcombine.low %v2923_v31, %v2927_v32  ;;  %v13086_v48 = vcombine.high %v2930_v14, %v2934_v33  ;;  %v2966_v29 = vld [vmem:[%s19589_s3 + $0x1460] sm:$0xff]  ;;  %v13109_v31 = vcombine.low %v2954_v15, %v2958_v16  ;;  %v2963_v32 = vld [vmem:[%s19589_s3 + $0x1448] sm:$0xff] }
 0x224   :  { %9032 = vmatprep.subr.bf16.mxu1 %v13048_v42  ;;  %v13088_v42 = vcombine.high %v2931_v40, %v2935_v43 }
 0x226   :  { %8689 = vmatpush1.bf16.msra.mxu0 %v13045_v53  ;;  %v13085_v53 = vcombine.low %v2930_v14, %v2934_v33  ;;  %v2974_v14 = vld [vmem:[%s19589_s3 + $0x14a0] sm:$0xff] }
 0x227   :  { %9033 = vmatpush1.bf16.msra.mxu1 %v13047_v52  ;;  %8690 = vmatprep.subr.bf16.mxu0 %v13054_v47  ;;  %v13087_v52 = vcombine.low %v2931_v40, %v2935_v43  ;;  %v13094_v47 = vcombine.high %v2938_v38, %v2942_v51  ;;  %v2971_v40 = vld [vmem:[%s19589_s3 + $0x1488] sm:$0xff] }
 0x228   :  { %9034 = vmatprep.subr.bf16.mxu1 %v13056_v61  ;;  %v13096_v61 = vcombine.high %v2939_v49, %v2943_v45  ;;  %v2975_v43 = vld [vmem:[%s19589_s3 + $0x14a8] sm:$0xff] }
 0x22a   :  { %8691 = vmatpush1.bf16.msra.mxu0 %v13053_v10  ;;  %v13093_v10 = vcombine.low %v2938_v38, %v2942_v51  ;;  %v2978_v38 = vld [vmem:[%s19589_s3 + $0x14c0] sm:$0xff] }
 0x22b   :  { %9035 = vmatpush1.bf16.msra.mxu1 %v13055_v11  ;;  %8692 = vmatprep.subr.bf16.mxu0 %v13062_v12  ;;  %v13095_v11 = vcombine.low %v2939_v49, %v2943_v45  ;;  %v13102_v12 = vcombine.high %v2946_v5, %v2950_v56  ;;  %v2982_v51 = vld [vmem:[%s19589_s3 + $0x14e0] sm:$0xff]  ;;  %v2979_v49 = vld [vmem:[%s19589_s3 + $0x14c8] sm:$0xff] }
 0x22c   :  { %9036 = vmatprep.subr.bf16.mxu1 %v13064_v50  ;;  %v13104_v50 = vcombine.high %v2947_v6, %v2951_v8  ;;  %v2983_v45 = vld [vmem:[%s19589_s3 + $0x14e8] sm:$0xff] }
 0x22e   :  { %8693 = vmatpush1.bf16.msra.mxu0 %v13061_v20  ;;  %v13101_v20 = vcombine.low %v2946_v5, %v2950_v56  ;;  %v2986_v5 = vld [vmem:[%s19589_s3 + $0x1500] sm:$0xff] }
 0x22f   :  { %9037 = vmatpush1.bf16.msra.mxu1 %v13063_v21  ;;  %8694 = vmatprep.subr.bf16.mxu0 %v13070_v22  ;;  %v13103_v21 = vcombine.low %v2947_v6, %v2951_v8  ;;  %v13110_v22 = vcombine.high %v2954_v15, %v2958_v16  ;;  %v2990_v56 = vld [vmem:[%s19589_s3 + $0x1520] sm:$0xff]  ;;  %v2987_v6 = vld [vmem:[%s19589_s3 + $0x1508] sm:$0xff] }
 0x230   :  { %9038 = vmatprep.subr.bf16.mxu1 %v13072_v24  ;;  %v13112_v24 = vcombine.high %v2955_v17, %v2959_v18  ;;  %v2991_v8 = vld [vmem:[%s19589_s3 + $0x1528] sm:$0xff]  ;;  %v2994_v15 = vld [vmem:[%s19589_s3 + $0x1540] sm:$0xff] }
 0x231   :  { %v2998_v16 = vld [vmem:[%s19589_s3 + $0x1560] sm:$0xff] }
 0x232   :  { %8695 = vmatpush1.bf16.msra.mxu0 %v13069_v27  ;;  %v2967_v27 = vld [vmem:[%s19589_s3 + $0x1468] sm:$0xff] }
 0x233   :  { %9039 = vmatpush1.bf16.msra.mxu1 %v13071_v35  ;;  %8696 = vmatprep.subr.bf16.mxu0 %v13078_v37  ;;  %v13111_v35 = vcombine.low %v2955_v17, %v2959_v18  ;;  %v13118_v37 = vcombine.high %v2962_v28, %v2966_v29  ;;  %v13120_v33 = vcombine.high %v2963_v32, %v2967_v27  ;;  %v2995_v17 = vld [vmem:[%s19589_s3 + $0x1548] sm:$0xff] }
 0x234   :  { %9040 = vmatprep.subr.bf16.mxu1 %v13080_v39  ;;  %v2970_v39 = vld [vmem:[%s19589_s3 + $0x1480] sm:$0xff]  ;;  %v2999_v18 = vld [vmem:[%s19589_s3 + $0x1568] sm:$0xff] }
 0x236   :  { %8697 = vmatpush1.bf16.msra.mxu0 %v13077_v44  ;;  %v13117_v44 = vcombine.low %v2962_v28, %v2966_v29  ;;  %v3002_v28 = vld [vmem:[%s19589_s3 + $0x1580] sm:$0xff] }
 0x237   :  { %9041 = vmatpush1.bf16.msra.mxu1 %v13079_v58  ;;  %8698 = vmatprep.subr.bf16.mxu0 %v13086_v48  ;;  %v13119_v58 = vcombine.low %v2963_v32, %v2967_v27  ;;  %v13126_v48 = vcombine.high %v2970_v39, %v2974_v14  ;;  %v3006_v29 = vld [vmem:[%s19589_s3 + $0x15a0] sm:$0xff]  ;;  %v3007_v32 = vld [vmem:[%s19589_s3 + $0x15a8] sm:$0xff]  ;;  %v13149_v27 = vcombine.low %v2994_v15, %v2998_v16 }
 0x238   :  { %9042 = vmatprep.subr.bf16.mxu1 %v13088_v42  ;;  %v13128_v42 = vcombine.high %v2971_v40, %v2975_v43 }
 0x23a   :  { %8699 = vmatpush1.bf16.msra.mxu0 %v13085_v53  ;;  %v13125_v53 = vcombine.low %v2970_v39, %v2974_v14  ;;  %v3010_v14 = vld [vmem:[%s19589_s3 + $0x15c0] sm:$0xff] }
 0x23b   :  { %9043 = vmatpush1.bf16.msra.mxu1 %v13087_v52  ;;  %8700 = vmatprep.subr.bf16.mxu0 %v13094_v47  ;;  %v13127_v52 = vcombine.low %v2971_v40, %v2975_v43  ;;  %v13134_v47 = vcombine.high %v2978_v38, %v2982_v51  ;;  %v3011_v40 = vld [vmem:[%s19589_s3 + $0x15c8] sm:$0xff] }
 0x23c   :  { %9044 = vmatprep.subr.bf16.mxu1 %v13096_v61  ;;  %v13136_v61 = vcombine.high %v2979_v49, %v2983_v45  ;;  %v3015_v43 = vld [vmem:[%s19589_s3 + $0x15e8] sm:$0xff] }
 0x23e   :  { %8701 = vmatpush1.bf16.msra.mxu0 %v13093_v10  ;;  %v13133_v10 = vcombine.low %v2978_v38, %v2982_v51  ;;  %v3018_v38 = vld [vmem:[%s19589_s3 + $0x1600] sm:$0xff] }
 0x23f   :  { %9045 = vmatpush1.bf16.msra.mxu1 %v13095_v11  ;;  %8702 = vmatprep.subr.bf16.mxu0 %v13102_v12  ;;  %v13135_v11 = vcombine.low %v2979_v49, %v2983_v45  ;;  %v13142_v12 = vcombine.high %v2986_v5, %v2990_v56  ;;  %v3022_v51 = vld [vmem:[%s19589_s3 + $0x1620] sm:$0xff]  ;;  %v3019_v49 = vld [vmem:[%s19589_s3 + $0x1608] sm:$0xff] }
 0x240   :  { %9046 = vmatprep.subr.bf16.mxu1 %v13104_v50  ;;  %v13144_v50 = vcombine.high %v2987_v6, %v2991_v8  ;;  %v3023_v45 = vld [vmem:[%s19589_s3 + $0x1628] sm:$0xff] }
 0x242   :  { %8703 = vmatpush1.bf16.msra.mxu0 %v13101_v20  ;;  %v13141_v20 = vcombine.low %v2986_v5, %v2990_v56  ;;  %v3026_v5 = vld [vmem:[%s19589_s3 + $0x1640] sm:$0xff] }
 0x243   :  { %9047 = vmatpush1.bf16.msra.mxu1 %v13103_v21  ;;  %8715 = vmatprep.subr.bf16.mxu0 %v13110_v22  ;;  %v13143_v21 = vcombine.low %v2987_v6, %v2991_v8  ;;  %v13150_v22 = vcombine.high %v2994_v15, %v2998_v16  ;;  %v3030_v56 = vld [vmem:[%s19589_s3 + $0x1660] sm:$0xff]  ;;  %v3027_v6 = vld [vmem:[%s19589_s3 + $0x1648] sm:$0xff] }
 0x244   :  { %9059 = vmatprep.subr.bf16.mxu1 %v13112_v24  ;;  %v13152_v24 = vcombine.high %v2995_v17, %v2999_v18  ;;  %v3031_v8 = vld [vmem:[%s19589_s3 + $0x1668] sm:$0xff]  ;;  %v3034_v15 = vld [vmem:[%s19589_s3 + $0x1680] sm:$0xff] }
 0x245   :  { %8705 = vmatmul.mubr.bf16.vlgmr.msra.gmra.mrb[16].mxu0 %v15930_v36  ;;  %v3038_v16 = vld [vmem:[%s19589_s3 + $0x16a0] sm:$0xff] }
 0x246   :  { %9049 = vmatmul.mubr.bf16.vlgmr.msra.gmra.mrb[16].mxu1 %v15930_v36  ;;  %8716 = vmatpush1.bf16.msra.mxu0 %v13109_v31  ;;  %v3003_v31 = vld [vmem:[%s19589_s3 + $0x1588] sm:$0xff] }
 0x247   :  { %8747 = vmatprep.mubr.bf16.mxu0 %v15966_v60  ;;  %9060 = vmatpush1.bf16.msra.mxu1 %v13111_v35  ;;  %v13151_v35 = vcombine.low %v2995_v17, %v2999_v18  ;;  %v13160_v39 = vcombine.high %v3003_v31, %v3007_v32  ;;  %v3035_v17 = vld [vmem:[%s19589_s3 + $0x1688] sm:$0xff] }
 0x248   :  { %9091 = vmatprep.mubr.bf16.mxu1 %v15966_v60  ;;  %8717 = vmatprep.subr.bf16.mxu0 %v13118_v37  ;;  %v13158_v37 = vcombine.high %v3002_v28, %v3006_v29  ;;  %v3039_v18 = vld [vmem:[%s19589_s3 + $0x16a8] sm:$0xff] }
 0x249   :  { %9061 = vmatprep.subr.bf16.mxu1 %v13120_v33  ;;  %v3014_v33 = vld [vmem:[%s19589_s3 + $0x15e0] sm:$0xff] }
 0x24a   :  { %8718 = vmatpush1.bf16.msra.mxu0 %v13117_v44  ;;  %v13157_v44 = vcombine.low %v3002_v28, %v3006_v29  ;;  %v3042_v28 = vld [vmem:[%s19589_s3 + $0x16c0] sm:$0xff] }
 0x24b   :  { %9062 = vmatpush1.bf16.msra.mxu1 %v13119_v58  ;;  %8719 = vmatprep.subr.bf16.mxu0 %v13126_v48  ;;  %v13159_v58 = vcombine.low %v3003_v31, %v3007_v32  ;;  %v13166_v48 = vcombine.high %v3010_v14, %v3014_v33  ;;  %v3046_v29 = vld [vmem:[%s19589_s3 + $0x16e0] sm:$0xff]  ;;  %v3043_v31 = vld [vmem:[%s19589_s3 + $0x16c8] sm:$0xff] }
 0x24c   :  { %9063 = vmatprep.subr.bf16.mxu1 %v13128_v42  ;;  %v13168_v42 = vcombine.high %v3011_v40, %v3015_v43  ;;  %v3047_v32 = vld [vmem:[%s19589_s3 + $0x16e8] sm:$0xff] }
 0x24e   :  { %8720 = vmatpush1.bf16.msra.mxu0 %v13125_v53  ;;  %v13165_v53 = vcombine.low %v3010_v14, %v3014_v33  ;;  %v3050_v14 = vld [vmem:[%s19589_s3 + $0x1700] sm:$0xff] }
 0x24f   :  { %9064 = vmatpush1.bf16.msra.mxu1 %v13127_v52  ;;  %8721 = vmatprep.subr.bf16.mxu0 %v13134_v47  ;;  %v13167_v52 = vcombine.low %v3011_v40, %v3015_v43  ;;  %v13174_v47 = vcombine.high %v3018_v38, %v3022_v51  ;;  %v3054_v33 = vld [vmem:[%s19589_s3 + $0x1720] sm:$0xff]  ;;  %v3051_v40 = vld [vmem:[%s19589_s3 + $0x1708] sm:$0xff] }
 0x250   :  { %9065 = vmatprep.subr.bf16.mxu1 %v13136_v61  ;;  %v13176_v61 = vcombine.high %v3019_v49, %v3023_v45  ;;  %v3055_v43 = vld [vmem:[%s19589_s3 + $0x1728] sm:$0xff] }
 0x252   :  { %8722 = vmatpush1.bf16.msra.mxu0 %v13133_v10  ;;  %v13173_v10 = vcombine.low %v3018_v38, %v3022_v51  ;;  %v3058_v38 = vld [vmem:[%s19589_s3 + $0x1740] sm:$0xff] }
 0x253   :  { %9066 = vmatpush1.bf16.msra.mxu1 %v13135_v11  ;;  %8723 = vmatprep.subr.bf16.mxu0 %v13142_v12  ;;  %v13175_v11 = vcombine.low %v3019_v49, %v3023_v45  ;;  %v13182_v12 = vcombine.high %v3026_v5, %v3030_v56  ;;  %v3062_v51 = vld [vmem:[%s19589_s3 + $0x1760] sm:$0xff]  ;;  %v3059_v49 = vld [vmem:[%s19589_s3 + $0x1748] sm:$0xff] }
 0x254   :  { %9067 = vmatprep.subr.bf16.mxu1 %v13144_v50  ;;  %v13184_v50 = vcombine.high %v3027_v6, %v3031_v8  ;;  %v3063_v45 = vld [vmem:[%s19589_s3 + $0x1768] sm:$0xff] }
 0x256   :  { %8724 = vmatpush1.bf16.msra.mxu0 %v13141_v20  ;;  %v13181_v20 = vcombine.low %v3026_v5, %v3030_v56  ;;  %v3066_v5 = vld [vmem:[%s19589_s3 + $0x1780] sm:$0xff] }
 0x257   :  { %9068 = vmatpush1.bf16.msra.mxu1 %v13143_v21  ;;  %8725 = vmatprep.subr.bf16.mxu0 %v13150_v22  ;;  %v13183_v21 = vcombine.low %v3027_v6, %v3031_v8  ;;  %v13190_v22 = vcombine.high %v3034_v15, %v3038_v16  ;;  %v3070_v56 = vld [vmem:[%s19589_s3 + $0x17a0] sm:$0xff]  ;;  %v3067_v6 = vld [vmem:[%s19589_s3 + $0x1788] sm:$0xff] }
 0x258   :  { %9069 = vmatprep.subr.bf16.mxu1 %v13152_v24  ;;  %v13192_v24 = vcombine.high %v3035_v17, %v3039_v18  ;;  %v3071_v8 = vld [vmem:[%s19589_s3 + $0x17a8] sm:$0xff] }
 0x25a   :  { %8726 = vmatpush1.bf16.msra.mxu0 %v13149_v27  ;;  %v13189_v27 = vcombine.low %v3034_v15, %v3038_v16  ;;  %v3074_v15 = vld [vmem:[%s19589_s3 + $0x17c0] sm:$0xff] }
 0x25b   :  { %9070 = vmatpush1.bf16.msra.mxu1 %v13151_v35  ;;  %8727 = vmatprep.subr.bf16.mxu0 %v13158_v37  ;;  %v13191_v35 = vcombine.low %v3035_v17, %v3039_v18  ;;  %v13198_v37 = vcombine.high %v3042_v28, %v3046_v29  ;;  %v3078_v16 = vld [vmem:[%s19589_s3 + $0x17e0] sm:$0xff]  ;;  %v3075_v17 = vld [vmem:[%s19589_s3 + $0x17c8] sm:$0xff] }
 0x25c   :  { %9071 = vmatprep.subr.bf16.mxu1 %v13160_v39  ;;  %v13200_v39 = vcombine.high %v3043_v31, %v3047_v32  ;;  %v3079_v18 = vld [vmem:[%s19589_s3 + $0x17e8] sm:$0xff] }
 0x25e   :  { %8728 = vmatpush1.bf16.msra.mxu0 %v13157_v44  ;;  %v13197_v44 = vcombine.low %v3042_v28, %v3046_v29  ;;  %v3082_v28 = vld [vmem:[%s19589_s3 + $0x1800] sm:$0xff] }
 0x25f   :  { %9072 = vmatpush1.bf16.msra.mxu1 %v13159_v58  ;;  %8729 = vmatprep.subr.bf16.mxu0 %v13166_v48  ;;  %v13199_v58 = vcombine.low %v3043_v31, %v3047_v32  ;;  %v13206_v48 = vcombine.high %v3050_v14, %v3054_v33  ;;  %v3086_v29 = vld [vmem:[%s19589_s3 + $0x1820] sm:$0xff]  ;;  %v3083_v31 = vld [vmem:[%s19589_s3 + $0x1808] sm:$0xff] }
 0x260   :  { %9073 = vmatprep.subr.bf16.mxu1 %v13168_v42  ;;  %v13208_v42 = vcombine.high %v3051_v40, %v3055_v43  ;;  %v3087_v32 = vld [vmem:[%s19589_s3 + $0x1828] sm:$0xff] }
 0x262   :  { %8730 = vmatpush1.bf16.msra.mxu0 %v13165_v53  ;;  %v13205_v53 = vcombine.low %v3050_v14, %v3054_v33  ;;  %v3090_v14 = vld [vmem:[%s19589_s3 + $0x1840] sm:$0xff] }
 0x263   :  { %9074 = vmatpush1.bf16.msra.mxu1 %v13167_v52  ;;  %8731 = vmatprep.subr.bf16.mxu0 %v13174_v47  ;;  %v13207_v52 = vcombine.low %v3051_v40, %v3055_v43  ;;  %v13214_v47 = vcombine.high %v3058_v38, %v3062_v51  ;;  %v3094_v33 = vld [vmem:[%s19589_s3 + $0x1860] sm:$0xff]  ;;  %v13237_v40 = vcombine.low %v3082_v28, %v3086_v29  ;;  %v3091_v43 = vld [vmem:[%s19589_s3 + $0x1848] sm:$0xff] }
 0x264   :  { %9075 = vmatprep.subr.bf16.mxu1 %v13176_v61  ;;  %v13216_v61 = vcombine.high %v3059_v49, %v3063_v45 }
 0x266   :  { %8732 = vmatpush1.bf16.msra.mxu0 %v13173_v10  ;;  %v13213_v10 = vcombine.low %v3058_v38, %v3062_v51  ;;  %v3102_v38 = vld [vmem:[%s19589_s3 + $0x18a0] sm:$0xff] }
 0x267   :  { %9076 = vmatpush1.bf16.msra.mxu1 %v13175_v11  ;;  %8733 = vmatprep.subr.bf16.mxu0 %v13182_v12  ;;  %v13215_v11 = vcombine.low %v3059_v49, %v3063_v45  ;;  %v13222_v12 = vcombine.high %v3066_v5, %v3070_v56  ;;  %v3099_v49 = vld [vmem:[%s19589_s3 + $0x1888] sm:$0xff] }
 0x268   :  { %9077 = vmatprep.subr.bf16.mxu1 %v13184_v50  ;;  %v13224_v50 = vcombine.high %v3067_v6, %v3071_v8  ;;  %v3103_v45 = vld [vmem:[%s19589_s3 + $0x18a8] sm:$0xff] }
 0x26a   :  { %8734 = vmatpush1.bf16.msra.mxu0 %v13181_v20  ;;  %v13221_v20 = vcombine.low %v3066_v5, %v3070_v56  ;;  %v3106_v5 = vld [vmem:[%s19589_s3 + $0x18c0] sm:$0xff] }
 0x26b   :  { %9078 = vmatpush1.bf16.msra.mxu1 %v13183_v21  ;;  %8735 = vmatprep.subr.bf16.mxu0 %v13190_v22  ;;  %v13223_v21 = vcombine.low %v3067_v6, %v3071_v8  ;;  %v13230_v22 = vcombine.high %v3074_v15, %v3078_v16  ;;  %v3110_v56 = vld [vmem:[%s19589_s3 + $0x18e0] sm:$0xff]  ;;  %v3107_v6 = vld [vmem:[%s19589_s3 + $0x18c8] sm:$0xff] }
 0x26c   :  { %9079 = vmatprep.subr.bf16.mxu1 %v13192_v24  ;;  %v13232_v24 = vcombine.high %v3075_v17, %v3079_v18  ;;  %v3111_v8 = vld [vmem:[%s19589_s3 + $0x18e8] sm:$0xff] }
 0x26e   :  { %8736 = vmatpush1.bf16.msra.mxu0 %v13189_v27  ;;  %v13229_v27 = vcombine.low %v3074_v15, %v3078_v16  ;;  %v3114_v15 = vld [vmem:[%s19589_s3 + $0x1900] sm:$0xff] }
 0x26f   :  { %9080 = vmatpush1.bf16.msra.mxu1 %v13191_v35  ;;  %8737 = vmatprep.subr.bf16.mxu0 %v13198_v37  ;;  %v13231_v35 = vcombine.low %v3075_v17, %v3079_v18  ;;  %v13238_v37 = vcombine.high %v3082_v28, %v3086_v29  ;;  %v3118_v16 = vld [vmem:[%s19589_s3 + $0x1920] sm:$0xff]  ;;  %v3115_v17 = vld [vmem:[%s19589_s3 + $0x1908] sm:$0xff] }
 0x270   :  { %9081 = vmatprep.subr.bf16.mxu1 %v13200_v39  ;;  %v13240_v39 = vcombine.high %v3083_v31, %v3087_v32  ;;  %v3119_v18 = vld [vmem:[%s19589_s3 + $0x1928] sm:$0xff]  ;;  %v3122_v28 = vld [vmem:[%s19589_s3 + $0x1940] sm:$0xff] }
 0x271   :  { %v3126_v29 = vld [vmem:[%s19589_s3 + $0x1960] sm:$0xff] }
 0x272   :  { %8738 = vmatpush1.bf16.msra.mxu0 %v13197_v44  ;;  %v3095_v44 = vld [vmem:[%s19589_s3 + $0x1868] sm:$0xff] }
 0x273   :  { %9082 = vmatpush1.bf16.msra.mxu1 %v13199_v58  ;;  %8739 = vmatprep.subr.bf16.mxu0 %v13206_v48  ;;  %v13239_v58 = vcombine.low %v3083_v31, %v3087_v32  ;;  %v13246_v48 = vcombine.high %v3090_v14, %v3094_v33  ;;  %v13248_v51 = vcombine.high %v3091_v43, %v3095_v44  ;;  %v3123_v31 = vld [vmem:[%s19589_s3 + $0x1948] sm:$0xff] }
 0x274   :  { %9083 = vmatprep.subr.bf16.mxu1 %v13208_v42  ;;  %v3098_v42 = vld [vmem:[%s19589_s3 + $0x1880] sm:$0xff]  ;;  %v3127_v32 = vld [vmem:[%s19589_s3 + $0x1968] sm:$0xff] }
 0x276   :  { %8740 = vmatpush1.bf16.msra.mxu0 %v13205_v53  ;;  %v13245_v53 = vcombine.low %v3090_v14, %v3094_v33  ;;  %v3130_v14 = vld [vmem:[%s19589_s3 + $0x1980] sm:$0xff] }
 0x277   :  { %9084 = vmatpush1.bf16.msra.mxu1 %v13207_v52  ;;  %8741 = vmatprep.subr.bf16.mxu0 %v13214_v47  ;;  %v13247_v52 = vcombine.low %v3091_v43, %v3095_v44  ;;  %v13254_v47 = vcombine.high %v3098_v42, %v3102_v38  ;;  %v3134_v33 = vld [vmem:[%s19589_s3 + $0x19a0] sm:$0xff]  ;;  %v3135_v43 = vld [vmem:[%s19589_s3 + $0x19a8] sm:$0xff]  ;;  %v13277_v44 = vcombine.low %v3122_v28, %v3126_v29 }
 0x278   :  { %9085 = vmatprep.subr.bf16.mxu1 %v13216_v61  ;;  %v13256_v61 = vcombine.high %v3099_v49, %v3103_v45 }
 0x27a   :  { %8742 = vmatpush1.bf16.msra.mxu0 %v13213_v10  ;;  %v13253_v10 = vcombine.low %v3098_v42, %v3102_v38  ;;  %v3138_v38 = vld [vmem:[%s19589_s3 + $0x19c0] sm:$0xff] }
 0x27b   :  { %9086 = vmatpush1.bf16.msra.mxu1 %v13215_v11  ;;  %8743 = vmatprep.subr.bf16.mxu0 %v13222_v12  ;;  %v13255_v11 = vcombine.low %v3099_v49, %v3103_v45  ;;  %v13262_v12 = vcombine.high %v3106_v5, %v3110_v56  ;;  %v3139_v49 = vld [vmem:[%s19589_s3 + $0x19c8] sm:$0xff] }
 0x27c   :  { %9087 = vmatprep.subr.bf16.mxu1 %v13224_v50  ;;  %v13264_v50 = vcombine.high %v3107_v6, %v3111_v8  ;;  %v3143_v45 = vld [vmem:[%s19589_s3 + $0x19e8] sm:$0xff] }
 0x27e   :  { %8744 = vmatpush1.bf16.msra.mxu0 %v13221_v20  ;;  %v13261_v20 = vcombine.low %v3106_v5, %v3110_v56  ;;  %v3146_v5 = vld [vmem:[%s19589_s3 + $0x1a00] sm:$0xff] }
 0x27f   :  { %9088 = vmatpush1.bf16.msra.mxu1 %v13223_v21  ;;  %8745 = vmatprep.subr.bf16.mxu0 %v13230_v22  ;;  %v13263_v21 = vcombine.low %v3107_v6, %v3111_v8  ;;  %v13270_v22 = vcombine.high %v3114_v15, %v3118_v16  ;;  %v3150_v56 = vld [vmem:[%s19589_s3 + $0x1a20] sm:$0xff]  ;;  %v3147_v6 = vld [vmem:[%s19589_s3 + $0x1a08] sm:$0xff] }
 0x280   :  { %9089 = vmatprep.subr.bf16.mxu1 %v13232_v24  ;;  %v13272_v24 = vcombine.high %v3115_v17, %v3119_v18  ;;  %v3151_v8 = vld [vmem:[%s19589_s3 + $0x1a28] sm:$0xff] }
 0x282   :  { %8746 = vmatpush1.bf16.msra.mxu0 %v13229_v27  ;;  %v13269_v27 = vcombine.low %v3114_v15, %v3118_v16  ;;  %v3154_v15 = vld [vmem:[%s19589_s3 + $0x1a40] sm:$0xff] }
 0x283   :  { %9090 = vmatpush1.bf16.msra.mxu1 %v13231_v35  ;;  %8758 = vmatprep.subr.bf16.mxu0 %v13238_v37  ;;  %v13271_v35 = vcombine.low %v3115_v17, %v3119_v18  ;;  %v13278_v37 = vcombine.high %v3122_v28, %v3126_v29  ;;  %v3158_v16 = vld [vmem:[%s19589_s3 + $0x1a60] sm:$0xff]  ;;  %v3155_v17 = vld [vmem:[%s19589_s3 + $0x1a48] sm:$0xff] }
 0x284   :  { %9102 = vmatprep.subr.bf16.mxu1 %v13240_v39  ;;  %v13280_v39 = vcombine.high %v3123_v31, %v3127_v32  ;;  %v3159_v18 = vld [vmem:[%s19589_s3 + $0x1a68] sm:$0xff]  ;;  %v3162_v28 = vld [vmem:[%s19589_s3 + $0x1a80] sm:$0xff] }
 0x285   :  { %8748 = vmatmul.mubr.bf16.vlgmr.msra.gmra.mrb[16].mxu0 %v15958_v54  ;;  %v3166_v29 = vld [vmem:[%s19589_s3 + $0x1aa0] sm:$0xff] }
 0x286   :  { %9092 = vmatmul.mubr.bf16.vlgmr.msra.gmra.mrb[16].mxu1 %v15958_v54  ;;  %8759 = vmatpush1.bf16.msra.mxu0 %v13237_v40  ;;  %v3131_v40 = vld [vmem:[%s19589_s3 + $0x1988] sm:$0xff] }
 0x287   :  { %8790 = vmatprep.mubr.bf16.mxu0 %v16185_v62  ;;  %9103 = vmatpush1.bf16.msra.mxu1 %v13239_v58  ;;  %v13279_v58 = vcombine.low %v3123_v31, %v3127_v32  ;;  %v13288_v42 = vcombine.high %v3131_v40, %v3135_v43  ;;  %v3163_v31 = vld [vmem:[%s19589_s3 + $0x1a88] sm:$0xff] }
 0x288   :  { %9134 = vmatprep.mubr.bf16.mxu1 %v16185_v62  ;;  %8760 = vmatprep.subr.bf16.mxu0 %v13246_v48  ;;  %v13286_v48 = vcombine.high %v3130_v14, %v3134_v33  ;;  %v3167_v32 = vld [vmem:[%s19589_s3 + $0x1aa8] sm:$0xff] }
 0x289   :  { %9104 = vmatprep.subr.bf16.mxu1 %v13248_v51  ;;  %v3142_v51 = vld [vmem:[%s19589_s3 + $0x19e0] sm:$0xff] }
 0x28a   :  { %8761 = vmatpush1.bf16.msra.mxu0 %v13245_v53  ;;  %v13285_v53 = vcombine.low %v3130_v14, %v3134_v33  ;;  %v3170_v14 = vld [vmem:[%s19589_s3 + $0x1ac0] sm:$0xff] }
 0x28b   :  { %9105 = vmatpush1.bf16.msra.mxu1 %v13247_v52  ;;  %8762 = vmatprep.subr.bf16.mxu0 %v13254_v47  ;;  %v13287_v52 = vcombine.low %v3131_v40, %v3135_v43  ;;  %v13294_v47 = vcombine.high %v3138_v38, %v3142_v51  ;;  %v3174_v33 = vld [vmem:[%s19589_s3 + $0x1ae0] sm:$0xff]  ;;  %v3171_v40 = vld [vmem:[%s19589_s3 + $0x1ac8] sm:$0xff] }
 0x28c   :  { %9106 = vmatprep.subr.bf16.mxu1 %v13256_v61  ;;  %v13296_v61 = vcombine.high %v3139_v49, %v3143_v45  ;;  %v3175_v43 = vld [vmem:[%s19589_s3 + $0x1ae8] sm:$0xff] }
 0x28e   :  { %8763 = vmatpush1.bf16.msra.mxu0 %v13253_v10  ;;  %v13293_v10 = vcombine.low %v3138_v38, %v3142_v51  ;;  %v3178_v38 = vld [vmem:[%s19589_s3 + $0x1b00] sm:$0xff] }
 0x28f   :  { %9107 = vmatpush1.bf16.msra.mxu1 %v13255_v11  ;;  %8764 = vmatprep.subr.bf16.mxu0 %v13262_v12  ;;  %v13295_v11 = vcombine.low %v3139_v49, %v3143_v45  ;;  %v13302_v12 = vcombine.high %v3146_v5, %v3150_v56  ;;  %v3182_v51 = vld [vmem:[%s19589_s3 + $0x1b20] sm:$0xff]  ;;  %v3179_v49 = vld [vmem:[%s19589_s3 + $0x1b08] sm:$0xff] }
 0x290   :  { %9108 = vmatprep.subr.bf16.mxu1 %v13264_v50  ;;  %v13304_v50 = vcombine.high %v3147_v6, %v3151_v8  ;;  %v3183_v45 = vld [vmem:[%s19589_s3 + $0x1b28] sm:$0xff] }
 0x292   :  { %8765 = vmatpush1.bf16.msra.mxu0 %v13261_v20  ;;  %v13301_v20 = vcombine.low %v3146_v5, %v3150_v56  ;;  %v3186_v5 = vld [vmem:[%s19589_s3 + $0x1b40] sm:$0xff] }
 0x293   :  { %9109 = vmatpush1.bf16.msra.mxu1 %v13263_v21  ;;  %8766 = vmatprep.subr.bf16.mxu0 %v13270_v22  ;;  %v13303_v21 = vcombine.low %v3147_v6, %v3151_v8  ;;  %v13310_v22 = vcombine.high %v3154_v15, %v3158_v16  ;;  %v3190_v56 = vld [vmem:[%s19589_s3 + $0x1b60] sm:$0xff]  ;;  %v3187_v6 = vld [vmem:[%s19589_s3 + $0x1b48] sm:$0xff] }
 0x294   :  { %9110 = vmatprep.subr.bf16.mxu1 %v13272_v24  ;;  %v13312_v24 = vcombine.high %v3155_v17, %v3159_v18  ;;  %v3191_v8 = vld [vmem:[%s19589_s3 + $0x1b68] sm:$0xff] }
 0x296   :  { %8767 = vmatpush1.bf16.msra.mxu0 %v13269_v27  ;;  %v13309_v27 = vcombine.low %v3154_v15, %v3158_v16  ;;  %v3194_v15 = vld [vmem:[%s19589_s3 + $0x1b80] sm:$0xff] }
 0x297   :  { %9111 = vmatpush1.bf16.msra.mxu1 %v13271_v35  ;;  %8768 = vmatprep.subr.bf16.mxu0 %v13278_v37  ;;  %v13311_v35 = vcombine.low %v3155_v17, %v3159_v18  ;;  %v13318_v37 = vcombine.high %v3162_v28, %v3166_v29  ;;  %v3198_v16 = vld [vmem:[%s19589_s3 + $0x1ba0] sm:$0xff]  ;;  %v3195_v17 = vld [vmem:[%s19589_s3 + $0x1b88] sm:$0xff] }
 0x298   :  { %9112 = vmatprep.subr.bf16.mxu1 %v13280_v39  ;;  %v13320_v39 = vcombine.high %v3163_v31, %v3167_v32  ;;  %v3199_v18 = vld [vmem:[%s19589_s3 + $0x1ba8] sm:$0xff] }
 0x29a   :  { %8769 = vmatpush1.bf16.msra.mxu0 %v13277_v44  ;;  %v13317_v44 = vcombine.low %v3162_v28, %v3166_v29  ;;  %v3202_v28 = vld [vmem:[%s19589_s3 + $0x1bc0] sm:$0xff] }
 0x29b   :  { %9113 = vmatpush1.bf16.msra.mxu1 %v13279_v58  ;;  %8770 = vmatprep.subr.bf16.mxu0 %v13286_v48  ;;  %v13319_v58 = vcombine.low %v3163_v31, %v3167_v32  ;;  %v13326_v48 = vcombine.high %v3170_v14, %v3174_v33  ;;  %v3206_v29 = vld [vmem:[%s19589_s3 + $0x1be0] sm:$0xff]  ;;  %v3203_v31 = vld [vmem:[%s19589_s3 + $0x1bc8] sm:$0xff] }
 0x29c   :  { %9114 = vmatprep.subr.bf16.mxu1 %v13288_v42  ;;  %v13328_v42 = vcombine.high %v3171_v40, %v3175_v43  ;;  %v3207_v32 = vld [vmem:[%s19589_s3 + $0x1be8] sm:$0xff] }
 0x29e   :  { %8771 = vmatpush1.bf16.msra.mxu0 %v13285_v53  ;;  %v13325_v53 = vcombine.low %v3170_v14, %v3174_v33  ;;  %v3210_v14 = vld [vmem:[%s19589_s3 + $0x1c00] sm:$0xff] }
 0x29f   :  { %9115 = vmatpush1.bf16.msra.mxu1 %v13287_v52  ;;  %8772 = vmatprep.subr.bf16.mxu0 %v13294_v47  ;;  %v13327_v52 = vcombine.low %v3171_v40, %v3175_v43  ;;  %v13334_v47 = vcombine.high %v3178_v38, %v3182_v51  ;;  %v3214_v33 = vld [vmem:[%s19589_s3 + $0x1c20] sm:$0xff]  ;;  %v3211_v40 = vld [vmem:[%s19589_s3 + $0x1c08] sm:$0xff] }
 0x2a0   :  { %9116 = vmatprep.subr.bf16.mxu1 %v13296_v61  ;;  %v13336_v61 = vcombine.high %v3179_v49, %v3183_v45  ;;  %v3215_v43 = vld [vmem:[%s19589_s3 + $0x1c28] sm:$0xff] }
 0x2a2   :  { %8773 = vmatpush1.bf16.msra.mxu0 %v13293_v10  ;;  %v13333_v10 = vcombine.low %v3178_v38, %v3182_v51  ;;  %v3218_v38 = vld [vmem:[%s19589_s3 + $0x1c40] sm:$0xff] }
 0x2a3   :  { %9117 = vmatpush1.bf16.msra.mxu1 %v13295_v11  ;;  %8774 = vmatprep.subr.bf16.mxu0 %v13302_v12  ;;  %v13335_v11 = vcombine.low %v3179_v49, %v3183_v45  ;;  %v13342_v12 = vcombine.high %v3186_v5, %v3190_v56  ;;  %v3222_v51 = vld [vmem:[%s19589_s3 + $0x1c60] sm:$0xff]  ;;  %v13365_v49 = vcombine.low %v3210_v14, %v3214_v33  ;;  %v3219_v45 = vld [vmem:[%s19589_s3 + $0x1c48] sm:$0xff] }
 0x2a4   :  { %9118 = vmatprep.subr.bf16.mxu1 %v13304_v50  ;;  %v13344_v50 = vcombine.high %v3187_v6, %v3191_v8 }
 0x2a6   :  { %8775 = vmatpush1.bf16.msra.mxu0 %v13301_v20  ;;  %v13341_v20 = vcombine.low %v3186_v5, %v3190_v56  ;;  %v3230_v5 = vld [vmem:[%s19589_s3 + $0x1ca0] sm:$0xff] }
 0x2a7   :  { %9119 = vmatpush1.bf16.msra.mxu1 %v13303_v21  ;;  %8776 = vmatprep.subr.bf16.mxu0 %v13310_v22  ;;  %v13343_v21 = vcombine.low %v3187_v6, %v3191_v8  ;;  %v13350_v22 = vcombine.high %v3194_v15, %v3198_v16  ;;  %v3227_v6 = vld [vmem:[%s19589_s3 + $0x1c88] sm:$0xff] }
 0x2a8   :  { %9120 = vmatprep.subr.bf16.mxu1 %v13312_v24  ;;  %v13352_v24 = vcombine.high %v3195_v17, %v3199_v18  ;;  %v3231_v8 = vld [vmem:[%s19589_s3 + $0x1ca8] sm:$0xff] }
 0x2aa   :  { %8777 = vmatpush1.bf16.msra.mxu0 %v13309_v27  ;;  %v13349_v27 = vcombine.low %v3194_v15, %v3198_v16  ;;  %v3234_v15 = vld [vmem:[%s19589_s3 + $0x1cc0] sm:$0xff] }
 0x2ab   :  { %9121 = vmatpush1.bf16.msra.mxu1 %v13311_v35  ;;  %8778 = vmatprep.subr.bf16.mxu0 %v13318_v37  ;;  %v13351_v35 = vcombine.low %v3195_v17, %v3199_v18  ;;  %v13358_v37 = vcombine.high %v3202_v28, %v3206_v29  ;;  %v3238_v16 = vld [vmem:[%s19589_s3 + $0x1ce0] sm:$0xff]  ;;  %v3235_v17 = vld [vmem:[%s19589_s3 + $0x1cc8] sm:$0xff] }
 0x2ac   :  { %9122 = vmatprep.subr.bf16.mxu1 %v13320_v39  ;;  %v13360_v39 = vcombine.high %v3203_v31, %v3207_v32  ;;  %v3239_v18 = vld [vmem:[%s19589_s3 + $0x1ce8] sm:$0xff] }
 0x2ae   :  { %8779 = vmatpush1.bf16.msra.mxu0 %v13317_v44  ;;  %v13357_v44 = vcombine.low %v3202_v28, %v3206_v29  ;;  %v3242_v28 = vld [vmem:[%s19589_s3 + $0x1d00] sm:$0xff] }
 0x2af   :  { %9123 = vmatpush1.bf16.msra.mxu1 %v13319_v58  ;;  %8780 = vmatprep.subr.bf16.mxu0 %v13326_v48  ;;  %v13359_v58 = vcombine.low %v3203_v31, %v3207_v32  ;;  %v13366_v48 = vcombine.high %v3210_v14, %v3214_v33  ;;  %v3246_v29 = vld [vmem:[%s19589_s3 + $0x1d20] sm:$0xff]  ;;  %v3243_v31 = vld [vmem:[%s19589_s3 + $0x1d08] sm:$0xff] }
 0x2b0   :  { %9124 = vmatprep.subr.bf16.mxu1 %v13328_v42  ;;  %v13368_v42 = vcombine.high %v3211_v40, %v3215_v43  ;;  %v3247_v32 = vld [vmem:[%s19589_s3 + $0x1d28] sm:$0xff]  ;;  %v3250_v14 = vld [vmem:[%s19589_s3 + $0x1d40] sm:$0xff] }
 0x2b1   :  { %v3254_v33 = vld [vmem:[%s19589_s3 + $0x1d60] sm:$0xff] }
 0x2b2   :  { %8781 = vmatpush1.bf16.msra.mxu0 %v13325_v53  ;;  %v3223_v53 = vld [vmem:[%s19589_s3 + $0x1c68] sm:$0xff] }
 0x2b3   :  { %9125 = vmatpush1.bf16.msra.mxu1 %v13327_v52  ;;  %8782 = vmatprep.subr.bf16.mxu0 %v13334_v47  ;;  %v13367_v52 = vcombine.low %v3211_v40, %v3215_v43  ;;  %v13374_v47 = vcombine.high %v3218_v38, %v3222_v51  ;;  %v13376_v56 = vcombine.high %v3219_v45, %v3223_v53  ;;  %v3251_v40 = vld [vmem:[%s19589_s3 + $0x1d48] sm:$0xff] }
 0x2b4   :  { %9126 = vmatprep.subr.bf16.mxu1 %v13336_v61  ;;  %v3226_v61 = vld [vmem:[%s19589_s3 + $0x1c80] sm:$0xff]  ;;  %v3255_v43 = vld [vmem:[%s19589_s3 + $0x1d68] sm:$0xff] }
 0x2b6   :  { %8783 = vmatpush1.bf16.msra.mxu0 %v13333_v10  ;;  %v13373_v10 = vcombine.low %v3218_v38, %v3222_v51  ;;  %v3258_v38 = vld [vmem:[%s19589_s3 + $0x1d80] sm:$0xff] }
 0x2b7   :  { %9127 = vmatpush1.bf16.msra.mxu1 %v13335_v11  ;;  %8784 = vmatprep.subr.bf16.mxu0 %v13342_v12  ;;  %v13375_v11 = vcombine.low %v3219_v45, %v3223_v53  ;;  %v13382_v12 = vcombine.high %v3226_v61, %v3230_v5  ;;  %v3262_v51 = vld [vmem:[%s19589_s3 + $0x1da0] sm:$0xff]  ;;  %v3263_v45 = vld [vmem:[%s19589_s3 + $0x1da8] sm:$0xff]  ;;  %v13405_v53 = vcombine.low %v3250_v14, %v3254_v33 }
 0x2b8   :  { %9128 = vmatprep.subr.bf16.mxu1 %v13344_v50  ;;  %v13384_v50 = vcombine.high %v3227_v6, %v3231_v8 }
 0x2ba   :  { %8785 = vmatpush1.bf16.msra.mxu0 %v13341_v20  ;;  %v13381_v20 = vcombine.low %v3226_v61, %v3230_v5  ;;  %v3266_v5 = vld [vmem:[%s19589_s3 + $0x1dc0] sm:$0xff] }
 0x2bb   :  { %9129 = vmatpush1.bf16.msra.mxu1 %v13343_v21  ;;  %8786 = vmatprep.subr.bf16.mxu0 %v13350_v22  ;;  %v13383_v21 = vcombine.low %v3227_v6, %v3231_v8  ;;  %v13390_v22 = vcombine.high %v3234_v15, %v3238_v16  ;;  %v3267_v6 = vld [vmem:[%s19589_s3 + $0x1dc8] sm:$0xff] }
 0x2bc   :  { %9130 = vmatprep.subr.bf16.mxu1 %v13352_v24  ;;  %v13392_v24 = vcombine.high %v3235_v17, %v3239_v18  ;;  %v3271_v8 = vld [vmem:[%s19589_s3 + $0x1de8] sm:$0xff] }
 0x2be   :  { %8787 = vmatpush1.bf16.msra.mxu0 %v13349_v27  ;;  %v13389_v27 = vcombine.low %v3234_v15, %v3238_v16  ;;  %v3274_v15 = vld [vmem:[%s19589_s3 + $0x1e00] sm:$0xff] }
 0x2bf   :  { %9131 = vmatpush1.bf16.msra.mxu1 %v13351_v35  ;;  %8788 = vmatprep.subr.bf16.mxu0 %v13358_v37  ;;  %v13391_v35 = vcombine.low %v3235_v17, %v3239_v18  ;;  %v13398_v37 = vcombine.high %v3242_v28, %v3246_v29  ;;  %v3278_v16 = vld [vmem:[%s19589_s3 + $0x1e20] sm:$0xff]  ;;  %v3275_v17 = vld [vmem:[%s19589_s3 + $0x1e08] sm:$0xff] }
 0x2c0   :  { %9132 = vmatprep.subr.bf16.mxu1 %v13360_v39  ;;  %v13400_v39 = vcombine.high %v3243_v31, %v3247_v32  ;;  %v3279_v18 = vld [vmem:[%s19589_s3 + $0x1e28] sm:$0xff] }
 0x2c2   :  { %8789 = vmatpush1.bf16.msra.mxu0 %v13357_v44  ;;  %v13397_v44 = vcombine.low %v3242_v28, %v3246_v29  ;;  %v3282_v28 = vld [vmem:[%s19589_s3 + $0x1e40] sm:$0xff] }
 0x2c3   :  { %9133 = vmatpush1.bf16.msra.mxu1 %v13359_v58  ;;  %8801 = vmatprep.subr.bf16.mxu0 %v13366_v48  ;;  %v13399_v58 = vcombine.low %v3243_v31, %v3247_v32  ;;  %v13406_v48 = vcombine.high %v3250_v14, %v3254_v33  ;;  %v3286_v29 = vld [vmem:[%s19589_s3 + $0x1e60] sm:$0xff]  ;;  %v3283_v31 = vld [vmem:[%s19589_s3 + $0x1e48] sm:$0xff] }
 0x2c4   :  { %9145 = vmatprep.subr.bf16.mxu1 %v13368_v42  ;;  %v13408_v42 = vcombine.high %v3251_v40, %v3255_v43  ;;  %v3287_v32 = vld [vmem:[%s19589_s3 + $0x1e68] sm:$0xff]  ;;  %v3290_v14 = vld [vmem:[%s19589_s3 + $0x1e80] sm:$0xff] }
 0x2c5   :  { %8791 = vmatmul.mubr.bf16.vlgmr.msra.gmra.mrb[16].mxu0 %v16177_v25  ;;  %v3294_v33 = vld [vmem:[%s19589_s3 + $0x1ea0] sm:$0xff] }
 0x2c6   :  { %9135 = vmatmul.mubr.bf16.vlgmr.msra.gmra.mrb[16].mxu1 %v16177_v25  ;;  %8802 = vmatpush1.bf16.msra.mxu0 %v13365_v49  ;;  %v3259_v49 = vld [vmem:[%s19589_s3 + $0x1d88] sm:$0xff] }
 0x2c7   :  { %8833 = vmatprep.mubr.bf16.mxu0 %v16213_v46  ;;  %9146 = vmatpush1.bf16.msra.mxu1 %v13367_v52  ;;  %v13407_v52 = vcombine.low %v3251_v40, %v3255_v43  ;;  %v13416_v61 = vcombine.high %v3259_v49, %v3263_v45  ;;  %v3291_v40 = vld [vmem:[%s19589_s3 + $0x1e88] sm:$0xff] }
 0x2c8   :  { %9177 = vmatprep.mubr.bf16.mxu1 %v16213_v46  ;;  %8803 = vmatprep.subr.bf16.mxu0 %v13374_v47  ;;  %v13414_v47 = vcombine.high %v3258_v38, %v3262_v51  ;;  %v3295_v43 = vld [vmem:[%s19589_s3 + $0x1ea8] sm:$0xff] }
 0x2c9   :  { %9147 = vmatprep.subr.bf16.mxu1 %v13376_v56  ;;  %v3270_v56 = vld [vmem:[%s19589_s3 + $0x1de0] sm:$0xff] }
 0x2ca   :  { %8804 = vmatpush1.bf16.msra.mxu0 %v13373_v10  ;;  %v13413_v10 = vcombine.low %v3258_v38, %v3262_v51  ;;  %v3298_v38 = vld [vmem:[%s19589_s3 + $0x1ec0] sm:$0xff] }
 0x2cb   :  { %9148 = vmatpush1.bf16.msra.mxu1 %v13375_v11  ;;  %8805 = vmatprep.subr.bf16.mxu0 %v13382_v12  ;;  %v13415_v11 = vcombine.low %v3259_v49, %v3263_v45  ;;  %v13422_v12 = vcombine.high %v3266_v5, %v3270_v56  ;;  %v3302_v51 = vld [vmem:[%s19589_s3 + $0x1ee0] sm:$0xff]  ;;  %v3299_v49 = vld [vmem:[%s19589_s3 + $0x1ec8] sm:$0xff] }
 0x2cc   :  { %9149 = vmatprep.subr.bf16.mxu1 %v13384_v50  ;;  %v13424_v50 = vcombine.high %v3267_v6, %v3271_v8  ;;  %v3303_v45 = vld [vmem:[%s19589_s3 + $0x1ee8] sm:$0xff] }
 0x2ce   :  { %8806 = vmatpush1.bf16.msra.mxu0 %v13381_v20  ;;  %v13421_v20 = vcombine.low %v3266_v5, %v3270_v56  ;;  %v3306_v5 = vld [vmem:[%s19589_s3 + $0x1f00] sm:$0xff] }
 0x2cf   :  { %9150 = vmatpush1.bf16.msra.mxu1 %v13383_v21  ;;  %8807 = vmatprep.subr.bf16.mxu0 %v13390_v22  ;;  %v13423_v21 = vcombine.low %v3267_v6, %v3271_v8  ;;  %v13430_v22 = vcombine.high %v3274_v15, %v3278_v16  ;;  %v3310_v56 = vld [vmem:[%s19589_s3 + $0x1f20] sm:$0xff]  ;;  %v3307_v6 = vld [vmem:[%s19589_s3 + $0x1f08] sm:$0xff] }
 0x2d0   :  { %9151 = vmatprep.subr.bf16.mxu1 %v13392_v24  ;;  %v13432_v24 = vcombine.high %v3275_v17, %v3279_v18  ;;  %v3311_v8 = vld [vmem:[%s19589_s3 + $0x1f28] sm:$0xff] }
 0x2d2   :  { %8808 = vmatpush1.bf16.msra.mxu0 %v13389_v27  ;;  %v13429_v27 = vcombine.low %v3274_v15, %v3278_v16  ;;  %v3314_v15 = vld [vmem:[%s19589_s3 + $0x1f40] sm:$0xff] }
 0x2d3   :  { %9152 = vmatpush1.bf16.msra.mxu1 %v13391_v35  ;;  %8809 = vmatprep.subr.bf16.mxu0 %v13398_v37  ;;  %v13431_v35 = vcombine.low %v3275_v17, %v3279_v18  ;;  %v13438_v37 = vcombine.high %v3282_v28, %v3286_v29  ;;  %v3318_v16 = vld [vmem:[%s19589_s3 + $0x1f60] sm:$0xff]  ;;  %v3315_v17 = vld [vmem:[%s19589_s3 + $0x1f48] sm:$0xff] }
 0x2d4   :  { %9153 = vmatprep.subr.bf16.mxu1 %v13400_v39  ;;  %v13440_v39 = vcombine.high %v3283_v31, %v3287_v32  ;;  %v3319_v18 = vld [vmem:[%s19589_s3 + $0x1f68] sm:$0xff] }
 0x2d6   :  { %8810 = vmatpush1.bf16.msra.mxu0 %v13397_v44  ;;  %v13437_v44 = vcombine.low %v3282_v28, %v3286_v29  ;;  %v3322_v28 = vld [vmem:[%s19589_s3 + $0x1f80] sm:$0xff] }
 0x2d7   :  { %9154 = vmatpush1.bf16.msra.mxu1 %v13399_v58  ;;  %8811 = vmatprep.subr.bf16.mxu0 %v13406_v48  ;;  %v13439_v58 = vcombine.low %v3283_v31, %v3287_v32  ;;  %v13446_v48 = vcombine.high %v3290_v14, %v3294_v33  ;;  %v3326_v29 = vld [vmem:[%s19589_s3 + $0x1fa0] sm:$0xff]  ;;  %v3323_v31 = vld [vmem:[%s19589_s3 + $0x1f88] sm:$0xff] }
 0x2d8   :  { %9155 = vmatprep.subr.bf16.mxu1 %v13408_v42  ;;  %v13448_v42 = vcombine.high %v3291_v40, %v3295_v43  ;;  %v3327_v32 = vld [vmem:[%s19589_s3 + $0x1fa8] sm:$0xff] }
 0x2da   :  { %8812 = vmatpush1.bf16.msra.mxu0 %v13405_v53  ;;  %v13445_v53 = vcombine.low %v3290_v14, %v3294_v33  ;;  %v3330_v14 = vld [vmem:[%s19589_s3 + $0x1fc0] sm:$0xff] }
 0x2db   :  { %9156 = vmatpush1.bf16.msra.mxu1 %v13407_v52  ;;  %8813 = vmatprep.subr.bf16.mxu0 %v13414_v47  ;;  %v13447_v52 = vcombine.low %v3291_v40, %v3295_v43  ;;  %v13454_v47 = vcombine.high %v3298_v38, %v3302_v51  ;;  %v3334_v33 = vld [vmem:[%s19589_s3 + $0x1fe0] sm:$0xff]  ;;  %v3331_v40 = vld [vmem:[%s19589_s3 + $0x1fc8] sm:$0xff] }
 0x2dc   :  { %9157 = vmatprep.subr.bf16.mxu1 %v13416_v61  ;;  %v13456_v61 = vcombine.high %v3299_v49, %v3303_v45  ;;  %v3335_v43 = vld [vmem:[%s19589_s3 + $0x1fe8] sm:$0xff] }
 0x2de   :  { %8814 = vmatpush1.bf16.msra.mxu0 %v13413_v10  ;;  %v13453_v10 = vcombine.low %v3298_v38, %v3302_v51  ;;  %v2316_v38 = vld [vmem:[%s19589_s3 + $0x10] sm:$0xff] }
 0x2df   :  { %9158 = vmatpush1.bf16.msra.mxu1 %v13415_v11  ;;  %8815 = vmatprep.subr.bf16.mxu0 %v13422_v12  ;;  %v13455_v11 = vcombine.low %v3299_v49, %v3303_v45  ;;  %v13462_v12 = vcombine.high %v3306_v5, %v3310_v56  ;;  %v2320_v51 = vld [vmem:[%s19589_s3 + $0x30] sm:$0xff]  ;;  %v2317_v49 = vld [vmem:[%s19589_s3 + $0x18] sm:$0xff] }
 0x2e0   :  { %9159 = vmatprep.subr.bf16.mxu1 %v13424_v50  ;;  %v13464_v50 = vcombine.high %v3307_v6, %v3311_v8  ;;  %v2321_v45 = vld [vmem:[%s19589_s3 + $0x38] sm:$0xff] }
 0x2e2   :  { %8816 = vmatpush1.bf16.msra.mxu0 %v13421_v20  ;;  %v13461_v20 = vcombine.low %v3306_v5, %v3310_v56  ;;  %v2324_v5 = vld [vmem:[%s19589_s3 + $0x50] sm:$0xff] }
 0x2e3   :  { %9160 = vmatpush1.bf16.msra.mxu1 %v13423_v21  ;;  %8817 = vmatprep.subr.bf16.mxu0 %v13430_v22  ;;  %v13463_v21 = vcombine.low %v3307_v6, %v3311_v8  ;;  %v13470_v22 = vcombine.high %v3314_v15, %v3318_v16  ;;  %v2328_v56 = vld [vmem:[%s19589_s3 + $0x70] sm:$0xff]  ;;  %v12473_v6 = vcombine.low %v2316_v38, %v2320_v51  ;;  %v2325_v8 = vld [vmem:[%s19589_s3 + $0x58] sm:$0xff] }
 0x2e4   :  { %9161 = vmatprep.subr.bf16.mxu1 %v13432_v24  ;;  %v13472_v24 = vcombine.high %v3315_v17, %v3319_v18 }
 0x2e6   :  { %8818 = vmatpush1.bf16.msra.mxu0 %v13429_v27  ;;  %v13469_v27 = vcombine.low %v3314_v15, %v3318_v16  ;;  %v2336_v15 = vld [vmem:[%s19589_s3 + $0xb0] sm:$0xff] }
 0x2e7   :  { %9162 = vmatpush1.bf16.msra.mxu1 %v13431_v35  ;;  %8819 = vmatprep.subr.bf16.mxu0 %v13438_v37  ;;  %v13471_v35 = vcombine.low %v3315_v17, %v3319_v18  ;;  %v13478_v37 = vcombine.high %v3322_v28, %v3326_v29  ;;  %v2333_v17 = vld [vmem:[%s19589_s3 + $0x98] sm:$0xff] }
 0x2e8   :  { %9163 = vmatprep.subr.bf16.mxu1 %v13440_v39  ;;  %v13480_v39 = vcombine.high %v3323_v31, %v3327_v32  ;;  %v2337_v18 = vld [vmem:[%s19589_s3 + $0xb8] sm:$0xff] }
 0x2ea   :  { %8820 = vmatpush1.bf16.msra.mxu0 %v13437_v44  ;;  %v13477_v44 = vcombine.low %v3322_v28, %v3326_v29  ;;  %v2340_v28 = vld [vmem:[%s19589_s3 + $0xd0] sm:$0xff] }
 0x2eb   :  { %9164 = vmatpush1.bf16.msra.mxu1 %v13439_v58  ;;  %8821 = vmatprep.subr.bf16.mxu0 %v13446_v48  ;;  %v13479_v58 = vcombine.low %v3323_v31, %v3327_v32  ;;  %v13486_v48 = vcombine.high %v3330_v14, %v3334_v33  ;;  %v2344_v29 = vld [vmem:[%s19589_s3 + $0xf0] sm:$0xff]  ;;  %v2341_v31 = vld [vmem:[%s19589_s3 + $0xd8] sm:$0xff] }
 0x2ec   :  { %9165 = vmatprep.subr.bf16.mxu1 %v13448_v42  ;;  %v13488_v42 = vcombine.high %v3331_v40, %v3335_v43  ;;  %v2345_v32 = vld [vmem:[%s19589_s3 + $0xf8] sm:$0xff] }
 0x2ee   :  { %8822 = vmatpush1.bf16.msra.mxu0 %v13445_v53  ;;  %v13485_v53 = vcombine.low %v3330_v14, %v3334_v33  ;;  %v2352_v14 = vld [vmem:[%s19589_s3 + $0x130] sm:$0xff]  ;;  %v2349_v33 = vld [vmem:[%s19589_s3 + $0x118] sm:$0xff] }
 0x2ef   :  { %9166 = vmatpush1.bf16.msra.mxu1 %v13447_v52  ;;  %8823 = vmatprep.subr.bf16.mxu0 %v13454_v47  ;;  %v13487_v52 = vcombine.low %v3331_v40, %v3335_v43  ;;  %v12474_v47 = vcombine.high %v2316_v38, %v2320_v51  ;;  %v2353_v40 = vld [vmem:[%s19589_s3 + $0x138] sm:$0xff]  ;;  %v12497_v43 = vcombine.low %v2340_v28, %v2344_v29  ;;  %v2360_v38 = vld [vmem:[%s19589_s3 + $0x170] sm:$0xff] }
 0x2f0   :  { %9167 = vmatprep.subr.bf16.mxu1 %v13456_v61  ;;  %v12476_v61 = vcombine.high %v2317_v49, %v2321_v45  ;;  %v2357_v51 = vld [vmem:[%s19589_s3 + $0x158] sm:$0xff] }
 0x2f2   :  { %8824 = vmatpush1.bf16.msra.mxu0 %v13453_v10  ;;  %v2329_v10 = vld [vmem:[%s19589_s3 + $0x78] sm:$0xff] }
 0x2f3   :  { %9168 = vmatpush1.bf16.msra.mxu1 %v13455_v11  ;;  %8825 = vmatprep.subr.bf16.mxu0 %v13462_v12  ;;  %v12475_v11 = vcombine.low %v2317_v49, %v2321_v45  ;;  %v12482_v12 = vcombine.high %v2324_v5, %v2328_v56  ;;  %v12484_v16 = vcombine.high %v2325_v8, %v2329_v10  ;;  %v2361_v49 = vld [vmem:[%s19589_s3 + $0x178] sm:$0xff] }
 0x2f4   :  { %9169 = vmatprep.subr.bf16.mxu1 %v13464_v50  ;;  %v2332_v50 = vld [vmem:[%s19589_s3 + $0x90] sm:$0xff] }
 0x2f6   :  { %8826 = vmatpush1.bf16.msra.mxu0 %v13461_v20  ;;  %v12481_v20 = vcombine.low %v2324_v5, %v2328_v56  ;;  %v2368_v5 = vld [vmem:[%s19589_s3 + $0x1b0] sm:$0xff]  ;;  %v2365_v56 = vld [vmem:[%s19589_s3 + $0x198] sm:$0xff] }
 0x2f7   :  { %9170 = vmatpush1.bf16.msra.mxu1 %v13463_v21  ;;  %8827 = vmatprep.subr.bf16.mxu0 %v13470_v22  ;;  %v12483_v21 = vcombine.low %v2325_v8, %v2329_v10  ;;  %v12490_v22 = vcombine.high %v2332_v50, %v2336_v15  ;;  %v12515_v10 = vcombine.low %v2357_v51, %v2361_v49 }
 0x2f8   :  { %9171 = vmatprep.subr.bf16.mxu1 %v13472_v24  ;;  %v12492_v24 = vcombine.high %v2333_v17, %v2337_v18 }
 0x2fa   :  { %8828 = vmatpush1.bf16.msra.mxu0 %v13469_v27  ;;  %v12491_v27 = vcombine.low %v2333_v17, %v2337_v18  ;;  %v2377_v17 = vld [vmem:[%s19589_s3 + $0x1f8] sm:$0xff] }
 0x2fb   :  { %9172 = vmatpush1.bf16.msra.mxu1 %v13471_v35  ;;  %8829 = vmatprep.subr.bf16.mxu0 %v13478_v37  ;;  %v12498_v35 = vcombine.high %v2340_v28, %v2344_v29  ;;  %v12500_v37 = vcombine.high %v2341_v31, %v2345_v32  ;;  %v2384_v28 = vld [vmem:[%s19589_s3 + $0x230] sm:$0xff]  ;;  %v2381_v29 = vld [vmem:[%s19589_s3 + $0x218] sm:$0xff] }
 0x2fc   :  { %9173 = vmatprep.subr.bf16.mxu1 %v13480_v39  ;;  %v2348_v39 = vld [vmem:[%s19589_s3 + $0x110] sm:$0xff] }
 0x2fd   :  { %v12505_v45 = vcombine.low %v2348_v39, %v2352_v14 }
 0x2fe   :  { %8830 = vmatpush1.bf16.msra.mxu0 %v13477_v44  ;;  %v12499_v44 = vcombine.low %v2341_v31, %v2345_v32  ;;  %v2385_v31 = vld [vmem:[%s19589_s3 + $0x238] sm:$0xff] }
 0x2ff   :  { %9174 = vmatpush1.bf16.msra.mxu1 %v13479_v58  ;;  %8831 = vmatprep.subr.bf16.mxu0 %v13486_v48  ;;  %v12506_v58 = vcombine.high %v2348_v39, %v2352_v14  ;;  %v12508_v48 = vcombine.high %v2349_v33, %v2353_v40  ;;  %v2392_v39 = vld [vmem:[%s19589_s3 + $0x270] sm:$0xff]  ;;  %v2389_v14 = vld [vmem:[%s19589_s3 + $0x258] sm:$0xff] }
 0x300   :  { %9175 = vmatprep.subr.bf16.mxu1 %v13488_v42  ;;  %v2356_v42 = vld [vmem:[%s19589_s3 + $0x150] sm:$0xff] }
 0x301   :  { %v12513_v8 = vcombine.low %v2356_v42, %v2360_v38 }
 0x302   :  { %8832 = vmatpush1.bf16.msra.mxu0 %v13485_v53  ;;  %v12507_v53 = vcombine.low %v2349_v33, %v2353_v40  ;;  %v2393_v33 = vld [vmem:[%s19589_s3 + $0x278] sm:$0xff] }
 0x303   :  { %9176 = vmatpush1.bf16.msra.mxu1 %v13487_v52  ;;  %9188 = vmatprep.subr.bf16.mxu0 %v12474_v47  ;;  %v12514_v52 = vcombine.high %v2356_v42, %v2360_v38  ;;  %v12516_v47 = vcombine.high %v2357_v51, %v2361_v49  ;;  %v2400_v42 = vld [vmem:[%s19589_s3 + $0x2b0] sm:$0xff]  ;;  %v2397_v38 = vld [vmem:[%s19589_s3 + $0x298] sm:$0xff] }
 0x304   :  { %9532 = vmatprep.subr.bf16.mxu1 %v12476_v61  ;;  %v2364_v61 = vld [vmem:[%s19589_s3 + $0x190] sm:$0xff]  ;;  %v2401_v51 = vld [vmem:[%s19589_s3 + $0x2b8] sm:$0xff] }
 0x305   :  { %8834 = vmatmul.mubr.bf16.vlgmr.msra.gmra.mrb[16].mxu0 %v16205_v26  ;;  %v12521_v18 = vcombine.low %v2364_v61, %v2368_v5 }
 0x306   :  { %9178 = vmatmul.mubr.bf16.vlgmr.msra.gmra.mrb[16].mxu1 %v16205_v26  ;;  %9189 = vmatpush1.bf16.msra.mxu0 %v12473_v6  ;;  %v2369_v6 = vld [vmem:[%s19589_s3 + $0x1b8] sm:$0xff] }
 0x307   :  { %9220 = vmatprep.mubr.bf16.mxu0 %v15425_v4  ;;  %9533 = vmatpush1.bf16.msra.mxu1 %v12475_v11  ;;  %v12522_v11 = vcombine.high %v2364_v61, %v2368_v5  ;;  %v2408_v61 = vld [vmem:[%s19589_s3 + $0x2f0] sm:$0xff]  ;;  %v2405_v5 = vld [vmem:[%s19589_s3 + $0x2d8] sm:$0xff] }
 0x308   :  { %9564 = vmatprep.mubr.bf16.mxu1 %v15425_v4  ;;  %9190 = vmatprep.subr.bf16.mxu0 %v12482_v12  ;;  %v12489_v4 = vcombine.low %v2332_v50, %v2336_v15  ;;  %v12524_v12 = vcombine.high %v2365_v56, %v2369_v6  ;;  %v2372_v50 = vld [vmem:[%s19589_s3 + $0x1d0] sm:$0xff] }
 0x309   :  { %9534 = vmatprep.subr.bf16.mxu1 %v12484_v16  ;;  %v2376_v15 = vld [vmem:[%s19589_s3 + $0x1f0] sm:$0xff]  ;;  %v2373_v16 = vld [vmem:[%s19589_s3 + $0x1d8] sm:$0xff] }
 0x30a   :  { %9191 = vmatpush1.bf16.msra.mxu0 %v12481_v20  ;;  %v12523_v20 = vcombine.low %v2365_v56, %v2369_v6  ;;  %v12529_v32 = vcombine.low %v2372_v50, %v2376_v15  ;;  %v2409_v56 = vld [vmem:[%s19589_s3 + $0x2f8] sm:$0xff] }
 0x30b   :  { %9535 = vmatpush1.bf16.msra.mxu1 %v12483_v21  ;;  %9192 = vmatprep.subr.bf16.mxu0 %v12490_v22  ;;  %v12530_v21 = vcombine.high %v2372_v50, %v2376_v15  ;;  %v12532_v22 = vcombine.high %v2373_v16, %v2377_v17  ;;  %v2416_v50 = vld [vmem:[%s19589_s3 + $0x330] sm:$0xff]  ;;  %v2413_v15 = vld [vmem:[%s19589_s3 + $0x318] sm:$0xff] }
 0x30c   :  { %9536 = vmatprep.subr.bf16.mxu1 %v12492_v24  ;;  %v2380_v24 = vld [vmem:[%s19589_s3 + $0x210] sm:$0xff] }
 0x30d   :  { %v12537_v40 = vcombine.low %v2380_v24, %v2384_v28 }
 0x30e   :  { %9193 = vmatpush1.bf16.msra.mxu0 %v12489_v4  ;;  %v12531_v4 = vcombine.low %v2373_v16, %v2377_v17  ;;  %v2417_v16 = vld [vmem:[%s19589_s3 + $0x338] sm:$0xff] }
 0x30f   :  { %9537 = vmatpush1.bf16.msra.mxu1 %v12491_v27  ;;  %9194 = vmatprep.subr.bf16.mxu0 %v12498_v35  ;;  %v12538_v27 = vcombine.high %v2380_v24, %v2384_v28  ;;  %v12540_v35 = vcombine.high %v2381_v29, %v2385_v31  ;;  %v2424_v24 = vld [vmem:[%s19589_s3 + $0x370] sm:$0xff]  ;;  %v2421_v28 = vld [vmem:[%s19589_s3 + $0x358] sm:$0xff] }
 0x310   :  { %9538 = vmatprep.subr.bf16.mxu1 %v12500_v37  ;;  %v2388_v37 = vld [vmem:[%s19589_s3 + $0x250] sm:$0xff] }
 0x311   :  { %v12545_v49 = vcombine.low %v2388_v37, %v2392_v39 }
 0x312   :  { %9195 = vmatpush1.bf16.msra.mxu0 %v12497_v43  ;;  %v12539_v43 = vcombine.low %v2381_v29, %v2385_v31  ;;  %v2425_v29 = vld [vmem:[%s19589_s3 + $0x378] sm:$0xff] }
 0x313   :  { %9539 = vmatpush1.bf16.msra.mxu1 %v12499_v44  ;;  %9196 = vmatprep.subr.bf16.mxu0 %v12506_v58  ;;  %v12546_v44 = vcombine.high %v2388_v37, %v2392_v39  ;;  %v12548_v58 = vcombine.high %v2389_v14, %v2393_v33  ;;  %v2432_v37 = vld [vmem:[%s19589_s3 + $0x3b0] sm:$0xff]  ;;  %v2429_v39 = vld [vmem:[%s19589_s3 + $0x398] sm:$0xff] }
 0x314   :  { %9540 = vmatprep.subr.bf16.mxu1 %v12508_v48  ;;  %v2396_v48 = vld [vmem:[%s19589_s3 + $0x290] sm:$0xff] }
 0x315   :  { %v12553_v6 = vcombine.low %v2396_v48, %v2400_v42 }
 0x316   :  { %9197 = vmatpush1.bf16.msra.mxu0 %v12505_v45  ;;  %v12547_v45 = vcombine.low %v2389_v14, %v2393_v33  ;;  %v2433_v14 = vld [vmem:[%s19589_s3 + $0x3b8] sm:$0xff] }
 0x317   :  { %9541 = vmatpush1.bf16.msra.mxu1 %v12507_v53  ;;  %9198 = vmatprep.subr.bf16.mxu0 %v12514_v52  ;;  %v12554_v53 = vcombine.high %v2396_v48, %v2400_v42  ;;  %v12556_v52 = vcombine.high %v2397_v38, %v2401_v51  ;;  %v2440_v48 = vld [vmem:[%s19589_s3 + $0x3f0] sm:$0xff]  ;;  %v2437_v42 = vld [vmem:[%s19589_s3 + $0x3d8] sm:$0xff] }
 0x318   :  { %9542 = vmatprep.subr.bf16.mxu1 %v12516_v47  ;;  %v2404_v47 = vld [vmem:[%s19589_s3 + $0x2d0] sm:$0xff] }
 0x319   :  { %v12561_v17 = vcombine.low %v2404_v47, %v2408_v61 }
 0x31a   :  { %9199 = vmatpush1.bf16.msra.mxu0 %v12513_v8  ;;  %v12555_v8 = vcombine.low %v2397_v38, %v2401_v51  ;;  %v2441_v38 = vld [vmem:[%s19589_s3 + $0x3f8] sm:$0xff] }
 0x31b   :  { %9543 = vmatpush1.bf16.msra.mxu1 %v12515_v10  ;;  %9200 = vmatprep.subr.bf16.mxu0 %v12522_v11  ;;  %v12562_v10 = vcombine.high %v2404_v47, %v2408_v61  ;;  %v12564_v11 = vcombine.high %v2405_v5, %v2409_v56  ;;  %v2448_v47 = vld [vmem:[%s19589_s3 + $0x430] sm:$0xff]  ;;  %v2445_v61 = vld [vmem:[%s19589_s3 + $0x418] sm:$0xff] }
 0x31c   :  { %9544 = vmatprep.subr.bf16.mxu1 %v12524_v12  ;;  %v2412_v12 = vld [vmem:[%s19589_s3 + $0x310] sm:$0xff] }
 0x31d   :  { %v12569_v31 = vcombine.low %v2412_v12, %v2416_v50 }
 0x31e   :  { %9201 = vmatpush1.bf16.msra.mxu0 %v12521_v18  ;;  %v12563_v18 = vcombine.low %v2405_v5, %v2409_v56  ;;  %v2449_v5 = vld [vmem:[%s19589_s3 + $0x438] sm:$0xff] }
 0x31f   :  { %9545 = vmatpush1.bf16.msra.mxu1 %v12523_v20  ;;  %9202 = vmatprep.subr.bf16.mxu0 %v12530_v21  ;;  %v12570_v20 = vcombine.high %v2412_v12, %v2416_v50  ;;  %v12572_v21 = vcombine.high %v2413_v15, %v2417_v16  ;;  %v2456_v12 = vld [vmem:[%s19589_s3 + $0x470] sm:$0xff] }
 0x320   :  { %9546 = vmatprep.subr.bf16.mxu1 %v12532_v22  ;;  %v2420_v22 = vld [vmem:[%s19589_s3 + $0x350] sm:$0xff] }
 0x321   :  { %v12577_v33 = vcombine.low %v2420_v22, %v2424_v24 }
 0x322   :  { %9203 = vmatpush1.bf16.msra.mxu0 %v12529_v32  ;;  %v12571_v32 = vcombine.low %v2413_v15, %v2417_v16  ;;  %v2453_v15 = vld [vmem:[%s19589_s3 + $0x458] sm:$0xff] }
 0x323   :  { %9547 = vmatpush1.bf16.msra.mxu1 %v12531_v4  ;;  %9204 = vmatprep.subr.bf16.mxu0 %v12538_v27  ;;  %v12578_v4 = vcombine.high %v2420_v22, %v2424_v24  ;;  %v12580_v27 = vcombine.high %v2421_v28, %v2425_v29  ;;  %v2457_v16 = vld [vmem:[%s19589_s3 + $0x478] sm:$0xff] }
 0x324   :  { %9548 = vmatprep.subr.bf16.mxu1 %v12540_v35  ;;  %v2428_v35 = vld [vmem:[%s19589_s3 + $0x390] sm:$0xff]  ;;  %v12612_v22 = vcombine.high %v2453_v15, %v2457_v16  ;;  %v2461_v24 = vld [vmem:[%s19589_s3 + $0x498] sm:$0xff] }
 0x325   :  { %v12585_v51 = vcombine.low %v2428_v35, %v2432_v37 }
 0x326   :  { %9205 = vmatpush1.bf16.msra.mxu0 %v12537_v40  ;;  %v12579_v40 = vcombine.low %v2421_v28, %v2425_v29  ;;  %v2465_v28 = vld [vmem:[%s19589_s3 + $0x4b8] sm:$0xff] }
 0x327   :  { %9549 = vmatpush1.bf16.msra.mxu1 %v12539_v43  ;;  %9206 = vmatprep.subr.bf16.mxu0 %v12546_v44  ;;  %v12586_v43 = vcombine.high %v2428_v35, %v2432_v37  ;;  %v12588_v44 = vcombine.high %v2429_v39, %v2433_v14  ;;  %v2472_v35 = vld [vmem:[%s19589_s3 + $0x4f0] sm:$0xff]  ;;  %v2473_v37 = vld [vmem:[%s19589_s3 + $0x4f8] sm:$0xff] }
 0x328   :  { %9550 = vmatprep.subr.bf16.mxu1 %v12548_v58  ;;  %v2436_v58 = vld [vmem:[%s19589_s3 + $0x3d0] sm:$0xff] }
 0x329   :  { %v12593_v56 = vcombine.low %v2436_v58, %v2440_v48 }
 0x32a   :  { %9207 = vmatpush1.bf16.msra.mxu0 %v12545_v49  ;;  %v12587_v49 = vcombine.low %v2429_v39, %v2433_v14  ;;  %v12619_v39 = vcombine.low %v2461_v24, %v2465_v28 }
 0x32b   :  { %9551 = vmatpush1.bf16.msra.mxu1 %v12547_v45  ;;  %9208 = vmatprep.subr.bf16.mxu0 %v12554_v53  ;;  %v12594_v45 = vcombine.high %v2436_v58, %v2440_v48  ;;  %v12596_v53 = vcombine.high %v2437_v42, %v2441_v38  ;;  %v2481_v58 = vld [vmem:[%s19589_s3 + $0x538] sm:$0xff] }
 0x32c   :  { %9552 = vmatprep.subr.bf16.mxu1 %v12556_v52  ;;  %v2444_v52 = vld [vmem:[%s19589_s3 + $0x410] sm:$0xff] }
 0x32d   :  { %v12601_v50 = vcombine.low %v2444_v52, %v2448_v47 }
 0x32e   :  { %9209 = vmatpush1.bf16.msra.mxu0 %v12553_v6  ;;  %v12595_v6 = vcombine.low %v2437_v42, %v2441_v38 }
 0x32f   :  { %9553 = vmatpush1.bf16.msra.mxu1 %v12555_v8  ;;  %9210 = vmatprep.subr.bf16.mxu0 %v12562_v10  ;;  %v12602_v8 = vcombine.high %v2444_v52, %v2448_v47  ;;  %v12604_v10 = vcombine.high %v2445_v61, %v2449_v5  ;;  %v2489_v52 = vld [vmem:[%s19589_s3 + $0x578] sm:$0xff] }
 0x330   :  { %9554 = vmatprep.subr.bf16.mxu1 %v12564_v11  ;;  %v2452_v11 = vld [vmem:[%s19589_s3 + $0x450] sm:$0xff] }
 0x331   :  { %v12609_v29 = vcombine.low %v2452_v11, %v2456_v12 }
 0x332   :  { %9211 = vmatpush1.bf16.msra.mxu0 %v12561_v17  ;;  %v12603_v17 = vcombine.low %v2445_v61, %v2449_v5 }
 0x333   :  { %9555 = vmatpush1.bf16.msra.mxu1 %v12563_v18  ;;  %9212 = vmatprep.subr.bf16.mxu0 %v12570_v20  ;;  %v12610_v18 = vcombine.high %v2452_v11, %v2456_v12  ;;  %v2460_v20 = vld [vmem:[%s19589_s3 + $0x490] sm:$0xff]  ;;  %v2497_v11 = vld [vmem:[%s19589_s3 + $0x5b8] sm:$0xff] }
 0x334   :  { %9556 = vmatprep.subr.bf16.mxu1 %v12572_v21  ;;  %v2464_v21 = vld [vmem:[%s19589_s3 + $0x4b0] sm:$0xff] }
 0x336   :  { %9213 = vmatpush1.bf16.msra.mxu0 %v12569_v31  ;;  %v12611_v31 = vcombine.low %v2453_v15, %v2457_v16 }
 0x337   :  { %9557 = vmatpush1.bf16.msra.mxu1 %v12571_v32  ;;  %9214 = vmatprep.subr.bf16.mxu0 %v12578_v4  ;;  %v12618_v32 = vcombine.high %v2460_v20, %v2464_v21  ;;  %v12620_v4 = vcombine.high %v2461_v24, %v2465_v28 }
 0x338   :  { %9558 = vmatprep.subr.bf16.mxu1 %v12580_v27  ;;  %v2468_v27 = vld [vmem:[%s19589_s3 + $0x4d0] sm:$0xff] }
 0x339   :  { %v12626_v14 = vcombine.high %v2468_v27, %v2472_v35  ;;  %v12625_v48 = vcombine.low %v2468_v27, %v2472_v35  ;;  %v2513_v27 = vld [vmem:[%s19589_s3 + $0x638] sm:$0xff] }
 0x33a   :  { %9215 = vmatpush1.bf16.msra.mxu0 %v12577_v33 }
 0x33b   :  { %9559 = vmatpush1.bf16.msra.mxu1 %v12579_v40  ;;  %9216 = vmatprep.subr.bf16.mxu0 %v12586_v43  ;;  %v2476_v40 = vld [vmem:[%s19589_s3 + $0x510] sm:$0xff] }
 0x33c   :  { %9560 = vmatprep.subr.bf16.mxu1 %v12588_v44  ;;  %v2480_v43 = vld [vmem:[%s19589_s3 + $0x530] sm:$0xff]  ;;  %v2477_v44 = vld [vmem:[%s19589_s3 + $0x518] sm:$0xff] }
 0x33d   :  { %v12634_v38 = vcombine.high %v2476_v40, %v2480_v43  ;;  %v12633_v47 = vcombine.low %v2476_v40, %v2480_v43  ;;  %v12635_v61 = vcombine.low %v2477_v44, %v2481_v58  ;;  %v2521_v40 = vld [vmem:[%s19589_s3 + $0x678] sm:$0xff] }
 0x33e   :  { %9217 = vmatpush1.bf16.msra.mxu0 %v12585_v51  ;;  %v12636_v51 = vcombine.high %v2477_v44, %v2481_v58 }
 0x33f   :  { %9561 = vmatpush1.bf16.msra.mxu1 %v12587_v49  ;;  %9218 = vmatprep.subr.bf16.mxu0 %v12594_v45  ;;  %v2484_v49 = vld [vmem:[%s19589_s3 + $0x550] sm:$0xff] }
 0x340   :  { %9562 = vmatprep.subr.bf16.mxu1 %v12596_v53  ;;  %v2488_v45 = vld [vmem:[%s19589_s3 + $0x570] sm:$0xff]  ;;  %v2485_v53 = vld [vmem:[%s19589_s3 + $0x558] sm:$0xff] }
 0x341   :  { %v12642_v5 = vcombine.high %v2484_v49, %v2488_v45  ;;  %v12641_v12 = vcombine.low %v2484_v49, %v2488_v45  ;;  %v2529_v49 = vld [vmem:[%s19589_s3 + $0x6b8] sm:$0xff] }
 0x342   :  { %9219 = vmatpush1.bf16.msra.mxu0 %v12593_v56  ;;  %v12644_v56 = vcombine.high %v2485_v53, %v2489_v52 }
 0x343   :  { %9563 = vmatpush1.bf16.msra.mxu1 %v12595_v6  ;;  %9231 = vmatprep.subr.bf16.mxu0 %v12602_v8  ;;  %v2492_v6 = vld [vmem:[%s19589_s3 + $0x590] sm:$0xff] }
 0x344   :  { %9575 = vmatprep.subr.bf16.mxu1 %v12604_v10  ;;  %v2496_v8 = vld [vmem:[%s19589_s3 + $0x5b0] sm:$0xff]  ;;  %v2493_v10 = vld [vmem:[%s19589_s3 + $0x598] sm:$0xff] }
 0x345   :  { %9221 = vmatmul.mubr.bf16.vlgmr.msra.gmra.mrb[20].mxu0 %v15417_v59  ;;  %v12650_v15 = vcombine.high %v2492_v6, %v2496_v8  ;;  %v12652_v16 = vcombine.high %v2493_v10, %v2497_v11  ;;  %v12651_v24 = vcombine.low %v2493_v10, %v2497_v11 }
 0x346   :  { %9565 = vmatmul.mubr.bf16.vlgmr.msra.gmra.mrb[20].mxu1 %v15417_v59  ;;  %9232 = vmatpush1.bf16.msra.mxu0 %v12601_v50  ;;  %v2469_v59 = vld [vmem:[%s19589_s3 + $0x4d8] sm:$0xff]  ;;  %v12643_v50 = vcombine.low %v2485_v53, %v2489_v52 }
 0x347   :  { %9263 = vmatprep.mubr.bf16.mxu0 %v15455_v23  ;;  %9576 = vmatpush1.bf16.msra.mxu1 %v12603_v17  ;;  %v12628_v33 = vcombine.high %v2469_v59, %v2473_v37  ;;  %v12627_v42 = vcombine.low %v2469_v59, %v2473_v37  ;;  %v2500_v17 = vld [vmem:[%s19589_s3 + $0x5d0] sm:$0xff] }
 0x348   :  { %9607 = vmatprep.mubr.bf16.mxu1 %v15455_v23  ;;  %9233 = vmatprep.subr.bf16.mxu0 %v12610_v18  ;;  %v12617_v23 = vcombine.low %v2460_v20, %v2464_v21  ;;  %v2504_v18 = vld [vmem:[%s19589_s3 + $0x5f0] sm:$0xff]  ;;  %v2501_v20 = vld [vmem:[%s19589_s3 + $0x5d8] sm:$0xff] }
 0x349   :  { %9577 = vmatprep.subr.bf16.mxu1 %v12612_v22  ;;  %v2505_v21 = vld [vmem:[%s19589_s3 + $0x5f8] sm:$0xff]  ;;  %v12649_v22 = vcombine.low %v2492_v6, %v2496_v8  ;;  %v12658_v28 = vcombine.high %v2500_v17, %v2504_v18  ;;  %v12657_v35 = vcombine.low %v2500_v17, %v2504_v18 }
 0x34a   :  { %9234 = vmatpush1.bf16.msra.mxu0 %v12609_v29  ;;  %v12660_v29 = vcombine.high %v2501_v20, %v2505_v21  ;;  %v12659_v59 = vcombine.low %v2501_v20, %v2505_v21  ;;  %v2537_v6 = vld [vmem:[%s19589_s3 + $0x6f8] sm:$0xff] }
 0x34b   :  { %9578 = vmatpush1.bf16.msra.mxu1 %v12611_v31  ;;  %9235 = vmatprep.subr.bf16.mxu0 %v12618_v32  ;;  %v2508_v31 = vld [vmem:[%s19589_s3 + $0x610] sm:$0xff]  ;;  %v2545_v17 = vld [vmem:[%s19589_s3 + $0x738] sm:$0xff] }
 0x34c   :  { %9579 = vmatprep.subr.bf16.mxu1 %v12620_v4  ;;  %v2512_v32 = vld [vmem:[%s19589_s3 + $0x630] sm:$0xff]  ;;  %v2509_v4 = vld [vmem:[%s19589_s3 + $0x618] sm:$0xff] }
 0x34d   :  { %v12666_v37 = vcombine.high %v2508_v31, %v2512_v32  ;;  %v12665_v43 = vcombine.low %v2508_v31, %v2512_v32  ;;  %v12667_v44 = vcombine.low %v2509_v4, %v2513_v27  ;;  %v2553_v31 = vld [vmem:[%s19589_s3 + $0x778] sm:$0xff] }
 0x34e   :  { %9236 = vmatpush1.bf16.msra.mxu0 %v12617_v23  ;;  %v12668_v23 = vcombine.high %v2509_v4, %v2513_v27 }
 0x34f   :  { %9580 = vmatpush1.bf16.msra.mxu1 %v12619_v39  ;;  %9237 = vmatprep.subr.bf16.mxu0 %v12626_v14  ;;  %v2516_v39 = vld [vmem:[%s19589_s3 + $0x650] sm:$0xff] }
 0x350   :  { %9581 = vmatprep.subr.bf16.mxu1 %v12628_v33  ;;  %v2520_v14 = vld [vmem:[%s19589_s3 + $0x670] sm:$0xff]  ;;  %v2517_v33 = vld [vmem:[%s19589_s3 + $0x658] sm:$0xff] }
 0x351   :  { %v12674_v58 = vcombine.high %v2516_v39, %v2520_v14  ;;  %v12673_v45 = vcombine.low %v2516_v39, %v2520_v14  ;;  %v12675_v53 = vcombine.low %v2517_v33, %v2521_v40  ;;  %v2561_v39 = vld [vmem:[%s19589_s3 + $0x7b8] sm:$0xff] }
 0x352   :  { %9238 = vmatpush1.bf16.msra.mxu0 %v12625_v48  ;;  %v12676_v48 = vcombine.high %v2517_v33, %v2521_v40 }
 0x353   :  { %9582 = vmatpush1.bf16.msra.mxu1 %v12627_v42  ;;  %9239 = vmatprep.subr.bf16.mxu0 %v12634_v38  ;;  %v2524_v42 = vld [vmem:[%s19589_s3 + $0x690] sm:$0xff] }
 0x354   :  { %9583 = vmatprep.subr.bf16.mxu1 %v12636_v51  ;;  %v2528_v38 = vld [vmem:[%s19589_s3 + $0x6b0] sm:$0xff]  ;;  %v2525_v51 = vld [vmem:[%s19589_s3 + $0x698] sm:$0xff] }
 0x355   :  { %v12682_v52 = vcombine.high %v2524_v42, %v2528_v38  ;;  %v12681_v8 = vcombine.low %v2524_v42, %v2528_v38  ;;  %v12683_v10 = vcombine.low %v2525_v51, %v2529_v49  ;;  %v2569_v42 = vld [vmem:[%s19589_s3 + $0x7f8] sm:$0xff] }
 0x356   :  { %9240 = vmatpush1.bf16.msra.mxu0 %v12633_v47  ;;  %v12684_v47 = vcombine.high %v2525_v51, %v2529_v49 }
 0x357   :  { %9584 = vmatpush1.bf16.msra.mxu1 %v12635_v61  ;;  %9241 = vmatprep.subr.bf16.mxu0 %v12642_v5  ;;  %v2532_v61 = vld [vmem:[%s19589_s3 + $0x6d0] sm:$0xff] }
 0x358   :  { %9585 = vmatprep.subr.bf16.mxu1 %v12644_v56  ;;  %v2536_v5 = vld [vmem:[%s19589_s3 + $0x6f0] sm:$0xff]  ;;  %v2533_v56 = vld [vmem:[%s19589_s3 + $0x6d8] sm:$0xff] }
 0x359   :  { %v12690_v11 = vcombine.high %v2532_v61, %v2536_v5  ;;  %v12689_v18 = vcombine.low %v2532_v61, %v2536_v5  ;;  %v12691_v20 = vcombine.low %v2533_v56, %v2537_v6  ;;  %v2577_v61 = vld [vmem:[%s19589_s3 + $0x838] sm:$0xff] }
 0x35a   :  { %9242 = vmatpush1.bf16.msra.mxu0 %v12641_v12  ;;  %v12692_v12 = vcombine.high %v2533_v56, %v2537_v6 }
 0x35b   :  { %9586 = vmatpush1.bf16.msra.mxu1 %v12643_v50  ;;  %9243 = vmatprep.subr.bf16.mxu0 %v12650_v15  ;;  %v2540_v50 = vld [vmem:[%s19589_s3 + $0x710] sm:$0xff] }
 0x35c   :  { %9587 = vmatprep.subr.bf16.mxu1 %v12652_v16  ;;  %v2544_v15 = vld [vmem:[%s19589_s3 + $0x730] sm:$0xff]  ;;  %v2541_v16 = vld [vmem:[%s19589_s3 + $0x718] sm:$0xff] }
 0x35d   :  { %v12698_v21 = vcombine.high %v2540_v50, %v2544_v15  ;;  %v12697_v32 = vcombine.low %v2540_v50, %v2544_v15  ;;  %v12699_v4 = vcombine.low %v2541_v16, %v2545_v17  ;;  %v2581_v50 = vld [vmem:[%s19589_s3 + $0x858] sm:$0xff] }
 0x35e   :  { %9244 = vmatpush1.bf16.msra.mxu0 %v12649_v22  ;;  %v12700_v22 = vcombine.high %v2541_v16, %v2545_v17  ;;  %v2585_v15 = vld [vmem:[%s19589_s3 + $0x878] sm:$0xff] }
 0x35f   :  { %9588 = vmatpush1.bf16.msra.mxu1 %v12651_v24  ;;  %9245 = vmatprep.subr.bf16.mxu0 %v12658_v28  ;;  %v2548_v24 = vld [vmem:[%s19589_s3 + $0x750] sm:$0xff] }
 0x360   :  { %9589 = vmatprep.subr.bf16.mxu1 %v12660_v29  ;;  %v2552_v28 = vld [vmem:[%s19589_s3 + $0x770] sm:$0xff]  ;;  %v2549_v29 = vld [vmem:[%s19589_s3 + $0x758] sm:$0xff] }
 0x361   :  { %v12706_v27 = vcombine.high %v2548_v24, %v2552_v28  ;;  %v12705_v14 = vcombine.low %v2548_v24, %v2552_v28  ;;  %v12707_v33 = vcombine.low %v2549_v29, %v2553_v31  ;;  %v2593_v24 = vld [vmem:[%s19589_s3 + $0x8b8] sm:$0xff] }
 0x362   :  { %9246 = vmatpush1.bf16.msra.mxu0 %v12657_v35  ;;  %v12708_v35 = vcombine.high %v2549_v29, %v2553_v31  ;;  %v12739_v29 = vcombine.low %v2581_v50, %v2585_v15 }
 0x363   :  { %9590 = vmatpush1.bf16.msra.mxu1 %v12659_v59  ;;  %9247 = vmatprep.subr.bf16.mxu0 %v12666_v37  ;;  %v2556_v59 = vld [vmem:[%s19589_s3 + $0x790] sm:$0xff] }
 0x364   :  { %9591 = vmatprep.subr.bf16.mxu1 %v12668_v23  ;;  %v2560_v37 = vld [vmem:[%s19589_s3 + $0x7b0] sm:$0xff]  ;;  %v2557_v23 = vld [vmem:[%s19589_s3 + $0x798] sm:$0xff] }
 0x365   :  { %v12714_v40 = vcombine.high %v2556_v59, %v2560_v37  ;;  %v12713_v38 = vcombine.low %v2556_v59, %v2560_v37  ;;  %v12715_v51 = vcombine.low %v2557_v23, %v2561_v39 }
 0x366   :  { %9248 = vmatpush1.bf16.msra.mxu0 %v12665_v43  ;;  %v12716_v43 = vcombine.high %v2557_v23, %v2561_v39  ;;  %v2604_v39 = vld [vmem:[%s19589_s3 + $0x910] sm:$0xff] }
 0x367   :  { %9592 = vmatpush1.bf16.msra.mxu1 %v12667_v44  ;;  %9249 = vmatprep.subr.bf16.mxu0 %v12674_v58  ;;  %v2564_v44 = vld [vmem:[%s19589_s3 + $0x7d0] sm:$0xff] }
 0x368   :  { %9593 = vmatprep.subr.bf16.mxu1 %v12676_v48  ;;  %v2568_v58 = vld [vmem:[%s19589_s3 + $0x7f0] sm:$0xff]  ;;  %v2565_v48 = vld [vmem:[%s19589_s3 + $0x7d8] sm:$0xff] }
 0x369   :  { %v12722_v49 = vcombine.high %v2564_v44, %v2568_v58  ;;  %v12721_v5 = vcombine.low %v2564_v44, %v2568_v58  ;;  %v12723_v56 = vcombine.low %v2565_v48, %v2569_v42 }
 0x36a   :  { %9250 = vmatpush1.bf16.msra.mxu0 %v12673_v45  ;;  %v12724_v45 = vcombine.high %v2565_v48, %v2569_v42  ;;  %v2612_v42 = vld [vmem:[%s19589_s3 + $0x950] sm:$0xff] }
 0x36b   :  { %9594 = vmatpush1.bf16.msra.mxu1 %v12675_v53  ;;  %9251 = vmatprep.subr.bf16.mxu0 %v12682_v52  ;;  %v2572_v53 = vld [vmem:[%s19589_s3 + $0x810] sm:$0xff] }
 0x36c   :  { %9595 = vmatprep.subr.bf16.mxu1 %v12684_v47  ;;  %v2576_v52 = vld [vmem:[%s19589_s3 + $0x830] sm:$0xff]  ;;  %v2573_v47 = vld [vmem:[%s19589_s3 + $0x818] sm:$0xff] }
 0x36d   :  { %v12730_v6 = vcombine.high %v2572_v53, %v2576_v52  ;;  %v12731_v16 = vcombine.low %v2573_v47, %v2577_v61 }
 0x36e   :  { %9252 = vmatpush1.bf16.msra.mxu0 %v12681_v8  ;;  %v12732_v8 = vcombine.high %v2573_v47, %v2577_v61  ;;  %v2620_v61 = vld [vmem:[%s19589_s3 + $0x990] sm:$0xff] }
 0x36f   :  { %9596 = vmatpush1.bf16.msra.mxu1 %v12683_v10  ;;  %9253 = vmatprep.subr.bf16.mxu0 %v12690_v11  ;;  %v2580_v10 = vld [vmem:[%s19589_s3 + $0x850] sm:$0xff] }
 0x370   :  { %9597 = vmatprep.subr.bf16.mxu1 %v12692_v12  ;;  %v2584_v11 = vld [vmem:[%s19589_s3 + $0x870] sm:$0xff]  ;;  %v12729_v12 = vcombine.low %v2572_v53, %v2576_v52 }
 0x371   :  { %v12738_v17 = vcombine.high %v2580_v10, %v2584_v11  ;;  %v12737_v28 = vcombine.low %v2580_v10, %v2584_v11 }
 0x372   :  { %9254 = vmatpush1.bf16.msra.mxu0 %v12689_v18  ;;  %v2588_v18 = vld [vmem:[%s19589_s3 + $0x890] sm:$0xff] }
 0x373   :  { %9598 = vmatpush1.bf16.msra.mxu1 %v12691_v20  ;;  %9255 = vmatprep.subr.bf16.mxu0 %v12698_v21  ;;  %v2592_v20 = vld [vmem:[%s19589_s3 + $0x8b0] sm:$0xff]  ;;  %v12740_v21 = vcombine.high %v2581_v50, %v2585_v15 }
 0x374   :  { %9599 = vmatprep.subr.bf16.mxu1 %v12700_v22  ;;  %v2589_v22 = vld [vmem:[%s19589_s3 + $0x898] sm:$0xff]  ;;  %v12746_v31 = vcombine.high %v2588_v18, %v2592_v20  ;;  %v2628_v50 = vld [vmem:[%s19589_s3 + $0x9d0] sm:$0xff] }
 0x375   :  { %v12747_v59 = vcombine.low %v2589_v22, %v2593_v24  ;;  %v2632_v15 = vld [vmem:[%s19589_s3 + $0x9f0] sm:$0xff] }
 0x376   :  { %9256 = vmatpush1.bf16.msra.mxu0 %v12697_v32  ;;  %v12748_v32 = vcombine.high %v2589_v22, %v2593_v24  ;;  %v2636_v24 = vld [vmem:[%s19589_s3 + $0xa10] sm:$0xff] }
 0x377   :  { %9600 = vmatpush1.bf16.msra.mxu1 %v12699_v4  ;;  %9257 = vmatprep.subr.bf16.mxu0 %v12706_v27  ;;  %v2596_v4 = vld [vmem:[%s19589_s3 + $0x8d0] sm:$0xff] }
 0x378   :  { %9601 = vmatprep.subr.bf16.mxu1 %v12708_v35  ;;  %v2600_v27 = vld [vmem:[%s19589_s3 + $0x8f0] sm:$0xff]  ;;  %v2601_v35 = vld [vmem:[%s19589_s3 + $0x8f8] sm:$0xff] }
 0x379   :  { %v12754_v37 = vcombine.high %v2596_v4, %v2600_v27 }
 0x37a   :  { %9258 = vmatpush1.bf16.msra.mxu0 %v12705_v14  ;;  %v2608_v14 = vld [vmem:[%s19589_s3 + $0x930] sm:$0xff] }
 0x37b   :  { %9602 = vmatpush1.bf16.msra.mxu1 %v12707_v33  ;;  %9259 = vmatprep.subr.bf16.mxu0 %v12714_v40  ;;  %v2605_v33 = vld [vmem:[%s19589_s3 + $0x918] sm:$0xff]  ;;  %v12762_v58 = vcombine.high %v2604_v39, %v2608_v14 }
 0x37c   :  { %9603 = vmatprep.subr.bf16.mxu1 %v12716_v43  ;;  %v2609_v40 = vld [vmem:[%s19589_s3 + $0x938] sm:$0xff]  ;;  %v12753_v43 = vcombine.low %v2596_v4, %v2600_v27 }
 0x37d   :  { %v12764_v48 = vcombine.high %v2605_v33, %v2609_v40  ;;  %v12763_v53 = vcombine.low %v2605_v33, %v2609_v40  ;;  %v2652_v40 = vld [vmem:[%s19589_s3 + $0xa90] sm:$0xff] }
 0x37e   :  { %9260 = vmatpush1.bf16.msra.mxu0 %v12713_v38  ;;  %v2616_v38 = vld [vmem:[%s19589_s3 + $0x970] sm:$0xff] }
 0x37f   :  { %9604 = vmatpush1.bf16.msra.mxu1 %v12715_v51  ;;  %9261 = vmatprep.subr.bf16.mxu0 %v12722_v49  ;;  %v2613_v51 = vld [vmem:[%s19589_s3 + $0x958] sm:$0xff]  ;;  %v12770_v52 = vcombine.high %v2612_v42, %v2616_v38 }
 0x380   :  { %9605 = vmatprep.subr.bf16.mxu1 %v12724_v45  ;;  %v2617_v49 = vld [vmem:[%s19589_s3 + $0x978] sm:$0xff]  ;;  %v12761_v45 = vcombine.low %v2604_v39, %v2608_v14 }
 0x381   :  { %v12772_v47 = vcombine.high %v2613_v51, %v2617_v49  ;;  %v12771_v10 = vcombine.low %v2613_v51, %v2617_v49  ;;  %v2660_v49 = vld [vmem:[%s19589_s3 + $0xad0] sm:$0xff] }
 0x382   :  { %9262 = vmatpush1.bf16.msra.mxu0 %v12721_v5  ;;  %v2624_v5 = vld [vmem:[%s19589_s3 + $0x9b0] sm:$0xff] }
 0x383   :  { %9606 = vmatpush1.bf16.msra.mxu1 %v12723_v56  ;;  %9274 = vmatprep.subr.bf16.mxu0 %v12730_v6  ;;  %v2621_v56 = vld [vmem:[%s19589_s3 + $0x998] sm:$0xff]  ;;  %v12778_v11 = vcombine.high %v2620_v61, %v2624_v5 }
 0x384   :  { %9618 = vmatprep.subr.bf16.mxu1 %v12732_v8  ;;  %v2625_v6 = vld [vmem:[%s19589_s3 + $0x9b8] sm:$0xff]  ;;  %v12769_v8 = vcombine.low %v2612_v42, %v2616_v38 }
 0x385   :  { %9264 = vmatmul.mubr.bf16.vlgmr.msra.gmra.mrb[20].mxu0 %v15447_v19 }
 0x386   :  { %9608 = vmatmul.mubr.bf16.vlgmr.msra.gmra.mrb[20].mxu1 %v15447_v19  ;;  %9275 = vmatpush1.bf16.msra.mxu0 %v12729_v12  ;;  %v2597_v19 = vld [vmem:[%s19589_s3 + $0x8d8] sm:$0xff]  ;;  %v12780_v12 = vcombine.high %v2621_v56, %v2625_v6 }
 0x387   :  { %9306 = vmatprep.mubr.bf16.mxu0 %v15686_v13  ;;  %9619 = vmatpush1.bf16.msra.mxu1 %v12731_v16  ;;  %v12756_v23 = vcombine.high %v2597_v19, %v2601_v35  ;;  %v12755_v44 = vcombine.low %v2597_v19, %v2601_v35  ;;  %v2629_v16 = vld [vmem:[%s19589_s3 + $0x9d8] sm:$0xff]  ;;  %v2644_v35 = vld [vmem:[%s19589_s3 + $0xa50] sm:$0xff] }
 0x388   :  { %9650 = vmatprep.mubr.bf16.mxu1 %v15686_v13  ;;  %9276 = vmatprep.subr.bf16.mxu0 %v12738_v17  ;;  %v12745_v13 = vcombine.low %v2588_v18, %v2592_v20  ;;  %v2633_v17 = vld [vmem:[%s19589_s3 + $0x9f8] sm:$0xff]  ;;  %v12777_v18 = vcombine.low %v2620_v61, %v2624_v5  ;;  %v12779_v20 = vcombine.low %v2621_v56, %v2625_v6  ;;  %v2668_v6 = vld [vmem:[%s19589_s3 + $0xb10] sm:$0xff] }
 0x389   :  { %9620 = vmatprep.subr.bf16.mxu1 %v12740_v21  ;;  %v12786_v21 = vcombine.high %v2628_v50, %v2632_v15  ;;  %v12788_v22 = vcombine.high %v2629_v16, %v2633_v17  ;;  %v12787_v4 = vcombine.low %v2629_v16, %v2633_v17  ;;  %v2676_v17 = vld [vmem:[%s19589_s3 + $0xb50] sm:$0xff] }
 0x38a   :  { %9277 = vmatpush1.bf16.msra.mxu0 %v12737_v28  ;;  %v2640_v28 = vld [vmem:[%s19589_s3 + $0xa30] sm:$0xff] }
 0x38b   :  { %9621 = vmatpush1.bf16.msra.mxu1 %v12739_v29  ;;  %9278 = vmatprep.subr.bf16.mxu0 %v12746_v31  ;;  %v2637_v29 = vld [vmem:[%s19589_s3 + $0xa18] sm:$0xff]  ;;  %v12794_v27 = vcombine.high %v2636_v24, %v2640_v28 }
 0x38c   :  { %9622 = vmatprep.subr.bf16.mxu1 %v12748_v32  ;;  %v2641_v31 = vld [vmem:[%s19589_s3 + $0xa38] sm:$0xff]  ;;  %v12785_v32 = vcombine.low %v2628_v50, %v2632_v15 }
 0x38d   :  { %v12796_v19 = vcombine.high %v2637_v29, %v2641_v31  ;;  %v12795_v39 = vcombine.low %v2637_v29, %v2641_v31  ;;  %v2684_v31 = vld [vmem:[%s19589_s3 + $0xb90] sm:$0xff] }
 0x38e   :  { %9279 = vmatpush1.bf16.msra.mxu0 %v12745_v13  ;;  %v2648_v13 = vld [vmem:[%s19589_s3 + $0xa70] sm:$0xff] }
 0x38f   :  { %9623 = vmatpush1.bf16.msra.mxu1 %v12747_v59  ;;  %9280 = vmatprep.subr.bf16.mxu0 %v12754_v37  ;;  %v2645_v59 = vld [vmem:[%s19589_s3 + $0xa58] sm:$0xff]  ;;  %v12802_v14 = vcombine.high %v2644_v35, %v2648_v13 }
 0x390   :  { %9624 = vmatprep.subr.bf16.mxu1 %v12756_v23  ;;  %v2649_v37 = vld [vmem:[%s19589_s3 + $0xa78] sm:$0xff]  ;;  %v12793_v23 = vcombine.low %v2636_v24, %v2640_v28 }
 0x391   :  { %v12804_v33 = vcombine.high %v2645_v59, %v2649_v37  ;;  %v12803_v42 = vcombine.low %v2645_v59, %v2649_v37  ;;  %v2692_v37 = vld [vmem:[%s19589_s3 + $0xbd0] sm:$0xff] }
 0x392   :  { %9281 = vmatpush1.bf16.msra.mxu0 %v12753_v43  ;;  %v2656_v43 = vld [vmem:[%s19589_s3 + $0xab0] sm:$0xff] }
 0x393   :  { %9625 = vmatpush1.bf16.msra.mxu1 %v12755_v44  ;;  %9282 = vmatprep.subr.bf16.mxu0 %v12762_v58  ;;  %v2653_v44 = vld [vmem:[%s19589_s3 + $0xa98] sm:$0xff]  ;;  %v12810_v38 = vcombine.high %v2652_v40, %v2656_v43 }
 0x394   :  { %9626 = vmatprep.subr.bf16.mxu1 %v12764_v48  ;;  %v2657_v58 = vld [vmem:[%s19589_s3 + $0xab8] sm:$0xff]  ;;  %v12801_v48 = vcombine.low %v2644_v35, %v2648_v13 }
 0x395   :  { %v12812_v51 = vcombine.high %v2653_v44, %v2657_v58  ;;  %v12811_v61 = vcombine.low %v2653_v44, %v2657_v58  ;;  %v2700_v58 = vld [vmem:[%s19589_s3 + $0xc10] sm:$0xff] }
 0x396   :  { %9283 = vmatpush1.bf16.msra.mxu0 %v12761_v45  ;;  %v2664_v45 = vld [vmem:[%s19589_s3 + $0xaf0] sm:$0xff] }
 0x397   :  { %9627 = vmatpush1.bf16.msra.mxu1 %v12763_v53  ;;  %9284 = vmatprep.subr.bf16.mxu0 %v12770_v52  ;;  %v2661_v53 = vld [vmem:[%s19589_s3 + $0xad8] sm:$0xff]  ;;  %v12818_v5 = vcombine.high %v2660_v49, %v2664_v45 }
 0x398   :  { %9628 = vmatprep.subr.bf16.mxu1 %v12772_v47  ;;  %v2665_v52 = vld [vmem:[%s19589_s3 + $0xaf8] sm:$0xff]  ;;  %v12809_v47 = vcombine.low %v2652_v40, %v2656_v43 }
 0x399   :  { %v12820_v56 = vcombine.high %v2661_v53, %v2665_v52  ;;  %v12819_v50 = vcombine.low %v2661_v53, %v2665_v52  ;;  %v2708_v52 = vld [vmem:[%s19589_s3 + $0xc50] sm:$0xff] }
 0x39a   :  { %9285 = vmatpush1.bf16.msra.mxu0 %v12769_v8  ;;  %v2672_v8 = vld [vmem:[%s19589_s3 + $0xb30] sm:$0xff] }
 0x39b   :  { %9629 = vmatpush1.bf16.msra.mxu1 %v12771_v10  ;;  %9286 = vmatprep.subr.bf16.mxu0 %v12778_v11  ;;  %v2669_v10 = vld [vmem:[%s19589_s3 + $0xb18] sm:$0xff]  ;;  %v12826_v15 = vcombine.high %v2668_v6, %v2672_v8 }
 0x39c   :  { %9630 = vmatprep.subr.bf16.mxu1 %v12780_v12  ;;  %v2673_v11 = vld [vmem:[%s19589_s3 + $0xb38] sm:$0xff]  ;;  %v12817_v12 = vcombine.low %v2660_v49, %v2664_v45 }
 0x39d   :  { %v12828_v16 = vcombine.high %v2669_v10, %v2673_v11  ;;  %v12827_v24 = vcombine.low %v2669_v10, %v2673_v11  ;;  %v2716_v10 = vld [vmem:[%s19589_s3 + $0xc90] sm:$0xff] }
 0x39e   :  { %9287 = vmatpush1.bf16.msra.mxu0 %v12777_v18  ;;  %v2680_v18 = vld [vmem:[%s19589_s3 + $0xb70] sm:$0xff] }
 0x39f   :  { %9631 = vmatpush1.bf16.msra.mxu1 %v12779_v20  ;;  %9288 = vmatprep.subr.bf16.mxu0 %v12786_v21  ;;  %v2677_v20 = vld [vmem:[%s19589_s3 + $0xb58] sm:$0xff]  ;;  %v12834_v28 = vcombine.high %v2676_v17, %v2680_v18  ;;  %v2720_v11 = vld [vmem:[%s19589_s3 + $0xcb0] sm:$0xff] }
 0x3a0   :  { %9632 = vmatprep.subr.bf16.mxu1 %v12788_v22  ;;  %v2681_v21 = vld [vmem:[%s19589_s3 + $0xb78] sm:$0xff]  ;;  %v12825_v22 = vcombine.low %v2668_v6, %v2672_v8 }
 0x3a1   :  { %v12836_v29 = vcombine.high %v2677_v20, %v2681_v21  ;;  %v12835_v35 = vcombine.low %v2677_v20, %v2681_v21  ;;  %v2724_v21 = vld [vmem:[%s19589_s3 + $0xcd0] sm:$0xff] }
 0x3a2   :  { %9289 = vmatpush1.bf16.msra.mxu0 %v12785_v32  ;;  %v2688_v32 = vld [vmem:[%s19589_s3 + $0xbb0] sm:$0xff] }
 0x3a3   :  { %9633 = vmatpush1.bf16.msra.mxu1 %v12787_v4  ;;  %9290 = vmatprep.subr.bf16.mxu0 %v12794_v27  ;;  %v2685_v4 = vld [vmem:[%s19589_s3 + $0xb98] sm:$0xff]  ;;  %v12842_v13 = vcombine.high %v2684_v31, %v2688_v32 }
 0x3a4   :  { %9634 = vmatprep.subr.bf16.mxu1 %v12796_v19  ;;  %v2689_v27 = vld [vmem:[%s19589_s3 + $0xbb8] sm:$0xff]  ;;  %v12833_v19 = vcombine.low %v2676_v17, %v2680_v18  ;;  %v12874_v18 = vcombine.high %v2716_v10, %v2720_v11 }
 0x3a5   :  { %v12844_v59 = vcombine.high %v2685_v4, %v2689_v27  ;;  %v12843_v40 = vcombine.low %v2685_v4, %v2689_v27  ;;  %v2736_v4 = vld [vmem:[%s19589_s3 + $0xd30] sm:$0xff]  ;;  %v2733_v27 = vld [vmem:[%s19589_s3 + $0xd18] sm:$0xff] }
 0x3a6   :  { %9291 = vmatpush1.bf16.msra.mxu0 %v12793_v23  ;;  %v2696_v23 = vld [vmem:[%s19589_s3 + $0xbf0] sm:$0xff] }
 0x3a7   :  { %9635 = vmatpush1.bf16.msra.mxu1 %v12795_v39  ;;  %9292 = vmatprep.subr.bf16.mxu0 %v12802_v14  ;;  %v2693_v39 = vld [vmem:[%s19589_s3 + $0xbd8] sm:$0xff]  ;;  %v12850_v43 = vcombine.high %v2692_v37, %v2696_v23 }
 0x3a8   :  { %9636 = vmatprep.subr.bf16.mxu1 %v12804_v33  ;;  %v2697_v14 = vld [vmem:[%s19589_s3 + $0xbf8] sm:$0xff]  ;;  %v12841_v33 = vcombine.low %v2684_v31, %v2688_v32  ;;  %v2732_v32 = vld [vmem:[%s19589_s3 + $0xd10] sm:$0xff] }
 0x3a9   :  { %v12852_v44 = vcombine.high %v2693_v39, %v2697_v14  ;;  %v12851_v49 = vcombine.low %v2693_v39, %v2697_v14  ;;  %v2744_v39 = vld [vmem:[%s19589_s3 + $0xd70] sm:$0xff]  ;;  %v2741_v14 = vld [vmem:[%s19589_s3 + $0xd58] sm:$0xff] }
 0x3aa   :  { %9293 = vmatpush1.bf16.msra.mxu0 %v12801_v48  ;;  %v2704_v48 = vld [vmem:[%s19589_s3 + $0xc30] sm:$0xff] }
 0x3ab   :  { %9637 = vmatpush1.bf16.msra.mxu1 %v12803_v42  ;;  %9294 = vmatprep.subr.bf16.mxu0 %v12810_v38  ;;  %v2701_v42 = vld [vmem:[%s19589_s3 + $0xc18] sm:$0xff]  ;;  %v12858_v45 = vcombine.high %v2700_v58, %v2704_v48 }
 0x3ac   :  { %9638 = vmatprep.subr.bf16.mxu1 %v12812_v51  ;;  %v2705_v38 = vld [vmem:[%s19589_s3 + $0xc38] sm:$0xff]  ;;  %v12849_v51 = vcombine.low %v2692_v37, %v2696_v23  ;;  %v2740_v23 = vld [vmem:[%s19589_s3 + $0xd50] sm:$0xff] }
 0x3ad   :  { %v12860_v53 = vcombine.high %v2701_v42, %v2705_v38  ;;  %v12859_v6 = vcombine.low %v2701_v42, %v2705_v38  ;;  %v2748_v42 = vld [vmem:[%s19589_s3 + $0xd90] sm:$0xff] }
 0x3ae   :  { %9295 = vmatpush1.bf16.msra.mxu0 %v12809_v47  ;;  %v2712_v47 = vld [vmem:[%s19589_s3 + $0xc70] sm:$0xff] }
 0x3af   :  { %9639 = vmatpush1.bf16.msra.mxu1 %v12811_v61  ;;  %9296 = vmatprep.subr.bf16.mxu0 %v12818_v5  ;;  %v12857_v61 = vcombine.low %v2700_v58, %v2704_v48  ;;  %v2709_v5 = vld [vmem:[%s19589_s3 + $0xc58] sm:$0xff]  ;;  %v12866_v8 = vcombine.high %v2708_v52, %v2712_v47  ;;  %v12898_v58 = vcombine.high %v2740_v23, %v2744_v39  ;;  %v2752_v38 = vld [vmem:[%s19589_s3 + $0xdb0] sm:$0xff] }
 0x3b0   :  { %9640 = vmatprep.subr.bf16.mxu1 %v12820_v56  ;;  %v2713_v56 = vld [vmem:[%s19589_s3 + $0xc78] sm:$0xff] }
 0x3b1   :  { %v12867_v17 = vcombine.low %v2709_v5, %v2713_v56 }
 0x3b2   :  { %9297 = vmatpush1.bf16.msra.mxu0 %v12817_v12  ;;  %v12868_v12 = vcombine.high %v2709_v5, %v2713_v56  ;;  %v12906_v5 = vcombine.high %v2748_v42, %v2752_v38  ;;  %v17744_v56 = vld [vmem:[%s19589_s3 + $0xdd0] sm:$0xff] }
 0x3b3   :  { %9641 = vmatpush1.bf16.msra.mxu1 %v12819_v50  ;;  %9298 = vmatprep.subr.bf16.mxu0 %v12826_v15  ;;  %v2717_v50 = vld [vmem:[%s19589_s3 + $0xc98] sm:$0xff] }
 0x3b4   :  { %9642 = vmatprep.subr.bf16.mxu1 %v12828_v16  ;;  %v2721_v15 = vld [vmem:[%s19589_s3 + $0xcb8] sm:$0xff]  ;;  %v12865_v16 = vcombine.low %v2708_v52, %v2712_v47  ;;  %v12897_v52 = vcombine.low %v2740_v23, %v2744_v39 }
 0x3b5   :  { %v12876_v20 = vcombine.high %v2717_v50, %v2721_v15 }
 0x3b6   :  { %9299 = vmatpush1.bf16.msra.mxu0 %v12825_v22  ;;  %v2728_v22 = vld [vmem:[%s19589_s3 + $0xcf0] sm:$0xff] }
 0x3b7   :  { %9643 = vmatpush1.bf16.msra.mxu1 %v12827_v24  ;;  %9300 = vmatprep.subr.bf16.mxu0 %v12834_v28  ;;  %v2729_v24 = vld [vmem:[%s19589_s3 + $0xcf8] sm:$0xff]  ;;  %v12875_v28 = vcombine.low %v2717_v50, %v2721_v15 }
 0x3b8   :  { %9644 = vmatprep.subr.bf16.mxu1 %v12836_v29  ;;  %v12882_v29 = vcombine.high %v2724_v21, %v2728_v22 }
 0x3ba   :  { %9301 = vmatpush1.bf16.msra.mxu0 %v12833_v19  ;;  %v2737_v19 = vld [vmem:[%s19589_s3 + $0xd38] sm:$0xff] }
 0x3bb   :  { %9645 = vmatpush1.bf16.msra.mxu1 %v12835_v35  ;;  %9302 = vmatprep.subr.bf16.mxu0 %v12842_v13  ;;  %v12881_v35 = vcombine.low %v2724_v21, %v2728_v22  ;;  %v12892_v37 = vcombine.high %v2733_v27, %v2737_v19  ;;  %v17770_v21 = vld [vmem:[%s19589_s3 + $0xe30] sm:$0xff] }
 0x3bc   :  { %9646 = vmatprep.subr.bf16.mxu1 %v12844_v59  ;;  %v12890_v59 = vcombine.high %v2732_v32, %v2736_v4 }
 0x3be   :  { %9303 = vmatpush1.bf16.msra.mxu0 %v12841_v33  ;;  %v2745_v33 = vld [vmem:[%s19589_s3 + $0xd78] sm:$0xff] }
 0x3bf   :  { %9647 = vmatpush1.bf16.msra.mxu1 %v12843_v40  ;;  %9304 = vmatprep.subr.bf16.mxu0 %v12850_v43  ;;  %v12889_v40 = vcombine.low %v2732_v32, %v2736_v4  ;;  %v3338_v43 = vld [vmem:[%s19591_s4] sm:$0xff]  ;;  %v12900_v48 = vcombine.high %v2741_v14, %v2745_v33  ;;  %v17784_v32 = vld [vmem:[%s19589_s3 + $0xe38] sm:$0xff] }
 0x3c0   :  { %9648 = vmatprep.subr.bf16.mxu1 %v12852_v44  ;;  %v12891_v44 = vcombine.low %v2733_v27, %v2737_v19  ;;  %v3347_v47 = vrot.slane %v3338_v43, %v15336_v63 }
 0x3c2   :  { %9305 = vmatpush1.bf16.msra.mxu0 %v12849_v51  ;;  %v3343_v51 = vrot.slane %v3338_v43, %v15322_v57 }
 0x3c3   :  { %9649 = vmatpush1.bf16.msra.mxu1 %v12851_v49  ;;  %9317 = vmatprep.subr.bf16.mxu0 %v12858_v45  ;;  %v2749_v49 = vld [vmem:[%s19589_s3 + $0xd98] sm:$0xff] }
 0x3c4   :  { %9661 = vmatprep.subr.bf16.mxu1 %v12860_v53  ;;  %v2753_v45 = vld [vmem:[%s19589_s3 + $0xdb8] sm:$0xff]  ;;  %v3351_v53 = vrot.slane %v3338_v43, %v15339_v0 }
 0x3c5   :  { %9307 = vmatmul.mubr.bf16.vlgmr.msra.gmra.mrb[20].mxu0 %v15678_v9 }
 0x3c6   :  { %9651 = vmatmul.mubr.bf16.vlgmr.msra.gmra.mrb[20].mxu1 %v15678_v9  ;;  %9318 = vmatpush1.bf16.msra.mxu0 %v12857_v61  ;;  %v2725_v9 = vld [vmem:[%s19589_s3 + $0xcd8] sm:$0xff]  ;;  %v12899_v61 = vcombine.low %v2741_v14, %v2745_v33 }
 0x3c7   :  { %9349 = vmatprep.mubr.bf16.mxu0 %v15714_v34  ;;  %9662 = vmatpush1.bf16.msra.mxu1 %v12859_v6  ;;  %v12884_v31 = vcombine.high %v2725_v9, %v2729_v24  ;;  %v12883_v13 = vcombine.low %v2725_v9, %v2729_v24  ;;  %v17749_v6 = vld [vmem:[%s19589_s3 + $0xdf0] sm:$0xff] }
 0x3c8   :  { %9693 = vmatprep.mubr.bf16.mxu1 %v15714_v34  ;;  %9319 = vmatprep.subr.bf16.mxu0 %v12866_v8  ;;  %v12873_v34 = vcombine.low %v2716_v10, %v2720_v11  ;;  %v12908_v10 = vcombine.high %v2749_v49, %v2753_v45  ;;  %v17754_v11 = vld [vmem:[%s19589_s3 + $0xdd8] sm:$0xff] }
 0x3c9   :  { %9663 = vmatprep.subr.bf16.mxu1 %v12868_v12  ;;  %v17759_v12 = vld [vmem:[%s19589_s3 + $0xdf8] sm:$0xff] }
 0x3ca   :  { %9320 = vmatpush1.bf16.msra.mxu0 %v12865_v16 }
 0x3cb   :  { %9664 = vmatpush1.bf16.msra.mxu1 %v12867_v17  ;;  %9321 = vmatprep.subr.bf16.mxu0 %v12874_v18  ;;  %v3355_v17 = vrot.slane %v3338_v43, %v15342_v3  ;;  %v12905_v18 = vcombine.low %v2748_v42, %v2752_v38 }
 0x3cc   :  { %9665 = vmatprep.subr.bf16.mxu1 %v12876_v20  ;;  %v17765_v20 = vld [vmem:[%s19589_s3 + $0xe10] sm:$0xff] }
 0x3cd   :  { %v12921_v23 = vcombine.low %v17765_v20, %v17770_v21  ;;  %v12922_v39 = vcombine.high %v17765_v20, %v17770_v21  ;;  %v2781_v20 = vld [vmem:[%s19589_s3 + $0xe98] sm:$0xff] }
 0x3ce   :  { %9322 = vmatpush1.bf16.msra.mxu0 %v12873_v34  ;;  %v12907_v34 = vcombine.low %v2749_v49, %v2753_v45  ;;  %v2785_v21 = vld [vmem:[%s19589_s3 + $0xeb8] sm:$0xff] }
 0x3cf   :  { %9666 = vmatpush1.bf16.msra.mxu1 %v12875_v28  ;;  %9323 = vmatprep.subr.bf16.mxu0 %v12882_v29  ;;  %v12913_v28 = vcombine.low %v17744_v56, %v17749_v6  ;;  %v12914_v29 = vcombine.high %v17744_v56, %v17749_v6 }
 0x3d0   :  { %9667 = vmatprep.subr.bf16.mxu1 %v12884_v31  ;;  %v17779_v31 = vld [vmem:[%s19589_s3 + $0xe18] sm:$0xff] }
 0x3d1   :  { %v12924_v38 = vcombine.high %v17779_v31, %v17784_v32 }
 0x3d2   :  { %9324 = vmatpush1.bf16.msra.mxu0 %v12881_v35 }
 0x3d3   :  { %9668 = vmatpush1.bf16.msra.mxu1 %v12883_v13  ;;  %9325 = vmatprep.subr.bf16.mxu0 %v12890_v59  ;;  %v12915_v13 = vcombine.low %v17754_v11, %v17759_v12 }
 0x3d4   :  { %9669 = vmatprep.subr.bf16.mxu1 %v12892_v37  ;;  %v12916_v37 = vcombine.high %v17754_v11, %v17759_v12 }
 0x3d6   :  { %9326 = vmatpush1.bf16.msra.mxu0 %v12889_v40  ;;  %v12923_v40 = vcombine.low %v17779_v31, %v17784_v32 }
 0x3d7   :  { %9670 = vmatpush1.bf16.msra.mxu1 %v12891_v44  ;;  %9327 = vmatprep.subr.bf16.mxu0 %v12898_v58 }
 0x3d8   :  { %v8835_v8 = vpop.f32.mrb[16].mxu0  ;;  %9671 = vmatprep.subr.bf16.mxu1 %v12900_v48 }
 0x3d9   :  { %v13826_v50 = vadd.f32 %v8835_v8, %v3343_v51  ;;  %v9179_v15 = vpop.f32.mrb[16].mxu1  ;;  %v8837_v16 = vpop.f32.mrb[17].mxu0 }
 0x3da   :  { %v13830_v22 = vadd.f32 %v9179_v15, %v3351_v53  ;;  %v9181_v9 = vpop.f32.mrb[17].mxu1  ;;  %v8839_v24 = vpop.f32.mrb[18].mxu0  ;;  %9328 = vmatpush1.bf16.msra.mxu0 %v12897_v52  ;;  %v13827_v4 = vadd.f32 %v8837_v16, %v3347_v47  ;;  %v2776_v52 = vld [vmem:[%s19589_s3 + $0xe70] sm:$0xff] }
 0x3db   :  { %v13828_v27 = vadd.f32 %v8839_v24, %v3343_v51  ;;  %v9183_v19 = vpop.f32.mrb[18].mxu1  ;;  %9672 = vmatpush1.bf16.msra.mxu1 %v12899_v61  ;;  %v8841_v35 = vpop.f32.mrb[19].mxu0  ;;  %9329 = vmatprep.subr.bf16.mxu0 %v12906_v5  ;;  %v9892_v59 = vmul.f32 0.01, %v13826_v50  ;;  %vm9876_vm0 = vcmp.gt.f32.partialorder %v13826_v50, 0.0  ;;  %v13831_v14 = vadd.f32 %v9181_v9, %v3355_v17  ;;  %v2772_v51 = vld [vmem:[%s19589_s3 + $0xe50] sm:$0xff] }
 0x3dc   :  { %9673 = vmatprep.subr.bf16.mxu1 %v12908_v10  ;;  %v9185_v33 = vpop.f32.mrb[19].mxu1  ;;  %v9894_v43 = vmul.f32 0.01, %v13830_v22  ;;  %v13832_v58 = vadd.f32 %v9183_v19, %v3351_v53  ;;  %v13829_v48 = vadd.f32 %v8841_v35, %v3347_v47  ;;  %vm9878_vm2 = vcmp.gt.f32.partialorder %v13830_v22, 0.0  ;;  %v2773_v47 = vld [vmem:[%s19589_s3 + $0xe58] sm:$0xff]  ;;  %v2792_v35 = vld [vmem:[%s19589_s3 + $0xef0] sm:$0xff] }
 0x3dd   :  { %vm9884_vm1 = vcmp.gt.f32.partialorder %v13828_v27, 0.0  ;;  %v9900_v44 = vmul.f32 0.01, %v13828_v27  ;;  %vm9877_vm3 = vcmp.gt.f32.partialorder %v13827_v4, 0.0  ;;  %v13833_v42 = vadd.f32 %v9185_v33, %v3355_v17  ;;  %v2777_v61 = vld [vmem:[%s19589_s3 + $0xe78] sm:$0xff]  ;;  %v2780_v17 = vld [vmem:[%s19589_s3 + $0xe90] sm:$0xff] }
 0x3de   :  { %9330 = vmatpush1.bf16.msra.mxu0 %v12905_v18  ;;  %v9908_v49 = vsel %vm9876_vm0, %v13826_v50, %v9892_v59  ;;  %vm9886_vm4 = vcmp.gt.f32.partialorder %v13832_v58, 0.0  ;;  %v9902_v53 = vmul.f32 0.01, %v13832_v58  ;;  %v9893_v5 = vmul.f32 0.01, %v13827_v4  ;;  %v2784_v18 = vld [vmem:[%s19589_s3 + $0xeb0] sm:$0xff] }
 0x3df   :  { %9674 = vmatpush1.bf16.msra.mxu1 %v12907_v34  ;;  %9331 = vmatprep.subr.bf16.mxu0 %v12914_v29  ;;  %v9916_v45 = vsel %vm9884_vm1, %v13828_v27, %v9900_v44  ;;  %v9895_v56 = vmul.f32 0.01, %v13831_v14  ;;  %v9901_v8 = vmul.f32 0.01, %v13829_v48  ;;  %v9910_v10 = vsel %vm9878_vm2, %v13830_v22, %v9894_v43  ;;  %v2793_v59 = vld [vmem:[%s19589_s3 + $0xef8] sm:$0xff]  ;;  %v2796_v33 = vld [vmem:[%s19589_s3 + $0xf10] sm:$0xff] }
 0x3e0   :  { %9675 = vmatprep.subr.bf16.mxu1 %v12916_v37  ;;  %v17812_v6 = vpack.c.bf16 %v9916_v45, %v9908_v49  ;;  %v9918_v11 = vsel %vm9886_vm4, %v13832_v58, %v9902_v53  ;;  %vm9885_vm5 = vcmp.gt.f32.partialorder %v13829_v48, 0.0  ;;  %v9903_v12 = vmul.f32 0.01, %v13833_v42  ;;  %v2797_v43 = vld [vmem:[%s19589_s3 + $0xf18] sm:$0xff]  ;;  %v2808_v49 = vld [vmem:[%s19589_s3 + $0xf70] sm:$0xff] }
 0x3e1   :  { %vm9879_vm6 = vcmp.gt.f32.partialorder %v13831_v14, 0.0  ;;  %v17815_v50 = vpack.c.bf16 %v9918_v11, %v9910_v10  ;;  %vm9887_vm7 = vcmp.gt.f32.partialorder %v13833_v42, 0.0  ;;  %v12930_v15 = vcombine.high %v2772_v51, %v2776_v52  ;;  %v2801_v44 = vld [vmem:[%s19589_s3 + $0xf38] sm:$0xff] }
 0x3e2   :  { %9332 = vmatpush1.bf16.msra.mxu0 %v12913_v28  ;;  %v12932_v16 = vcombine.high %v2773_v47, %v2777_v61  ;;  %v9909_v22 = vsel %vm9877_vm3, %v13827_v4, %v9893_v5  ;;  %v9917_v9 = vsel %vm9885_vm5, %v13829_v48, %v9901_v8  ;;  %v12929_v24 = vcombine.low %v2772_v51, %v2776_v52  ;;  %v2788_v4 = vld [vmem:[%s19589_s3 + $0xed0] sm:$0xff]  ;;  %v2805_v45 = vld [vmem:[%s19589_s3 + $0xf58] sm:$0xff] }
 0x3e3   :  { %9676 = vmatpush1.bf16.msra.mxu1 %v12915_v13  ;;  %9333 = vmatprep.subr.bf16.mxu0 %v12922_v39  ;;  %v17831_v34 = vpack.c.bf16 %v9917_v9, %v9909_v22  ;;  %v9911_v28 = vsel %vm9879_vm6, %v13831_v14, %v9895_v56  ;;  %v9919_v29 = vsel %vm9887_vm7, %v13833_v42, %v9903_v12  ;;  %v2789_v13 = vld [vmem:[%s19589_s3 + $0xed8] sm:$0xff]  ;;  %v2804_v51 = vld [vmem:[%s19589_s3 + $0xf50] sm:$0xff] }
 0x3e4   :  { %9677 = vmatprep.subr.bf16.mxu1 %v12924_v38  ;;  %v12931_v31 = vcombine.low %v2773_v47, %v2777_v61  ;;  %v12938_v32 = vcombine.high %v2780_v17, %v2784_v18  ;;  %v17835_v27 = vpack.c.bf16 %v9919_v29, %v9911_v28  ;;  %v12940_v19 = vcombine.high %v2781_v20, %v2785_v21  ;;  %v2809_v53 = vld [vmem:[%s19589_s3 + $0xf78] sm:$0xff]  ;;  %v2812_v56 = vld [vmem:[%s19589_s3 + $0xf90] sm:$0xff] }
 0x3e5   :  { %v12937_v37 = vcombine.low %v2780_v17, %v2784_v18  ;;  %v12946_v39 = vcombine.high %v2788_v4, %v2792_v35  ;;  %v12948_v14 = vcombine.high %v2789_v13, %v2793_v59  ;;  %v12945_v58 = vcombine.low %v2788_v4, %v2792_v35  ;;  %v2816_v8 = vld [vmem:[%s19589_s3 + $0xfb0] sm:$0xff]  ;;  %v2813_v10 = vld [vmem:[%s19589_s3 + $0xf98] sm:$0xff] }
 0x3e6   :  { %9334 = vmatpush1.bf16.msra.mxu0 %v12921_v23  ;;  %v12939_v23 = vcombine.low %v2781_v20, %v2785_v21  ;;  %v12947_v48 = vcombine.low %v2789_v13, %v2793_v59  ;;  %v12956_v38 = vcombine.high %v2797_v43, %v2801_v44  ;;  %v12955_v47 = vcombine.low %v2797_v43, %v2801_v44  ;;  %v2817_v11 = vld [vmem:[%s19589_s3 + $0xfb8] sm:$0xff]  ;;  %v2820_v18 = vld [vmem:[%s19589_s3 + $0xfd0] sm:$0xff] }
 0x3e7   :  { %9678 = vmatpush1.bf16.msra.mxu1 %v12923_v40  ;;  %9335 = vmatprep.subr.bf16.mxu0 %v12930_v15  ;;  %v2800_v40 = vld [vmem:[%s19589_s3 + $0xf30] sm:$0xff]  ;;  %v12962_v61 = vcombine.high %v2804_v51, %v2808_v49  ;;  %v12964_v5 = vcombine.high %v2805_v45, %v2809_v53  ;;  %v12961_v12 = vcombine.low %v2804_v51, %v2808_v49  ;;  %v2821_v21 = vld [vmem:[%s19589_s3 + $0xfd8] sm:$0xff] }
 0x3e8   :  { %9679 = vmatprep.subr.bf16.mxu1 %v12932_v16  ;;  %v12954_v42 = vcombine.high %v2796_v33, %v2800_v40  ;;  %v12953_v52 = vcombine.low %v2796_v33, %v2800_v40  ;;  %v12963_v15 = vcombine.low %v2805_v45, %v2809_v53  ;;  %v12970_v16 = vcombine.high %v2812_v56, %v2816_v8  ;;  %v2824_v20 = vld [vmem:[%s19589_s3 + $0xff0] sm:$0xff]  ;;  %v2825_v22 = vld [vmem:[%s19589_s3 + $0xff8] sm:$0xff] }
 0x3e9   :  { %v12972_v17 = vcombine.high %v2813_v10, %v2817_v11  ;;  %v12969_v9 = vcombine.low %v2812_v56, %v2816_v8  ;;  %v12978_v28 = vcombine.high %v2820_v18, %v2824_v20  ;;  %v12980_v29 = vcombine.high %v2821_v21, %v2825_v22  ;;  %v2833_v4 = vld [vmem:[%s19589_s3 + $0x1038] sm:$0xff] }
 0x3ea   :  { %9336 = vmatpush1.bf16.msra.mxu0 %v12929_v24  ;;  %v12971_v24 = vcombine.low %v2813_v10, %v2817_v11  ;;  %v12977_v35 = vcombine.low %v2820_v18, %v2824_v20  ;;  %v12979_v13 = vcombine.low %v2821_v21, %v2825_v22  ;;  %v2837_v33 = vld [vmem:[%s19589_s3 + $0x1058] sm:$0xff]  ;;  %v2860_v11 = vld [vmem:[%s19589_s3 + $0x1110] sm:$0xff] }
 0x3eb   :  { %9680 = vmatpush1.bf16.msra.mxu1 %v12931_v31  ;;  %9337 = vmatprep.subr.bf16.mxu0 %v12938_v32  ;;  %v2828_v31 = vld [vmem:[%s19589_s3 + $0x1010] sm:$0xff]  ;;  %v2841_v40 = vld [vmem:[%s19589_s3 + $0x1078] sm:$0xff] }
 0x3ec   :  { %9681 = vmatprep.subr.bf16.mxu1 %v12940_v19  ;;  %v2832_v32 = vld [vmem:[%s19589_s3 + $0x1030] sm:$0xff]  ;;  %v2829_v19 = vld [vmem:[%s19589_s3 + $0x1018] sm:$0xff]  ;;  %v12995_v45 = vcombine.low %v2837_v33, %v2841_v40 }
 0x3ed   :  { %v12986_v59 = vcombine.high %v2828_v31, %v2832_v32  ;;  %v12987_v43 = vcombine.low %v2829_v19, %v2833_v4  ;;  %v2849_v51 = vld [vmem:[%s19589_s3 + $0x10b8] sm:$0xff]  ;;  %v2868_v22 = vld [vmem:[%s19589_s3 + $0x1150] sm:$0xff] }
 0x3ee   :  { %9338 = vmatpush1.bf16.msra.mxu0 %v12937_v37  ;;  %v12988_v37 = vcombine.high %v2829_v19, %v2833_v4  ;;  %v2876_v4 = vld [vmem:[%s19589_s3 + $0x1190] sm:$0xff] }
 0x3ef   :  { %9682 = vmatpush1.bf16.msra.mxu1 %v12939_v23  ;;  %9339 = vmatprep.subr.bf16.mxu0 %v12946_v39  ;;  %v2836_v23 = vld [vmem:[%s19589_s3 + $0x1050] sm:$0xff] }
 0x3f0   :  { %9683 = vmatprep.subr.bf16.mxu1 %v12948_v14  ;;  %v2840_v39 = vld [vmem:[%s19589_s3 + $0x1070] sm:$0xff]  ;;  %v12985_v14 = vcombine.low %v2828_v31, %v2832_v32 }
 0x3f1   :  { %v12994_v44 = vcombine.high %v2836_v23, %v2840_v39  ;;  %v12993_v49 = vcombine.low %v2836_v23, %v2840_v39 }
 0x3f2   :  { %9340 = vmatpush1.bf16.msra.mxu0 %v12945_v58  ;;  %v2844_v58 = vld [vmem:[%s19589_s3 + $0x1090] sm:$0xff] }
 0x3f3   :  { %9684 = vmatpush1.bf16.msra.mxu1 %v12947_v48  ;;  %9341 = vmatprep.subr.bf16.mxu0 %v12954_v42  ;;  %v2848_v48 = vld [vmem:[%s19589_s3 + $0x10b0] sm:$0xff]  ;;  %v12996_v42 = vcombine.high %v2837_v33, %v2841_v40 }
 0x3f4   :  { %9685 = vmatprep.subr.bf16.mxu1 %v12956_v38  ;;  %v2845_v38 = vld [vmem:[%s19589_s3 + $0x1098] sm:$0xff]  ;;  %v13002_v53 = vcombine.high %v2844_v58, %v2848_v48  ;;  %v2884_v33 = vld [vmem:[%s19589_s3 + $0x11d0] sm:$0xff] }
 0x3f5   :  { %v13003_v56 = vcombine.low %v2845_v38, %v2849_v51  ;;  %v2888_v40 = vld [vmem:[%s19589_s3 + $0x11f0] sm:$0xff] }
 0x3f6   :  { %9342 = vmatpush1.bf16.msra.mxu0 %v12953_v52  ;;  %v13004_v52 = vcombine.high %v2845_v38, %v2849_v51  ;;  %v2892_v51 = vld [vmem:[%s19589_s3 + $0x1210] sm:$0xff] }
 0x3f7   :  { %9686 = vmatpush1.bf16.msra.mxu1 %v12955_v47  ;;  %9343 = vmatprep.subr.bf16.mxu0 %v12962_v61  ;;  %v2852_v47 = vld [vmem:[%s19589_s3 + $0x10d0] sm:$0xff] }
 0x3f8   :  { %9687 = vmatprep.subr.bf16.mxu1 %v12964_v5  ;;  %v2856_v61 = vld [vmem:[%s19589_s3 + $0x10f0] sm:$0xff]  ;;  %v2857_v5 = vld [vmem:[%s19589_s3 + $0x10f8] sm:$0xff] }
 0x3f9   :  { %v13010_v8 = vcombine.high %v2852_v47, %v2856_v61 }
 0x3fa   :  { %9344 = vmatpush1.bf16.msra.mxu0 %v12961_v12  ;;  %v2864_v12 = vld [vmem:[%s19589_s3 + $0x1130] sm:$0xff] }
 0x3fb   :  { %9688 = vmatpush1.bf16.msra.mxu1 %v12963_v15  ;;  %9345 = vmatprep.subr.bf16.mxu0 %v12970_v16  ;;  %v2861_v15 = vld [vmem:[%s19589_s3 + $0x1118] sm:$0xff]  ;;  %v13018_v20 = vcombine.high %v2860_v11, %v2864_v12 }
 0x3fc   :  { %9689 = vmatprep.subr.bf16.mxu1 %v12972_v17  ;;  %v2865_v16 = vld [vmem:[%s19589_s3 + $0x1138] sm:$0xff]  ;;  %v13009_v17 = vcombine.low %v2852_v47, %v2856_v61 }
 0x3fd   :  { %v13020_v21 = vcombine.high %v2861_v15, %v2865_v16  ;;  %v13019_v31 = vcombine.low %v2861_v15, %v2865_v16  ;;  %v2908_v16 = vld [vmem:[%s19589_s3 + $0x1290] sm:$0xff] }
 0x3fe   :  { %9346 = vmatpush1.bf16.msra.mxu0 %v12969_v9  ;;  %v2872_v9 = vld [vmem:[%s19589_s3 + $0x1170] sm:$0xff] }
 0x3ff   :  { %9690 = vmatpush1.bf16.msra.mxu1 %v12971_v24  ;;  %9347 = vmatprep.subr.bf16.mxu0 %v12978_v28  ;;  %v2869_v24 = vld [vmem:[%s19589_s3 + $0x1158] sm:$0xff]  ;;  %v13026_v32 = vcombine.high %v2868_v22, %v2872_v9 }
 0x400   :  { %9691 = vmatprep.subr.bf16.mxu1 %v12980_v29  ;;  %v2873_v28 = vld [vmem:[%s19589_s3 + $0x1178] sm:$0xff]  ;;  %v13017_v29 = vcombine.low %v2860_v11, %v2864_v12 }
 0x401   :  { %v13028_v19 = vcombine.high %v2869_v24, %v2873_v28  ;;  %v13027_v23 = vcombine.low %v2869_v24, %v2873_v28  ;;  %v2916_v28 = vld [vmem:[%s19589_s3 + $0x12d0] sm:$0xff] }
 0x402   :  { %9348 = vmatpush1.bf16.msra.mxu0 %v12977_v35  ;;  %v2880_v35 = vld [vmem:[%s19589_s3 + $0x11b0] sm:$0xff] }
 0x403   :  { %9692 = vmatpush1.bf16.msra.mxu1 %v12979_v13  ;;  %9360 = vmatprep.subr.bf16.mxu0 %v12986_v59  ;;  %v2877_v13 = vld [vmem:[%s19589_s3 + $0x1198] sm:$0xff]  ;;  %v13034_v39 = vcombine.high %v2876_v4, %v2880_v35 }
 0x404   :  { %9704 = vmatprep.subr.bf16.mxu1 %v12988_v37  ;;  %v2881_v59 = vld [vmem:[%s19589_s3 + $0x11b8] sm:$0xff]  ;;  %v13025_v37 = vcombine.low %v2868_v22, %v2872_v9 }
 0x405   :  { %9350 = vmatmul.mubr.bf16.vlgmr.msra.gmra.mrb[20].mxu0 %v15706_v30 }
 0x406   :  { %9694 = vmatmul.mubr.bf16.vlgmr.msra.gmra.mrb[20].mxu1 %v15706_v30  ;;  %9361 = vmatpush1.bf16.msra.mxu0 %v12985_v14  ;;  %v2853_v30 = vld [vmem:[%s19589_s3 + $0x10d8] sm:$0xff]  ;;  %v13036_v14 = vcombine.high %v2877_v13, %v2881_v59 }
 0x407   :  { %9392 = vmatprep.mubr.bf16.mxu0 %v15938_v41  ;;  %9705 = vmatpush1.bf16.msra.mxu1 %v12987_v43  ;;  %v13012_v10 = vcombine.high %v2853_v30, %v2857_v5  ;;  %v13011_v18 = vcombine.low %v2853_v30, %v2857_v5  ;;  %v2885_v43 = vld [vmem:[%s19589_s3 + $0x11d8] sm:$0xff]  ;;  %v2900_v5 = vld [vmem:[%s19589_s3 + $0x1250] sm:$0xff] }
 0x408   :  { %9736 = vmatprep.mubr.bf16.mxu1 %v15938_v41  ;;  %9362 = vmatprep.subr.bf16.mxu0 %v12994_v44  ;;  %v13001_v41 = vcombine.low %v2844_v58, %v2848_v48  ;;  %v2889_v44 = vld [vmem:[%s19589_s3 + $0x11f8] sm:$0xff]  ;;  %v13033_v58 = vcombine.low %v2876_v4, %v2880_v35  ;;  %v13035_v48 = vcombine.low %v2877_v13, %v2881_v59  ;;  %v2924_v59 = vld [vmem:[%s19589_s3 + $0x1310] sm:$0xff] }
 0x409   :  { %9706 = vmatprep.subr.bf16.mxu1 %v12996_v42  ;;  %v13042_v42 = vcombine.high %v2884_v33, %v2888_v40  ;;  %v13044_v38 = vcombine.high %v2885_v43, %v2889_v44  ;;  %v13043_v47 = vcombine.low %v2885_v43, %v2889_v44  ;;  %v2932_v44 = vld [vmem:[%s19589_s3 + $0x1350] sm:$0xff] }
 0x40a   :  { %9363 = vmatpush1.bf16.msra.mxu0 %v12993_v49  ;;  %v2896_v49 = vld [vmem:[%s19589_s3 + $0x1230] sm:$0xff] }
 0x40b   :  { %9707 = vmatpush1.bf16.msra.mxu1 %v12995_v45  ;;  %9364 = vmatprep.subr.bf16.mxu0 %v13002_v53  ;;  %v2893_v45 = vld [vmem:[%s19589_s3 + $0x1218] sm:$0xff]  ;;  %v13050_v61 = vcombine.high %v2892_v51, %v2896_v49 }
 0x40c   :  { %9708 = vmatprep.subr.bf16.mxu1 %v13004_v52  ;;  %v2897_v53 = vld [vmem:[%s19589_s3 + $0x1238] sm:$0xff]  ;;  %v13041_v52 = vcombine.low %v2884_v33, %v2888_v40 }
 0x40d   :  { %v13052_v30 = vcombine.high %v2893_v45, %v2897_v53  ;;  %v13051_v11 = vcombine.low %v2893_v45, %v2897_v53  ;;  %v2940_v53 = vld [vmem:[%s19589_s3 + $0x1390] sm:$0xff] }
 0x40e   :  { %9365 = vmatpush1.bf16.msra.mxu0 %v13001_v41  ;;  %v2904_v41 = vld [vmem:[%s19589_s3 + $0x1270] sm:$0xff] }
 0x40f   :  { %9709 = vmatpush1.bf16.msra.mxu1 %v13003_v56  ;;  %9366 = vmatprep.subr.bf16.mxu0 %v13010_v8  ;;  %v2901_v56 = vld [vmem:[%s19589_s3 + $0x1258] sm:$0xff]  ;;  %v13058_v12 = vcombine.high %v2900_v5, %v2904_v41 }
 0x410   :  { %9710 = vmatprep.subr.bf16.mxu1 %v13012_v10  ;;  %v2905_v8 = vld [vmem:[%s19589_s3 + $0x1278] sm:$0xff]  ;;  %v13049_v10 = vcombine.low %v2892_v51, %v2896_v49 }
 0x411   :  { %v13060_v15 = vcombine.high %v2901_v56, %v2905_v8  ;;  %v13059_v22 = vcombine.low %v2901_v56, %v2905_v8  ;;  %v2948_v8 = vld [vmem:[%s19589_s3 + $0x13d0] sm:$0xff] }
 0x412   :  { %9367 = vmatpush1.bf16.msra.mxu0 %v13009_v17  ;;  %v2912_v17 = vld [vmem:[%s19589_s3 + $0x12b0] sm:$0xff] }
 0x413   :  { %9711 = vmatpush1.bf16.msra.mxu1 %v13011_v18  ;;  %9368 = vmatprep.subr.bf16.mxu0 %v13018_v20  ;;  %v2909_v18 = vld [vmem:[%s19589_s3 + $0x1298] sm:$0xff]  ;;  %v13066_v9 = vcombine.high %v2908_v16, %v2912_v17 }
 0x414   :  { %9712 = vmatprep.subr.bf16.mxu1 %v13020_v21  ;;  %v2913_v20 = vld [vmem:[%s19589_s3 + $0x12b8] sm:$0xff]  ;;  %v13057_v21 = vcombine.low %v2900_v5, %v2904_v41 }
 0x415   :  { %v13068_v24 = vcombine.high %v2909_v18, %v2913_v20  ;;  %v13067_v4 = vcombine.low %v2909_v18, %v2913_v20  ;;  %v2956_v20 = vld [vmem:[%s19589_s3 + $0x1410] sm:$0xff] }
 0x416   :  { %9369 = vmatpush1.bf16.msra.mxu0 %v13017_v29  ;;  %v2920_v29 = vld [vmem:[%s19589_s3 + $0x12f0] sm:$0xff] }
 0x417   :  { %9713 = vmatpush1.bf16.msra.mxu1 %v13019_v31  ;;  %9370 = vmatprep.subr.bf16.mxu0 %v13026_v32  ;;  %v2917_v31 = vld [vmem:[%s19589_s3 + $0x12d8] sm:$0xff]  ;;  %v13074_v35 = vcombine.high %v2916_v28, %v2920_v29 }
 0x418   :  { %9714 = vmatprep.subr.bf16.mxu1 %v13028_v19  ;;  %v2921_v32 = vld [vmem:[%s19589_s3 + $0x12f8] sm:$0xff]  ;;  %v13065_v19 = vcombine.low %v2908_v16, %v2912_v17 }
 0x419   :  { %v13076_v13 = vcombine.high %v2917_v31, %v2921_v32  ;;  %v13075_v33 = vcombine.low %v2917_v31, %v2921_v32  ;;  %v2964_v32 = vld [vmem:[%s19589_s3 + $0x1450] sm:$0xff] }
 0x41a   :  { %9371 = vmatpush1.bf16.msra.mxu0 %v13025_v37  ;;  %v2928_v37 = vld [vmem:[%s19589_s3 + $0x1330] sm:$0xff] }
 0x41b   :  { %9715 = vmatpush1.bf16.msra.mxu1 %v13027_v23  ;;  %9372 = vmatprep.subr.bf16.mxu0 %v13034_v39  ;;  %v2925_v23 = vld [vmem:[%s19589_s3 + $0x1318] sm:$0xff]  ;;  %v13082_v40 = vcombine.high %v2924_v59, %v2928_v37 }
 0x41c   :  { %9716 = vmatprep.subr.bf16.mxu1 %v13036_v14  ;;  %v2929_v39 = vld [vmem:[%s19589_s3 + $0x1338] sm:$0xff]  ;;  %v13073_v14 = vcombine.low %v2916_v28, %v2920_v29 }
 0x41d   :  { %v13084_v43 = vcombine.high %v2925_v23, %v2929_v39  ;;  %v13083_v51 = vcombine.low %v2925_v23, %v2929_v39  ;;  %v2972_v23 = vld [vmem:[%s19589_s3 + $0x1490] sm:$0xff] }
 0x41e   :  { %9373 = vmatpush1.bf16.msra.mxu0 %v13033_v58  ;;  %v2936_v58 = vld [vmem:[%s19589_s3 + $0x1370] sm:$0xff] }
 0x41f   :  { %9717 = vmatpush1.bf16.msra.mxu1 %v13035_v48  ;;  %9374 = vmatprep.subr.bf16.mxu0 %v13042_v42  ;;  %v2933_v48 = vld [vmem:[%s19589_s3 + $0x1358] sm:$0xff]  ;;  %v13090_v49 = vcombine.high %v2932_v44, %v2936_v58  ;;  %v2976_v39 = vld [vmem:[%s19589_s3 + $0x14b0] sm:$0xff] }
 0x420   :  { %9718 = vmatprep.subr.bf16.mxu1 %v13044_v38  ;;  %v2937_v42 = vld [vmem:[%s19589_s3 + $0x1378] sm:$0xff]  ;;  %v13081_v38 = vcombine.low %v2924_v59, %v2928_v37 }
 0x421   :  { %v13092_v45 = vcombine.high %v2933_v48, %v2937_v42  ;;  %v13091_v5 = vcombine.low %v2933_v48, %v2937_v42  ;;  %v2980_v42 = vld [vmem:[%s19589_s3 + $0x14d0] sm:$0xff] }
 0x422   :  { %9375 = vmatpush1.bf16.msra.mxu0 %v13041_v52  ;;  %v2944_v52 = vld [vmem:[%s19589_s3 + $0x13b0] sm:$0xff] }
 0x423   :  { %9719 = vmatpush1.bf16.msra.mxu1 %v13043_v47  ;;  %9376 = vmatprep.subr.bf16.mxu0 %v13050_v61  ;;  %v2941_v47 = vld [vmem:[%s19589_s3 + $0x1398] sm:$0xff]  ;;  %v13098_v41 = vcombine.high %v2940_v53, %v2944_v52 }
 0x424   :  { %9720 = vmatprep.subr.bf16.mxu1 %v13052_v30  ;;  %v2945_v61 = vld [vmem:[%s19589_s3 + $0x13b8] sm:$0xff]  ;;  %v13089_v30 = vcombine.low %v2932_v44, %v2936_v58  ;;  %v13130_v58 = vcombine.high %v2972_v23, %v2976_v39 }
 0x425   :  { %v13100_v56 = vcombine.high %v2941_v47, %v2945_v61  ;;  %v13099_v16 = vcombine.low %v2941_v47, %v2945_v61  ;;  %v2992_v47 = vld [vmem:[%s19589_s3 + $0x1530] sm:$0xff]  ;;  %v2989_v61 = vld [vmem:[%s19589_s3 + $0x1518] sm:$0xff] }
 0x426   :  { %9377 = vmatpush1.bf16.msra.mxu0 %v13049_v10  ;;  %v2952_v10 = vld [vmem:[%s19589_s3 + $0x13f0] sm:$0xff] }
 0x427   :  { %9721 = vmatpush1.bf16.msra.mxu1 %v13051_v11  ;;  %9378 = vmatprep.subr.bf16.mxu0 %v13058_v12  ;;  %v2949_v11 = vld [vmem:[%s19589_s3 + $0x13d8] sm:$0xff]  ;;  %v13106_v17 = vcombine.high %v2948_v8, %v2952_v10 }
 0x428   :  { %9722 = vmatprep.subr.bf16.mxu1 %v13060_v15  ;;  %v2953_v12 = vld [vmem:[%s19589_s3 + $0x13f8] sm:$0xff]  ;;  %v13097_v15 = vcombine.low %v2940_v53, %v2944_v52  ;;  %v2988_v52 = vld [vmem:[%s19589_s3 + $0x1510] sm:$0xff] }
 0x429   :  { %v13108_v18 = vcombine.high %v2949_v11, %v2953_v12  ;;  %v13107_v28 = vcombine.low %v2949_v11, %v2953_v12  ;;  %v3000_v11 = vld [vmem:[%s19589_s3 + $0x1570] sm:$0xff]  ;;  %v2997_v12 = vld [vmem:[%s19589_s3 + $0x1558] sm:$0xff] }
 0x42a   :  { %9379 = vmatpush1.bf16.msra.mxu0 %v13057_v21  ;;  %v2960_v21 = vld [vmem:[%s19589_s3 + $0x1430] sm:$0xff] }
 0x42b   :  { %9723 = vmatpush1.bf16.msra.mxu1 %v13059_v22  ;;  %9380 = vmatprep.subr.bf16.mxu0 %v13066_v9  ;;  %v2957_v22 = vld [vmem:[%s19589_s3 + $0x1418] sm:$0xff]  ;;  %v13114_v29 = vcombine.high %v2956_v20, %v2960_v21 }
 0x42c   :  { %9724 = vmatprep.subr.bf16.mxu1 %v13068_v24  ;;  %v2961_v9 = vld [vmem:[%s19589_s3 + $0x1438] sm:$0xff]  ;;  %v13105_v24 = vcombine.low %v2948_v8, %v2952_v10  ;;  %v2996_v10 = vld [vmem:[%s19589_s3 + $0x1550] sm:$0xff] }
 0x42d   :  { %v13116_v31 = vcombine.high %v2957_v22, %v2961_v9  ;;  %v13115_v59 = vcombine.low %v2957_v22, %v2961_v9  ;;  %v3008_v22 = vld [vmem:[%s19589_s3 + $0x15b0] sm:$0xff]  ;;  %v3005_v9 = vld [vmem:[%s19589_s3 + $0x1598] sm:$0xff] }
 0x42e   :  { %9381 = vmatpush1.bf16.msra.mxu0 %v13065_v19  ;;  %v2968_v19 = vld [vmem:[%s19589_s3 + $0x1470] sm:$0xff] }
 0x42f   :  { %9725 = vmatpush1.bf16.msra.mxu1 %v13067_v4  ;;  %9382 = vmatprep.subr.bf16.mxu0 %v13074_v35  ;;  %v13113_v4 = vcombine.low %v2956_v20, %v2960_v21  ;;  %v2965_v35 = vld [vmem:[%s19589_s3 + $0x1458] sm:$0xff]  ;;  %v13122_v37 = vcombine.high %v2964_v32, %v2968_v19  ;;  %v3004_v21 = vld [vmem:[%s19589_s3 + $0x1590] sm:$0xff] }
 0x430   :  { %9726 = vmatprep.subr.bf16.mxu1 %v13076_v13  ;;  %v2969_v13 = vld [vmem:[%s19589_s3 + $0x1478] sm:$0xff] }
 0x431   :  { %v13123_v44 = vcombine.low %v2965_v35, %v2969_v13 }
 0x432   :  { %9383 = vmatpush1.bf16.msra.mxu0 %v13073_v14  ;;  %v13124_v14 = vcombine.high %v2965_v35, %v2969_v13  ;;  %v3013_v35 = vld [vmem:[%s19589_s3 + $0x15d8] sm:$0xff] }
 0x433   :  { %9727 = vmatpush1.bf16.msra.mxu1 %v13075_v33  ;;  %9384 = vmatprep.subr.bf16.mxu0 %v13082_v40  ;;  %v2973_v33 = vld [vmem:[%s19589_s3 + $0x1498] sm:$0xff] }
 0x434   :  { %9728 = vmatprep.subr.bf16.mxu1 %v13084_v43  ;;  %v2977_v40 = vld [vmem:[%s19589_s3 + $0x14b8] sm:$0xff]  ;;  %v13121_v43 = vcombine.low %v2964_v32, %v2968_v19  ;;  %v3012_v19 = vld [vmem:[%s19589_s3 + $0x15d0] sm:$0xff] }
 0x435   :  { %v13132_v48 = vcombine.high %v2973_v33, %v2977_v40  ;;  %v3017_v13 = vld [vmem:[%s19589_s3 + $0x15f8] sm:$0xff] }
 0x436   :  { %9385 = vmatpush1.bf16.msra.mxu0 %v13081_v38  ;;  %v2984_v38 = vld [vmem:[%s19589_s3 + $0x14f0] sm:$0xff] }
 0x437   :  { %9729 = vmatpush1.bf16.msra.mxu1 %v13083_v51  ;;  %9386 = vmatprep.subr.bf16.mxu0 %v13090_v49  ;;  %v2985_v51 = vld [vmem:[%s19589_s3 + $0x14f8] sm:$0xff]  ;;  %v13131_v49 = vcombine.low %v2973_v33, %v2977_v40  ;;  %v3024_v33 = vld [vmem:[%s19589_s3 + $0x1630] sm:$0xff] }
 0x438   :  { %9730 = vmatprep.subr.bf16.mxu1 %v13092_v45  ;;  %v13138_v45 = vcombine.high %v2980_v42, %v2984_v38  ;;  %v3021_v40 = vld [vmem:[%s19589_s3 + $0x1618] sm:$0xff] }
 0x43a   :  { %9387 = vmatpush1.bf16.msra.mxu0 %v13089_v30  ;;  %v2993_v30 = vld [vmem:[%s19589_s3 + $0x1538] sm:$0xff] }
 0x43b   :  { %9731 = vmatpush1.bf16.msra.mxu1 %v13091_v5  ;;  %9388 = vmatprep.subr.bf16.mxu0 %v13098_v41  ;;  %v13137_v5 = vcombine.low %v2980_v42, %v2984_v38  ;;  %v13148_v8 = vcombine.high %v2989_v61, %v2993_v30  ;;  %v3028_v38 = vld [vmem:[%s19589_s3 + $0x1650] sm:$0xff] }
 0x43c   :  { %9732 = vmatprep.subr.bf16.mxu1 %v13100_v56  ;;  %v13146_v56 = vcombine.high %v2988_v52, %v2992_v47 }
 0x43e   :  { %9389 = vmatpush1.bf16.msra.mxu0 %v13097_v15  ;;  %v3001_v15 = vld [vmem:[%s19589_s3 + $0x1578] sm:$0xff] }
 0x43f   :  { %9733 = vmatpush1.bf16.msra.mxu1 %v13099_v16  ;;  %9390 = vmatprep.subr.bf16.mxu0 %v13106_v17  ;;  %v13145_v16 = vcombine.low %v2988_v52, %v2992_v47  ;;  %v13147_v17 = vcombine.low %v2989_v61, %v2993_v30  ;;  %v13156_v20 = vcombine.high %v2997_v12, %v3001_v15  ;;  %v3036_v47 = vld [vmem:[%s19589_s3 + $0x1690] sm:$0xff]  ;;  %v3037_v30 = vld [vmem:[%s19589_s3 + $0x1698] sm:$0xff] }
 0x440   :  { %9734 = vmatprep.subr.bf16.mxu1 %v13108_v18  ;;  %v13154_v18 = vcombine.high %v2996_v10, %v3000_v11  ;;  %v3040_v61 = vld [vmem:[%s19589_s3 + $0x16b0] sm:$0xff] }
 0x442   :  { %9391 = vmatpush1.bf16.msra.mxu0 %v13105_v24  ;;  %v3009_v24 = vld [vmem:[%s19589_s3 + $0x15b8] sm:$0xff] }
 0x443   :  { %9735 = vmatpush1.bf16.msra.mxu1 %v13107_v28  ;;  %9403 = vmatprep.subr.bf16.mxu0 %v13114_v29  ;;  %v13153_v28 = vcombine.low %v2996_v10, %v3000_v11  ;;  %v13155_v29 = vcombine.low %v2997_v12, %v3001_v15  ;;  %v13164_v32 = vcombine.high %v3005_v9, %v3009_v24  ;;  %v3044_v11 = vld [vmem:[%s19589_s3 + $0x16d0] sm:$0xff]  ;;  %v3045_v15 = vld [vmem:[%s19589_s3 + $0x16d8] sm:$0xff] }
 0x444   :  { %9747 = vmatprep.subr.bf16.mxu1 %v13116_v31  ;;  %v13162_v31 = vcombine.high %v3004_v21, %v3008_v22  ;;  %v3048_v12 = vld [vmem:[%s19589_s3 + $0x16f0] sm:$0xff] }
 0x445   :  { %9393 = vmatmul.mubr.bf16.vlgmr.msra.gmra.mrb[20].mxu0 %v15930_v36 }
 0x446   :  { %9737 = vmatmul.mubr.bf16.vlgmr.msra.gmra.mrb[20].mxu1 %v15930_v36  ;;  %9404 = vmatpush1.bf16.msra.mxu0 %v13113_v4  ;;  %v2981_v36 = vld [vmem:[%s19589_s3 + $0x14d8] sm:$0xff]  ;;  %v3016_v4 = vld [vmem:[%s19589_s3 + $0x15f0] sm:$0xff] }
 0x447   :  { %9435 = vmatprep.mubr.bf16.mxu0 %v15966_v60  ;;  %9748 = vmatpush1.bf16.msra.mxu1 %v13115_v59  ;;  %v13140_v53 = vcombine.high %v2981_v36, %v2985_v51  ;;  %v13139_v41 = vcombine.low %v2981_v36, %v2985_v51  ;;  %v13161_v59 = vcombine.low %v3004_v21, %v3008_v22  ;;  %v3032_v36 = vld [vmem:[%s19589_s3 + $0x1670] sm:$0xff]  ;;  %v3029_v51 = vld [vmem:[%s19589_s3 + $0x1658] sm:$0xff] }
 0x448   :  { %9779 = vmatprep.mubr.bf16.mxu1 %v15966_v60  ;;  %9405 = vmatprep.subr.bf16.mxu0 %v13122_v37  ;;  %v13129_v60 = vcombine.low %v2972_v23, %v2976_v39  ;;  %v13163_v37 = vcombine.low %v3005_v9, %v3009_v24  ;;  %v13170_v23 = vcombine.high %v3012_v19, %v3016_v4  ;;  %v3052_v22 = vld [vmem:[%s19589_s3 + $0x1710] sm:$0xff]  ;;  %v3053_v24 = vld [vmem:[%s19589_s3 + $0x1718] sm:$0xff] }
 0x449   :  { %9749 = vmatprep.subr.bf16.mxu1 %v13124_v14  ;;  %v13172_v39 = vcombine.high %v3013_v35, %v3017_v13  ;;  %v3020_v14 = vld [vmem:[%s19589_s3 + $0x1610] sm:$0xff] }
 0x44a   :  { %9406 = vmatpush1.bf16.msra.mxu0 %v13121_v43  ;;  %v3025_v43 = vld [vmem:[%s19589_s3 + $0x1638] sm:$0xff]  ;;  %v3056_v9 = vld [vmem:[%s19589_s3 + $0x1730] sm:$0xff] }
 0x44b   :  { %9750 = vmatpush1.bf16.msra.mxu1 %v13123_v44  ;;  %9407 = vmatprep.subr.bf16.mxu0 %v13130_v58  ;;  %v13169_v44 = vcombine.low %v3012_v19, %v3016_v4  ;;  %v13171_v58 = vcombine.low %v3013_v35, %v3017_v13  ;;  %v13180_v42 = vcombine.high %v3021_v40, %v3025_v43  ;;  %v3060_v4 = vld [vmem:[%s19589_s3 + $0x1750] sm:$0xff]  ;;  %v3061_v13 = vld [vmem:[%s19589_s3 + $0x1758] sm:$0xff] }
 0x44c   :  { %9751 = vmatprep.subr.bf16.mxu1 %v13132_v48  ;;  %v13178_v48 = vcombine.high %v3020_v14, %v3024_v33  ;;  %v3064_v35 = vld [vmem:[%s19589_s3 + $0x1770] sm:$0xff] }
 0x44e   :  { %9408 = vmatpush1.bf16.msra.mxu0 %v13129_v60  ;;  %v3033_v60 = vld [vmem:[%s19589_s3 + $0x1678] sm:$0xff] }
 0x44f   :  { %9752 = vmatpush1.bf16.msra.mxu1 %v13131_v49  ;;  %9409 = vmatprep.subr.bf16.mxu0 %v13138_v45  ;;  %v13177_v49 = vcombine.low %v3020_v14, %v3024_v33  ;;  %v13179_v45 = vcombine.low %v3021_v40, %v3025_v43  ;;  %v13188_v52 = vcombine.high %v3029_v51, %v3033_v60  ;;  %v3068_v33 = vld [vmem:[%s19589_s3 + $0x1790] sm:$0xff]  ;;  %v3069_v43 = vld [vmem:[%s19589_s3 + $0x1798] sm:$0xff] }
 0x450   :  { %9753 = vmatprep.subr.bf16.mxu1 %v13140_v53  ;;  %v13186_v53 = vcombine.high %v3028_v38, %v3032_v36  ;;  %v3072_v40 = vld [vmem:[%s19589_s3 + $0x17b0] sm:$0xff] }
 0x452   :  { %9410 = vmatpush1.bf16.msra.mxu0 %v13137_v5  ;;  %v3041_v5 = vld [vmem:[%s19589_s3 + $0x16b8] sm:$0xff] }
 0x453   :  { %9754 = vmatpush1.bf16.msra.mxu1 %v13139_v41  ;;  %9411 = vmatprep.subr.bf16.mxu0 %v13146_v56  ;;  %v13185_v41 = vcombine.low %v3028_v38, %v3032_v36  ;;  %v13187_v56 = vcombine.low %v3029_v51, %v3033_v60  ;;  %v13196_v10 = vcombine.high %v3037_v30, %v3041_v5  ;;  %v3076_v36 = vld [vmem:[%s19589_s3 + $0x17d0] sm:$0xff]  ;;  %v3077_v60 = vld [vmem:[%s19589_s3 + $0x17d8] sm:$0xff] }
 0x454   :  { %9755 = vmatprep.subr.bf16.mxu1 %v13148_v8  ;;  %v13194_v8 = vcombine.high %v3036_v47, %v3040_v61  ;;  %v3080_v51 = vld [vmem:[%s19589_s3 + $0x17f0] sm:$0xff] }
 0x456   :  { %9412 = vmatpush1.bf16.msra.mxu0 %v13145_v16  ;;  %v3049_v16 = vld [vmem:[%s19589_s3 + $0x16f8] sm:$0xff] }
 0x457   :  { %9756 = vmatpush1.bf16.msra.mxu1 %v13147_v17  ;;  %9413 = vmatprep.subr.bf16.mxu0 %v13154_v18  ;;  %v13193_v17 = vcombine.low %v3036_v47, %v3040_v61  ;;  %v13195_v18 = vcombine.low %v3037_v30, %v3041_v5  ;;  %v13204_v21 = vcombine.high %v3045_v15, %v3049_v16  ;;  %v3084_v61 = vld [vmem:[%s19589_s3 + $0x1810] sm:$0xff]  ;;  %v3085_v5 = vld [vmem:[%s19589_s3 + $0x1818] sm:$0xff] }
 0x458   :  { %9757 = vmatprep.subr.bf16.mxu1 %v13156_v20  ;;  %v13202_v20 = vcombine.high %v3044_v11, %v3048_v12  ;;  %v3088_v30 = vld [vmem:[%s19589_s3 + $0x1830] sm:$0xff] }
 0x45a   :  { %9414 = vmatpush1.bf16.msra.mxu0 %v13153_v28  ;;  %v3057_v28 = vld [vmem:[%s19589_s3 + $0x1738] sm:$0xff] }
 0x45b   :  { %9758 = vmatpush1.bf16.msra.mxu1 %v13155_v29  ;;  %9415 = vmatprep.subr.bf16.mxu0 %v13162_v31  ;;  %v13201_v29 = vcombine.low %v3044_v11, %v3048_v12  ;;  %v13203_v31 = vcombine.low %v3045_v15, %v3049_v16  ;;  %v13212_v19 = vcombine.high %v3053_v24, %v3057_v28  ;;  %v3092_v12 = vld [vmem:[%s19589_s3 + $0x1850] sm:$0xff] }
 0x45c   :  { %9759 = vmatprep.subr.bf16.mxu1 %v13164_v32  ;;  %v13210_v32 = vcombine.high %v3052_v22, %v3056_v9  ;;  %v3096_v15 = vld [vmem:[%s19589_s3 + $0x1870] sm:$0xff]  ;;  %v13241_v16 = vcombine.low %v3084_v61, %v3088_v30 }
 0x45e   :  { %9416 = vmatpush1.bf16.msra.mxu0 %v13161_v59  ;;  %v3065_v59 = vld [vmem:[%s19589_s3 + $0x1778] sm:$0xff] }
 0x45f   :  { %9760 = vmatpush1.bf16.msra.mxu1 %v13163_v37  ;;  %9417 = vmatprep.subr.bf16.mxu0 %v13170_v23  ;;  %v13209_v37 = vcombine.low %v3052_v22, %v3056_v9  ;;  %v13211_v23 = vcombine.low %v3053_v24, %v3057_v28  ;;  %v13220_v14 = vcombine.high %v3061_v13, %v3065_v59  ;;  %v3100_v22 = vld [vmem:[%s19589_s3 + $0x1890] sm:$0xff]  ;;  %v3101_v28 = vld [vmem:[%s19589_s3 + $0x1898] sm:$0xff] }
 0x460   :  { %9761 = vmatprep.subr.bf16.mxu1 %v13172_v39  ;;  %v13218_v39 = vcombine.high %v3060_v4, %v3064_v35  ;;  %v3104_v9 = vld [vmem:[%s19589_s3 + $0x18b0] sm:$0xff] }
 0x462   :  { %9418 = vmatpush1.bf16.msra.mxu0 %v13169_v44  ;;  %v3073_v44 = vld [vmem:[%s19589_s3 + $0x17b8] sm:$0xff] }
 0x463   :  { %9762 = vmatpush1.bf16.msra.mxu1 %v13171_v58  ;;  %9419 = vmatprep.subr.bf16.mxu0 %v13178_v48  ;;  %v13217_v58 = vcombine.low %v3060_v4, %v3064_v35  ;;  %v13219_v48 = vcombine.low %v3061_v13, %v3065_v59  ;;  %v13228_v38 = vcombine.high %v3069_v43, %v3073_v44  ;;  %v3108_v35 = vld [vmem:[%s19589_s3 + $0x18d0] sm:$0xff]  ;;  %v3113_v59 = vld [vmem:[%s19589_s3 + $0x18f8] sm:$0xff] }
 0x464   :  { %9763 = vmatprep.subr.bf16.mxu1 %v13180_v42  ;;  %v13226_v42 = vcombine.high %v3068_v33, %v3072_v40  ;;  %v3112_v13 = vld [vmem:[%s19589_s3 + $0x18f0] sm:$0xff] }
 0x466   :  { %9420 = vmatpush1.bf16.msra.mxu0 %v13177_v49  ;;  %v3081_v49 = vld [vmem:[%s19589_s3 + $0x17f8] sm:$0xff] }
 0x467   :  { %9764 = vmatpush1.bf16.msra.mxu1 %v13179_v45  ;;  %9421 = vmatprep.subr.bf16.mxu0 %v13186_v53  ;;  %v13225_v45 = vcombine.low %v3068_v33, %v3072_v40  ;;  %v13227_v53 = vcombine.low %v3069_v43, %v3073_v44  ;;  %v13236_v47 = vcombine.high %v3077_v60, %v3081_v49  ;;  %v3120_v33 = vld [vmem:[%s19589_s3 + $0x1930] sm:$0xff]  ;;  %v3117_v40 = vld [vmem:[%s19589_s3 + $0x1918] sm:$0xff] }
 0x468   :  { %9765 = vmatprep.subr.bf16.mxu1 %v13188_v52  ;;  %v13234_v52 = vcombine.high %v3076_v36, %v3080_v51  ;;  %v3121_v43 = vld [vmem:[%s19589_s3 + $0x1938] sm:$0xff]  ;;  %v13265_v44 = vcombine.low %v3108_v35, %v3112_v13 }
 0x46a   :  { %9422 = vmatpush1.bf16.msra.mxu0 %v13185_v41  ;;  %v3089_v41 = vld [vmem:[%s19589_s3 + $0x1838] sm:$0xff] }
 0x46b   :  { %9766 = vmatpush1.bf16.msra.mxu1 %v13187_v56  ;;  %9423 = vmatprep.subr.bf16.mxu0 %v13194_v8  ;;  %v13233_v56 = vcombine.low %v3076_v36, %v3080_v51  ;;  %v13235_v8 = vcombine.low %v3077_v60, %v3081_v49  ;;  %v13244_v11 = vcombine.high %v3085_v5, %v3089_v41  ;;  %v3125_v51 = vld [vmem:[%s19589_s3 + $0x1958] sm:$0xff] }
 0x46c   :  { %9767 = vmatprep.subr.bf16.mxu1 %v13196_v10  ;;  %v13242_v10 = vcombine.high %v3084_v61, %v3088_v30  ;;  %v13276_v36 = vcombine.high %v3117_v40, %v3121_v43  ;;  %v3129_v60 = vld [vmem:[%s19589_s3 + $0x1978] sm:$0xff] }
 0x46d   :  { %v3133_v61 = vld [vmem:[%s19589_s3 + $0x1998] sm:$0xff]  ;;  %v13284_v30 = vcombine.high %v3125_v51, %v3129_v60 }
 0x46e   :  { %9424 = vmatpush1.bf16.msra.mxu0 %v13193_v17  ;;  %v3093_v17 = vld [vmem:[%s19589_s3 + $0x1858] sm:$0xff] }
 0x46f   :  { %9768 = vmatpush1.bf16.msra.mxu1 %v13195_v18  ;;  %9425 = vmatprep.subr.bf16.mxu0 %v13202_v20  ;;  %v3097_v18 = vld [vmem:[%s19589_s3 + $0x1878] sm:$0xff]  ;;  %v13243_v20 = vcombine.low %v3085_v5, %v3089_v41 }
 0x470   :  { %9769 = vmatprep.subr.bf16.mxu1 %v13204_v21  ;;  %v13250_v21 = vcombine.high %v3092_v12, %v3096_v15  ;;  %v13252_v24 = vcombine.high %v3093_v17, %v3097_v18  ;;  %v3137_v5 = vld [vmem:[%s19589_s3 + $0x19b8] sm:$0xff] }
 0x472   :  { %9426 = vmatpush1.bf16.msra.mxu0 %v13201_v29  ;;  %v3105_v29 = vld [vmem:[%s19589_s3 + $0x18b8] sm:$0xff] }
 0x473   :  { %9770 = vmatpush1.bf16.msra.mxu1 %v13203_v31  ;;  %9427 = vmatprep.subr.bf16.mxu0 %v13210_v32  ;;  %v13249_v31 = vcombine.low %v3092_v12, %v3096_v15  ;;  %v13251_v32 = vcombine.low %v3093_v17, %v3097_v18  ;;  %v13260_v4 = vcombine.high %v3101_v28, %v3105_v29  ;;  %v3141_v12 = vld [vmem:[%s19589_s3 + $0x19d8] sm:$0xff] }
 0x474   :  { %9771 = vmatprep.subr.bf16.mxu1 %v13212_v19  ;;  %v13258_v19 = vcombine.high %v3100_v22, %v3104_v9  ;;  %v13292_v15 = vcombine.high %v3133_v61, %v3137_v5  ;;  %v13291_v18 = vcombine.low %v3133_v61, %v3137_v5 }
 0x476   :  { %9428 = vmatpush1.bf16.msra.mxu0 %v13209_v37  ;;  %v13259_v37 = vcombine.low %v3101_v28, %v3105_v29  ;;  %v3153_v28 = vld [vmem:[%s19589_s3 + $0x1a38] sm:$0xff] }
 0x477   :  { %9772 = vmatpush1.bf16.msra.mxu1 %v13211_v23  ;;  %9429 = vmatprep.subr.bf16.mxu0 %v13218_v39  ;;  %v13266_v23 = vcombine.high %v3108_v35, %v3112_v13  ;;  %v3157_v35 = vld [vmem:[%s19589_s3 + $0x1a58] sm:$0xff] }
 0x478   :  { %9773 = vmatprep.subr.bf16.mxu1 %v13220_v14  ;;  %v3116_v14 = vld [vmem:[%s19589_s3 + $0x1910] sm:$0xff] }
 0x479   :  { %v13273_v49 = vcombine.low %v3116_v14, %v3120_v33 }
 0x47a   :  { %9430 = vmatpush1.bf16.msra.mxu0 %v13217_v58 }
 0x47b   :  { %9774 = vmatpush1.bf16.msra.mxu1 %v13219_v48  ;;  %9431 = vmatprep.subr.bf16.mxu0 %v13226_v42  ;;  %v13274_v48 = vcombine.high %v3116_v14, %v3120_v33  ;;  %v3124_v42 = vld [vmem:[%s19589_s3 + $0x1950] sm:$0xff]  ;;  %v3165_v14 = vld [vmem:[%s19589_s3 + $0x1a98] sm:$0xff] }
 0x47c   :  { %9775 = vmatprep.subr.bf16.mxu1 %v13228_v38  ;;  %v3128_v38 = vld [vmem:[%s19589_s3 + $0x1970] sm:$0xff] }
 0x47d   :  { %v13281_v41 = vcombine.low %v3124_v42, %v3128_v38 }
 0x47e   :  { %9432 = vmatpush1.bf16.msra.mxu0 %v13225_v45  ;;  %v13275_v45 = vcombine.low %v3117_v40, %v3121_v43  ;;  %v3169_v40 = vld [vmem:[%s19589_s3 + $0x1ab8] sm:$0xff] }
 0x47f   :  { %9776 = vmatpush1.bf16.msra.mxu1 %v13227_v53  ;;  %9433 = vmatprep.subr.bf16.mxu0 %v13234_v52  ;;  %v13282_v53 = vcombine.high %v3124_v42, %v3128_v38  ;;  %v3132_v52 = vld [vmem:[%s19589_s3 + $0x1990] sm:$0xff]  ;;  %v3173_v38 = vld [vmem:[%s19589_s3 + $0x1ad8] sm:$0xff] }
 0x480   :  { %9777 = vmatprep.subr.bf16.mxu1 %v13236_v47  ;;  %v3136_v47 = vld [vmem:[%s19589_s3 + $0x19b0] sm:$0xff] }
 0x481   :  { %v13289_v17 = vcombine.low %v3132_v52, %v3136_v47  ;;  %v3176_v42 = vld [vmem:[%s19589_s3 + $0x1af0] sm:$0xff] }
 0x482   :  { %9434 = vmatpush1.bf16.msra.mxu0 %v13233_v56  ;;  %v13283_v56 = vcombine.low %v3125_v51, %v3129_v60  ;;  %v3177_v51 = vld [vmem:[%s19589_s3 + $0x1af8] sm:$0xff] }
 0x483   :  { %9778 = vmatpush1.bf16.msra.mxu1 %v13235_v8  ;;  %9446 = vmatprep.subr.bf16.mxu0 %v13242_v10  ;;  %v13290_v8 = vcombine.high %v3132_v52, %v3136_v47  ;;  %v3140_v10 = vld [vmem:[%s19589_s3 + $0x19d0] sm:$0xff]  ;;  %v3181_v47 = vld [vmem:[%s19589_s3 + $0x1b18] sm:$0xff]  ;;  %v13332_v61 = vcombine.high %v3173_v38, %v3177_v51 }
 0x484   :  { %9790 = vmatprep.subr.bf16.mxu1 %v13244_v11  ;;  %v3144_v11 = vld [vmem:[%s19589_s3 + $0x19f0] sm:$0xff] }
 0x485   :  { %9436 = vmatmul.mubr.bf16.vlgmr.msra.gmra.mrb[20].mxu0 %v15958_v54  ;;  %v13297_v29 = vcombine.low %v3140_v10, %v3144_v11  ;;  %v3184_v52 = vld [vmem:[%s19589_s3 + $0x1b30] sm:$0xff] }
 0x486   :  { %9780 = vmatmul.mubr.bf16.vlgmr.msra.gmra.mrb[20].mxu1 %v15958_v54  ;;  %9447 = vmatpush1.bf16.msra.mxu0 %v13241_v16  ;;  %v3109_v54 = vld [vmem:[%s19589_s3 + $0x18d8] sm:$0xff] }
 0x487   :  { %9478 = vmatprep.mubr.bf16.mxu0 %v16185_v62  ;;  %9791 = vmatpush1.bf16.msra.mxu1 %v13243_v20  ;;  %v13268_v39 = vcombine.high %v3109_v54, %v3113_v59  ;;  %v13267_v58 = vcombine.low %v3109_v54, %v3113_v59  ;;  %v3145_v16 = vld [vmem:[%s19589_s3 + $0x19f8] sm:$0xff]  ;;  %v13298_v20 = vcombine.high %v3140_v10, %v3144_v11  ;;  %v3192_v10 = vld [vmem:[%s19589_s3 + $0x1b70] sm:$0xff] }
 0x488   :  { %9822 = vmatprep.mubr.bf16.mxu1 %v16185_v62  ;;  %9448 = vmatprep.subr.bf16.mxu0 %v13250_v21  ;;  %v13257_v62 = vcombine.low %v3100_v22, %v3104_v9  ;;  %v3148_v21 = vld [vmem:[%s19589_s3 + $0x1a10] sm:$0xff]  ;;  %v3149_v9 = vld [vmem:[%s19589_s3 + $0x1a18] sm:$0xff] }
 0x489   :  { %9792 = vmatprep.subr.bf16.mxu1 %v13252_v24  ;;  %v3152_v22 = vld [vmem:[%s19589_s3 + $0x1a30] sm:$0xff]  ;;  %v13300_v24 = vcombine.high %v3141_v12, %v3145_v16  ;;  %v13308_v13 = vcombine.high %v3149_v9, %v3153_v28  ;;  %v3161_v54 = vld [vmem:[%s19589_s3 + $0x1a78] sm:$0xff] }
 0x48a   :  { %9449 = vmatpush1.bf16.msra.mxu0 %v13249_v31  ;;  %v13299_v31 = vcombine.low %v3141_v12, %v3145_v16  ;;  %v13305_v59 = vcombine.low %v3148_v21, %v3152_v22  ;;  %v13316_v33 = vcombine.high %v3157_v35, %v3161_v54  ;;  %v3189_v11 = vld [vmem:[%s19589_s3 + $0x1b58] sm:$0xff] }
 0x48b   :  { %9793 = vmatpush1.bf16.msra.mxu1 %v13251_v32  ;;  %9450 = vmatprep.subr.bf16.mxu0 %v13258_v19  ;;  %v13306_v32 = vcombine.high %v3148_v21, %v3152_v22  ;;  %v3156_v19 = vld [vmem:[%s19589_s3 + $0x1a50] sm:$0xff]  ;;  %v3197_v22 = vld [vmem:[%s19589_s3 + $0x1b98] sm:$0xff] }
 0x48c   :  { %9794 = vmatprep.subr.bf16.mxu1 %v13260_v4  ;;  %v3160_v4 = vld [vmem:[%s19589_s3 + $0x1a70] sm:$0xff] }
 0x48d   :  { %v13313_v43 = vcombine.low %v3156_v19, %v3160_v4  ;;  %v3200_v21 = vld [vmem:[%s19589_s3 + $0x1bb0] sm:$0xff] }
 0x48e   :  { %9451 = vmatpush1.bf16.msra.mxu0 %v13257_v62  ;;  %v13307_v62 = vcombine.low %v3149_v9, %v3153_v28 }
 0x48f   :  { %9795 = vmatpush1.bf16.msra.mxu1 %v13259_v37  ;;  %9452 = vmatprep.subr.bf16.mxu0 %v13266_v23  ;;  %v13314_v37 = vcombine.high %v3156_v19, %v3160_v4  ;;  %v3164_v23 = vld [vmem:[%s19589_s3 + $0x1a90] sm:$0xff]  ;;  %v3205_v4 = vld [vmem:[%s19589_s3 + $0x1bd8] sm:$0xff] }
 0x490   :  { %9796 = vmatprep.subr.bf16.mxu1 %v13268_v39  ;;  %v3168_v39 = vld [vmem:[%s19589_s3 + $0x1ab0] sm:$0xff] }
 0x491   :  { %v13321_v60 = vcombine.low %v3164_v23, %v3168_v39  ;;  %v3208_v19 = vld [vmem:[%s19589_s3 + $0x1bf0] sm:$0xff] }
 0x492   :  { %9453 = vmatpush1.bf16.msra.mxu0 %v13265_v44  ;;  %v13315_v44 = vcombine.low %v3157_v35, %v3161_v54 }
 0x493   :  { %9797 = vmatpush1.bf16.msra.mxu1 %v13267_v58  ;;  %9454 = vmatprep.subr.bf16.mxu0 %v13274_v48  ;;  %v13322_v58 = vcombine.high %v3164_v23, %v3168_v39  ;;  %v3172_v48 = vld [vmem:[%s19589_s3 + $0x1ad0] sm:$0xff]  ;;  %v3213_v39 = vld [vmem:[%s19589_s3 + $0x1c18] sm:$0xff] }
 0x494   :  { %9798 = vmatprep.subr.bf16.mxu1 %v13276_v36  ;;  %v13324_v36 = vcombine.high %v3165_v14, %v3169_v40  ;;  %v13329_v5 = vcombine.low %v3172_v48, %v3176_v42  ;;  %v3216_v23 = vld [vmem:[%s19589_s3 + $0x1c30] sm:$0xff] }
 0x496   :  { %9455 = vmatpush1.bf16.msra.mxu0 %v13273_v49  ;;  %v13323_v49 = vcombine.low %v3165_v14, %v3169_v40 }
 0x497   :  { %9799 = vmatpush1.bf16.msra.mxu1 %v13275_v45  ;;  %9456 = vmatprep.subr.bf16.mxu0 %v13282_v53  ;;  %v13330_v45 = vcombine.high %v3172_v48, %v3176_v42  ;;  %v3180_v53 = vld [vmem:[%s19589_s3 + $0x1b10] sm:$0xff] }
 0x498   :  { %9800 = vmatprep.subr.bf16.mxu1 %v13284_v30  ;;  %v3185_v30 = vld [vmem:[%s19589_s3 + $0x1b38] sm:$0xff]  ;;  %v13337_v16 = vcombine.low %v3180_v53, %v3184_v52  ;;  %v3224_v48 = vld [vmem:[%s19589_s3 + $0x1c70] sm:$0xff] }
 0x499   :  { %v13340_v12 = vcombine.high %v3181_v47, %v3185_v30 }
 0x49a   :  { %9457 = vmatpush1.bf16.msra.mxu0 %v13281_v41  ;;  %v13331_v41 = vcombine.low %v3173_v38, %v3177_v51  ;;  %v3221_v38 = vld [vmem:[%s19589_s3 + $0x1c58] sm:$0xff] }
 0x49b   :  { %9801 = vmatpush1.bf16.msra.mxu1 %v13283_v56  ;;  %9458 = vmatprep.subr.bf16.mxu0 %v13290_v8  ;;  %v13338_v56 = vcombine.high %v3180_v53, %v3184_v52  ;;  %v3188_v8 = vld [vmem:[%s19589_s3 + $0x1b50] sm:$0xff] }
 0x49c   :  { %9802 = vmatprep.subr.bf16.mxu1 %v13292_v15  ;;  %v3193_v15 = vld [vmem:[%s19589_s3 + $0x1b78] sm:$0xff]  ;;  %v13345_v28 = vcombine.low %v3188_v8, %v3192_v10 }
 0x49d   :  { %v13348_v9 = vcombine.high %v3189_v11, %v3193_v15 }
 0x49e   :  { %9459 = vmatpush1.bf16.msra.mxu0 %v13289_v17  ;;  %v13339_v17 = vcombine.low %v3181_v47, %v3185_v30  ;;  %v3229_v47 = vld [vmem:[%s19589_s3 + $0x1c98] sm:$0xff] }
 0x49f   :  { %9803 = vmatpush1.bf16.msra.mxu1 %v13291_v18  ;;  %9460 = vmatprep.subr.bf16.mxu0 %v13298_v20  ;;  %v13346_v18 = vcombine.high %v3188_v8, %v3192_v10  ;;  %v3196_v20 = vld [vmem:[%s19589_s3 + $0x1b90] sm:$0xff] }
 0x4a0   :  { %9804 = vmatprep.subr.bf16.mxu1 %v13300_v24  ;;  %v3201_v24 = vld [vmem:[%s19589_s3 + $0x1bb8] sm:$0xff]  ;;  %v13353_v54 = vcombine.low %v3196_v20, %v3200_v21  ;;  %v3236_v8 = vld [vmem:[%s19589_s3 + $0x1cd0] sm:$0xff] }
 0x4a1   :  { %v13356_v35 = vcombine.high %v3197_v22, %v3201_v24  ;;  %v3240_v10 = vld [vmem:[%s19589_s3 + $0x1cf0] sm:$0xff] }
 0x4a2   :  { %9461 = vmatpush1.bf16.msra.mxu0 %v13297_v29  ;;  %v13347_v29 = vcombine.low %v3189_v11, %v3193_v15  ;;  %v3241_v11 = vld [vmem:[%s19589_s3 + $0x1cf8] sm:$0xff]  ;;  %v13394_v15 = vcombine.high %v3236_v8, %v3240_v10 }
 0x4a3   :  { %9805 = vmatpush1.bf16.msra.mxu1 %v13299_v31  ;;  %9462 = vmatprep.subr.bf16.mxu0 %v13306_v32  ;;  %v13354_v31 = vcombine.high %v3196_v20, %v3200_v21  ;;  %v3204_v32 = vld [vmem:[%s19589_s3 + $0x1bd0] sm:$0xff]  ;;  %v3249_v21 = vld [vmem:[%s19589_s3 + $0x1d38] sm:$0xff] }
 0x4a4   :  { %9806 = vmatprep.subr.bf16.mxu1 %v13308_v13  ;;  %v3209_v13 = vld [vmem:[%s19589_s3 + $0x1bf8] sm:$0xff]  ;;  %v13361_v40 = vcombine.low %v3204_v32, %v3208_v19 }
 0x4a5   :  { %v13364_v14 = vcombine.high %v3205_v4, %v3209_v13 }
 0x4a6   :  { %9463 = vmatpush1.bf16.msra.mxu0 %v13305_v59  ;;  %v13355_v59 = vcombine.low %v3197_v22, %v3201_v24  ;;  %v13393_v22 = vcombine.low %v3236_v8, %v3240_v10  ;;  %v3289_v8 = vld [vmem:[%s19589_s3 + $0x1e78] sm:$0xff] }
 0x4a7   :  { %9807 = vmatpush1.bf16.msra.mxu1 %v13307_v62  ;;  %9464 = vmatprep.subr.bf16.mxu0 %v13314_v37  ;;  %v13362_v62 = vcombine.high %v3204_v32, %v3208_v19  ;;  %v3212_v37 = vld [vmem:[%s19589_s3 + $0x1c10] sm:$0xff]  ;;  %v3257_v19 = vld [vmem:[%s19589_s3 + $0x1d78] sm:$0xff] }
 0x4a8   :  { %9808 = vmatprep.subr.bf16.mxu1 %v13316_v33  ;;  %v3217_v33 = vld [vmem:[%s19589_s3 + $0x1c38] sm:$0xff]  ;;  %v13369_v51 = vcombine.low %v3212_v37, %v3216_v23 }
 0x4a9   :  { %v13372_v42 = vcombine.high %v3213_v39, %v3217_v33 }
 0x4aa   :  { %9465 = vmatpush1.bf16.msra.mxu0 %v13313_v43  ;;  %v13363_v43 = vcombine.low %v3205_v4, %v3209_v13 }
 0x4ab   :  { %9809 = vmatpush1.bf16.msra.mxu1 %v13315_v44  ;;  %9466 = vmatprep.subr.bf16.mxu0 %v13322_v58  ;;  %v13370_v44 = vcombine.high %v3212_v37, %v3216_v23  ;;  %v3220_v58 = vld [vmem:[%s19589_s3 + $0x1c50] sm:$0xff]  ;;  %v3265_v23 = vld [vmem:[%s19589_s3 + $0x1db8] sm:$0xff] }
 0x4ac   :  { %9810 = vmatprep.subr.bf16.mxu1 %v13324_v36  ;;  %v3225_v36 = vld [vmem:[%s19589_s3 + $0x1c78] sm:$0xff]  ;;  %v13378_v53 = vcombine.high %v3220_v58, %v3224_v48  ;;  %v13377_v30 = vcombine.low %v3220_v58, %v3224_v48 }
 0x4ad   :  { %v13380_v52 = vcombine.high %v3221_v38, %v3225_v36  ;;  %v3273_v48 = vld [vmem:[%s19589_s3 + $0x1df8] sm:$0xff] }
 0x4ae   :  { %9467 = vmatpush1.bf16.msra.mxu0 %v13321_v60  ;;  %v3228_v60 = vld [vmem:[%s19589_s3 + $0x1c90] sm:$0xff] }
 0x4af   :  { %9811 = vmatpush1.bf16.msra.mxu1 %v13323_v49  ;;  %9468 = vmatprep.subr.bf16.mxu0 %v13330_v45  ;;  %v3232_v49 = vld [vmem:[%s19589_s3 + $0x1cb0] sm:$0xff]  ;;  %v13371_v45 = vcombine.low %v3213_v39, %v3217_v33 }
 0x4b0   :  { %9812 = vmatprep.subr.bf16.mxu1 %v13332_v61  ;;  %v3233_v61 = vld [vmem:[%s19589_s3 + $0x1cb8] sm:$0xff] }
 0x4b2   :  { %9469 = vmatpush1.bf16.msra.mxu0 %v13329_v5  ;;  %v13379_v5 = vcombine.low %v3221_v38, %v3225_v36 }
 0x4b3   :  { %9813 = vmatpush1.bf16.msra.mxu1 %v13331_v41  ;;  %9470 = vmatprep.subr.bf16.mxu0 %v13338_v56  ;;  %v13386_v41 = vcombine.high %v3228_v60, %v3232_v49  ;;  %v13388_v56 = vcombine.high %v3229_v47, %v3233_v61 }
 0x4b4   :  { %9814 = vmatprep.subr.bf16.mxu1 %v13340_v12  ;;  %v13387_v12 = vcombine.low %v3229_v47, %v3233_v61 }
 0x4b6   :  { %9471 = vmatpush1.bf16.msra.mxu0 %v13337_v16  ;;  %v3244_v16 = vld [vmem:[%s19589_s3 + $0x1d10] sm:$0xff] }
 0x4b7   :  { %9815 = vmatpush1.bf16.msra.mxu1 %v13339_v17  ;;  %9472 = vmatprep.subr.bf16.mxu0 %v13346_v18  ;;  %v3248_v17 = vld [vmem:[%s19589_s3 + $0x1d30] sm:$0xff]  ;;  %v3245_v18 = vld [vmem:[%s19589_s3 + $0x1d18] sm:$0xff] }
 0x4b8   :  { %9816 = vmatprep.subr.bf16.mxu1 %v13348_v9  ;;  %v13402_v24 = vcombine.high %v3244_v16, %v3248_v17  ;;  %v13404_v32 = vcombine.high %v3245_v18, %v3249_v21  ;;  %v13401_v4 = vcombine.low %v3244_v16, %v3248_v17  ;;  %v3297_v17 = vld [vmem:[%s19589_s3 + $0x1eb8] sm:$0xff] }
 0x4ba   :  { %9473 = vmatpush1.bf16.msra.mxu0 %v13345_v28  ;;  %v3252_v28 = vld [vmem:[%s19589_s3 + $0x1d50] sm:$0xff] }
 0x4bb   :  { %9817 = vmatpush1.bf16.msra.mxu1 %v13347_v29  ;;  %9474 = vmatprep.subr.bf16.mxu0 %v13354_v31  ;;  %v3256_v29 = vld [vmem:[%s19589_s3 + $0x1d70] sm:$0xff]  ;;  %v3253_v31 = vld [vmem:[%s19589_s3 + $0x1d58] sm:$0xff] }
 0x4bc   :  { %9818 = vmatprep.subr.bf16.mxu1 %v13356_v35  ;;  %v13403_v35 = vcombine.low %v3245_v18, %v3249_v21  ;;  %v13410_v13 = vcombine.high %v3252_v28, %v3256_v29  ;;  %v13412_v37 = vcombine.high %v3253_v31, %v3257_v19  ;;  %v13409_v39 = vcombine.low %v3252_v28, %v3256_v29  ;;  %v3305_v29 = vld [vmem:[%s19589_s3 + $0x1ef8] sm:$0xff] }
 0x4be   :  { %9475 = vmatpush1.bf16.msra.mxu0 %v13353_v54  ;;  %v3260_v54 = vld [vmem:[%s19589_s3 + $0x1d90] sm:$0xff] }
 0x4bf   :  { %9819 = vmatpush1.bf16.msra.mxu1 %v13355_v59  ;;  %9476 = vmatprep.subr.bf16.mxu0 %v13362_v62  ;;  %v3264_v59 = vld [vmem:[%s19589_s3 + $0x1db0] sm:$0xff]  ;;  %v3261_v62 = vld [vmem:[%s19589_s3 + $0x1d98] sm:$0xff] }
 0x4c0   :  { %9820 = vmatprep.subr.bf16.mxu1 %v13364_v14  ;;  %v13411_v14 = vcombine.low %v3253_v31, %v3257_v19  ;;  %v13418_v33 = vcombine.high %v3260_v54, %v3264_v59  ;;  %v13420_v58 = vcombine.high %v3261_v62, %v3265_v23  ;;  %v13419_v38 = vcombine.low %v3261_v62, %v3265_v23 }
 0x4c2   :  { %9477 = vmatpush1.bf16.msra.mxu0 %v13361_v40  ;;  %v3268_v40 = vld [vmem:[%s19589_s3 + $0x1dd0] sm:$0xff] }
 0x4c3   :  { %9821 = vmatpush1.bf16.msra.mxu1 %v13363_v43  ;;  %9489 = vmatprep.subr.bf16.mxu0 %v13370_v44  ;;  %v3272_v43 = vld [vmem:[%s19589_s3 + $0x1df0] sm:$0xff]  ;;  %v3269_v44 = vld [vmem:[%s19589_s3 + $0x1dd8] sm:$0xff] }
 0x4c4   :  { %9833 = vmatprep.subr.bf16.mxu1 %v13372_v42  ;;  %v13417_v42 = vcombine.low %v3260_v54, %v3264_v59  ;;  %v13426_v36 = vcombine.high %v3268_v40, %v3272_v43  ;;  %v13427_v47 = vcombine.low %v3269_v44, %v3273_v48  ;;  %v3313_v59 = vld [vmem:[%s19589_s3 + $0x1f38] sm:$0xff] }
 0x4c5   :  { %9479 = vmatmul.mubr.bf16.vlgmr.msra.gmra.mrb[20].mxu0 %v16177_v25 }
 0x4c6   :  { %9823 = vmatmul.mubr.bf16.vlgmr.msra.gmra.mrb[20].mxu1 %v16177_v25  ;;  %9490 = vmatpush1.bf16.msra.mxu0 %v13369_v51  ;;  %v3237_v25 = vld [vmem:[%s19589_s3 + $0x1cd8] sm:$0xff]  ;;  %v3276_v51 = vld [vmem:[%s19589_s3 + $0x1e10] sm:$0xff] }
 0x4c7   :  { %9521 = vmatprep.mubr.bf16.mxu0 %v16213_v46  ;;  %9834 = vmatpush1.bf16.msra.mxu1 %v13371_v45  ;;  %v13396_v20 = vcombine.high %v3237_v25, %v3241_v11  ;;  %v13395_v9 = vcombine.low %v3237_v25, %v3241_v11  ;;  %v13428_v45 = vcombine.high %v3269_v44, %v3273_v48 }
 0x4c8   :  { %9865 = vmatprep.mubr.bf16.mxu1 %v16213_v46  ;;  %9491 = vmatprep.subr.bf16.mxu0 %v13378_v53  ;;  %v13385_v46 = vcombine.low %v3228_v60, %v3232_v49  ;;  %v3280_v60 = vld [vmem:[%s19589_s3 + $0x1e30] sm:$0xff]  ;;  %v3277_v49 = vld [vmem:[%s19589_s3 + $0x1e18] sm:$0xff] }
 0x4c9   :  { %9835 = vmatprep.subr.bf16.mxu1 %v13380_v52  ;;  %v3281_v53 = vld [vmem:[%s19589_s3 + $0x1e38] sm:$0xff]  ;;  %v13425_v52 = vcombine.low %v3268_v40, %v3272_v43  ;;  %v13434_v61 = vcombine.high %v3276_v51, %v3280_v60  ;;  %v13433_v10 = vcombine.low %v3276_v51, %v3280_v60 }
 0x4ca   :  { %9492 = vmatpush1.bf16.msra.mxu0 %v13377_v30  ;;  %v3284_v30 = vld [vmem:[%s19589_s3 + $0x1e50] sm:$0xff]  ;;  %v13435_v25 = vcombine.low %v3277_v49, %v3281_v53  ;;  %v3321_v43 = vld [vmem:[%s19589_s3 + $0x1f78] sm:$0xff] }
 0x4cb   :  { %9836 = vmatpush1.bf16.msra.mxu1 %v13379_v5  ;;  %9493 = vmatprep.subr.bf16.mxu0 %v13386_v41  ;;  %v3288_v5 = vld [vmem:[%s19589_s3 + $0x1e70] sm:$0xff]  ;;  %v3285_v41 = vld [vmem:[%s19589_s3 + $0x1e58] sm:$0xff] }
 0x4cc   :  { %9837 = vmatprep.subr.bf16.mxu1 %v13388_v56  ;;  %v13436_v56 = vcombine.high %v3277_v49, %v3281_v53  ;;  %v13442_v11 = vcombine.high %v3284_v30, %v3288_v5  ;;  %v13444_v16 = vcombine.high %v3285_v41, %v3289_v8  ;;  %v13441_v18 = vcombine.low %v3284_v30, %v3288_v5  ;;  %v3329_v60 = vld [vmem:[%s19589_s3 + $0x1fb8] sm:$0xff] }
 0x4cd   :  { %v3337_v5 = vld [vmem:[%s19589_s3 + $0x1ff8] sm:$0xff] }
 0x4ce   :  { %9494 = vmatpush1.bf16.msra.mxu0 %v13385_v46  ;;  %v3292_v46 = vld [vmem:[%s19589_s3 + $0x1e90] sm:$0xff] }
 0x4cf   :  { %9838 = vmatpush1.bf16.msra.mxu1 %v13387_v12  ;;  %9495 = vmatprep.subr.bf16.mxu0 %v13394_v15  ;;  %v3296_v12 = vld [vmem:[%s19589_s3 + $0x1eb0] sm:$0xff]  ;;  %v3293_v15 = vld [vmem:[%s19589_s3 + $0x1e98] sm:$0xff] }
 0x4d0   :  { %9839 = vmatprep.subr.bf16.mxu1 %v13396_v20  ;;  %v13443_v20 = vcombine.low %v3285_v41, %v3289_v8  ;;  %v13450_v21 = vcombine.high %v3292_v46, %v3296_v12  ;;  %v13452_v28 = vcombine.high %v3293_v15, %v3297_v17  ;;  %v13449_v31 = vcombine.low %v3292_v46, %v3296_v12  ;;  %v13988_v46 = vld [vmem:[%s19592_s5 + $0x4] ss:$16 sps:$4 sm:$0xff]   ;;  %v13986_v12 = vld [vmem:[%s19592_s5] ss:$16 sps:$4 sm:$0xff]  }
 0x4d2   :  { %9496 = vmatpush1.bf16.msra.mxu0 %v13393_v22  ;;  %v3300_v22 = vld [vmem:[%s19589_s3 + $0x1ed0] sm:$0xff] }
 0x4d3   :  { %9840 = vmatpush1.bf16.msra.mxu1 %v13395_v9  ;;  %9497 = vmatprep.subr.bf16.mxu0 %v13402_v24  ;;  %v3304_v9 = vld [vmem:[%s19589_s3 + $0x1ef0] sm:$0xff]  ;;  %v3301_v24 = vld [vmem:[%s19589_s3 + $0x1ed8] sm:$0xff] }
 0x4d4   :  { %9841 = vmatprep.subr.bf16.mxu1 %v13404_v32  ;;  %v13451_v32 = vcombine.low %v3293_v15, %v3297_v17  ;;  %v13458_v19 = vcombine.high %v3300_v22, %v3304_v9  ;;  %v13460_v54 = vcombine.high %v3301_v24, %v3305_v29  ;;  %v13457_v62 = vcombine.low %v3300_v22, %v3304_v9  ;;  %v13991_v15 = vld [vmem:[%s19592_s5 + $0xc] ss:$16 sps:$4 sm:$0xff]   ;;  %v13994_v17 = vld [vmem:[%s19592_s5 + $0x24] ss:$16 sps:$4 sm:$0xff]   ;;  %v13998_v9 = vld [vmem:[%s19592_s5 + $0x40] ss:$16 sps:$4 sm:$0xff]  }
 0x4d5   :  { %v14000_v22 = vld [vmem:[%s19592_s5 + $0x44] ss:$16 sps:$4 sm:$0xff]  }
 0x4d6   :  { %9498 = vmatpush1.bf16.msra.mxu0 %v13401_v4  ;;  %v3308_v4 = vld [vmem:[%s19589_s3 + $0x1f10] sm:$0xff] }
 0x4d7   :  { %9842 = vmatpush1.bf16.msra.mxu1 %v13403_v35  ;;  %9499 = vmatprep.subr.bf16.mxu0 %v13410_v13  ;;  %v3312_v35 = vld [vmem:[%s19589_s3 + $0x1f30] sm:$0xff]  ;;  %v3309_v13 = vld [vmem:[%s19589_s3 + $0x1f18] sm:$0xff] }
 0x4d8   :  { %9843 = vmatprep.subr.bf16.mxu1 %v13412_v37  ;;  %v13459_v37 = vcombine.low %v3301_v24, %v3305_v29  ;;  %v13466_v23 = vcombine.high %v3308_v4, %v3312_v35  ;;  %v13468_v40 = vcombine.high %v3309_v13, %v3313_v59  ;;  %v13465_v44 = vcombine.low %v3308_v4, %v3312_v35  ;;  %v14001_v24 = vld [vmem:[%s19592_s5 + $0x48] ss:$16 sps:$4 sm:$0xff]   ;;  %v14004_v29 = vld [vmem:[%s19592_s5 + $0x60] ss:$16 sps:$4 sm:$0xff]  }
 0x4d9   :  { %v14010_v4 = vld [vmem:[%s19592_s5 + $0x80] ss:$16 sps:$4 sm:$0xff]   ;;  %v14013_v35 = vld [vmem:[%s19592_s5 + $0x88] ss:$16 sps:$4 sm:$0xff]  }
 0x4da   :  { %9500 = vmatpush1.bf16.msra.mxu0 %v13409_v39  ;;  %v3316_v39 = vld [vmem:[%s19589_s3 + $0x1f50] sm:$0xff] }
 0x4db   :  { %9844 = vmatpush1.bf16.msra.mxu1 %v13411_v14  ;;  %9501 = vmatprep.subr.bf16.mxu0 %v13418_v33  ;;  %v3320_v14 = vld [vmem:[%s19589_s3 + $0x1f70] sm:$0xff]  ;;  %v3317_v33 = vld [vmem:[%s19589_s3 + $0x1f58] sm:$0xff] }
 0x4dc   :  { %9845 = vmatprep.subr.bf16.mxu1 %v13420_v58  ;;  %v13467_v58 = vcombine.low %v3309_v13, %v3313_v59  ;;  %v13474_v48 = vcombine.high %v3316_v39, %v3320_v14  ;;  %v13476_v51 = vcombine.high %v3317_v33, %v3321_v43  ;;  %v13473_v49 = vcombine.low %v3316_v39, %v3320_v14  ;;  %v14018_v13 = vld [vmem:[%s19592_s5 + $0xa4] ss:$16 sps:$4 sm:$0xff]   ;;  %v14016_v59 = vld [vmem:[%s19592_s5 + $0xa0] ss:$16 sps:$4 sm:$0xff]   ;;  %v14025_v14 = vld [vmem:[%s19592_s5 + $0xc8] ss:$16 sps:$4 sm:$0xff]  }
 0x4dd   :  { %v14022_v39 = vld [vmem:[%s19592_s5 + $0xc0] ss:$16 sps:$4 sm:$0xff]  }
 0x4de   :  { %9502 = vmatpush1.bf16.msra.mxu0 %v13417_v42  ;;  %v3324_v42 = vld [vmem:[%s19589_s3 + $0x1f90] sm:$0xff] }
 0x4df   :  { %9846 = vmatpush1.bf16.msra.mxu1 %v13419_v38  ;;  %9503 = vmatprep.subr.bf16.mxu0 %v13426_v36  ;;  %v3328_v38 = vld [vmem:[%s19589_s3 + $0x1fb0] sm:$0xff]  ;;  %v3325_v36 = vld [vmem:[%s19589_s3 + $0x1f98] sm:$0xff] }
 0x4e0   :  { %9847 = vmatprep.subr.bf16.mxu1 %v13428_v45  ;;  %v13475_v45 = vcombine.low %v3317_v33, %v3321_v43  ;;  %v13482_v53 = vcombine.high %v3324_v42, %v3328_v38  ;;  %v13484_v30 = vcombine.high %v3325_v36, %v3329_v60  ;;  %v13481_v41 = vcombine.low %v3324_v42, %v3328_v38  ;;  %v14030_v33 = vld [vmem:[%s19592_s5 + $0xe4] ss:$16 sps:$4 sm:$0xff]   ;;  %v14028_v43 = vld [vmem:[%s19592_s5 + $0xe0] ss:$16 sps:$4 sm:$0xff]   ;;  %v14037_v38 = vld [vmem:[%s19592_s5 + $0x108] ss:$16 sps:$4 sm:$0xff]  }
 0x4e1   :  { %v14034_v42 = vld [vmem:[%s19592_s5 + $0x100] ss:$16 sps:$4 sm:$0xff]  }
 0x4e2   :  { %9504 = vmatpush1.bf16.msra.mxu0 %v13425_v52  ;;  %v3332_v52 = vld [vmem:[%s19589_s3 + $0x1fd0] sm:$0xff] }
 0x4e3   :  { %9848 = vmatpush1.bf16.msra.mxu1 %v13427_v47  ;;  %9505 = vmatprep.subr.bf16.mxu0 %v13434_v61  ;;  %v3336_v47 = vld [vmem:[%s19589_s3 + $0x1ff0] sm:$0xff]  ;;  %v3333_v61 = vld [vmem:[%s19589_s3 + $0x1fd8] sm:$0xff] }
 0x4e4   :  { %9849 = vmatprep.subr.bf16.mxu1 %v13436_v56  ;;  %v13483_v56 = vcombine.low %v3325_v36, %v3329_v60  ;;  %v13490_v8 = vcombine.high %v3332_v52, %v3336_v47  ;;  %v14042_v36 = vld [vmem:[%s19592_s5 + $0x124] ss:$16 sps:$4 sm:$0xff]   ;;  %v14040_v60 = vld [vmem:[%s19592_s5 + $0x120] ss:$16 sps:$4 sm:$0xff]  }
 0x4e6   :  { %9506 = vmatpush1.bf16.msra.mxu0 %v13433_v10  ;;  %v13492_v10 = vcombine.high %v3333_v61, %v3337_v5 }
 0x4e7   :  { %9850 = vmatpush1.bf16.msra.mxu1 %v13435_v25  ;;  %9507 = vmatprep.subr.bf16.mxu0 %v13442_v11  ;;  %v13489_v25 = vcombine.low %v3332_v52, %v3336_v47  ;;  %v13491_v11 = vcombine.low %v3333_v61, %v3337_v5  ;;  %v14046_v52 = vld [vmem:[%s19592_s5 + $0x140] ss:$16 sps:$4 sm:$0xff]   ;;  %v14049_v47 = vld [vmem:[%s19592_s5 + $0x148] ss:$16 sps:$4 sm:$0xff]   ;;  %v14054_v61 = vld [vmem:[%s19592_s5 + $0x164] ss:$16 sps:$4 sm:$0xff]  }
 0x4e8   :  { %9851 = vmatprep.subr.bf16.mxu1 %v13444_v16  ;;  %v13989_v16 = vld [vmem:[%s19592_s5 + $0x8] ss:$16 sps:$4 sm:$0xff]   ;;  %v14052_v5 = vld [vmem:[%s19592_s5 + $0x160] ss:$16 sps:$4 sm:$0xff]  }
 0x4ea   :  { %9508 = vmatpush1.bf16.msra.mxu0 %v13441_v18  ;;  %v13997_v18 = vld [vmem:[%s19592_s5 + $0x2c] ss:$16 sps:$4 sm:$0xff]  }
 0x4eb   :  { %9852 = vmatpush1.bf16.msra.mxu1 %v13443_v20  ;;  %9509 = vmatprep.subr.bf16.mxu0 %v13450_v21  ;;  %v13992_v20 = vld [vmem:[%s19592_s5 + $0x20] ss:$16 sps:$4 sm:$0xff]   ;;  %v13995_v21 = vld [vmem:[%s19592_s5 + $0x28] ss:$16 sps:$4 sm:$0xff]  }
 0x4ec   :  { %9853 = vmatprep.subr.bf16.mxu1 %v13452_v28  ;;  %v14009_v28 = vld [vmem:[%s19592_s5 + $0x6c] ss:$16 sps:$4 sm:$0xff]  }
 0x4ee   :  { %9510 = vmatpush1.bf16.msra.mxu0 %v13449_v31  ;;  %v14007_v31 = vld [vmem:[%s19592_s5 + $0x68] ss:$16 sps:$4 sm:$0xff]  }
 0x4ef   :  { %9854 = vmatpush1.bf16.msra.mxu1 %v13451_v32  ;;  %9511 = vmatprep.subr.bf16.mxu0 %v13458_v19  ;;  %v14012_v32 = vld [vmem:[%s19592_s5 + $0x84] ss:$16 sps:$4 sm:$0xff]   ;;  %v14015_v19 = vld [vmem:[%s19592_s5 + $0x8c] ss:$16 sps:$4 sm:$0xff]  }
 0x4f0   :  { %9855 = vmatprep.subr.bf16.mxu1 %v13460_v54  ;;  %v14021_v54 = vld [vmem:[%s19592_s5 + $0xac] ss:$16 sps:$4 sm:$0xff]  }
 0x4f2   :  { %9512 = vmatpush1.bf16.msra.mxu0 %v13457_v62  ;;  %v14019_v62 = vld [vmem:[%s19592_s5 + $0xa8] ss:$16 sps:$4 sm:$0xff]  }
 0x4f3   :  { %9856 = vmatpush1.bf16.msra.mxu1 %v13459_v37  ;;  %9513 = vmatprep.subr.bf16.mxu0 %v13466_v23  ;;  %v14024_v37 = vld [vmem:[%s19592_s5 + $0xc4] ss:$16 sps:$4 sm:$0xff]   ;;  %v14027_v23 = vld [vmem:[%s19592_s5 + $0xcc] ss:$16 sps:$4 sm:$0xff]  }
 0x4f4   :  { %9857 = vmatprep.subr.bf16.mxu1 %v13468_v40  ;;  %v14033_v40 = vld [vmem:[%s19592_s5 + $0xec] ss:$16 sps:$4 sm:$0xff]  }
 0x4f6   :  { %9514 = vmatpush1.bf16.msra.mxu0 %v13465_v44  ;;  %v14031_v44 = vld [vmem:[%s19592_s5 + $0xe8] ss:$16 sps:$4 sm:$0xff]  }
 0x4f7   :  { %9858 = vmatpush1.bf16.msra.mxu1 %v13467_v58  ;;  %9515 = vmatprep.subr.bf16.mxu0 %v13474_v48  ;;  %v14036_v58 = vld [vmem:[%s19592_s5 + $0x104] ss:$16 sps:$4 sm:$0xff]   ;;  %v14039_v48 = vld [vmem:[%s19592_s5 + $0x10c] ss:$16 sps:$4 sm:$0xff]  }
 0x4f8   :  { %9859 = vmatprep.subr.bf16.mxu1 %v13476_v51  ;;  %v14045_v51 = vld [vmem:[%s19592_s5 + $0x12c] ss:$16 sps:$4 sm:$0xff]  }
 0x4fa   :  { %9516 = vmatpush1.bf16.msra.mxu0 %v13473_v49  ;;  %v14043_v49 = vld [vmem:[%s19592_s5 + $0x128] ss:$16 sps:$4 sm:$0xff]  }
 0x4fb   :  { %9860 = vmatpush1.bf16.msra.mxu1 %v13475_v45  ;;  %9517 = vmatprep.subr.bf16.mxu0 %v13482_v53  ;;  %v14048_v45 = vld [vmem:[%s19592_s5 + $0x144] ss:$16 sps:$4 sm:$0xff]   ;;  %v14051_v53 = vld [vmem:[%s19592_s5 + $0x14c] ss:$16 sps:$4 sm:$0xff]  }
 0x4fc   :  { %9861 = vmatprep.subr.bf16.mxu1 %v13484_v30  ;;  %v14057_v30 = vld [vmem:[%s19592_s5 + $0x16c] ss:$16 sps:$4 sm:$0xff]  }
 0x4fe   :  { %9518 = vmatpush1.bf16.msra.mxu0 %v13481_v41  ;;  %v14055_v41 = vld [vmem:[%s19592_s5 + $0x168] ss:$16 sps:$4 sm:$0xff]  }
 0x4ff   :  { %9862 = vmatpush1.bf16.msra.mxu1 %v13483_v56  ;;  %9519 = vmatprep.subr.bf16.mxu0 %v13490_v8  ;;  %v14060_v56 = vld [vmem:[%s19592_s5 + $0x184] ss:$16 sps:$4 sm:$0xff]   ;;  %v14063_v8 = vld [vmem:[%s19592_s5 + $0x18c] ss:$16 sps:$4 sm:$0xff]  }
 0x500   :  { %9863 = vmatprep.subr.bf16.mxu1 %v13492_v10  ;;  %v14058_v10 = vld [vmem:[%s19592_s5 + $0x180] ss:$16 sps:$4 sm:$0xff]  }
 0x502   :  { %9520 = vmatpush1.bf16.msra.mxu0 %v13489_v25  ;;  %v14061_v25 = vld [vmem:[%s19592_s5 + $0x188] ss:$16 sps:$4 sm:$0xff]  }
 0x503   :  { %9864 = vmatpush1.bf16.msra.mxu1 %v13491_v11  ;;  %11490 = vmatprep.subr.bf16.mxu0 %v13988_v46  ;;  %v14066_v11 = vld [vmem:[%s19592_s5 + $0x1a4] ss:$16 sps:$4 sm:$0xff]   ;;  %v14069_v46 = vld [vmem:[%s19592_s5 + $0x1ac] ss:$16 sps:$4 sm:$0xff]  }
 0x504   :  { %11662 = vmatprep.subr.bf16.mxu1 %v13991_v15  ;;  %v14067_v15 = vld [vmem:[%s19592_s5 + $0x1a8] ss:$16 sps:$4 sm:$0xff]  }
 0x505   :  { %9522 = vmatmul.mubr.bf16.vlgmr.msra.gmra.mrb[20].mxu0 %v16205_v26 }
 0x506   :  { %9866 = vmatmul.mubr.bf16.vlgmr.msra.gmra.mrb[20].mxu1 %v16205_v26  ;;  %11491 = vmatpush1.bf16.msra.mxu0 %v13986_v12  ;;  %v14003_v26 = vld [vmem:[%s19592_s5 + $0x4c] ss:$16 sps:$4 sm:$0xff]   ;;  %v14064_v12 = vld [vmem:[%s19592_s5 + $0x1a0] ss:$16 sps:$4 sm:$0xff]  }
 0x507   :  { %11522 = vmatprep.mubr.bf16.mxu0 %v17831_v34  ;;  %11663 = vmatpush1.bf16.msra.mxu1 %v13989_v16  ;;  %v14072_v16 = vld [vmem:[%s19592_s5 + $0x1c4] ss:$16 sps:$4 sm:$0xff]  }
 0x508   :  { %11694 = vmatprep.mubr.bf16.mxu1 %v17831_v34  ;;  %11492 = vmatprep.subr.bf16.mxu0 %v13994_v17  ;;  %v14006_v34 = vld [vmem:[%s19592_s5 + $0x64] ss:$16 sps:$4 sm:$0xff]   ;;  %v14075_v17 = vld [vmem:[%s19592_s5 + $0x1cc] ss:$16 sps:$4 sm:$0xff]  }
 0x509   :  { %11664 = vmatprep.subr.bf16.mxu1 %v13997_v18  ;;  %v14070_v18 = vld [vmem:[%s19592_s5 + $0x1c0] ss:$16 sps:$4 sm:$0xff]  }
 0x50a   :  { %11493 = vmatpush1.bf16.msra.mxu0 %v13992_v20  ;;  %v14073_v20 = vld [vmem:[%s19592_s5 + $0x1c8] ss:$16 sps:$4 sm:$0xff]  }
 0x50b   :  { %11665 = vmatpush1.bf16.msra.mxu1 %v13995_v21  ;;  %11494 = vmatprep.subr.bf16.mxu0 %v14000_v22  ;;  %v14078_v21 = vld [vmem:[%s19592_s5 + $0x1e4] ss:$16 sps:$4 sm:$0xff]   ;;  %v14081_v22 = vld [vmem:[%s19592_s5 + $0x1ec] ss:$16 sps:$4 sm:$0xff]  }
 0x50c   :  { %11666 = vmatprep.subr.bf16.mxu1 %v14003_v26  ;;  %v14076_v26 = vld [vmem:[%s19592_s5 + $0x1e0] ss:$16 sps:$4 sm:$0xff]  }
 0x50e   :  { %11495 = vmatpush1.bf16.msra.mxu0 %v13998_v9  ;;  %v14079_v9 = vld [vmem:[%s19592_s5 + $0x1e8] ss:$16 sps:$4 sm:$0xff]  }
 0x50f   :  { %11667 = vmatpush1.bf16.msra.mxu1 %v14001_v24  ;;  %11496 = vmatprep.subr.bf16.mxu0 %v14006_v34  ;;  %v14084_v24 = vld [vmem:[%s19592_s5 + $0x204] ss:$16 sps:$4 sm:$0xff]   ;;  %v14087_v34 = vld [vmem:[%s19592_s5 + $0x20c] ss:$16 sps:$4 sm:$0xff]  }
 0x510   :  { %11668 = vmatprep.subr.bf16.mxu1 %v14009_v28  ;;  %v14082_v28 = vld [vmem:[%s19592_s5 + $0x200] ss:$16 sps:$4 sm:$0xff]  }
 0x512   :  { %11497 = vmatpush1.bf16.msra.mxu0 %v14004_v29  ;;  %v14085_v29 = vld [vmem:[%s19592_s5 + $0x208] ss:$16 sps:$4 sm:$0xff]  }
 0x513   :  { %11669 = vmatpush1.bf16.msra.mxu1 %v14007_v31  ;;  %11498 = vmatprep.subr.bf16.mxu0 %v14012_v32  ;;  %v14090_v31 = vld [vmem:[%s19592_s5 + $0x224] ss:$16 sps:$4 sm:$0xff]   ;;  %v14093_v32 = vld [vmem:[%s19592_s5 + $0x22c] ss:$16 sps:$4 sm:$0xff]  }
 0x514   :  { %11670 = vmatprep.subr.bf16.mxu1 %v14015_v19  ;;  %v14088_v19 = vld [vmem:[%s19592_s5 + $0x220] ss:$16 sps:$4 sm:$0xff]  }
 0x516   :  { %11499 = vmatpush1.bf16.msra.mxu0 %v14010_v4  ;;  %v14091_v4 = vld [vmem:[%s19592_s5 + $0x228] ss:$16 sps:$4 sm:$0xff]  }
 0x517   :  { %11671 = vmatpush1.bf16.msra.mxu1 %v14013_v35  ;;  %11500 = vmatprep.subr.bf16.mxu0 %v14018_v13  ;;  %v14096_v35 = vld [vmem:[%s19592_s5 + $0x244] ss:$16 sps:$4 sm:$0xff]   ;;  %v14094_v13 = vld [vmem:[%s19592_s5 + $0x240] ss:$16 sps:$4 sm:$0xff]  }
 0x518   :  { %11672 = vmatprep.subr.bf16.mxu1 %v14021_v54  ;;  %v14097_v54 = vld [vmem:[%s19592_s5 + $0x248] ss:$16 sps:$4 sm:$0xff]  }
 0x51a   :  { %11501 = vmatpush1.bf16.msra.mxu0 %v14016_v59  ;;  %v14105_v59 = vld [vmem:[%s19592_s5 + $0x26c] ss:$16 sps:$4 sm:$0xff]  }
 0x51b   :  { %11673 = vmatpush1.bf16.msra.mxu1 %v14019_v62  ;;  %11502 = vmatprep.subr.bf16.mxu0 %v14024_v37  ;;  %v14100_v62 = vld [vmem:[%s19592_s5 + $0x260] ss:$16 sps:$4 sm:$0xff]   ;;  %v14103_v37 = vld [vmem:[%s19592_s5 + $0x268] ss:$16 sps:$4 sm:$0xff]  }
 0x51c   :  { %11674 = vmatprep.subr.bf16.mxu1 %v14027_v23  ;;  %v14108_v23 = vld [vmem:[%s19592_s5 + $0x284] ss:$16 sps:$4 sm:$0xff]  }
 0x51e   :  { %11503 = vmatpush1.bf16.msra.mxu0 %v14022_v39  ;;  %v14111_v39 = vld [vmem:[%s19592_s5 + $0x28c] ss:$16 sps:$4 sm:$0xff]  }
 0x51f   :  { %11675 = vmatpush1.bf16.msra.mxu1 %v14025_v14  ;;  %11504 = vmatprep.subr.bf16.mxu0 %v14030_v33  ;;  %v14106_v14 = vld [vmem:[%s19592_s5 + $0x280] ss:$16 sps:$4 sm:$0xff]   ;;  %v14109_v33 = vld [vmem:[%s19592_s5 + $0x288] ss:$16 sps:$4 sm:$0xff]  }
 0x520   :  { %11676 = vmatprep.subr.bf16.mxu1 %v14033_v40  ;;  %v14114_v40 = vld [vmem:[%s19592_s5 + $0x2a4] ss:$16 sps:$4 sm:$0xff]  }
 0x522   :  { %11505 = vmatpush1.bf16.msra.mxu0 %v14028_v43  ;;  %v14117_v43 = vld [vmem:[%s19592_s5 + $0x2ac] ss:$16 sps:$4 sm:$0xff]  }
 0x523   :  { %11677 = vmatpush1.bf16.msra.mxu1 %v14031_v44  ;;  %11506 = vmatprep.subr.bf16.mxu0 %v14036_v58  ;;  %v14112_v44 = vld [vmem:[%s19592_s5 + $0x2a0] ss:$16 sps:$4 sm:$0xff]   ;;  %v14115_v58 = vld [vmem:[%s19592_s5 + $0x2a8] ss:$16 sps:$4 sm:$0xff]  }
 0x524   :  { %11678 = vmatprep.subr.bf16.mxu1 %v14039_v48  ;;  %v14120_v48 = vld [vmem:[%s19592_s5 + $0x2c4] ss:$16 sps:$4 sm:$0xff]  }
 0x526   :  { %11507 = vmatpush1.bf16.msra.mxu0 %v14034_v42  ;;  %v14123_v42 = vld [vmem:[%s19592_s5 + $0x2cc] ss:$16 sps:$4 sm:$0xff]  }
 0x527   :  { %11679 = vmatpush1.bf16.msra.mxu1 %v14037_v38  ;;  %11508 = vmatprep.subr.bf16.mxu0 %v14042_v36  ;;  %v14118_v38 = vld [vmem:[%s19592_s5 + $0x2c0] ss:$16 sps:$4 sm:$0xff]   ;;  %v14121_v36 = vld [vmem:[%s19592_s5 + $0x2c8] ss:$16 sps:$4 sm:$0xff]  }
 0x528   :  { %11680 = vmatprep.subr.bf16.mxu1 %v14045_v51  ;;  %v14126_v51 = vld [vmem:[%s19592_s5 + $0x2e4] ss:$16 sps:$4 sm:$0xff]  }
 0x52a   :  { %11509 = vmatpush1.bf16.msra.mxu0 %v14040_v60  ;;  %v14129_v60 = vld [vmem:[%s19592_s5 + $0x2ec] ss:$16 sps:$4 sm:$0xff]  }
 0x52b   :  { %11681 = vmatpush1.bf16.msra.mxu1 %v14043_v49  ;;  %11510 = vmatprep.subr.bf16.mxu0 %v14048_v45  ;;  %v14124_v49 = vld [vmem:[%s19592_s5 + $0x2e0] ss:$16 sps:$4 sm:$0xff]   ;;  %v14127_v45 = vld [vmem:[%s19592_s5 + $0x2e8] ss:$16 sps:$4 sm:$0xff]  }
 0x52c   :  { %11682 = vmatprep.subr.bf16.mxu1 %v14051_v53  ;;  %v14132_v53 = vld [vmem:[%s19592_s5 + $0x304] ss:$16 sps:$4 sm:$0xff]  }
 0x52e   :  { %11511 = vmatpush1.bf16.msra.mxu0 %v14046_v52  ;;  %v14135_v52 = vld [vmem:[%s19592_s5 + $0x30c] ss:$16 sps:$4 sm:$0xff]  }
 0x52f   :  { %11683 = vmatpush1.bf16.msra.mxu1 %v14049_v47  ;;  %11512 = vmatprep.subr.bf16.mxu0 %v14054_v61  ;;  %v14130_v47 = vld [vmem:[%s19592_s5 + $0x300] ss:$16 sps:$4 sm:$0xff]   ;;  %v14133_v61 = vld [vmem:[%s19592_s5 + $0x308] ss:$16 sps:$4 sm:$0xff]  }
 0x530   :  { %11684 = vmatprep.subr.bf16.mxu1 %v14057_v30  ;;  %v14138_v30 = vld [vmem:[%s19592_s5 + $0x324] ss:$16 sps:$4 sm:$0xff]  }
 0x532   :  { %11513 = vmatpush1.bf16.msra.mxu0 %v14052_v5  ;;  %v14141_v5 = vld [vmem:[%s19592_s5 + $0x32c] ss:$16 sps:$4 sm:$0xff]  }
 0x533   :  { %11685 = vmatpush1.bf16.msra.mxu1 %v14055_v41  ;;  %11514 = vmatprep.subr.bf16.mxu0 %v14060_v56  ;;  %v14136_v41 = vld [vmem:[%s19592_s5 + $0x320] ss:$16 sps:$4 sm:$0xff]   ;;  %v14139_v56 = vld [vmem:[%s19592_s5 + $0x328] ss:$16 sps:$4 sm:$0xff]  }
 0x534   :  { %11686 = vmatprep.subr.bf16.mxu1 %v14063_v8  ;;  %v14144_v8 = vld [vmem:[%s19592_s5 + $0x344] ss:$16 sps:$4 sm:$0xff]  }
 0x536   :  { %11515 = vmatpush1.bf16.msra.mxu0 %v14058_v10  ;;  %v14147_v10 = vld [vmem:[%s19592_s5 + $0x34c] ss:$16 sps:$4 sm:$0xff]  }
 0x537   :  { %11687 = vmatpush1.bf16.msra.mxu1 %v14061_v25  ;;  %11516 = vmatprep.subr.bf16.mxu0 %v14066_v11  ;;  %v14142_v25 = vld [vmem:[%s19592_s5 + $0x340] ss:$16 sps:$4 sm:$0xff]   ;;  %v14145_v11 = vld [vmem:[%s19592_s5 + $0x348] ss:$16 sps:$4 sm:$0xff]  }
 0x538   :  { %11688 = vmatprep.subr.bf16.mxu1 %v14069_v46  ;;  %v14150_v46 = vld [vmem:[%s19592_s5 + $0x364] ss:$16 sps:$4 sm:$0xff]  }
 0x53a   :  { %11517 = vmatpush1.bf16.msra.mxu0 %v14064_v12  ;;  %v14153_v12 = vld [vmem:[%s19592_s5 + $0x36c] ss:$16 sps:$4 sm:$0xff]  }
 0x53b   :  { %11689 = vmatpush1.bf16.msra.mxu1 %v14067_v15  ;;  %11518 = vmatprep.subr.bf16.mxu0 %v14072_v16  ;;  %v14148_v15 = vld [vmem:[%s19592_s5 + $0x360] ss:$16 sps:$4 sm:$0xff]   ;;  %v14151_v16 = vld [vmem:[%s19592_s5 + $0x368] ss:$16 sps:$4 sm:$0xff]  }
 0x53c   :  { %11690 = vmatprep.subr.bf16.mxu1 %v14075_v17  ;;  %v14156_v17 = vld [vmem:[%s19592_s5 + $0x384] ss:$16 sps:$4 sm:$0xff]  }
 0x53e   :  { %11519 = vmatpush1.bf16.msra.mxu0 %v14070_v18  ;;  %v14159_v18 = vld [vmem:[%s19592_s5 + $0x38c] ss:$16 sps:$4 sm:$0xff]  }
 0x53f   :  { %11691 = vmatpush1.bf16.msra.mxu1 %v14073_v20  ;;  %11520 = vmatprep.subr.bf16.mxu0 %v14078_v21  ;;  %v14154_v20 = vld [vmem:[%s19592_s5 + $0x380] ss:$16 sps:$4 sm:$0xff]   ;;  %v14157_v21 = vld [vmem:[%s19592_s5 + $0x388] ss:$16 sps:$4 sm:$0xff]  }
 0x540   :  { %11692 = vmatprep.subr.bf16.mxu1 %v14081_v22  ;;  %v14162_v22 = vld [vmem:[%s19592_s5 + $0x3a4] ss:$16 sps:$4 sm:$0xff]  }
 0x542   :  { %11521 = vmatpush1.bf16.msra.mxu0 %v14076_v26  ;;  %v14165_v26 = vld [vmem:[%s19592_s5 + $0x3ac] ss:$16 sps:$4 sm:$0xff]  }
 0x543   :  { %11693 = vmatpush1.bf16.msra.mxu1 %v14079_v9  ;;  %11533 = vmatprep.subr.bf16.mxu0 %v14084_v24  ;;  %v14160_v9 = vld [vmem:[%s19592_s5 + $0x3a0] ss:$16 sps:$4 sm:$0xff]   ;;  %v14163_v24 = vld [vmem:[%s19592_s5 + $0x3a8] ss:$16 sps:$4 sm:$0xff]  }
 0x544   :  { %11705 = vmatprep.subr.bf16.mxu1 %v14087_v34  ;;  %v14168_v34 = vld [vmem:[%s19592_s5 + $0x3c4] ss:$16 sps:$4 sm:$0xff]  }
 0x545   :  { %11523 = vmatmul.mubr.bf16.vlgmr.msra.gmra.mrb[24].mxu0 %v17812_v6 }
 0x546   :  { %11695 = vmatmul.mubr.bf16.vlgmr.msra.gmra.mrb[24].mxu1 %v17812_v6  ;;  %11534 = vmatpush1.bf16.msra.mxu0 %v14082_v28  ;;  %v14099_v6 = vld [vmem:[%s19592_s5 + $0x24c] ss:$16 sps:$4 sm:$0xff]  }
 0x547   :  { %11565 = vmatprep.mubr.bf16.mxu0 %v17835_v27  ;;  %11706 = vmatpush1.bf16.msra.mxu1 %v14085_v29  ;;  %v14171_v28 = vld [vmem:[%s19592_s5 + $0x3cc] ss:$16 sps:$4 sm:$0xff]   ;;  %v14166_v29 = vld [vmem:[%s19592_s5 + $0x3c0] ss:$16 sps:$4 sm:$0xff]  }
 0x548   :  { %11737 = vmatprep.mubr.bf16.mxu1 %v17835_v27  ;;  %11535 = vmatprep.subr.bf16.mxu0 %v14090_v31  ;;  %v14102_v27 = vld [vmem:[%s19592_s5 + $0x264] ss:$16 sps:$4 sm:$0xff]   ;;  %v14169_v31 = vld [vmem:[%s19592_s5 + $0x3c8] ss:$16 sps:$4 sm:$0xff]  }
 0x549   :  { %11707 = vmatprep.subr.bf16.mxu1 %v14093_v32  ;;  %v14174_v32 = vld [vmem:[%s19592_s5 + $0x3e4] ss:$16 sps:$4 sm:$0xff]  }
 0x54a   :  { %11536 = vmatpush1.bf16.msra.mxu0 %v14088_v19  ;;  %v14177_v19 = vld [vmem:[%s19592_s5 + $0x3ec] ss:$16 sps:$4 sm:$0xff]  }
 0x54b   :  { %11708 = vmatpush1.bf16.msra.mxu1 %v14091_v4  ;;  %11537 = vmatprep.subr.bf16.mxu0 %v14096_v35  ;;  %v14172_v4 = vld [vmem:[%s19592_s5 + $0x3e0] ss:$16 sps:$4 sm:$0xff]   ;;  %v14175_v35 = vld [vmem:[%s19592_s5 + $0x3e8] ss:$16 sps:$4 sm:$0xff]  }
 0x54c   :  { %11709 = vmatprep.subr.bf16.mxu1 %v14099_v6  ;;  %v14180_v6 = vld [vmem:[%s19592_s5 + $0x404] ss:$16 sps:$4 sm:$0xff]  }
 0x54e   :  { %11538 = vmatpush1.bf16.msra.mxu0 %v14094_v13  ;;  %v14183_v13 = vld [vmem:[%s19592_s5 + $0x40c] ss:$16 sps:$4 sm:$0xff]  }
 0x54f   :  { %11710 = vmatpush1.bf16.msra.mxu1 %v14097_v54  ;;  %11539 = vmatprep.subr.bf16.mxu0 %v14102_v27  ;;  %v14178_v54 = vld [vmem:[%s19592_s5 + $0x400] ss:$16 sps:$4 sm:$0xff]   ;;  %v14181_v27 = vld [vmem:[%s19592_s5 + $0x408] ss:$16 sps:$4 sm:$0xff]  }
 0x550   :  { %11711 = vmatprep.subr.bf16.mxu1 %v14105_v59  ;;  %v14186_v59 = vld [vmem:[%s19592_s5 + $0x424] ss:$16 sps:$4 sm:$0xff]  }
 0x552   :  { %11540 = vmatpush1.bf16.msra.mxu0 %v14100_v62  ;;  %v14189_v62 = vld [vmem:[%s19592_s5 + $0x42c] ss:$16 sps:$4 sm:$0xff]  }
 0x553   :  { %11712 = vmatpush1.bf16.msra.mxu1 %v14103_v37  ;;  %11541 = vmatprep.subr.bf16.mxu0 %v14108_v23  ;;  %v14184_v37 = vld [vmem:[%s19592_s5 + $0x420] ss:$16 sps:$4 sm:$0xff]   ;;  %v14187_v23 = vld [vmem:[%s19592_s5 + $0x428] ss:$16 sps:$4 sm:$0xff]  }
 0x554   :  { %11713 = vmatprep.subr.bf16.mxu1 %v14111_v39  ;;  %v14192_v39 = vld [vmem:[%s19592_s5 + $0x444] ss:$16 sps:$4 sm:$0xff]  }
 0x556   :  { %11542 = vmatpush1.bf16.msra.mxu0 %v14106_v14  ;;  %v14190_v14 = vld [vmem:[%s19592_s5 + $0x440] ss:$16 sps:$4 sm:$0xff]  }
 0x557   :  { %11714 = vmatpush1.bf16.msra.mxu1 %v14109_v33  ;;  %11543 = vmatprep.subr.bf16.mxu0 %v14114_v40  ;;  %v14193_v33 = vld [vmem:[%s19592_s5 + $0x448] ss:$16 sps:$4 sm:$0xff]   ;;  %v14198_v40 = vld [vmem:[%s19592_s5 + $0x464] ss:$16 sps:$4 sm:$0xff]  }
 0x558   :  { %11715 = vmatprep.subr.bf16.mxu1 %v14117_v43  ;;  %v14201_v43 = vld [vmem:[%s19592_s5 + $0x46c] ss:$16 sps:$4 sm:$0xff]  }
 0x55a   :  { %11544 = vmatpush1.bf16.msra.mxu0 %v14112_v44  ;;  %v14196_v44 = vld [vmem:[%s19592_s5 + $0x460] ss:$16 sps:$4 sm:$0xff]  }
 0x55b   :  { %11716 = vmatpush1.bf16.msra.mxu1 %v14115_v58  ;;  %11545 = vmatprep.subr.bf16.mxu0 %v14120_v48  ;;  %v14199_v58 = vld [vmem:[%s19592_s5 + $0x468] ss:$16 sps:$4 sm:$0xff]   ;;  %v14204_v48 = vld [vmem:[%s19592_s5 + $0x484] ss:$16 sps:$4 sm:$0xff]  }
 0x55c   :  { %11717 = vmatprep.subr.bf16.mxu1 %v14123_v42  ;;  %v14207_v42 = vld [vmem:[%s19592_s5 + $0x48c] ss:$16 sps:$4 sm:$0xff]  }
 0x55e   :  { %11546 = vmatpush1.bf16.msra.mxu0 %v14118_v38  ;;  %v14202_v38 = vld [vmem:[%s19592_s5 + $0x480] ss:$16 sps:$4 sm:$0xff]  }
 0x55f   :  { %11718 = vmatpush1.bf16.msra.mxu1 %v14121_v36  ;;  %11547 = vmatprep.subr.bf16.mxu0 %v14126_v51  ;;  %v14205_v36 = vld [vmem:[%s19592_s5 + $0x488] ss:$16 sps:$4 sm:$0xff]   ;;  %v14210_v51 = vld [vmem:[%s19592_s5 + $0x4a4] ss:$16 sps:$4 sm:$0xff]  }
 0x560   :  { %11719 = vmatprep.subr.bf16.mxu1 %v14129_v60  ;;  %v14213_v60 = vld [vmem:[%s19592_s5 + $0x4ac] ss:$16 sps:$4 sm:$0xff]  }
 0x562   :  { %11548 = vmatpush1.bf16.msra.mxu0 %v14124_v49  ;;  %v14208_v49 = vld [vmem:[%s19592_s5 + $0x4a0] ss:$16 sps:$4 sm:$0xff]  }
 0x563   :  { %11720 = vmatpush1.bf16.msra.mxu1 %v14127_v45  ;;  %11549 = vmatprep.subr.bf16.mxu0 %v14132_v53  ;;  %v14211_v45 = vld [vmem:[%s19592_s5 + $0x4a8] ss:$16 sps:$4 sm:$0xff]   ;;  %v14216_v53 = vld [vmem:[%s19592_s5 + $0x4c4] ss:$16 sps:$4 sm:$0xff]  }
 0x564   :  { %11721 = vmatprep.subr.bf16.mxu1 %v14135_v52  ;;  %v14219_v52 = vld [vmem:[%s19592_s5 + $0x4cc] ss:$16 sps:$4 sm:$0xff]  }
 0x566   :  { %11550 = vmatpush1.bf16.msra.mxu0 %v14130_v47  ;;  %v14214_v47 = vld [vmem:[%s19592_s5 + $0x4c0] ss:$16 sps:$4 sm:$0xff]  }
 0x567   :  { %11722 = vmatpush1.bf16.msra.mxu1 %v14133_v61  ;;  %11551 = vmatprep.subr.bf16.mxu0 %v14138_v30  ;;  %v14217_v61 = vld [vmem:[%s19592_s5 + $0x4c8] ss:$16 sps:$4 sm:$0xff]   ;;  %v14222_v30 = vld [vmem:[%s19592_s5 + $0x4e4] ss:$16 sps:$4 sm:$0xff]  }
 0x568   :  { %11723 = vmatprep.subr.bf16.mxu1 %v14141_v5  ;;  %v14225_v5 = vld [vmem:[%s19592_s5 + $0x4ec] ss:$16 sps:$4 sm:$0xff]  }
 0x56a   :  { %11552 = vmatpush1.bf16.msra.mxu0 %v14136_v41  ;;  %v14220_v41 = vld [vmem:[%s19592_s5 + $0x4e0] ss:$16 sps:$4 sm:$0xff]  }
 0x56b   :  { %11724 = vmatpush1.bf16.msra.mxu1 %v14139_v56  ;;  %11553 = vmatprep.subr.bf16.mxu0 %v14144_v8  ;;  %v14223_v56 = vld [vmem:[%s19592_s5 + $0x4e8] ss:$16 sps:$4 sm:$0xff]   ;;  %v14228_v8 = vld [vmem:[%s19592_s5 + $0x504] ss:$16 sps:$4 sm:$0xff]  }
 0x56c   :  { %11725 = vmatprep.subr.bf16.mxu1 %v14147_v10  ;;  %v14231_v10 = vld [vmem:[%s19592_s5 + $0x50c] ss:$16 sps:$4 sm:$0xff]  }
 0x56e   :  { %11554 = vmatpush1.bf16.msra.mxu0 %v14142_v25  ;;  %v14226_v25 = vld [vmem:[%s19592_s5 + $0x500] ss:$16 sps:$4 sm:$0xff]  }
 0x56f   :  { %11726 = vmatpush1.bf16.msra.mxu1 %v14145_v11  ;;  %11555 = vmatprep.subr.bf16.mxu0 %v14150_v46  ;;  %v14229_v11 = vld [vmem:[%s19592_s5 + $0x508] ss:$16 sps:$4 sm:$0xff]   ;;  %v14234_v46 = vld [vmem:[%s19592_s5 + $0x524] ss:$16 sps:$4 sm:$0xff]  }
 0x570   :  { %11727 = vmatprep.subr.bf16.mxu1 %v14153_v12  ;;  %v14237_v12 = vld [vmem:[%s19592_s5 + $0x52c] ss:$16 sps:$4 sm:$0xff]  }
 0x572   :  { %11556 = vmatpush1.bf16.msra.mxu0 %v14148_v15  ;;  %v14232_v15 = vld [vmem:[%s19592_s5 + $0x520] ss:$16 sps:$4 sm:$0xff]  }
 0x573   :  { %11728 = vmatpush1.bf16.msra.mxu1 %v14151_v16  ;;  %11557 = vmatprep.subr.bf16.mxu0 %v14156_v17  ;;  %v14235_v16 = vld [vmem:[%s19592_s5 + $0x528] ss:$16 sps:$4 sm:$0xff]   ;;  %v14240_v17 = vld [vmem:[%s19592_s5 + $0x544] ss:$16 sps:$4 sm:$0xff]  }
 0x574   :  { %11729 = vmatprep.subr.bf16.mxu1 %v14159_v18  ;;  %v14243_v18 = vld [vmem:[%s19592_s5 + $0x54c] ss:$16 sps:$4 sm:$0xff]  }
 0x576   :  { %11558 = vmatpush1.bf16.msra.mxu0 %v14154_v20  ;;  %v14238_v20 = vld [vmem:[%s19592_s5 + $0x540] ss:$16 sps:$4 sm:$0xff]  }
 0x577   :  { %11730 = vmatpush1.bf16.msra.mxu1 %v14157_v21  ;;  %11559 = vmatprep.subr.bf16.mxu0 %v14162_v22  ;;  %v14241_v21 = vld [vmem:[%s19592_s5 + $0x548] ss:$16 sps:$4 sm:$0xff]   ;;  %v14246_v22 = vld [vmem:[%s19592_s5 + $0x564] ss:$16 sps:$4 sm:$0xff]  }
 0x578   :  { %11731 = vmatprep.subr.bf16.mxu1 %v14165_v26  ;;  %v14249_v26 = vld [vmem:[%s19592_s5 + $0x56c] ss:$16 sps:$4 sm:$0xff]  }
 0x57a   :  { %11560 = vmatpush1.bf16.msra.mxu0 %v14160_v9  ;;  %v14244_v9 = vld [vmem:[%s19592_s5 + $0x560] ss:$16 sps:$4 sm:$0xff]  }
 0x57b   :  { %11732 = vmatpush1.bf16.msra.mxu1 %v14163_v24  ;;  %11561 = vmatprep.subr.bf16.mxu0 %v14168_v34  ;;  %v14247_v24 = vld [vmem:[%s19592_s5 + $0x568] ss:$16 sps:$4 sm:$0xff]   ;;  %v14252_v34 = vld [vmem:[%s19592_s5 + $0x584] ss:$16 sps:$4 sm:$0xff]  }
 0x57c   :  { %11733 = vmatprep.subr.bf16.mxu1 %v14171_v28  ;;  %v14255_v28 = vld [vmem:[%s19592_s5 + $0x58c] ss:$16 sps:$4 sm:$0xff]  }
 0x57e   :  { %11562 = vmatpush1.bf16.msra.mxu0 %v14166_v29  ;;  %v14250_v29 = vld [vmem:[%s19592_s5 + $0x580] ss:$16 sps:$4 sm:$0xff]  }
 0x57f   :  { %11734 = vmatpush1.bf16.msra.mxu1 %v14169_v31  ;;  %11563 = vmatprep.subr.bf16.mxu0 %v14174_v32  ;;  %v14253_v31 = vld [vmem:[%s19592_s5 + $0x588] ss:$16 sps:$4 sm:$0xff]   ;;  %v14258_v32 = vld [vmem:[%s19592_s5 + $0x5a4] ss:$16 sps:$4 sm:$0xff]  }
 0x580   :  { %11735 = vmatprep.subr.bf16.mxu1 %v14177_v19  ;;  %v14261_v19 = vld [vmem:[%s19592_s5 + $0x5ac] ss:$16 sps:$4 sm:$0xff]  }
 0x582   :  { %11564 = vmatpush1.bf16.msra.mxu0 %v14172_v4  ;;  %v14256_v4 = vld [vmem:[%s19592_s5 + $0x5a0] ss:$16 sps:$4 sm:$0xff]  }
 0x583   :  { %11736 = vmatpush1.bf16.msra.mxu1 %v14175_v35  ;;  %11576 = vmatprep.subr.bf16.mxu0 %v14180_v6  ;;  %v14259_v35 = vld [vmem:[%s19592_s5 + $0x5a8] ss:$16 sps:$4 sm:$0xff]   ;;  %v14264_v6 = vld [vmem:[%s19592_s5 + $0x5c4] ss:$16 sps:$4 sm:$0xff]  }
 0x584   :  { %11748 = vmatprep.subr.bf16.mxu1 %v14183_v13  ;;  %v14267_v13 = vld [vmem:[%s19592_s5 + $0x5cc] ss:$16 sps:$4 sm:$0xff]  }
 0x585   :  { %11566 = vmatmul.mubr.bf16.vlgmr.msra.gmra.mrb[24].mxu0 %v17815_v50 }
 0x586   :  { %11738 = vmatmul.mubr.bf16.vlgmr.msra.gmra.mrb[24].mxu1 %v17815_v50  ;;  %11577 = vmatpush1.bf16.msra.mxu0 %v14178_v54  ;;  %v14195_v50 = vld [vmem:[%s19592_s5 + $0x44c] ss:$16 sps:$4 sm:$0xff]   ;;  %v14262_v54 = vld [vmem:[%s19592_s5 + $0x5c0] ss:$16 sps:$4 sm:$0xff]  }
 0x587   :  { %11749 = vmatpush1.bf16.msra.mxu1 %v14181_v27  ;;  %11578 = vmatprep.subr.bf16.mxu0 %v14186_v59  ;;  %v14265_v27 = vld [vmem:[%s19592_s5 + $0x5c8] ss:$16 sps:$4 sm:$0xff]   ;;  %v14270_v59 = vld [vmem:[%s19592_s5 + $0x5e4] ss:$16 sps:$4 sm:$0xff]  }
 0x588   :  { %11750 = vmatprep.subr.bf16.mxu1 %v14189_v62  ;;  %v14268_v62 = vld [vmem:[%s19592_s5 + $0x5e0] ss:$16 sps:$4 sm:$0xff]  }
 0x58a   :  { %11579 = vmatpush1.bf16.msra.mxu0 %v14184_v37  ;;  %v14273_v37 = vld [vmem:[%s19592_s5 + $0x5ec] ss:$16 sps:$4 sm:$0xff]  }
 0x58b   :  { %11751 = vmatpush1.bf16.msra.mxu1 %v14187_v23  ;;  %11580 = vmatprep.subr.bf16.mxu0 %v14192_v39  ;;  %v14271_v23 = vld [vmem:[%s19592_s5 + $0x5e8] ss:$16 sps:$4 sm:$0xff]   ;;  %v14276_v39 = vld [vmem:[%s19592_s5 + $0x604] ss:$16 sps:$4 sm:$0xff]  }
 0x58c   :  { %11752 = vmatprep.subr.bf16.mxu1 %v14195_v50  ;;  %v14279_v50 = vld [vmem:[%s19592_s5 + $0x60c] ss:$16 sps:$4 sm:$0xff]  }
 0x58e   :  { %11581 = vmatpush1.bf16.msra.mxu0 %v14190_v14  ;;  %v14402_v14 = vld [vmem:[%s19591_s4] sm:$0xff] }
 0x58f   :  { %11753 = vmatpush1.bf16.msra.mxu1 %v14193_v33  ;;  %11582 = vmatprep.subr.bf16.mxu0 %v14198_v40  ;;  %v3359_v33 = vrot.slane %v14402_v14, %v15588_v55  ;;  %v3367_v40 = vrot.slane %v14402_v14, %v15600_v2 }
 0x590   :  { %11754 = vmatprep.subr.bf16.mxu1 %v14201_v43  ;;  %v3363_v43 = vrot.slane %v14402_v14, %v15597_v1 }
 0x592   :  { %11583 = vmatpush1.bf16.msra.mxu0 %v14196_v44  ;;  %v3371_v44 = vrot.slane %v14402_v14, %v15603_v7  ;;  %v14309_v14 = vld [vmem:[%s19592_s5 + $0x6ac] ss:$16 sps:$4 sm:$0xff]  }
 0x593   :  { %11755 = vmatpush1.bf16.msra.mxu1 %v14199_v58  ;;  %11584 = vmatprep.subr.bf16.mxu0 %v14204_v48 }
 0x594   :  { %11756 = vmatprep.subr.bf16.mxu1 %v14207_v42 }
 0x596   :  { %11585 = vmatpush1.bf16.msra.mxu0 %v14202_v38 }
 0x597   :  { %11757 = vmatpush1.bf16.msra.mxu1 %v14205_v36  ;;  %11586 = vmatprep.subr.bf16.mxu0 %v14210_v51 }
 0x598   :  { %11758 = vmatprep.subr.bf16.mxu1 %v14213_v60 }
 0x59a   :  { %11587 = vmatpush1.bf16.msra.mxu0 %v14208_v49 }
 0x59b   :  { %11759 = vmatpush1.bf16.msra.mxu1 %v14211_v45  ;;  %11588 = vmatprep.subr.bf16.mxu0 %v14216_v53 }
 0x59c   :  { %11760 = vmatprep.subr.bf16.mxu1 %v14219_v52 }
 0x59e   :  { %11589 = vmatpush1.bf16.msra.mxu0 %v14214_v47 }
 0x59f   :  { %11761 = vmatpush1.bf16.msra.mxu1 %v14217_v61  ;;  %11590 = vmatprep.subr.bf16.mxu0 %v14222_v30 }
 0x5a0   :  { %11762 = vmatprep.subr.bf16.mxu1 %v14225_v5 }
 0x5a2   :  { %11591 = vmatpush1.bf16.msra.mxu0 %v14220_v41 }
 0x5a3   :  { %11763 = vmatpush1.bf16.msra.mxu1 %v14223_v56  ;;  %11592 = vmatprep.subr.bf16.mxu0 %v14228_v8 }
 0x5a4   :  { %11764 = vmatprep.subr.bf16.mxu1 %v14231_v10 }
 0x5a6   :  { %11593 = vmatpush1.bf16.msra.mxu0 %v14226_v25 }
 0x5a7   :  { %11765 = vmatpush1.bf16.msra.mxu1 %v14229_v11  ;;  %11594 = vmatprep.subr.bf16.mxu0 %v14234_v46 }
 0x5a8   :  { %11766 = vmatprep.subr.bf16.mxu1 %v14237_v12 }
 0x5aa   :  { %11595 = vmatpush1.bf16.msra.mxu0 %v14232_v15 }
 0x5ab   :  { %11767 = vmatpush1.bf16.msra.mxu1 %v14235_v16  ;;  %11596 = vmatprep.subr.bf16.mxu0 %v14240_v17 }
 0x5ac   :  { %11768 = vmatprep.subr.bf16.mxu1 %v14243_v18 }
 0x5ae   :  { %11597 = vmatpush1.bf16.msra.mxu0 %v14238_v20 }
 0x5af   :  { %11769 = vmatpush1.bf16.msra.mxu1 %v14241_v21  ;;  %11598 = vmatprep.subr.bf16.mxu0 %v14246_v22 }
 0x5b0   :  { %11770 = vmatprep.subr.bf16.mxu1 %v14249_v26 }
 0x5b2   :  { %11599 = vmatpush1.bf16.msra.mxu0 %v14244_v9  ;;  %v14274_v9 = vld [vmem:[%s19592_s5 + $0x600] ss:$16 sps:$4 sm:$0xff]  }
 0x5b3   :  { %11771 = vmatpush1.bf16.msra.mxu1 %v14247_v24  ;;  %11600 = vmatprep.subr.bf16.mxu0 %v14252_v34  ;;  %v14277_v24 = vld [vmem:[%s19592_s5 + $0x608] ss:$16 sps:$4 sm:$0xff]  }
 0x5b4   :  { %11772 = vmatprep.subr.bf16.mxu1 %v14255_v28  ;;  %v14282_v28 = vld [vmem:[%s19592_s5 + $0x624] ss:$16 sps:$4 sm:$0xff]  }
 0x5b6   :  { %11601 = vmatpush1.bf16.msra.mxu0 %v14250_v29  ;;  %v14285_v29 = vld [vmem:[%s19592_s5 + $0x62c] ss:$16 sps:$4 sm:$0xff]  }
 0x5b7   :  { %11773 = vmatpush1.bf16.msra.mxu1 %v14253_v31  ;;  %11602 = vmatprep.subr.bf16.mxu0 %v14258_v32  ;;  %v14280_v31 = vld [vmem:[%s19592_s5 + $0x620] ss:$16 sps:$4 sm:$0xff]   ;;  %v14283_v32 = vld [vmem:[%s19592_s5 + $0x628] ss:$16 sps:$4 sm:$0xff]  }
 0x5b8   :  { %11774 = vmatprep.subr.bf16.mxu1 %v14261_v19  ;;  %v14288_v19 = vld [vmem:[%s19592_s5 + $0x644] ss:$16 sps:$4 sm:$0xff]  }
 0x5ba   :  { %11603 = vmatpush1.bf16.msra.mxu0 %v14256_v4  ;;  %v14291_v4 = vld [vmem:[%s19592_s5 + $0x64c] ss:$16 sps:$4 sm:$0xff]  }
 0x5bb   :  { %11775 = vmatpush1.bf16.msra.mxu1 %v14259_v35  ;;  %11604 = vmatprep.subr.bf16.mxu0 %v14264_v6  ;;  %v14286_v35 = vld [vmem:[%s19592_s5 + $0x640] ss:$16 sps:$4 sm:$0xff]   ;;  %v14289_v6 = vld [vmem:[%s19592_s5 + $0x648] ss:$16 sps:$4 sm:$0xff]  }
 0x5bc   :  { %11776 = vmatprep.subr.bf16.mxu1 %v14267_v13  ;;  %v14294_v13 = vld [vmem:[%s19592_s5 + $0x664] ss:$16 sps:$4 sm:$0xff]  }
 0x5be   :  { %11605 = vmatpush1.bf16.msra.mxu0 %v14262_v54  ;;  %v14297_v54 = vld [vmem:[%s19592_s5 + $0x66c] ss:$16 sps:$4 sm:$0xff]  }
 0x5bf   :  { %11777 = vmatpush1.bf16.msra.mxu1 %v14265_v27  ;;  %11606 = vmatprep.subr.bf16.mxu0 %v14270_v59  ;;  %v14292_v27 = vld [vmem:[%s19592_s5 + $0x660] ss:$16 sps:$4 sm:$0xff]   ;;  %v14295_v59 = vld [vmem:[%s19592_s5 + $0x668] ss:$16 sps:$4 sm:$0xff]  }
 0x5c0   :  { %11778 = vmatprep.subr.bf16.mxu1 %v14273_v37  ;;  %v14303_v37 = vld [vmem:[%s19592_s5 + $0x68c] ss:$16 sps:$4 sm:$0xff]  }
 0x5c2   :  { %11607 = vmatpush1.bf16.msra.mxu0 %v14268_v62  ;;  %v14300_v62 = vld [vmem:[%s19592_s5 + $0x684] ss:$16 sps:$4 sm:$0xff]  }
 0x5c3   :  { %11779 = vmatpush1.bf16.msra.mxu1 %v14271_v23  ;;  %11619 = vmatprep.subr.bf16.mxu0 %v14276_v39  ;;  %v14298_v23 = vld [vmem:[%s19592_s5 + $0x680] ss:$16 sps:$4 sm:$0xff]   ;;  %v14301_v39 = vld [vmem:[%s19592_s5 + $0x688] ss:$16 sps:$4 sm:$0xff]  }
 0x5c4   :  { %11791 = vmatprep.subr.bf16.mxu1 %v14279_v50  ;;  %v14306_v50 = vld [vmem:[%s19592_s5 + $0x6a4] ss:$16 sps:$4 sm:$0xff]  }
 0x5d8   :  { %v9523_v58 = vpop.f32.mrb[20].mxu0 }
 0x5d9   :  { %v13834_v48 = vadd.f32 %v9523_v58, %v3359_v33  ;;  %v9867_v42 = vpop.f32.mrb[20].mxu1  ;;  %v9525_v38 = vpop.f32.mrb[21].mxu0  ;;  %v14310_v58 = vld [vmem:[%s19592_s5 + $0x6c0] ss:$16 sps:$4 sm:$0xff]  }
 0x5da   :  { %v13838_v36 = vadd.f32 %v9867_v42, %v3367_v40  ;;  %v13835_v51 = vadd.f32 %v9525_v38, %v3363_v43  ;;  %v9869_v60 = vpop.f32.mrb[21].mxu1  ;;  %v9527_v49 = vpop.f32.mrb[22].mxu0  ;;  %v14318_v42 = vld [vmem:[%s19592_s5 + $0x6e4] ss:$16 sps:$4 sm:$0xff]   ;;  %v14321_v38 = vld [vmem:[%s19592_s5 + $0x6ec] ss:$16 sps:$4 sm:$0xff]  }
 0x5db   :  { %v9896_v45 = vmul.f32 0.01, %v13834_v48  ;;  %v13839_v53 = vadd.f32 %v9869_v60, %v3371_v44  ;;  %v13836_v52 = vadd.f32 %v9527_v49, %v3359_v33  ;;  %v9871_v47 = vpop.f32.mrb[22].mxu1  ;;  %v9529_v61 = vpop.f32.mrb[23].mxu0  ;;  %vm9880_vm8 = vcmp.gt.f32.partialorder %v13834_v48, 0.0 }
 0x5dc   :  { %vm9882_vm9 = vcmp.gt.f32.partialorder %v13838_v36, 0.0  ;;  %v9898_v55 = vmul.f32 0.01, %v13838_v36  ;;  %vm9881_vm10 = vcmp.gt.f32.partialorder %v13835_v51, 0.0  ;;  %v9873_v1 = vpop.f32.mrb[23].mxu1  ;;  %v13840_v30 = vadd.f32 %v9871_v47, %v3367_v40 }
 0x5dd   :  { %vm9888_vm11 = vcmp.gt.f32.partialorder %v13836_v52, 0.0  ;;  %v9897_v2 = vmul.f32 0.01, %v13835_v51  ;;  %v9904_v7 = vmul.f32 0.01, %v13836_v52  ;;  %v13837_v5 = vadd.f32 %v9529_v61, %v3363_v43 }
 0x5de   :  { %v9912_v41 = vsel %vm9880_vm8, %v13834_v48, %v9896_v45  ;;  %vm9883_vm12 = vcmp.gt.f32.partialorder %v13839_v53, 0.0  ;;  %v9899_v56 = vmul.f32 0.01, %v13839_v53  ;;  %v13841_v8 = vadd.f32 %v9873_v1, %v3371_v44  ;;  %v14304_v33 = vld [vmem:[%s19592_s5 + $0x6a0] ss:$16 sps:$4 sm:$0xff]  }
 0x5df   :  { %v9920_v10 = vsel %vm9888_vm11, %v13836_v52, %v9904_v7  ;;  %vm9890_vm13 = vcmp.gt.f32.partialorder %v13840_v30, 0.0  ;;  %v9906_v25 = vmul.f32 0.01, %v13840_v30  ;;  %vm9889_vm14 = vcmp.gt.f32.partialorder %v13837_v5, 0.0  ;;  %v14307_v40 = vld [vmem:[%s19592_s5 + $0x6a8] ss:$16 sps:$4 sm:$0xff]  }
 0x5e0   :  { %v9928_v11 = vpack.c.bf16 %v9920_v10, %v9912_v41  ;;  %v9905_v46 = vmul.f32 0.01, %v13837_v5  ;;  %vm9891_vm15 = vcmp.gt.f32.partialorder %v13841_v8, 0.0  ;;  %v9907_v12 = vmul.f32 0.01, %v13841_v8 }
 0x5e1   :  { %v9914_v15 = vsel %vm9882_vm9, %v13838_v36, %v9898_v55  ;;  %v9922_v16 = vsel %vm9890_vm13, %v13840_v30, %v9906_v25  ;;  %v9913_v17 = vsel %vm9881_vm10, %v13835_v51, %v9897_v2  ;;  %v9915_v21 = vsel %vm9883_vm12, %v13839_v53, %v9899_v56  ;;  %v14312_v43 = vld [vmem:[%s19592_s5 + $0x6c4] ss:$16 sps:$4 sm:$0xff]   ;;  %v14315_v44 = vld [vmem:[%s19592_s5 + $0x6cc] ss:$16 sps:$4 sm:$0xff]   ;;  %v14313_v48 = vld [vmem:[%s19592_s5 + $0x6c8] ss:$16 sps:$4 sm:$0xff]  }
 0x5e2   :  { %v19282_v18 = vpack.c.bf16 %v9922_v16, %v9914_v15  ;;  %v9921_v20 = vsel %vm9889_vm14, %v13837_v5, %v9905_v46  ;;  %v9923_v22 = vsel %vm9891_vm15, %v13841_v8, %v9907_v12  ;;  %v14316_v36 = vld [vmem:[%s19592_s5 + $0x6e0] ss:$16 sps:$4 sm:$0xff]   ;;  %v14319_v51 = vld [vmem:[%s19592_s5 + $0x6e8] ss:$16 sps:$4 sm:$0xff]   ;;  %v14324_v60 = vld [vmem:[%s19592_s5 + $0x704] ss:$16 sps:$4 sm:$0xff]  }
 0x5e3   :  { %v9929_v26 = vpack.c.bf16 %v9921_v20, %v9913_v17  ;;  %v9931_v34 = vpack.c.bf16 %v9923_v22, %v9915_v21  ;;  %v14327_v49 = vld [vmem:[%s19592_s5 + $0x70c] ss:$16 sps:$4 sm:$0xff]   ;;  %v14322_v45 = vld [vmem:[%s19592_s5 + $0x700] ss:$16 sps:$4 sm:$0xff]   ;;  %v14325_v53 = vld [vmem:[%s19592_s5 + $0x708] ss:$16 sps:$4 sm:$0xff]  }
 0x5e4   :  { %v14330_v52 = vld [vmem:[%s19592_s5 + $0x724] ss:$16 sps:$4 sm:$0xff]   ;;  %v14333_v47 = vld [vmem:[%s19592_s5 + $0x72c] ss:$16 sps:$4 sm:$0xff]   ;;  %v14328_v61 = vld [vmem:[%s19592_s5 + $0x720] ss:$16 sps:$4 sm:$0xff]  }
 0x5e5   :  { %11608 = vmatprep.mubr.bf16.mxu0 %v9929_v26  ;;  %11780 = vmatprep.mubr.bf16.mxu1 %v9929_v26  ;;  %v14331_v55 = vld [vmem:[%s19592_s5 + $0x728] ss:$16 sps:$4 sm:$0xff]   ;;  %v14336_v1 = vld [vmem:[%s19592_s5 + $0x744] ss:$16 sps:$4 sm:$0xff]   ;;  %v14339_v2 = vld [vmem:[%s19592_s5 + $0x74c] ss:$16 sps:$4 sm:$0xff]  }
 0x5e6   :  { %11609 = vmatmul.mubr.bf16.vlgmr.msra.gmra.mrb[24].mxu0 %v9928_v11  ;;  %11781 = vmatmul.mubr.bf16.vlgmr.msra.gmra.mrb[24].mxu1 %v9928_v11  ;;  %v14334_v7 = vld [vmem:[%s19592_s5 + $0x740] ss:$16 sps:$4 sm:$0xff]   ;;  %v14337_v30 = vld [vmem:[%s19592_s5 + $0x748] ss:$16 sps:$4 sm:$0xff]   ;;  %v14342_v5 = vld [vmem:[%s19592_s5 + $0x764] ss:$16 sps:$4 sm:$0xff]  }
 0x5e7   :  { %11620 = vmatpush1.bf16.msra.mxu0 %v14274_v9  ;;  %11792 = vmatpush1.bf16.msra.mxu1 %v14277_v24  ;;  %v14345_v41 = vld [vmem:[%s19592_s5 + $0x76c] ss:$16 sps:$4 sm:$0xff]   ;;  %v14340_v56 = vld [vmem:[%s19592_s5 + $0x760] ss:$16 sps:$4 sm:$0xff]   ;;  %v14343_v8 = vld [vmem:[%s19592_s5 + $0x768] ss:$16 sps:$4 sm:$0xff]  }
 0x5e8   :  { %11651 = vmatprep.mubr.bf16.mxu0 %v9931_v34  ;;  %11823 = vmatprep.mubr.bf16.mxu1 %v9931_v34  ;;  %v14348_v10 = vld [vmem:[%s19592_s5 + $0x784] ss:$16 sps:$4 sm:$0xff]   ;;  %v14351_v25 = vld [vmem:[%s19592_s5 + $0x78c] ss:$16 sps:$4 sm:$0xff]   ;;  %v14346_v11 = vld [vmem:[%s19592_s5 + $0x780] ss:$16 sps:$4 sm:$0xff]  }
 0x5e9   :  { %11621 = vmatprep.subr.bf16.mxu0 %v14282_v28  ;;  %11793 = vmatprep.subr.bf16.mxu1 %v14285_v29  ;;  %v14349_v46 = vld [vmem:[%s19592_s5 + $0x788] ss:$16 sps:$4 sm:$0xff]   ;;  %v14354_v12 = vld [vmem:[%s19592_s5 + $0x7a4] ss:$16 sps:$4 sm:$0xff]   ;;  %v14357_v15 = vld [vmem:[%s19592_s5 + $0x7ac] ss:$16 sps:$4 sm:$0xff]  }
 0x5ea   :  { %v14352_v16 = vld [vmem:[%s19592_s5 + $0x7a0] ss:$16 sps:$4 sm:$0xff]   ;;  %v14355_v17 = vld [vmem:[%s19592_s5 + $0x7a8] ss:$16 sps:$4 sm:$0xff]   ;;  %v14360_v20 = vld [vmem:[%s19592_s5 + $0x7c4] ss:$16 sps:$4 sm:$0xff]  }
 0x5eb   :  { %11622 = vmatpush1.bf16.msra.mxu0 %v14280_v31  ;;  %11794 = vmatpush1.bf16.msra.mxu1 %v14283_v32  ;;  %v14363_v21 = vld [vmem:[%s19592_s5 + $0x7cc] ss:$16 sps:$4 sm:$0xff]   ;;  %v14358_v22 = vld [vmem:[%s19592_s5 + $0x7c0] ss:$16 sps:$4 sm:$0xff]   ;;  %v14361_v26 = vld [vmem:[%s19592_s5 + $0x7c8] ss:$16 sps:$4 sm:$0xff]  }
 0x5ec   :  { %11623 = vmatprep.subr.bf16.mxu0 %v14288_v19  ;;  %11795 = vmatprep.subr.bf16.mxu1 %v14291_v4  ;;  %v14366_v9 = vld [vmem:[%s19592_s5 + $0x7e4] ss:$16 sps:$4 sm:$0xff]   ;;  %v14369_v24 = vld [vmem:[%s19592_s5 + $0x7ec] ss:$16 sps:$4 sm:$0xff]   ;;  %v14364_v34 = vld [vmem:[%s19592_s5 + $0x7e0] ss:$16 sps:$4 sm:$0xff]  }
 0x5ed   :  { %v14367_v28 = vld [vmem:[%s19592_s5 + $0x7e8] ss:$16 sps:$4 sm:$0xff]   ;;  %v14370_v29 = vld [vmem:[%s19593_s7 + $0x40] sm:$0xff]  }
 0x5ee   :  { %v14371_v31 = vld [vmem:[%s19593_s7 + $0xc0] sm:$0xff]   ;;  %v14374_v4 = vld [vmem:[%s19593_s7 + $0x48] sm:$0xff]  }
 0x5ef   :  { %11624 = vmatpush1.bf16.msra.mxu0 %v14286_v35  ;;  %11796 = vmatpush1.bf16.msra.mxu1 %v14289_v6  ;;  %v14372_v32 = vld [vmem:[%s19593_s7] sm:$0xff]   ;;  %v14375_v35 = vld [vmem:[%s19593_s7 + $0xc8] sm:$0xff]  }
 0x5f0   :  { %11625 = vmatprep.subr.bf16.mxu0 %v14294_v13  ;;  %11797 = vmatprep.subr.bf16.mxu1 %v14297_v54  ;;  %v14373_v19 = vld [vmem:[%s19593_s7 + $0x80] sm:$0xff]   ;;  %v14376_v6 = vld [vmem:[%s19593_s7 + $0x8] sm:$0xff]   ;;  %v14378_v54 = vld [vmem:[%s19593_s7 + $0x50] sm:$0xff]  }
 0x5f1   :  { %v14377_v13 = vld [vmem:[%s19593_s7 + $0x88] sm:$0xff]  }
 0x5f3   :  { %11626 = vmatpush1.bf16.msra.mxu0 %v14292_v27  ;;  %11798 = vmatpush1.bf16.msra.mxu1 %v14295_v59  ;;  %v14380_v27 = vld [vmem:[%s19593_s7 + $0x10] sm:$0xff]  }
 0x5f4   :  { %11627 = vmatprep.subr.bf16.mxu0 %v14300_v62  ;;  %11799 = vmatprep.subr.bf16.mxu1 %v14303_v37  ;;  %v14381_v59 = vld [vmem:[%s19593_s7 + $0x90] sm:$0xff]   ;;  %v14382_v62 = vld [vmem:[%s19593_s7 + $0x58] sm:$0xff]  }
 0x5f5   :  { %v14383_v37 = vld [vmem:[%s19593_s7 + $0xd8] sm:$0xff]  }
 0x5f7   :  { %11628 = vmatpush1.bf16.msra.mxu0 %v14298_v23  ;;  %11800 = vmatpush1.bf16.msra.mxu1 %v14301_v39  ;;  %v14384_v23 = vld [vmem:[%s19593_s7 + $0x18] sm:$0xff]  }
 0x5f8   :  { %11629 = vmatprep.subr.bf16.mxu0 %v14306_v50  ;;  %11801 = vmatprep.subr.bf16.mxu1 %v14309_v14  ;;  %v14385_v39 = vld [vmem:[%s19593_s7 + $0x98] sm:$0xff]   ;;  %v14386_v50 = vld [vmem:[%s19593_s7 + $0x60] sm:$0xff]  }
 0x5f9   :  { %v14387_v14 = vld [vmem:[%s19593_s7 + $0xe0] sm:$0xff]  }
 0x5fb   :  { %11630 = vmatpush1.bf16.msra.mxu0 %v14304_v33  ;;  %11802 = vmatpush1.bf16.msra.mxu1 %v14307_v40  ;;  %v14388_v33 = vld [vmem:[%s19593_s7 + $0x20] sm:$0xff]  }
 0x5fc   :  { %11631 = vmatprep.subr.bf16.mxu0 %v14312_v43  ;;  %11803 = vmatprep.subr.bf16.mxu1 %v14315_v44  ;;  %v14389_v40 = vld [vmem:[%s19593_s7 + $0xa0] sm:$0xff]   ;;  %v14390_v43 = vld [vmem:[%s19593_s7 + $0x68] sm:$0xff]  }
 0x5fd   :  { %v14391_v44 = vld [vmem:[%s19593_s7 + $0xe8] sm:$0xff]  }
 0x5ff   :  { %11632 = vmatpush1.bf16.msra.mxu0 %v14310_v58  ;;  %11804 = vmatpush1.bf16.msra.mxu1 %v14313_v48  ;;  %v14392_v58 = vld [vmem:[%s19593_s7 + $0x28] sm:$0xff]  }
 0x600   :  { %11633 = vmatprep.subr.bf16.mxu0 %v14318_v42  ;;  %11805 = vmatprep.subr.bf16.mxu1 %v14321_v38  ;;  %v14393_v48 = vld [vmem:[%s19593_s7 + $0xa8] sm:$0xff]   ;;  %v14394_v42 = vld [vmem:[%s19593_s7 + $0x70] sm:$0xff]  }
 0x601   :  { %v14395_v38 = vld [vmem:[%s19593_s7 + $0xf0] sm:$0xff]  }
 0x603   :  { %11634 = vmatpush1.bf16.msra.mxu0 %v14316_v36  ;;  %11806 = vmatpush1.bf16.msra.mxu1 %v14319_v51  ;;  %v14396_v36 = vld [vmem:[%s19593_s7 + $0x30] sm:$0xff]  }
 0x604   :  { %11635 = vmatprep.subr.bf16.mxu0 %v14324_v60  ;;  %11807 = vmatprep.subr.bf16.mxu1 %v14327_v49  ;;  %v14397_v51 = vld [vmem:[%s19593_s7 + $0xb0] sm:$0xff]   ;;  %v14398_v60 = vld [vmem:[%s19593_s7 + $0x78] sm:$0xff]  }
 0x605   :  { %v14399_v49 = vld [vmem:[%s19593_s7 + $0xf8] sm:$0xff]  }
 0x607   :  { %11636 = vmatpush1.bf16.msra.mxu0 %v14322_v45  ;;  %11808 = vmatpush1.bf16.msra.mxu1 %v14325_v53  ;;  %v14400_v45 = vld [vmem:[%s19593_s7 + $0x38] sm:$0xff]  }
 0x608   :  { %11637 = vmatprep.subr.bf16.mxu0 %v14330_v52  ;;  %11809 = vmatprep.subr.bf16.mxu1 %v14333_v47  ;;  %v14401_v53 = vld [vmem:[%s19593_s7 + $0xb8] sm:$0xff]   ;;  %v10188_v52 = vld [vmem:[%s19594_s6] sm:$0xf] }
 0x609   :  { %v10193_v47 = vrot.slane %v10188_v52, %v15322_v57 }
 0x60b   :  { %11638 = vmatpush1.bf16.msra.mxu0 %v14328_v61  ;;  %11810 = vmatpush1.bf16.msra.mxu1 %v14331_v55  ;;  %v10201_v61 = vrot.slane %v10188_v52, %v15339_v0  ;;  %v10197_v55 = vrot.slane %v10188_v52, %v15336_v63 }
 0x60c   :  { %11639 = vmatprep.subr.bf16.mxu0 %v14336_v1  ;;  %11811 = vmatprep.subr.bf16.mxu1 %v14339_v2  ;;  %v10205_v1 = vrot.slane %v10188_v52, %v15342_v3 }
 0x60f   :  { %11640 = vmatpush1.bf16.msra.mxu0 %v14334_v7  ;;  %11812 = vmatpush1.bf16.msra.mxu1 %v14337_v30 }
 0x610   :  { %11641 = vmatprep.subr.bf16.mxu0 %v14342_v5  ;;  %11813 = vmatprep.subr.bf16.mxu1 %v14345_v41 }
 0x613   :  { %11642 = vmatpush1.bf16.msra.mxu0 %v14340_v56  ;;  %11814 = vmatpush1.bf16.msra.mxu1 %v14343_v8 }
 0x614   :  { %11643 = vmatprep.subr.bf16.mxu0 %v14348_v10  ;;  %11815 = vmatprep.subr.bf16.mxu1 %v14351_v25 }
 0x617   :  { %11644 = vmatpush1.bf16.msra.mxu0 %v14346_v11  ;;  %11816 = vmatpush1.bf16.msra.mxu1 %v14349_v46 }
 0x618   :  { %11645 = vmatprep.subr.bf16.mxu0 %v14354_v12  ;;  %11817 = vmatprep.subr.bf16.mxu1 %v14357_v15 }
 0x61b   :  { %11646 = vmatpush1.bf16.msra.mxu0 %v14352_v16  ;;  %11818 = vmatpush1.bf16.msra.mxu1 %v14355_v17 }
 0x61c   :  { %11647 = vmatprep.subr.bf16.mxu0 %v14360_v20  ;;  %11819 = vmatprep.subr.bf16.mxu1 %v14363_v21 }
 0x61f   :  { %11648 = vmatpush1.bf16.msra.mxu0 %v14358_v22  ;;  %11820 = vmatpush1.bf16.msra.mxu1 %v14361_v26 }
 0x620   :  { %11649 = vmatprep.subr.bf16.mxu0 %v14366_v9  ;;  %11821 = vmatprep.subr.bf16.mxu1 %v14369_v24 }
 0x623   :  { %11650 = vmatpush1.bf16.msra.mxu0 %v14364_v34  ;;  %11822 = vmatpush1.bf16.msra.mxu1 %v14367_v28 }
 0x624   :  { %13782 = vmatprep.subr.bf16.mxu0 %v14370_v29  ;;  %13804 = vmatprep.subr.bf16.mxu1 %v14371_v31 }
 0x626   :  { %11652 = vmatmul.mubr.bf16.vlgmr.msra.gmra.mrb[24].mxu0 %v19282_v18  ;;  %11824 = vmatmul.mubr.bf16.vlgmr.msra.gmra.mrb[24].mxu1 %v19282_v18  ;;  %v14379_v18 = vld [vmem:[%s19593_s7 + $0xd0] sm:$0xff]  }
 0x627   :  { %13783 = vmatpush3.bf16.msra.mxu0 %v14372_v32  ;;  %13805 = vmatpush3.bf16.msra.mxu1 %v14373_v19 }
 0x628   :  { %13784 = vmatprep.subr.bf16.mxu0 %v14374_v4  ;;  %13806 = vmatprep.subr.bf16.mxu1 %v14375_v35 }
 0x62b   :  { %13785 = vmatpush3.bf16.msra.mxu0 %v14376_v6  ;;  %13807 = vmatpush3.bf16.msra.mxu1 %v14377_v13 }
 0x62c   :  { %13786 = vmatprep.subr.bf16.mxu0 %v14378_v54  ;;  %13808 = vmatprep.subr.bf16.mxu1 %v14379_v18 }
 0x62f   :  { %13787 = vmatpush3.bf16.msra.mxu0 %v14380_v27  ;;  %13809 = vmatpush3.bf16.msra.mxu1 %v14381_v59  ;;  %v13749_v59 = vld [vmem:[%s19595_s8] ss:$0 sm:$0xff] }
 0x630   :  { %13788 = vmatprep.subr.bf16.mxu0 %v14382_v62  ;;  %13810 = vmatprep.subr.bf16.mxu1 %v14383_v37 }
 0x633   :  { %13789 = vmatpush3.bf16.msra.mxu0 %v14384_v23  ;;  %13811 = vmatpush3.bf16.msra.mxu1 %v14385_v39 }
 0x634   :  { %13790 = vmatprep.subr.bf16.mxu0 %v14386_v50  ;;  %13812 = vmatprep.subr.bf16.mxu1 %v14387_v14 }
 0x637   :  { %13791 = vmatpush3.bf16.msra.mxu0 %v14388_v33  ;;  %13813 = vmatpush3.bf16.msra.mxu1 %v14389_v40 }
 0x638   :  { %13792 = vmatprep.subr.bf16.mxu0 %v14390_v43  ;;  %13814 = vmatprep.subr.bf16.mxu1 %v14391_v44 }
 0x63b   :  { %13793 = vmatpush3.bf16.msra.mxu0 %v14392_v58  ;;  %13815 = vmatpush3.bf16.msra.mxu1 %v14393_v48 }
 0x63c   :  { %13794 = vmatprep.subr.bf16.mxu0 %v14394_v42  ;;  %13816 = vmatprep.subr.bf16.mxu1 %v14395_v38 }
 0x63f   :  { %13795 = vmatpush3.bf16.msra.mxu0 %v14396_v36  ;;  %13817 = vmatpush3.bf16.msra.mxu1 %v14397_v51 }
 0x640   :  { %13796 = vmatprep.subr.bf16.mxu0 %v14398_v60  ;;  %13818 = vmatprep.subr.bf16.mxu1 %v14399_v49 }
 0x643   :  { %13797 = vmatpush3.bf16.msra.mxu0 %v14400_v45  ;;  %13819 = vmatpush3.bf16.msra.mxu1 %v14401_v53 }
 0x6f9   :  { %v11653_v2 = vpop.f32.mrb[24].mxu0  ;;  %v11825_v7 = vpop.f32.mrb[24].mxu1 }
 0x6fa   :  { %v13842_v30 = vadd.f32 %v11653_v2, %v10193_v47  ;;  %v13846_v5 = vadd.f32 %v11825_v7, %v10201_v61  ;;  %v11655_v41 = vpop.f32.mrb[25].mxu0  ;;  %v11827_v56 = vpop.f32.mrb[25].mxu1 }
 0x6fb   :  { %v13843_v8 = vadd.f32 %v11655_v41, %v10197_v55  ;;  %v13847_v10 = vadd.f32 %v11827_v56, %v10205_v1  ;;  %v11657_v25 = vpop.f32.mrb[26].mxu0  ;;  %v11829_v11 = vpop.f32.mrb[26].mxu1 }
 0x6fc   :  { %vm11834_vm0 = vcmp.gt.f32.partialorder %v13842_v30, 0.0  ;;  %v11842_v46 = vmul.f32 0.01, %v13842_v30  ;;  %vm11836_vm1 = vcmp.gt.f32.partialorder %v13846_v5, 0.0  ;;  %v11844_v57 = vmul.f32 0.01, %v13846_v5 }
 0x6fd   :  { %vm11835_vm2 = vcmp.gt.f32.partialorder %v13843_v8, 0.0  ;;  %v11843_v0 = vmul.f32 0.01, %v13843_v8  ;;  %vm11837_vm3 = vcmp.gt.f32.partialorder %v13847_v10, 0.0  ;;  %v11845_v63 = vmul.f32 0.01, %v13847_v10 }
 0x6fe   :  { %v13844_v12 = vadd.f32 %v11657_v25, %v10193_v47  ;;  %v13848_v3 = vadd.f32 %v11829_v11, %v10201_v61  ;;  %v11659_v15 = vpop.f32.mrb[27].mxu0  ;;  %v11831_v16 = vpop.f32.mrb[27].mxu1  ;;  %v11850_v17 = vsel %vm11834_vm0, %v13842_v30, %v11842_v46  ;;  %v11852_v20 = vsel %vm11836_vm1, %v13846_v5, %v11844_v57 }
 0x6ff   :  { %v13845_v21 = vadd.f32 %v11659_v15, %v10197_v55  ;;  %v13849_v22 = vadd.f32 %v11831_v16, %v10205_v1  ;;  %v11851_v31 = vsel %vm11835_vm2, %v13843_v8, %v11843_v0  ;;  %v11853_v32 = vsel %vm11837_vm3, %v13847_v10, %v11845_v63 }
 0x700   :  { %vm11838_vm4 = vcmp.gt.f32.partialorder %v13844_v12, 0.0  ;;  %v11846_v26 = vmul.f32 0.01, %v13844_v12  ;;  %vm11840_vm5 = vcmp.gt.f32.partialorder %v13848_v3, 0.0  ;;  %v11848_v9 = vmul.f32 0.01, %v13848_v3 }
 0x701   :  { %vm11839_vm6 = vcmp.gt.f32.partialorder %v13845_v21, 0.0  ;;  %v11847_v24 = vmul.f32 0.01, %v13845_v21  ;;  %vm11841_vm7 = vcmp.gt.f32.partialorder %v13849_v22, 0.0  ;;  %v11849_v34 = vmul.f32 0.01, %v13849_v22 }
 0x702   :  { %v11854_v28 = vsel %vm11838_vm4, %v13844_v12, %v11846_v26  ;;  %v11856_v29 = vsel %vm11840_vm5, %v13848_v3, %v11848_v9 }
 0x703   :  { %v11858_v19 = vpack.c.bf16 %v11854_v28, %v11850_v17  ;;  %v11860_v4 = vpack.c.bf16 %v11856_v29, %v11852_v20  ;;  %v11855_v35 = vsel %vm11839_vm6, %v13845_v21, %v11847_v24  ;;  %v11857_v6 = vsel %vm11841_vm7, %v13849_v22, %v11849_v34 }
 0x704   :  { %v11859_v13 = vpack.c.bf16 %v11855_v35, %v11851_v31  ;;  %v11861_v54 = vpack.c.bf16 %v11857_v6, %v11853_v32 }
 0x706   :  { %12157 = vmatprep.mubr.bf16.mxu0 %v11859_v13  ;;  %12198 = vmatprep.mubr.bf16.mxu1 %v11861_v54 }
 0x707   :  { %12158 = vmatmul.mubr.bf16.vlgmr.msra.gmra.mrb[28].mxu0 %v11858_v19  ;;  %12199 = vmatmul.mubr.bf16.vlgmr.msra.gmra.mrb[28].mxu1 %v11860_v4 }
 0x7da   :  { %v13798_v18 = vpop.f32.mrb[28].mxu0  ;;  %v13820_v27 = vpop.f32.mrb[28].mxu1 }
 0x7db   :  { %v13799_v62 = vpop.f32.mrb[29].mxu0  ;;  %v13821_v37 = vpop.f32.mrb[29].mxu1 }
 0x7dc   :  { %v13800_v23 = vadd.f32 %v13799_v62, %v13798_v18  ;;  %v13822_v39 = vadd.f32 %v13821_v37, %v13820_v27  ;;  %v13801_v50 = vpop.f32.mrb[30].mxu0  ;;  %v13823_v14 = vpop.f32.mrb[30].mxu1 }
 0x7dd   :  { %v13802_v33 = vpop.f32.mrb[31].mxu0  ;;  %v13824_v40 = vpop.f32.mrb[31].mxu1 }
 0x7de   :  { %v12160_v43 = vadd.f32 %v13800_v23, %v13749_v59  ;;  %v13803_v44 = vadd.f32 %v13802_v33, %v13801_v50  ;;  %v13825_v58 = vadd.f32 %v13824_v40, %v13823_v14 }
 0x7e0   :  { %v12201_v48 = vadd.f32 %v13822_v39, %v12160_v43  ;;  %v12163_v42 = vadd.f32 %v13803_v44, %v13749_v59 }
 0x7e2   :  { %12207 = vst [vmem:[%s19596_s9] sm:$0xff] %v12201_v48  ;;  %v12204_v38 = vadd.f32 %v13825_v58, %v12163_v42 }
 0x7e4   :  { %12208 = vst [vmem:[%s19596_s9 + $0x8] sm:$0xff] %v12204_v38 }

</bundles_post_ra>
